<compile_context>
chip_gen: v7x
topology: tpu7x:2x2x1
jax: 0.10.0
libtpu: 0.0.40
codegen_flags: <defaults>
</compile_context>

<pallas_src>
import functools

import jax
import jax.numpy as jnp
from jax.experimental import pallas as pl
from jax.experimental.pallas import tpu as pltpu

LANE = 128


def _round_up(v, m):
    return ((v + m - 1) // m) * m


def _default_tap_mode():
    """Pick the im2col strategy from the MXU depth of the attached TPUs."""
    try:
        kind = jax.devices()[0].device_kind.lower()
    except Exception:
        return "kh_concat"
    for tag in ("v2", "v3", "v4", "v5"):
        if tag in kind:
            return "per_tap"      # 128-deep MXU: K = Cin_p per tap already full
    return "kh_concat"            # 256-deep MXU (v6e/v7x): K = KH*Cin_p


# ----------------------------------------------------------------------------
# Fused kernel: whole conv stack for ONE batch element.
# ----------------------------------------------------------------------------
def _conv_stack_kernel(*refs, H, W, layer_meta, ph0, pw0, c_in0, out_channels,
                       residual, mode):
    """refs = (x_ref, w0, b0, w1, b1, ..., o_ref, buf_a, buf_b)

      x_ref : (1, H, W, Cin0)               bf16, UNPADDED channels
      w_l   : kh_concat: (KW, KH*Cin_l_p, Cout_l_p)  bf16
              per_tap  : (KH*KW, Cin_l_p, Cout_l_p)  bf16
      b_l   : (1, Cout_l_p)                 f32 (zero-padded)
      o_ref : (1, H, W, Cout_last)          bf16, true channels only
      buf_* : (ph0+H+PH_HI, pw0+W+PW_HI, Cmax_p) bf16 ping-pong scratch; the
              zeroed halo ring implements 'same' padding in-kernel.
    """
    num_layers = len(layer_meta)
    x_ref = refs[0]
    wb_refs = refs[1:1 + 2 * num_layers]
    o_ref = refs[1 + 2 * num_layers]
    src_ref = refs[2 + 2 * num_layers]
    dst_ref = refs[3 + 2 * num_layers]

    HP, WP, CMAX = src_ref.shape
    cdtype = src_ref.dtype

    # ---- zero ONLY the halo strips (interiors are overwritten every layer).
    def zero_halo(buf):
        if ph0 > 0:
            buf[0:ph0, :, :] = jnp.zeros((ph0, WP, CMAX), cdtype)
        if ph0 + H < HP:
            buf[ph0 + H:HP, :, :] = jnp.zeros((HP - ph0 - H, WP, CMAX), cdtype)
        if pw0 > 0:
            buf[ph0:ph0 + H, 0:pw0, :] = jnp.zeros((H, pw0, CMAX), cdtype)
        if pw0 + W < WP:
            buf[ph0:ph0 + H, pw0 + W:WP, :] = jnp.zeros(
                (H, WP - pw0 - W, CMAX), cdtype)

    zero_halo(src_ref)
    if num_layers > 1:
        zero_halo(dst_ref)

    # ---- place the input in the interior of src (layer-0 channel padding is
    #      one lane-dense zero store; the input copy itself is unpadded).
    cin0_p = layer_meta[0][4]
    if cin0_p > c_in0:
        src_ref[ph0:ph0 + H, pw0:pw0 + W, :cin0_p] = jnp.zeros(
            (H, W, cin0_p), cdtype)
    src_ref[ph0:ph0 + H, pw0:pw0 + W, :c_in0] = x_ref[0].astype(cdtype)

    for l, (kh_sz, kw_sz, ph_lo, pw_lo, cin_p, cout_p) in enumerate(layer_meta):
        w_ref = wb_refs[2 * l]
        b_ref = wb_refs[2 * l + 1]
        r0 = ph0 - ph_lo
        c0 = pw0 - pw_lo

        acc = None
        if mode == "per_tap":
            # v5e path: K = Cin_p per tap (128-deep MXU already full), no
            # im2col patch materialization at all.
            for kh in range(kh_sz):
                for kw in range(kw_sz):
                    tap = src_ref[r0 + kh:r0 + kh + H,
                                  c0 + kw:c0 + kw + W, :cin_p]
                    part = jax.lax.dot_general(
                        tap, w_ref[kh * kw_sz + kw],
                        dimension_numbers=(((2,), (0,)), ((), ())),
                        preferred_element_type=jnp.float32)
                    acc = part if acc is None else acc + part
        else:
            # v6e/v7x path: concat only the KH row taps (free row shifts) so
            # the contraction depth is KH*Cin_p, accumulate over KW in f32.
            for kw in range(kw_sz):
                cols = [src_ref[r0 + kh:r0 + kh + H,
                                c0 + kw:c0 + kw + W, :cin_p]
                        for kh in range(kh_sz)]
                patch = cols[0] if len(cols) == 1 else jnp.concatenate(cols, -1)
                part = jax.lax.dot_general(
                    patch, w_ref[kw],
                    dimension_numbers=(((2,), (0,)), ((), ())),
                    preferred_element_type=jnp.float32)
                acc = part if acc is None else acc + part

        acc = acc + b_ref[...][None]                       # bias in f32
        acc = jnp.maximum(acc, 0.0)                        # ReLU in f32
        if residual:
            # TODO(synk): residual stream round-trips bf16 scratch between
            # layers; keep an f32 residual accumulator if precision matters.
            prev = src_ref[ph0:ph0 + H, pw0:pw0 + W, :cout_p]
            acc = prev.astype(jnp.float32) + acc

        if l == num_layers - 1:
            # Store only the true Cout channels (unpadded writeback).
            o_ref[...] = acc[None, :, :, :out_channels].astype(o_ref.dtype)
        else:
            dst_ref[ph0:ph0 + H, pw0:pw0 + W, :cout_p] = acc.astype(cdtype)
            src_ref, dst_ref = dst_ref, src_ref


# ----------------------------------------------------------------------------
# Parameter preparation (done ONCE in __init__, cached).
# ----------------------------------------------------------------------------
def prepare_conv_stack(params, dim_input, *, residual=False,
                       compute_dtype=jnp.bfloat16, mode=None, lane=LANE):
    assert params
    if mode is None:
        mode = _default_tap_mode()
    layer_meta = []
    flat_wb = []
    ph_lo_m = ph_hi_m = pw_lo_m = pw_hi_m = 0
    cin = dim_input
    cin_p = _round_up(cin, lane)
    c_p_max = cin_p
    for (w, b) in params:
        KH, KW, wcin, cout = w.shape
        assert wcin == cin
        if residual:
            assert wcin == cout, "residual needs Cin == Cout"
        cout_p = _round_up(cout, lane)
        # PyTorch padding='same' convention (lo = (K-1)//2, rest on the hi side)
        ph_lo, ph_hi = (KH - 1) // 2, (KH - 1) - (KH - 1) // 2
        pw_lo, pw_hi = (KW - 1) // 2, (KW - 1) - (KW - 1) // 2
        ph_lo_m, ph_hi_m = max(ph_lo_m, ph_lo), max(ph_hi_m, ph_hi)
        pw_lo_m, pw_hi_m = max(pw_lo_m, pw_lo), max(pw_hi_m, pw_hi)
        c_p_max = max(c_p_max, cout_p)

        # Channel-padded, bf16, im2col-layouted weights (cached, not rebuilt
        # per forward call).
        w_p = jnp.zeros((KH, KW, cin_p, cout_p), compute_dtype)
        w_p = w_p.at[:, :, :cin, :cout].set(w.astype(compute_dtype))
        if mode == "per_tap":
            w2 = w_p.reshape(KH * KW, cin_p, cout_p)
        else:
            # w2[kw, kh*cin_p + ci, co] = w[kh, kw, ci, co]
            w2 = jnp.transpose(w_p, (1, 0, 2, 3)).reshape(KW, KH * cin_p, cout_p)
        b2 = jnp.zeros((1, cout_p), jnp.float32).at[0, :cout].set(
            b.astype(jnp.float32))

        flat_wb += [w2, b2]
        layer_meta.append((KH, KW, ph_lo, pw_lo, cin_p, cout_p))
        cin, cin_p = cout, cout_p

    return dict(mode=mode, residual=residual, compute_dtype=compute_dtype,
                flat_wb=flat_wb, layer_meta=tuple(layer_meta),
                c_in0=dim_input, c_out_last=cin,
                pads=(ph_lo_m, ph_hi_m, pw_lo_m, pw_hi_m), c_p_max=c_p_max)


# ----------------------------------------------------------------------------
# Wrapper: one pallas_call for the whole stack.
# ----------------------------------------------------------------------------
def conv_stack_apply(x_nchw, prep):
    """x_nchw: (N, Cin, H, W) f32 -> (N, Cout_last, H, W) f32."""
    N, C, H, W = x_nchw.shape
    assert C == prep["c_in0"]
    layer_meta = prep["layer_meta"]
    compute_dtype = prep["compute_dtype"]
    flat_wb = prep["flat_wb"]
    ph_lo_m, ph_hi_m, pw_lo_m, pw_hi_m = prep["pads"]
    c_p_max = prep["c_p_max"]
    cout_last = prep["c_out_last"]

    # NCHW -> NHWC + bf16 cast (single fused XLA pass); NO channel padding.
    x = jnp.transpose(x_nchw, (0, 2, 3, 1)).astype(compute_dtype)

    # bf16 packs 16 rows per sublane tile: round the left W-halo up so the big
    # interior scratch stores stay sublane-aligned.
    sub = 16 if jnp.dtype(compute_dtype).itemsize == 2 else 8
    pw0 = _round_up(pw_lo_m, sub) if pw_lo_m > 0 else 0
    ph0 = ph_lo_m
    HP = ph0 + H + ph_hi_m
    WP = pw0 + W + pw_hi_m
    scratch_shape = (HP, WP, c_p_max)

    in_specs = [pl.BlockSpec((1, H, W, C), lambda n: (n, 0, 0, 0))]
    for arr in flat_wb:
        # Constant index maps: weights/bias stay VMEM-resident across the grid.
        # TODO(synk): pipeline_mode=pl.Buffered(1) here would halve weight VMEM
        # once single-buffered revisited blocks are confirmed supported.
        in_specs.append(
            pl.BlockSpec(arr.shape, (lambda n, _nd=arr.ndim: (0,) * _nd)))

    kernel = functools.partial(
        _conv_stack_kernel, H=H, W=W, layer_meta=layer_meta, ph0=ph0, pw0=pw0,
        c_in0=C, out_channels=cout_last, residual=prep["residual"],
        mode=prep["mode"])

    # VMEM budget: 2 ping-pong scratches + (double-buffered) weights + I/O.
    dsize = jnp.dtype(compute_dtype).itemsize
    scratch_bytes = 2 * HP * WP * c_p_max * dsize
    wb_bytes = sum(int(a.size) * jnp.dtype(a.dtype).itemsize for a in flat_wb)
    io_bytes = (H * W * C + H * W * cout_last) * dsize
    est = scratch_bytes + 2 * wb_bytes + 2 * io_bytes
    vmem_limit = int(max(32 << 20, min(int(est * 1.5) + (2 << 20), 64 << 20)))

    # TODO(synk): for large feature maps add an H-row-tile grid axis (with
    # per-layer halo handling) to bound VMEM under ~48 MiB on v7x and feed its
    # second TensorCore when N is small; and pack several batch elements per
    # grid step when H*W is small to raise the MXU M dimension.
    out = pl.pallas_call(
        kernel,
        out_shape=jax.ShapeDtypeStruct((N, H, W, cout_last), compute_dtype),
        grid_spec=pltpu.PrefetchScalarGridSpec(
            num_scalar_prefetch=0,
            grid=(N,),
            in_specs=in_specs,
            out_specs=pl.BlockSpec((1, H, W, cout_last),
                                   lambda n: (n, 0, 0, 0)),
            scratch_shapes=[
                pltpu.VMEM(scratch_shape, compute_dtype),
                pltpu.VMEM(scratch_shape, compute_dtype),
            ]),
        compiler_params=pltpu.CompilerParams(
            dimension_semantics=("parallel",),
            vmem_limit_bytes=vmem_limit),
    )(x, *flat_wb)

    # Only the true Cout channels were written; NHWC bf16 -> NCHW f32 is tiny.
    return jnp.transpose(out, (0, 3, 1, 2)).astype(jnp.float32)


# ----------------------------------------------------------------------------
# Module wrapper replicating ConvNeuralNetwork.forward (default config)
# ----------------------------------------------------------------------------
class ConvNeuralNetworkPallas:
    def __init__(self, dim_input, dim_layers, kernel_size, key,
                 residual=False, compute_dtype=jnp.bfloat16, mode=None):
        if isinstance(dim_layers, int):
            dim_layers = [dim_layers]
        self.residual = residual
        self.params = []
        c_in = dim_input
        for layer_id, c_out in enumerate(dim_layers):
            k = (kernel_size[layer_id]
                 if isinstance(kernel_size, list) else kernel_size)
            key, kw_key, kb_key = jax.random.split(key, 3)
            fan_in = c_in * k * k
            bound = 1.0 / float(fan_in) ** 0.5
            w = jax.random.uniform(kw_key, (k, k, c_in, c_out),
                                   jnp.float32, -bound, bound)
            b = jax.random.uniform(kb_key, (c_out,), jnp.float32,
                                   -bound, bound)
            self.params.append((w, b))
            c_in = c_out
        # Weight pad / im2col reshape / bf16 cast hoisted out of forward.
        self._prepared = prepare_conv_stack(
            self.params, dim_input, residual=residual,
            compute_dtype=compute_dtype, mode=mode)

    def __call__(self, x, x_len=None, num_batch_axes=1):
        # TODO(synk): x_len downsampling bookkeeping (only meaningful for
        # stride>1 configs) is not implemented.
        assert x_len is None
        shape = x.shape
        if num_batch_axes > 1:
            x = x.reshape((-1,) + shape[num_batch_axes:])
        y = conv_stack_apply(x, self._prepared)
        if num_batch_axes > 1:
            y = y.reshape(shape[:num_batch_axes] + y.shape[1:])
        return y


# ----------------------------------------------------------------------------
# Pure-JAX f32 reference for validation
# ----------------------------------------------------------------------------
def _reference_forward(x_nchw, params, residual=False):
    x = x_nchw
    for (w, b) in params:
        w_oihw = jnp.transpose(w, (3, 2, 0, 1))
        y = jax.lax.conv_general_dilated(
            x, w_oihw, window_strides=(1, 1), padding="SAME",
            dimension_numbers=("NCHW", "OIHW", "NCHW"))
        y = y + b[None, :, None, None]
        y = jnp.maximum(y, 0.0)
        x = x + y if residual else y
    return x


if __name__ == "__main__":
    key = jax.random.PRNGKey(0)
    key, x_key, p_key = jax.random.split(key, 3)

    # Small shapes consistent with the module: NCHW input.
    N, C, Hs, Ws = 2, 4, 16, 16
    dim_layers = [8, 8]
    kernel_size = 3

    x = jax.random.normal(x_key, (N, C, Hs, Ws), jnp.float32)

    model = ConvNeuralNetworkPallas(
        dim_input=C, dim_layers=dim_layers, kernel_size=kernel_size,
        key=p_key, residual=False)

    out = jax.block_until_ready(model(x))

    ref = _reference_forward(x, model.params, residual=False)
    assert out.shape == (N, dim_layers[-1], Hs, Ws), out.shape
    assert out.dtype == jnp.float32
    # bf16 MXU operands / activations / output store -> loosened tolerance.
    assert jnp.allclose(out, ref, atol=5e-2, rtol=5e-2), (
        float(jnp.max(jnp.abs(out - ref))))

    print("KERNEL_OK")
</pallas_src>

<mosaic_0001>
module attributes {stable_mosaic.version = 11 : i64} {
  func.func @_conv_stack_kernel(%arg0: i32, %arg1: memref<1x16x16x4xbf16, #tpu.memory_space<vmem>>, %arg2: memref<3x384x128xbf16, #tpu.memory_space<vmem>>, %arg3: memref<1x128xf32, #tpu.memory_space<vmem>>, %arg4: memref<3x384x128xbf16, #tpu.memory_space<vmem>>, %arg5: memref<1x128xf32, #tpu.memory_space<vmem>>, %arg6: memref<1x16x16x8xbf16, #tpu.memory_space<vmem>>, %arg7: memref<18x33x128xbf16, #tpu.memory_space<vmem>>, %arg8: memref<18x33x128xbf16, #tpu.memory_space<vmem>>) attributes {dimension_semantics = [#tpu.dimension_semantics<parallel>], iteration_bounds = array<i64: 2>, scalar_prefetch = 0 : i64, scratch_operands = 2 : i64, tpu.core_type = #tpu.core_type<tc>, window_params = [{transform_indices = @transform_0, window_bounds = array<i64: 1, 16, 16, 4>}, {pipeline_mode = #tpu.pipeline_mode<synchronous>, transform_indices = @transform_1, window_bounds = array<i64: 3, 384, 128>}, {pipeline_mode = #tpu.pipeline_mode<synchronous>, transform_indices = @transform_2, window_bounds = array<i64: 1, 128>}, {pipeline_mode = #tpu.pipeline_mode<synchronous>, transform_indices = @transform_3, window_bounds = array<i64: 3, 384, 128>}, {pipeline_mode = #tpu.pipeline_mode<synchronous>, transform_indices = @transform_4, window_bounds = array<i64: 1, 128>}, {transform_indices = @transform_5, window_bounds = array<i64: 1, 16, 16, 8>}]} {
    %cst = arith.constant 0.000000e+00 : bf16
    %0 = vector.broadcast %cst : bf16 to vector<1x33x128xbf16>
    %c0 = arith.constant 0 : index
    %c0_0 = arith.constant 0 : index
    %c0_1 = arith.constant 0 : index
    %1 = vector.load %arg7[%c0, %c0_0, %c0_1] : memref<18x33x128xbf16, #tpu.memory_space<vmem>>, vector<1x33x128xbf16>
    tpu.vector_store %arg7[%c0, %c0_0, %c0_1], %0 {strides = array<i32>} : memref<18x33x128xbf16, #tpu.memory_space<vmem>>, vector<1x33x128xbf16>,
    %cst_2 = arith.constant 0.000000e+00 : bf16
    %2 = vector.broadcast %cst_2 : bf16 to vector<1x33x128xbf16>
    %c17 = arith.constant 17 : index
    %c0_3 = arith.constant 0 : index
    %c0_4 = arith.constant 0 : index
    %3 = vector.load %arg7[%c17, %c0_3, %c0_4] : memref<18x33x128xbf16, #tpu.memory_space<vmem>>, vector<1x33x128xbf16>
    tpu.vector_store %arg7[%c17, %c0_3, %c0_4], %2 {strides = array<i32>} : memref<18x33x128xbf16, #tpu.memory_space<vmem>>, vector<1x33x128xbf16>,
    %cst_5 = arith.constant 0.000000e+00 : bf16
    %4 = vector.broadcast %cst_5 : bf16 to vector<16x16x128xbf16>
    %c1 = arith.constant 1 : index
    %c0_6 = arith.constant 0 : index
    %c0_7 = arith.constant 0 : index
    %5 = vector.load %arg7[%c1, %c0_6, %c0_7] : memref<18x33x128xbf16, #tpu.memory_space<vmem>>, vector<16x16x128xbf16>
    tpu.vector_store %arg7[%c1, %c0_6, %c0_7], %4 {strides = array<i32>} : memref<18x33x128xbf16, #tpu.memory_space<vmem>>, vector<16x16x128xbf16>,
    %cst_8 = arith.constant 0.000000e+00 : bf16
    %6 = vector.broadcast %cst_8 : bf16 to vector<16x1x128xbf16>
    %c1_9 = arith.constant 1 : index
    %c32 = arith.constant 32 : index
    %c0_10 = arith.constant 0 : index
    %7 = vector.load %arg7[%c1_9, %c32, %c0_10] : memref<18x33x128xbf16, #tpu.memory_space<vmem>>, vector<16x1x128xbf16>
    tpu.vector_store %arg7[%c1_9, %c32, %c0_10], %6 {strides = array<i32>} : memref<18x33x128xbf16, #tpu.memory_space<vmem>>, vector<16x1x128xbf16>,
    %cst_11 = arith.constant 0.000000e+00 : bf16
    %8 = vector.broadcast %cst_11 : bf16 to vector<1x33x128xbf16>
    %c0_12 = arith.constant 0 : index
    %c0_13 = arith.constant 0 : index
    %c0_14 = arith.constant 0 : index
    %9 = vector.load %arg8[%c0_12, %c0_13, %c0_14] : memref<18x33x128xbf16, #tpu.memory_space<vmem>>, vector<1x33x128xbf16>
    tpu.vector_store %arg8[%c0_12, %c0_13, %c0_14], %8 {strides = array<i32>} : memref<18x33x128xbf16, #tpu.memory_space<vmem>>, vector<1x33x128xbf16>,
    %cst_15 = arith.constant 0.000000e+00 : bf16
    %10 = vector.broadcast %cst_15 : bf16 to vector<1x33x128xbf16>
    %c17_16 = arith.constant 17 : index
    %c0_17 = arith.constant 0 : index
    %c0_18 = arith.constant 0 : index
    %11 = vector.load %arg8[%c17_16, %c0_17, %c0_18] : memref<18x33x128xbf16, #tpu.memory_space<vmem>>, vector<1x33x128xbf16>
    tpu.vector_store %arg8[%c17_16, %c0_17, %c0_18], %10 {strides = array<i32>} : memref<18x33x128xbf16, #tpu.memory_space<vmem>>, vector<1x33x128xbf16>,
    %cst_19 = arith.constant 0.000000e+00 : bf16
    %12 = vector.broadcast %cst_19 : bf16 to vector<16x16x128xbf16>
    %c1_20 = arith.constant 1 : index
    %c0_21 = arith.constant 0 : index
    %c0_22 = arith.constant 0 : index
    %13 = vector.load %arg8[%c1_20, %c0_21, %c0_22] : memref<18x33x128xbf16, #tpu.memory_space<vmem>>, vector<16x16x128xbf16>
    tpu.vector_store %arg8[%c1_20, %c0_21, %c0_22], %12 {strides = array<i32>} : memref<18x33x128xbf16, #tpu.memory_space<vmem>>, vector<16x16x128xbf16>,
    %cst_23 = arith.constant 0.000000e+00 : bf16
    %14 = vector.broadcast %cst_23 : bf16 to vector<16x1x128xbf16>
    %c1_24 = arith.constant 1 : index
    %c32_25 = arith.constant 32 : index
    %c0_26 = arith.constant 0 : index
    %15 = vector.load %arg8[%c1_24, %c32_25, %c0_26] : memref<18x33x128xbf16, #tpu.memory_space<vmem>>, vector<16x1x128xbf16>
    tpu.vector_store %arg8[%c1_24, %c32_25, %c0_26], %14 {strides = array<i32>} : memref<18x33x128xbf16, #tpu.memory_space<vmem>>, vector<16x1x128xbf16>,
    %cst_27 = arith.constant 0.000000e+00 : bf16
    %16 = vector.broadcast %cst_27 : bf16 to vector<16x16x128xbf16>
    %c1_28 = arith.constant 1 : index
    %c16 = arith.constant 16 : index
    %c0_29 = arith.constant 0 : index
    %17 = vector.load %arg7[%c1_28, %c16, %c0_29] : memref<18x33x128xbf16, #tpu.memory_space<vmem>>, vector<16x16x128xbf16>
    tpu.vector_store %arg7[%c1_28, %c16, %c0_29], %16 {strides = array<i32>} : memref<18x33x128xbf16, #tpu.memory_space<vmem>>, vector<16x16x128xbf16>,
    %c0_30 = arith.constant 0 : index
    %c0_31 = arith.constant 0 : index
    %c0_32 = arith.constant 0 : index
    %c0_33 = arith.constant 0 : index
    %18 = vector.load %arg1[%c0_30, %c0_31, %c0_32, %c0_33] : memref<1x16x16x4xbf16, #tpu.memory_space<vmem>>, vector<1x16x16x4xbf16>
    %19 = vector.shape_cast %18 : vector<1x16x16x4xbf16> to vector<16x16x4xbf16>
    %c1_34 = arith.constant 1 : index
    %c16_35 = arith.constant 16 : index
    %c0_36 = arith.constant 0 : index
    %20 = vector.load %arg7[%c1_34, %c16_35, %c0_36] : memref<18x33x128xbf16, #tpu.memory_space<vmem>>, vector<16x16x4xbf16>
    tpu.vector_store %arg7[%c1_34, %c16_35, %c0_36], %19 {strides = array<i32>} : memref<18x33x128xbf16, #tpu.memory_space<vmem>>, vector<16x16x4xbf16>,
    %c0_37 = arith.constant 0 : index
    %c15 = arith.constant 15 : index
    %c0_38 = arith.constant 0 : index
    %21 = vector.load %arg7[%c0_37, %c15, %c0_38] : memref<18x33x128xbf16, #tpu.memory_space<vmem>>, vector<16x16x128xbf16>
    %c1_39 = arith.constant 1 : index
    %c15_40 = arith.constant 15 : index
    %c0_41 = arith.constant 0 : index
    %22 = vector.load %arg7[%c1_39, %c15_40, %c0_41] : memref<18x33x128xbf16, #tpu.memory_space<vmem>>, vector<16x16x128xbf16>
    %c2 = arith.constant 2 : index
    %c15_42 = arith.constant 15 : index
    %c0_43 = arith.constant 0 : index
    %23 = vector.load %arg7[%c2, %c15_42, %c0_43] : memref<18x33x128xbf16, #tpu.memory_space<vmem>>, vector<16x16x128xbf16>
    %24 = tpu.concatenate %21, %22, %23 in 2 : vector<16x16x128xbf16>, vector<16x16x128xbf16>, vector<16x16x128xbf16> -> vector<16x16x384xbf16>
    %c0_44 = arith.constant 0 : index
    %c0_45 = arith.constant 0 : index
    %c0_46 = arith.constant 0 : index
    %25 = vector.load %arg2[%c0_44, %c0_45, %c0_46] : memref<3x384x128xbf16, #tpu.memory_space<vmem>>, vector<1x384x128xbf16>
    %26 = vector.shape_cast %25 : vector<1x384x128xbf16> to vector<384x128xbf16>
    %cst_47 = arith.constant dense<0.000000e+00> : vector<16x16x128xf32>
    %27 = tpu.matmul %24, %26, %cst_47 {dimension_numbers = #tpu.dot_dimension_numbers<[2], [0], [0, 1], [1], [0, 0, 0, 1, 1, 1], [], []>} : vector<16x16x384xbf16>, vector<384x128xbf16>, vector<16x16x128xf32> -> vector<16x16x128xf32>
    %c0_48 = arith.constant 0 : index
    %c16_49 = arith.constant 16 : index
    %c0_50 = arith.constant 0 : index
    %28 = vector.load %arg7[%c0_48, %c16_49, %c0_50] : memref<18x33x128xbf16, #tpu.memory_space<vmem>>, vector<16x16x128xbf16>
    %c1_51 = arith.constant 1 : index
    %c16_52 = arith.constant 16 : index
    %c0_53 = arith.constant 0 : index
    %29 = vector.load %arg7[%c1_51, %c16_52, %c0_53] : memref<18x33x128xbf16, #tpu.memory_space<vmem>>, vector<16x16x128xbf16>
    %c2_54 = arith.constant 2 : index
    %c16_55 = arith.constant 16 : index
    %c0_56 = arith.constant 0 : index
    %30 = vector.load %arg7[%c2_54, %c16_55, %c0_56] : memref<18x33x128xbf16, #tpu.memory_space<vmem>>, vector<16x16x128xbf16>
    %31 = tpu.concatenate %28, %29, %30 in 2 : vector<16x16x128xbf16>, vector<16x16x128xbf16>, vector<16x16x128xbf16> -> vector<16x16x384xbf16>
    %c1_57 = arith.constant 1 : index
    %c0_58 = arith.constant 0 : index
    %c0_59 = arith.constant 0 : index
    %32 = vector.load %arg2[%c1_57, %c0_58, %c0_59] : memref<3x384x128xbf16, #tpu.memory_space<vmem>>, vector<1x384x128xbf16>
    %33 = vector.shape_cast %32 : vector<1x384x128xbf16> to vector<384x128xbf16>
    %cst_60 = arith.constant dense<0.000000e+00> : vector<16x16x128xf32>
    %34 = tpu.matmul %31, %33, %cst_60 {dimension_numbers = #tpu.dot_dimension_numbers<[2], [0], [0, 1], [1], [0, 0, 0, 1, 1, 1], [], []>} : vector<16x16x384xbf16>, vector<384x128xbf16>, vector<16x16x128xf32> -> vector<16x16x128xf32>
    %35 = arith.addf %27, %34 : vector<16x16x128xf32>
    %c0_61 = arith.constant 0 : index
    %c17_62 = arith.constant 17 : index
    %c0_63 = arith.constant 0 : index
    %36 = vector.load %arg7[%c0_61, %c17_62, %c0_63] : memref<18x33x128xbf16, #tpu.memory_space<vmem>>, vector<16x16x128xbf16>
    %c1_64 = arith.constant 1 : index
    %c17_65 = arith.constant 17 : index
    %c0_66 = arith.constant 0 : index
    %37 = vector.load %arg7[%c1_64, %c17_65, %c0_66] : memref<18x33x128xbf16, #tpu.memory_space<vmem>>, vector<16x16x128xbf16>
    %c2_67 = arith.constant 2 : index
    %c17_68 = arith.constant 17 : index
    %c0_69 = arith.constant 0 : index
    %38 = vector.load %arg7[%c2_67, %c17_68, %c0_69] : memref<18x33x128xbf16, #tpu.memory_space<vmem>>, vector<16x16x128xbf16>
    %39 = tpu.concatenate %36, %37, %38 in 2 : vector<16x16x128xbf16>, vector<16x16x128xbf16>, vector<16x16x128xbf16> -> vector<16x16x384xbf16>
    %c2_70 = arith.constant 2 : index
    %c0_71 = arith.constant 0 : index
    %c0_72 = arith.constant 0 : index
    %40 = vector.load %arg2[%c2_70, %c0_71, %c0_72] : memref<3x384x128xbf16, #tpu.memory_space<vmem>>, vector<1x384x128xbf16>
    %41 = vector.shape_cast %40 : vector<1x384x128xbf16> to vector<384x128xbf16>
    %cst_73 = arith.constant dense<0.000000e+00> : vector<16x16x128xf32>
    %42 = tpu.matmul %39, %41, %cst_73 {dimension_numbers = #tpu.dot_dimension_numbers<[2], [0], [0, 1], [1], [0, 0, 0, 1, 1, 1], [], []>} : vector<16x16x384xbf16>, vector<384x128xbf16>, vector<16x16x128xf32> -> vector<16x16x128xf32>
    %43 = arith.addf %35, %42 : vector<16x16x128xf32>
    %c0_74 = arith.constant 0 : index
    %c0_75 = arith.constant 0 : index
    %44 = vector.load %arg3[%c0_74, %c0_75] : memref<1x128xf32, #tpu.memory_space<vmem>>, vector<1x128xf32>
    %45 = vector.shape_cast %44 : vector<1x128xf32> to vector<1x1x128xf32>
    %46 = vector.broadcast %45 : vector<1x1x128xf32> to vector<16x16x128xf32>
    %47 = arith.addf %43, %46 : vector<16x16x128xf32>
    %cst_76 = arith.constant 0.000000e+00 : f32
    %48 = vector.broadcast %cst_76 : f32 to vector<16x16x128xf32>
    %49 = arith.maximumf %47, %48 : vector<16x16x128xf32>
    %50 = arith.truncf %49 : vector<16x16x128xf32> to vector<16x16x128xbf16>
    %c1_77 = arith.constant 1 : index
    %c16_78 = arith.constant 16 : index
    %c0_79 = arith.constant 0 : index
    %51 = vector.load %arg8[%c1_77, %c16_78, %c0_79] : memref<18x33x128xbf16, #tpu.memory_space<vmem>>, vector<16x16x128xbf16>
    tpu.vector_store %arg8[%c1_77, %c16_78, %c0_79], %50 {strides = array<i32>} : memref<18x33x128xbf16, #tpu.memory_space<vmem>>, vector<16x16x128xbf16>,
    %c0_80 = arith.constant 0 : index
    %c15_81 = arith.constant 15 : index
    %c0_82 = arith.constant 0 : index
    %52 = vector.load %arg8[%c0_80, %c15_81, %c0_82] : memref<18x33x128xbf16, #tpu.memory_space<vmem>>, vector<16x16x128xbf16>
    %c1_83 = arith.constant 1 : index
    %c15_84 = arith.constant 15 : index
    %c0_85 = arith.constant 0 : index
    %53 = vector.load %arg8[%c1_83, %c15_84, %c0_85] : memref<18x33x128xbf16, #tpu.memory_space<vmem>>, vector<16x16x128xbf16>
    %c2_86 = arith.constant 2 : index
    %c15_87 = arith.constant 15 : index
    %c0_88 = arith.constant 0 : index
    %54 = vector.load %arg8[%c2_86, %c15_87, %c0_88] : memref<18x33x128xbf16, #tpu.memory_space<vmem>>, vector<16x16x128xbf16>
    %55 = tpu.concatenate %52, %53, %54 in 2 : vector<16x16x128xbf16>, vector<16x16x128xbf16>, vector<16x16x128xbf16> -> vector<16x16x384xbf16>
    %c0_89 = arith.constant 0 : index
    %c0_90 = arith.constant 0 : index
    %c0_91 = arith.constant 0 : index
    %56 = vector.load %arg4[%c0_89, %c0_90, %c0_91] : memref<3x384x128xbf16, #tpu.memory_space<vmem>>, vector<1x384x128xbf16>
    %57 = vector.shape_cast %56 : vector<1x384x128xbf16> to vector<384x128xbf16>
    %cst_92 = arith.constant dense<0.000000e+00> : vector<16x16x128xf32>
    %58 = tpu.matmul %55, %57, %cst_92 {dimension_numbers = #tpu.dot_dimension_numbers<[2], [0], [0, 1], [1], [0, 0, 0, 1, 1, 1], [], []>} : vector<16x16x384xbf16>, vector<384x128xbf16>, vector<16x16x128xf32> -> vector<16x16x128xf32>
    %c0_93 = arith.constant 0 : index
    %c16_94 = arith.constant 16 : index
    %c0_95 = arith.constant 0 : index
    %59 = vector.load %arg8[%c0_93, %c16_94, %c0_95] : memref<18x33x128xbf16, #tpu.memory_space<vmem>>, vector<16x16x128xbf16>
    %c1_96 = arith.constant 1 : index
    %c16_97 = arith.constant 16 : index
    %c0_98 = arith.constant 0 : index
    %60 = vector.load %arg8[%c1_96, %c16_97, %c0_98] : memref<18x33x128xbf16, #tpu.memory_space<vmem>>, vector<16x16x128xbf16>
    %c2_99 = arith.constant 2 : index
    %c16_100 = arith.constant 16 : index
    %c0_101 = arith.constant 0 : index
    %61 = vector.load %arg8[%c2_99, %c16_100, %c0_101] : memref<18x33x128xbf16, #tpu.memory_space<vmem>>, vector<16x16x128xbf16>
    %62 = tpu.concatenate %59, %60, %61 in 2 : vector<16x16x128xbf16>, vector<16x16x128xbf16>, vector<16x16x128xbf16> -> vector<16x16x384xbf16>
    %c1_102 = arith.constant 1 : index
    %c0_103 = arith.constant 0 : index
    %c0_104 = arith.constant 0 : index
    %63 = vector.load %arg4[%c1_102, %c0_103, %c0_104] : memref<3x384x128xbf16, #tpu.memory_space<vmem>>, vector<1x384x128xbf16>
    %64 = vector.shape_cast %63 : vector<1x384x128xbf16> to vector<384x128xbf16>
    %cst_105 = arith.constant dense<0.000000e+00> : vector<16x16x128xf32>
    %65 = tpu.matmul %62, %64, %cst_105 {dimension_numbers = #tpu.dot_dimension_numbers<[2], [0], [0, 1], [1], [0, 0, 0, 1, 1, 1], [], []>} : vector<16x16x384xbf16>, vector<384x128xbf16>, vector<16x16x128xf32> -> vector<16x16x128xf32>
    %66 = arith.addf %58, %65 : vector<16x16x128xf32>
    %c0_106 = arith.constant 0 : index
    %c17_107 = arith.constant 17 : index
    %c0_108 = arith.constant 0 : index
    %67 = vector.load %arg8[%c0_106, %c17_107, %c0_108] : memref<18x33x128xbf16, #tpu.memory_space<vmem>>, vector<16x16x128xbf16>
    %c1_109 = arith.constant 1 : index
    %c17_110 = arith.constant 17 : index
    %c0_111 = arith.constant 0 : index
    %68 = vector.load %arg8[%c1_109, %c17_110, %c0_111] : memref<18x33x128xbf16, #tpu.memory_space<vmem>>, vector<16x16x128xbf16>
    %c2_112 = arith.constant 2 : index
    %c17_113 = arith.constant 17 : index
    %c0_114 = arith.constant 0 : index
    %69 = vector.load %arg8[%c2_112, %c17_113, %c0_114] : memref<18x33x128xbf16, #tpu.memory_space<vmem>>, vector<16x16x128xbf16>
    %70 = tpu.concatenate %67, %68, %69 in 2 : vector<16x16x128xbf16>, vector<16x16x128xbf16>, vector<16x16x128xbf16> -> vector<16x16x384xbf16>
    %c2_115 = arith.constant 2 : index
    %c0_116 = arith.constant 0 : index
    %c0_117 = arith.constant 0 : index
    %71 = vector.load %arg4[%c2_115, %c0_116, %c0_117] : memref<3x384x128xbf16, #tpu.memory_space<vmem>>, vector<1x384x128xbf16>
    %72 = vector.shape_cast %71 : vector<1x384x128xbf16> to vector<384x128xbf16>
    %cst_118 = arith.constant dense<0.000000e+00> : vector<16x16x128xf32>
    %73 = tpu.matmul %70, %72, %cst_118 {dimension_numbers = #tpu.dot_dimension_numbers<[2], [0], [0, 1], [1], [0, 0, 0, 1, 1, 1], [], []>} : vector<16x16x384xbf16>, vector<384x128xbf16>, vector<16x16x128xf32> -> vector<16x16x128xf32>
    %74 = arith.addf %66, %73 : vector<16x16x128xf32>
    %c0_119 = arith.constant 0 : index
    %c0_120 = arith.constant 0 : index
    %75 = vector.load %arg5[%c0_119, %c0_120] : memref<1x128xf32, #tpu.memory_space<vmem>>, vector<1x128xf32>
    %76 = vector.shape_cast %75 : vector<1x128xf32> to vector<1x1x128xf32>
    %77 = vector.broadcast %76 : vector<1x1x128xf32> to vector<16x16x128xf32>
    %78 = arith.addf %74, %77 : vector<16x16x128xf32>
    %cst_121 = arith.constant 0.000000e+00 : f32
    %79 = vector.broadcast %cst_121 : f32 to vector<16x16x128xf32>
    %80 = arith.maximumf %78, %79 : vector<16x16x128xf32>
    %81 = vector.extract_strided_slice %80 {offsets = [0, 0, 0], sizes = [16, 16, 8], strides = [1, 1, 1]} : vector<16x16x128xf32> to vector<16x16x8xf32>
    %82 = vector.shape_cast %81 : vector<16x16x8xf32> to vector<1x16x16x8xf32>
    %83 = arith.truncf %82 : vector<1x16x16x8xf32> to vector<1x16x16x8xbf16>
    %c0_122 = arith.constant 0 : index
    %c0_123 = arith.constant 0 : index
    %c0_124 = arith.constant 0 : index
    %c0_125 = arith.constant 0 : index
    %84 = vector.load %arg6[%c0_122, %c0_123, %c0_124, %c0_125] : memref<1x16x16x8xbf16, #tpu.memory_space<vmem>>, vector<1x16x16x8xbf16>
    tpu.vector_store %arg6[%c0_122, %c0_123, %c0_124, %c0_125], %83 {strides = array<i32>} : memref<1x16x16x8xbf16, #tpu.memory_space<vmem>>, vector<1x16x16x8xbf16>,
    return
  }
  func.func @transform_0(%arg0: i32) -> (i32, i32, i32, i32) {
    %c0_i32 = arith.constant 0 : i32
    %c0_i32_0 = arith.constant 0 : i32
    %c0_i32_1 = arith.constant 0 : i32
    %c0_i32_2 = arith.constant 0 : i32
    return %arg0, %c0_i32, %c0_i32_0, %c0_i32_1 : i32, i32, i32, i32
  }
  func.func @transform_1(%arg0: i32) -> (i32, i32, i32) {
    %c0_i32 = arith.constant 0 : i32
    %c0_i32_0 = arith.constant 0 : i32
    %c0_i32_1 = arith.constant 0 : i32
    %c0_i32_2 = arith.constant 0 : i32
    return %c0_i32, %c0_i32_0, %c0_i32_1 : i32, i32, i32
  }
  func.func @transform_2(%arg0: i32) -> (i32, i32) {
    %c0_i32 = arith.constant 0 : i32
    %c0_i32_0 = arith.constant 0 : i32
    %c0_i32_1 = arith.constant 0 : i32
    return %c0_i32, %c0_i32_0 : i32, i32
  }
  func.func @transform_3(%arg0: i32) -> (i32, i32, i32) {
    %c0_i32 = arith.constant 0 : i32
    %c0_i32_0 = arith.constant 0 : i32
    %c0_i32_1 = arith.constant 0 : i32
    %c0_i32_2 = arith.constant 0 : i32
    return %c0_i32, %c0_i32_0, %c0_i32_1 : i32, i32, i32
  }
  func.func @transform_4(%arg0: i32) -> (i32, i32) {
    %c0_i32 = arith.constant 0 : i32
    %c0_i32_0 = arith.constant 0 : i32
    %c0_i32_1 = arith.constant 0 : i32
    return %c0_i32, %c0_i32_0 : i32, i32
  }
  func.func @transform_5(%arg0: i32) -> (i32, i32, i32, i32) {
    %c0_i32 = arith.constant 0 : i32
    %c0_i32_0 = arith.constant 0 : i32
    %c0_i32_1 = arith.constant 0 : i32
    %c0_i32_2 = arith.constant 0 : i32
    return %arg0, %c0_i32, %c0_i32_0, %c0_i32_1 : i32, i32, i32, i32
  }
}

</mosaic_0001>

<bundles_post_ra>
// kernel: tpu_custom_call.1
= control target key start
LH: loop header
LB: loop body
LE: loop exit
PB: predicated region body
PF: predicated region fallthrough
CT: control target
= control target key end

     0   :  { %10 = vsyncpa [#allocation5], 0  ;;  %s15571_s0 = inlined_call_operand.vmem [shape: bf16[2,16,16,4], index: 0, kind: input, shape index: {}]   ;;  %s15572_s1 = inlined_call_operand.hbm [shape: bf16[3,384,128], index: 1, kind: input, shape index: {}]   ;;  %s15573_s2 = inlined_call_operand.vmem [shape: f32[1,128], index: 2, kind: input, shape index: {}]   ;;  %s15574_s3 = inlined_call_operand.hbm [shape: bf16[3,384,128], index: 3, kind: input, shape index: {}]   ;;  %s15575_s4 = inlined_call_operand.vmem [shape: f32[1,128], index: 4, kind: input, shape index: {}]   ;;  %s15576_s5 = inlined_call_operand.vmem [shape: bf16[2,16,16,8], index: 5, kind: output, shape index: {}]  }
   0x1   :  { %11 = vsyncpa [#allocation7], 0  ;;  %s12534_s18 = smov 0  }
   0x2 LB: > { %s12540_s19 = sadd.s32 4294967295, %s12497_s18   ;;  %p9526_p0 = scmp.ge.s32.totalorder %s12497_s18, 1  ;;  %s12497_s18 = sphi %s12534_s18, %s17_s18  }
   0x3   : > { %p158_p1 = scmp.lt.s32.totalorder %s12497_s18, 3  ;;  %s12499_s20 = smov [#allocation4]  }
   0x4   : > { %s170_s21 = sshll.u32 %s12499_s20, 4  ;;  %p15577_p3 = scmp.eq.s32.totalorder %s12540_s19, 0  ;;  %s171_s21 = int_to_ptr.vmem [resolvable:$true] %s170_s21 }
   0x5   : > { %p12544_p2 = pnand %p9526_p0, %p158_p1  ;;  %s12500_s23 = smov [#allocation6]  }
   0x6   : > { %s186_s24 = sshll.u32 %s12500_s23, 4  ;;  %s12427_s28 = scalar_lea.hbm %s15572_s1, 9216  ;;  %s12557_s24 = int_to_ptr.vmem [resolvable:$true] %s186_s24 }
   0x7   : > { %s15691_s22 = scalar_select %p12544_p2, 1, 0 }
   0x8   : > { %p11775_p4 = pneg %p12544_p2  ;;  %p12428_p6 = scmp.ne.s32.totalorder %s15572_s1, %s12427_s28 }
   0x9   : > { %p12434_p10 = scmp.lt.u32.totalorder %s12427_s28, %s15572_s1 }
   0xa   : > { %p12553_p5 = pnand %p15577_p3, %p11775_p4 }
   0xc   : > { %p12429_p7 = pneg %p12553_p5 }
   0xe   : > { %p12430_p8 = pnand %p12429_p7, %p12428_p6 }
  0x10   : > { %p12431_p9 = pneg %p12430_p8 }
  0x12   : > { %p12436_p11 = pnand %p12434_p10, %p12431_p9 }
  0x14   : > { %12439 = shalt.err (!%p12436_p11)
}
  0x15   : > { %s12440_s8 = scalar_lea.vmem %s171_s21, 9216  ;;  %p12448_p1 = scmp.lt.s32.totalorder %s171_s21, %s171_s21 }
  0x16   : > { %p12441_p12 = scmp.ne.s32.totalorder %s171_s21, %s12440_s8  ;;  %p12449_p4 = scmp.lt.s32.totalorder %s12440_s8, %s12440_s8 }
  0x18   : > { %p12443_p13 = pnand %p12441_p12, %p12429_p7  ;;  %p12450_p3 = por %p12449_p4, %p12448_p1 }
  0x1a   : > { %p12444_p0 = pneg %p12443_p13 }
  0x1c   : > { %p12451_p2 = pnand %p12450_p3, %p12444_p0 }
  0x1e   : > { %12454 = shalt.err (!%p12451_p2)
}
  0x1f   : > { %s12501_s9 = smov 64   ;;  %s12502_s10 = smov 4  }
  0x20   : > { %11778 = dma.hbm_to_vmem [thread:$0]  (!%p12553_p5), %s15572_s1, 9216, %s171_s21, [#allocation5], %s12501_s9, %s12501_s9, %s12502_s10  }
  0x21   : > { %s12455_s15 = scalar_lea.hbm %s15574_s3, 9216 }
  0x22   : > { %p12456_p6 = scmp.ne.s32.totalorder %s15574_s3, %s12455_s15  ;;  %p12462_p8 = scmp.lt.u32.totalorder %s12455_s15, %s15574_s3 }
  0x24   : > { %p12458_p2 = pnand %p12456_p6, %p12429_p7 }
  0x26   : > { %p12459_p3 = pneg %p12458_p2 }
  0x28   : > { %p12464_p9 = pnand %p12462_p8, %p12459_p3 }
  0x2a   : > { %12467 = shalt.err (!%p12464_p9)
}
  0x2b   : > { %s12468_s21 = scalar_lea.vmem %s12557_s24, 9216  ;;  %p12476_p13 = scmp.lt.s32.totalorder %s12557_s24, %s12557_s24 }
  0x2c   : > { %p12469_p10 = scmp.ne.s32.totalorder %s12557_s24, %s12468_s21  ;;  %p12477_p0 = scmp.lt.s32.totalorder %s12468_s21, %s12468_s21 }
  0x2e   : > { %p12471_p11 = pnand %p12469_p10, %p12429_p7  ;;  %p12478_p1 = por %p12477_p0, %p12476_p13 }
  0x30   : > { %p12472_p12 = pneg %p12471_p11 }
  0x32   : > { %p12479_p4 = pnand %p12478_p1, %p12472_p12 }
  0x34   : > { %12482 = shalt.err (!%p12479_p4)
}
  0x35   : > { %11781 = dma.hbm_to_vmem [thread:$0]  (!%p12553_p5), %s15574_s3, 9216, %s12557_s24, [#allocation7], %s12501_s9, %s12501_s9, %s12502_s10  }
  0x36   : > { %p15693_p6 = scmp.ne.s32.totalorder %s15691_s22, 0 }
  0x38   : > { %213 = sbr.rel (%p15693_p6) target bundleno = 1193 (0x4a9), region = 40 }
  0x3f   : > { %p15694_p2 = scmp.eq.s32.totalorder %s12540_s19, 0 }
  0x41   : > { %12488 = dma.done.wait (%p15694_p2), [#allocation5], 9216   ;;  %p15695_p7 = pmov %p15694_p2 }
  0x42   : > { %p15696_p3 = pmov %p15694_p2 }
  0x43   : > { %12490 = vsyncadd (%p15695_p7), [#allocation5], 4294958080 }
  0x44   : > { %12492 = dma.done.wait (%p15696_p3), [#allocation7], 9216   ;;  %p15697_p8 = pmov %p15694_p2 }
  0x45   : > { %v12503_v0 = vmov 0   ;;  %v11799_v1 = vld [vmem:[#allocation4 + $0x100] sm:$0xff]   ;;  %v11803_v5 = vld [vmem:[#allocation4 + $0x108] sm:$0xff]   ;;  %v11807_v9 = vld [vmem:[#allocation4 + $0x110] sm:$0xff]   ;;  %p245_p5 = scmp.lt.s32.totalorder %s12540_s19, 1  ;;  %vm515_vm0 = vcmask 27648  }
  0x46   : > { %12494 = vsyncadd (%p15697_p8), [#allocation7], 4294958080  ;;  %257 = vst [vmem:[#allocation2 + $0x4] sm:$0xf] %v12503_v0  ;;  %v11800_v2 = vld [vmem:[#allocation4 + $0x40] sm:$0xff]   ;;  %10343 = vmatprep.subr.bf16.mxu0 %v11799_v1  ;;  %v11804_v6 = vld [vmem:[#allocation4 + $0x48] sm:$0xff]  }
  0x47   : > { %258 = vst [vmem:[#allocation2 + $0x8] sm:$0xf] %v12503_v0  ;;  %259 = vst [vmem:[#allocation2 + $0xc] sm:$0xf] %v12503_v0  ;;  %v11801_v3 = vld [vmem:[#allocation4 + $0xc0] sm:$0xff]   ;;  %10479 = vmatprep.subr.bf16.mxu1 %v11800_v2  ;;  %v11805_v7 = vld [vmem:[#allocation4 + $0xc8] sm:$0xff]  }
  0x48   : > { %268 = vst [vmem:[#allocation2 + $0x158] sm:$0xf] %v12503_v0  ;;  %269 = vst [vmem:[#allocation2 + $0x15c] sm:$0xf] %v12503_v0  ;;  %v11802_v4 = vld [vmem:[#allocation4] sm:$0xff]   ;;  %10344 = vmatpush3.bf16.msra.mxu0 %v11801_v3  ;;  %v11806_v8 = vld [vmem:[#allocation4 + $0x8] sm:$0xff]  }
  0x49   : > { %270 = vst [vmem:[#allocation2 + $0x160] sm:$0xf] %v12503_v0  ;;  %276 = vst [vmem:[#allocation2 + $0x18] sm:$0xf] %v12503_v0  ;;  %10480 = vmatpush3.bf16.msra.mxu1 %v11802_v4  ;;  %10345 = vmatprep.subr.bf16.mxu0 %v11803_v5  ;;  %v11808_v10 = vld [vmem:[#allocation4 + $0x50] sm:$0xff]   ;;  %v11811_v13 = vld [vmem:[#allocation4 + $0x118] sm:$0xff]  }
  0x4a   : > { %278 = vst [vmem:[#allocation2 + $0x2c] sm:$0xf] %v12503_v0  ;;  %280 = vst [vmem:[#allocation2 + $0x40] sm:$0xf] %v12503_v0  ;;  %10481 = vmatprep.subr.bf16.mxu1 %v11804_v6  ;;  %v11809_v11 = vld [vmem:[#allocation4 + $0xd0] sm:$0xff]   ;;  %v11812_v14 = vld [vmem:[#allocation4 + $0x58] sm:$0xff]  }
  0x4b   : > { %282 = vst [vmem:[#allocation2 + $0x54] sm:$0xf] %v12503_v0  ;;  %284 = vst [vmem:[#allocation2 + $0x68] sm:$0xf] %v12503_v0  ;;  %v11810_v12 = vld [vmem:[#allocation4 + $0x10] sm:$0xff]   ;;  %v11813_v15 = vld [vmem:[#allocation4 + $0xd8] sm:$0xff]  }
  0x4c   : > { %286 = vst [vmem:[#allocation2 + $0x7c] sm:$0xf] %v12503_v0  ;;  %288 = vst [vmem:[#allocation2 + $0x90] sm:$0xf] %v12503_v0  ;;  %10346 = vmatpush3.bf16.msra.mxu0 %v11805_v7  ;;  %v11814_v16 = vld [vmem:[#allocation4 + $0x18] sm:$0xff]   ;;  %v11815_v17 = vld [vmem:[#allocation4 + $0x120] sm:$0xff]  }
  0x4d   : > { %290 = vst [vmem:[#allocation2 + $0xa4] sm:$0xf] %v12503_v0  ;;  %292 = vst [vmem:[#allocation2 + $0xb8] sm:$0xf] %v12503_v0  ;;  %10482 = vmatpush3.bf16.msra.mxu1 %v11806_v8  ;;  %10347 = vmatprep.subr.bf16.mxu0 %v11807_v9  ;;  %v11816_v18 = vld [vmem:[#allocation4 + $0x60] sm:$0xff]   ;;  %v11819_v21 = vld [vmem:[#allocation4 + $0x128] sm:$0xff]  }
  0x4e   : > { %294 = vst [vmem:[#allocation2 + $0xcc] sm:$0xf] %v12503_v0  ;;  %296 = vst [vmem:[#allocation2 + $0xe0] sm:$0xf] %v12503_v0  ;;  %10483 = vmatprep.subr.bf16.mxu1 %v11808_v10  ;;  %v11817_v19 = vld [vmem:[#allocation4 + $0xe0] sm:$0xff]   ;;  %v11820_v22 = vld [vmem:[#allocation4 + $0x68] sm:$0xff]  }
  0x4f   : > { %298 = vst [vmem:[#allocation2 + $0xf4] sm:$0xf] %v12503_v0  ;;  %300 = vst [vmem:[#allocation2 + $0x108] sm:$0xf] %v12503_v0  ;;  %v11818_v20 = vld [vmem:[#allocation4 + $0x20] sm:$0xff]   ;;  %v11821_v23 = vld [vmem:[#allocation4 + $0xe8] sm:$0xff]  }
  0x50   : > { %302 = vst [vmem:[#allocation2 + $0x11c] sm:$0xf] %v12503_v0  ;;  %304 = vst [vmem:[#allocation2 + $0x130] sm:$0xf] %v12503_v0  ;;  %10348 = vmatpush3.bf16.msra.mxu0 %v11809_v11  ;;  %s16017_s19 = smov (!%p245_p5, %s12540_s19), 1  ;;  %v11822_v24 = vld [vmem:[#allocation4 + $0x28] sm:$0xff]  }
  0x51   : > { %306 = vst [vmem:[#allocation2 + $0x144] sm:$0xf] %v12503_v0  ;;  %356 = vst [vmem:[#allocation3 + $0x4] sm:$0xf] %v12503_v0  ;;  %10484 = vmatpush3.bf16.msra.mxu1 %v11810_v12  ;;  %10349 = vmatprep.subr.bf16.mxu0 %v11811_v13  ;;  %v11823_v25 = vld [vmem:[#allocation4 + $0x130] sm:$0xff]   ;;  %s10229_s22 = sshll.u32 %s16017_s19, 7 }
  0x52   : > { %357 = vst [vmem:[#allocation3 + $0x8] sm:$0xf] %v12503_v0  ;;  %358 = vst [vmem:[#allocation3 + $0xc] sm:$0xf] %v12503_v0  ;;  %10485 = vmatprep.subr.bf16.mxu1 %v11812_v14  ;;  %v11824_v26 = vld [vmem:[#allocation4 + $0x70] sm:$0xff]   ;;  %v11827_v29 = vld [vmem:[#allocation4 + $0x138] sm:$0xff]   ;;  %s12702_s28 = scalar_lea.vmem %s15571_s0, %s10229_s22  ;;  %s15445_s12 = scalar_lea.vmem %s15576_s5, %s10229_s22 }
  0x53   : > { %364 = vst [vmem:[#allocation3 + $0x158] sm:$0xf] %v12503_v0  ;;  %365 = vst [vmem:[#allocation3 + $0x15c] sm:$0xf] %v12503_v0  ;;  %v11825_v27 = vld [vmem:[#allocation4 + $0xf0] sm:$0xff]   ;;  %v11828_v30 = vld [vmem:[#allocation4 + $0x78] sm:$0xff]  }
  0x54   : > { %366 = vst [vmem:[#allocation3 + $0x160] sm:$0xf] %v12503_v0  ;;  %372 = vst [vmem:[#allocation3 + $0x18] sm:$0xf] %v12503_v0  ;;  %10350 = vmatpush3.bf16.msra.mxu0 %v11813_v15  ;;  %v11826_v28 = vld [vmem:[#allocation4 + $0x30] sm:$0xff]   ;;  %v11829_v31 = vld [vmem:[#allocation4 + $0xf8] sm:$0xff]  }
  0x55   : > { %374 = vst [vmem:[#allocation3 + $0x2c] sm:$0xf] %v12503_v0  ;;  %376 = vst [vmem:[#allocation3 + $0x40] sm:$0xf] %v12503_v0  ;;  %10486 = vmatpush3.bf16.msra.mxu1 %v11814_v16  ;;  %10351 = vmatprep.subr.bf16.mxu0 %v11815_v17  ;;  %v11830_v32 = vld [vmem:[#allocation4 + $0x38] sm:$0xff]   ;;  %v11837_v40 = vld [vmem:[#allocation4 + $0x140] sm:$0xff]  }
  0x56   : > { %378 = vst [vmem:[#allocation3 + $0x54] sm:$0xf] %v12503_v0  ;;  %380 = vst [vmem:[#allocation3 + $0x68] sm:$0xf] %v12503_v0  ;;  %10487 = vmatprep.subr.bf16.mxu1 %v11816_v18  ;;  %v483_v33 = vld [vmem:[%s12702_s28] sm:$0xf] }
  0x57   : > { %382 = vst [vmem:[#allocation3 + $0x7c] sm:$0xf] %v12503_v0  ;;  %384 = vst [vmem:[#allocation3 + $0x90] sm:$0xf] %v12503_v0  ;;  %v484_v34 = vld [vmem:[%s12702_s28 + $0x4] sm:$0xf] }
  0x58   : > { %386 = vst [vmem:[#allocation3 + $0xa4] sm:$0xf] %v12503_v0  ;;  %388 = vst [vmem:[#allocation3 + $0xb8] sm:$0xf] %v12503_v0  ;;  %10352 = vmatpush3.bf16.msra.mxu0 %v11817_v19  ;;  %v548_v35 = vld [vmem:[#allocation2 + $0x4] sm:$0x8] }
  0x59   : > { %390 = vst [vmem:[#allocation3 + $0xcc] sm:$0xf] %v12503_v0  ;;  %392 = vst [vmem:[#allocation3 + $0xe0] sm:$0xf] %v12503_v0  ;;  %10488 = vmatpush3.bf16.msra.mxu1 %v11818_v20  ;;  %10353 = vmatprep.subr.bf16.mxu0 %v11819_v21  ;;  %v549_v36 = vld [vmem:[#allocation2 + $0x8] sm:$0xf] }
  0x5a   : > { %394 = vst [vmem:[#allocation3 + $0xf4] sm:$0xf] %v12503_v0  ;;  %396 = vst [vmem:[#allocation3 + $0x108] sm:$0xf] %v12503_v0  ;;  %10489 = vmatprep.subr.bf16.mxu1 %v11820_v22  ;;  %v550_v37 = vld [vmem:[#allocation2 + $0xc] sm:$0xf]  ;;  %v9537_v38 = vcombine.low %v548_v35, %v549_v36 }
  0x5b   : > { %398 = vst [vmem:[#allocation3 + $0x11c] sm:$0xf] %v12503_v0  ;;  %400 = vst [vmem:[#allocation3 + $0x130] sm:$0xf] %v12503_v0  ;;  %v9538_v39 = vcombine.low %v550_v37, %v550_v37  ;;  %vm1736_vm1 = vsmask.f32 4352  ;;  %v9633_v58 = vcombine.low %v549_v36, %v550_v37 }
  0x5c   : > { %402 = vst [vmem:[#allocation3 + $0x144] sm:$0xf] %v12503_v0  ;;  %451 = vst [vmem:[#allocation2 + $0x1c] sm:$0xf] %v12503_v0  ;;  %10354 = vmatpush3.bf16.msra.mxu0 %v11821_v23  ;;  %v485_v41 = vld [vmem:[%s12702_s28 + $0x8] sm:$0xf] }
  0x5d   : > { %452 = vst [vmem:[#allocation2 + $0x20] sm:$0xf] %v12503_v0  ;;  %453 = vst [vmem:[#allocation2 + $0x30] sm:$0xf] %v12503_v0  ;;  %10490 = vmatpush3.bf16.msra.mxu1 %v11822_v24  ;;  %10355 = vmatprep.subr.bf16.mxu0 %v11823_v25  ;;  %v486_v42 = vld [vmem:[%s12702_s28 + $0xc] sm:$0xf] }
  0x5e   : > { %454 = vst [vmem:[#allocation2 + $0x34] sm:$0xf] %v12503_v0  ;;  %455 = vst [vmem:[#allocation2 + $0x44] sm:$0xf] %v12503_v0  ;;  %10491 = vmatprep.subr.bf16.mxu1 %v11824_v26  ;;  %v1738_v43 = vshrl.u32 %v9537_v38, 16  ;;  %v1741_v44 = vshll.u32 %v9537_v38, 16 }
  0x5f   : > { %456 = vst [vmem:[#allocation2 + $0x48] sm:$0xf] %v12503_v0  ;;  %457 = vst [vmem:[#allocation2 + $0x58] sm:$0xf] %v12503_v0  ;;  %v1746_v45 = vshrl.u32 %v9538_v39, 16  ;;  %v1749_v46 = vshll.u32 %v9538_v39, 16 }
  0x60   : > { %458 = vst [vmem:[#allocation2 + $0x5c] sm:$0xf] %v12503_v0  ;;  %459 = vst [vmem:[#allocation2 + $0x6c] sm:$0xf] %v12503_v0  ;;  %10356 = vmatpush3.bf16.msra.mxu0 %v11825_v27  ;;  %v596_v47 = vld [vmem:[#allocation2 + $0x18] sm:$0x8] }
  0x61   : > { %460 = vst [vmem:[#allocation2 + $0x70] sm:$0xf] %v12503_v0  ;;  %461 = vst [vmem:[#allocation2 + $0x80] sm:$0xf] %v12503_v0  ;;  %10492 = vmatpush3.bf16.msra.mxu1 %v11826_v28  ;;  %10357 = vmatprep.subr.bf16.mxu0 %v11827_v29  ;;  %v487_v48 = vld [vmem:[%s12702_s28 + $0x10] sm:$0xf] }
  0x62   : > { %462 = vst [vmem:[#allocation2 + $0x84] sm:$0xf] %v12503_v0  ;;  %463 = vst [vmem:[#allocation2 + $0x94] sm:$0xf] %v12503_v0  ;;  %10493 = vmatprep.subr.bf16.mxu1 %v11828_v30  ;;  %v488_v49 = vld [vmem:[%s12702_s28 + $0x14] sm:$0xf] }
  0x63   : > { %464 = vst [vmem:[#allocation2 + $0x98] sm:$0xf] %v12503_v0  ;;  %465 = vst [vmem:[#allocation2 + $0xa8] sm:$0xf] %v12503_v0  ;;  %v1740_v50 = vrot.slane %v1738_v43, 3  ;;  %v1743_v51 = vrot.slane %v1741_v44, 4 }
  0x64   : > { %466 = vst [vmem:[#allocation2 + $0xac] sm:$0xf] %v12503_v0  ;;  %467 = vst [vmem:[#allocation2 + $0xbc] sm:$0xf] %v12503_v0  ;;  %10358 = vmatpush3.bf16.msra.mxu0 %v11829_v31  ;;  %v1748_v52 = vrot.slane %v1746_v45, 3  ;;  %v1751_v53 = vrot.slane %v1749_v46, 4 }
  0x65   : > { %468 = vst [vmem:[#allocation2 + $0xc0] sm:$0xf] %v12503_v0  ;;  %469 = vst [vmem:[#allocation2 + $0xd0] sm:$0xf] %v12503_v0  ;;  %10494 = vmatpush3.bf16.msra.mxu1 %v11830_v32  ;;  %11159 = vmatprep.subr.bf16.mxu0 %v11837_v40  ;;  %v551_v54 = vld [vmem:[#allocation2 + $0x18] sm:$0x8]  ;;  %v1744_v59 = vor.u32 %v1743_v51, %v1740_v50 }
  0x66   : > { %470 = vst [vmem:[#allocation2 + $0xd4] sm:$0xf] %v12503_v0  ;;  %471 = vst [vmem:[#allocation2 + $0xe4] sm:$0xf] %v12503_v0  ;;  %v599_v55 = vld [vmem:[#allocation2 + $0x2c] sm:$0x8]  ;;  %v1752_v60 = vor.u32 %v1751_v53, %v1748_v52 }
  0x67   : > { %472 = vst [vmem:[#allocation2 + $0xe8] sm:$0xf] %v12503_v0  ;;  %473 = vst [vmem:[#allocation2 + $0xf8] sm:$0xf] %v12503_v0  ;;  %v489_v3 = vld [vmem:[%s12702_s28 + $0x18] sm:$0xf] }
  0x68   : > { %474 = vst [vmem:[#allocation2 + $0xfc] sm:$0xf] %v12503_v0  ;;  %475 = vst [vmem:[#allocation2 + $0x10c] sm:$0xf] %v12503_v0  ;;  %v490_v4 = vld [vmem:[%s12702_s28 + $0x1c] sm:$0xf]  ;;  %v1753_v5 = vsel %vm1736_vm1, %v1744_v59, %v1752_v60 }
  0x69   : > { %476 = vst [vmem:[#allocation2 + $0x110] sm:$0xf] %v12503_v0  ;;  %477 = vst [vmem:[#allocation2 + $0x120] sm:$0xf] %v12503_v0  ;;  %v11850_v8 = vld [vmem:[#allocation4 + $0x148] sm:$0xff]   ;;  %v11863_v29 = vld [vmem:[#allocation4 + $0x150] sm:$0xff]  }
  0x6a   : > { %478 = vst [vmem:[#allocation2 + $0x124] sm:$0xf] %v12503_v0  ;;  %479 = vst [vmem:[#allocation2 + $0x134] sm:$0xf] %v12503_v0  ;;  %v491_v9 = vld [vmem:[%s12702_s28 + $0x20] sm:$0xf] }
  0x6b   : > { %480 = vst [vmem:[#allocation2 + $0x138] sm:$0xf] %v12503_v0  ;;  %481 = vst [vmem:[#allocation2 + $0x148] sm:$0xf] %v12503_v0  ;;  %v602_v28 = vld [vmem:[#allocation2 + $0x40] sm:$0x8] }
  0x6c   : > { %482 = vst [vmem:[#allocation2 + $0x14c] sm:$0xf] %v12503_v0  ;;  %516 = vst.msk [vmem:[#allocation2 + $0x1c] sm:$0xf] %vm515_vm0, %v483_v33  ;;  %v554_v36 = vld [vmem:[#allocation2 + $0x2c] sm:$0x8] }
  0x6d   : > { %517 = vst.msk [vmem:[#allocation2 + $0x20] sm:$0xf] %vm515_vm0, %v484_v34  ;;  %518 = vst.msk [vmem:[#allocation2 + $0x30] sm:$0xf] %vm515_vm0, %v485_v41  ;;  %v492_v51 = vld [vmem:[%s12702_s28 + $0x24] sm:$0xf] }
  0x6e   : > { %519 = vst.msk [vmem:[#allocation2 + $0x34] sm:$0xf] %vm515_vm0, %v486_v42  ;;  %520 = vst.msk [vmem:[#allocation2 + $0x44] sm:$0xf] %vm515_vm0, %v487_v48  ;;  %v11876_v52 = vld [vmem:[#allocation4 + $0x158] sm:$0xff]   ;;  %vm260_vm2 = vcmask 1040384  }
  0x6f   : > { %521 = vst.msk [vmem:[#allocation2 + $0x48] sm:$0xf] %vm515_vm0, %v488_v49  ;;  %522 = vst.msk [vmem:[#allocation2 + $0x58] sm:$0xf] %vm515_vm0, %v489_v3  ;;  %vm261_vm3 = vsmask.f32 256 }
  0x70   : > { %523 = vst.msk [vmem:[#allocation2 + $0x5c] sm:$0xf] %vm515_vm0, %v490_v4  ;;  %524 = vst.msk [vmem:[#allocation2 + $0x6c] sm:$0xf] %vm515_vm0, %v491_v9  ;;  %v494_v9 = vld [vmem:[%s12702_s28 + $0x2c] sm:$0xf] }
  0x71   : > { %525 = vst.msk [vmem:[#allocation2 + $0x70] sm:$0xf] %vm515_vm0, %v492_v51  ;;  %527 = vst.msk [vmem:[#allocation2 + $0x84] sm:$0xf] %vm515_vm0, %v494_v9  ;;  %vm3644_vm5 = vsmask.f32 7424 }
  0x72   : > { %vm13274_vm4 = vmand %vm260_vm2, %vm261_vm3  ;;  %vm9414_vm6 = vcmask 60416  }
  0x73   : > { %v597_v56 = vld [vmem:[#allocation2 + $0x1c] sm:$0xf] }
  0x74   : > { %v598_v57 = vld [vmem:[#allocation2 + $0x20] sm:$0xf]  ;;  %v12716_v61 = vld [vmem:[#allocation2 + $0x1c] sm:$0xf]  ;;  %v9569_v62 = vcombine.low %v596_v47, %v597_v56  ;;  %v600_v14 = vld [vmem:[#allocation2 + $0x30] sm:$0xf] }
  0x75   : > { %v9570_v63 = vcombine.low %v598_v57, %v598_v57  ;;  %v9649_v0 = vcombine.low %v597_v56, %v598_v57  ;;  %v12718_v1 = vld [vmem:[#allocation2 + $0x20] sm:$0xf]  ;;  %v9539_v2 = vcombine.low %v551_v54, %v12716_v61  ;;  %v601_v15 = vld [vmem:[#allocation2 + $0x34] sm:$0xf]  ;;  %v9571_v16 = vcombine.low %v599_v55, %v600_v14  ;;  %v603_v34 = vld [vmem:[#allocation2 + $0x44] sm:$0xf] }
  0x76   : > { %v9540_v6 = vcombine.low %v12718_v1, %v12718_v1  ;;  %v9634_v7 = vcombine.low %v12716_v61, %v12718_v1  ;;  %v1755_v10 = vshrl.u32 %v9569_v62, 16  ;;  %v1758_v11 = vshll.u32 %v9569_v62, 16  ;;  %v604_v35 = vld [vmem:[#allocation2 + $0x48] sm:$0xf]  ;;  %v12732_v41 = vld [vmem:[#allocation2 + $0x30] sm:$0xf] }
  0x77   : > { %1446 = vmatprep.mubr.bf16.mxu0 %v9649_v0  ;;  %v1763_v12 = vshrl.u32 %v9570_v63, 16  ;;  %v1766_v13 = vshll.u32 %v9570_v63, 16  ;;  %v1789_v17 = vshrl.u32 %v9539_v2, 16  ;;  %v1792_v18 = vshll.u32 %v9539_v2, 16  ;;  %v12735_v46 = vld [vmem:[#allocation2 + $0x34] sm:$0xf] }
  0x78   : > { %1447 = vmatmul.mubr.bf16.vlgmr.msra.gmra.mrb[0].mxu0 %v9633_v58  ;;  %v1797_v19 = vshrl.u32 %v9540_v6, 16  ;;  %v1757_v20 = vrot.slane %v1755_v10, 3  ;;  %v1760_v21 = vrot.slane %v1758_v11, 4  ;;  %v9572_v24 = vcombine.low %v601_v15, %v601_v15  ;;  %v605_v57 = vld [vmem:[#allocation2 + $0x54] sm:$0x8] }
  0x79   : > { %v1765_v22 = vrot.slane %v1763_v12, 3  ;;  %v1768_v23 = vrot.slane %v1766_v13, 4  ;;  %11160 = vmatpush3.bf16.msra.mxu0 %v11837_v40  ;;  %v9650_v25 = vcombine.low %v600_v14, %v601_v15  ;;  %v1806_v26 = vshrl.u32 %v9571_v16, 16  ;;  %v606_v63 = vld [vmem:[#allocation2 + $0x58] sm:$0xf] }
  0x7a   : > { %v1809_v27 = vshll.u32 %v9571_v16, 16  ;;  %11161 = vmatprep.subr.bf16.mxu0 %v11850_v8  ;;  %v1761_v30 = vor.u32 %v1760_v21, %v1757_v20  ;;  %v1800_v32 = vshll.u32 %v9540_v6, 16  ;;  %v1791_v33 = vrot.slane %v1789_v17, 3  ;;  %v607_v0 = vld [vmem:[#allocation2 + $0x5c] sm:$0xf] }
  0x7b   : > { %v1769_v31 = vor.u32 %v1768_v23, %v1765_v22  ;;  %1454 = vmatprep.mubr.bf16.mxu0 %v9650_v25  ;;  %v1814_v37 = vshrl.u32 %v9572_v24, 16  ;;  %v1817_v38 = vshll.u32 %v9572_v24, 16  ;;  %v1808_v39 = vrot.slane %v1806_v26, 3  ;;  %v495_v24 = vld [vmem:[%s12702_s28 + $0x30] sm:$0xf] }
  0x7c   : > { %v1811_v40 = vrot.slane %v1809_v27, 4  ;;  %v1794_v43 = vrot.slane %v1792_v18, 4  ;;  %v1799_v44 = vrot.slane %v1797_v19, 3  ;;  %v1802_v45 = vrot.slane %v1800_v32, 4  ;;  %v557_v18 = vld [vmem:[#allocation2 + $0x40] sm:$0x8] }
  0x7d   : > { %v1770_v42 = vsel %vm1736_vm1, %v1761_v30, %v1769_v31  ;;  %11162 = vmatpush3.bf16.msra.mxu0 %v11850_v8  ;;  %v1816_v48 = vrot.slane %v1814_v37, 3  ;;  %v1819_v49 = vrot.slane %v1817_v38, 4  ;;  %v9573_v50 = vcombine.low %v602_v28, %v603_v34  ;;  %v493_v8 = vld [vmem:[%s12702_s28 + $0x28] sm:$0xf]  ;;  %v12753_v19 = vld [vmem:[#allocation2 + $0x44] sm:$0xf] }
  0x7e   : > { %2777 = vmatprep.mubr.bf16.mxu1 %v1770_v42  ;;  %v1812_v47 = vor.u32 %v1811_v40, %v1808_v39  ;;  %11163 = vmatprep.subr.bf16.mxu0 %v11863_v29  ;;  %v1795_v53 = vor.u32 %v1794_v43, %v1791_v33  ;;  %v1803_v54 = vor.u32 %v1802_v45, %v1799_v44  ;;  %v496_v25 = vld [vmem:[%s12702_s28 + $0x34] sm:$0xf]  ;;  %v12757_v30 = vld [vmem:[#allocation2 + $0x48] sm:$0xf]  ;;  %v609_v37 = vld [vmem:[#allocation2 + $0x6c] sm:$0xf] }
  0x7f   : > { %2778 = vmatmul.mubr.bf16.vlgmr.msra.gmra.mrb[0].mxu1 %v1753_v5  ;;  %v9574_v55 = vcombine.low %v604_v35, %v604_v35  ;;  %v9651_v56 = vcombine.low %v603_v34, %v604_v35  ;;  %v1820_v58 = vor.u32 %v1819_v49, %v1816_v48  ;;  %v1857_v59 = vshrl.u32 %v9573_v50, 16  ;;  %526 = vst.msk [vmem:[#allocation2 + $0x80] sm:$0xf] %vm515_vm0, %v493_v8  ;;  %v11883_v31 = vld [vmem:[#allocation4 + $0x80] sm:$0xff]  }
  0x80   : > { %1455 = vmatmul.mubr.bf16.gmra.mrb[4].mxu0 %v9634_v7  ;;  %v1860_v60 = vshll.u32 %v9573_v50, 16  ;;  %v9541_v62 = vcombine.low %v554_v36, %v12732_v41  ;;  %v1804_v2 = vsel %vm1736_vm1, %v1795_v53, %v1803_v54  ;;  %v9542_v5 = vcombine.low %v12735_v46, %v12735_v46  ;;  %528 = vst.msk [vmem:[#allocation2 + $0x94] sm:$0xf] %vm515_vm0, %v495_v24  ;;  %v608_v36 = vld [vmem:[#allocation2 + $0x68] sm:$0x8] }
  0x81   : > { %1462 = vmatprep.mubr.bf16.mxu0 %v9651_v56  ;;  %v1865_v3 = vshrl.u32 %v9574_v55, 16  ;;  %v1868_v4 = vshll.u32 %v9574_v55, 16  ;;  %11164 = vmatpush3.bf16.msra.mxu0 %v11863_v29  ;;  %v1821_v61 = vsel %vm1736_vm1, %v1812_v47, %v1820_v58  ;;  %v1859_v1 = vrot.slane %v1857_v59, 3  ;;  %529 = vst.msk [vmem:[#allocation2 + $0x98] sm:$0xf] %vm515_vm0, %v496_v25  ;;  %v11904_v25 = vld [vmem:[#allocation4 + $0x168] sm:$0xff]  }
  0x82   : > { %v1862_v6 = vrot.slane %v1860_v60, 4  ;;  %v9635_v7 = vcombine.low %v12732_v41, %v12735_v46  ;;  %11165 = vmatprep.subr.bf16.mxu0 %v11876_v52  ;;  %2785 = vmatprep.mubr.bf16.mxu1 %v1821_v61  ;;  %v1840_v12 = vshrl.u32 %v9541_v62, 16  ;;  %v1843_v13 = vshll.u32 %v9541_v62, 16  ;;  %v610_v42 = vld [vmem:[#allocation2 + $0x70] sm:$0xf] }
  0x83   : > { %v1867_v10 = vrot.slane %v1865_v3, 3  ;;  %v1870_v11 = vrot.slane %v1868_v4, 4  ;;  %v1848_v15 = vshrl.u32 %v9542_v5, 16  ;;  %v1851_v16 = vshll.u32 %v9542_v5, 16  ;;  %v497_v47 = vld [vmem:[%s12702_s28 + $0x38] sm:$0xf]  ;;  %11207 = vmatprep.subr.bf16.mxu1 %v11883_v31 }
  0x84   : > { %v1863_v14 = vor.u32 %v1862_v6, %v1859_v1  ;;  %v9575_v17 = vcombine.low %v605_v57, %v606_v63  ;;  %v1842_v21 = vrot.slane %v1840_v12, 3  ;;  %v1845_v22 = vrot.slane %v1843_v13, 4  ;;  %530 = vst.msk [vmem:[#allocation2 + $0xa8] sm:$0xf] %vm515_vm0, %v497_v47  ;;  %11208 = vmatpush3.bf16.msra.mxu1 %v11883_v31  ;;  %v560_v57 = vld [vmem:[#allocation2 + $0x54] sm:$0x8] }
  0x85   : > { %v1871_v20 = vor.u32 %v1870_v11, %v1867_v10  ;;  %v9576_v23 = vcombine.low %v607_v0, %v607_v0  ;;  %11166 = vmatpush3.bf16.msra.mxu0 %v11876_v52  ;;  %v1850_v26 = vrot.slane %v1848_v15, 3  ;;  %v1853_v27 = vrot.slane %v1851_v16, 4  ;;  %v11890_v52 = vld [vmem:[#allocation4 + $0x160] sm:$0xff]   ;;  %v12773_v61 = vld [vmem:[#allocation2 + $0x5c] sm:$0xf] }
  0x86   : > { %v9652_v28 = vcombine.low %v606_v63, %v607_v0  ;;  %v1908_v29 = vshrl.u32 %v9575_v17, 16  ;;  %v1846_v33 = vor.u32 %v1845_v22, %v1842_v21  ;;  %v1911_v34 = vshll.u32 %v9575_v17, 16  ;;  %v12770_v63 = vld [vmem:[#allocation2 + $0x58] sm:$0xf]  ;;  %v498_v0 = vld [vmem:[%s12702_s28 + $0x3c] sm:$0xf]  ;;  %11167 = vmatprep.subr.bf16.mxu0 %v11890_v52 }
  0x87   : > { %2786 = vmatmul.mubr.bf16.gmra.mrb[4].mxu1 %v1804_v2  ;;  %v1872_v32 = vsel %vm1736_vm1, %v1863_v14, %v1871_v20  ;;  %v1916_v35 = vshrl.u32 %v9576_v23, 16  ;;  %v1854_v38 = vor.u32 %v1853_v27, %v1850_v26  ;;  %v1919_v39 = vshll.u32 %v9576_v23, 16  ;;  %531 = vst.msk [vmem:[#allocation2 + $0xac] sm:$0xf] %vm515_vm0, %v498_v0  ;;  %v11897_v1 = vld [vmem:[#allocation4 + $0x88] sm:$0xff]  }
  0x88   : > { %2793 = vmatprep.mubr.bf16.mxu1 %v1872_v32  ;;  %1463 = vmatmul.mubr.bf16.gmra.mrb[8].mxu0 %v9635_v7  ;;  %v1910_v40 = vrot.slane %v1908_v29, 3  ;;  %v9543_v41 = vcombine.low %v557_v18, %v12753_v19  ;;  %v1913_v43 = vrot.slane %v1911_v34, 4  ;;  %v9544_v45 = vcombine.low %v12757_v30, %v12757_v30  ;;  %v611_v13 = vld [vmem:[#allocation2 + $0x7c] sm:$0x8]  ;;  %v12778_v14 = vld [vmem:[#allocation2 + $0x80] sm:$0xf] }
  0x89   : > { %1470 = vmatprep.mubr.bf16.mxu0 %v9652_v28  ;;  %v1918_v44 = vrot.slane %v1916_v35, 3  ;;  %v9636_v46 = vcombine.low %v12753_v19, %v12757_v30  ;;  %v1855_v48 = vsel %vm1736_vm1, %v1846_v33, %v1854_v38  ;;  %v1921_v49 = vrot.slane %v1919_v39, 4  ;;  %11168 = vmatpush3.bf16.msra.mxu0 %v11890_v52  ;;  %v613_v19 = vld [vmem:[#allocation2 + $0x84] sm:$0xf]  ;;  %v563_v24 = vld [vmem:[#allocation2 + $0x68] sm:$0x8] }
  0x8a   : > { %v1891_v50 = vshrl.u32 %v9543_v41, 16  ;;  %v1894_v51 = vshll.u32 %v9543_v41, 16  ;;  %v1914_v53 = vor.u32 %v1913_v43, %v1910_v40  ;;  %v1899_v54 = vshrl.u32 %v9544_v45, 16  ;;  %11209 = vmatprep.subr.bf16.mxu1 %v11897_v1  ;;  %v499_v30 = vld [vmem:[%s12702_s28 + $0x40] sm:$0xf]  ;;  %11169 = vmatprep.subr.bf16.mxu0 %v11904_v25 }
  0x8b   : > { %v1902_v55 = vshll.u32 %v9544_v45, 16  ;;  %v9577_v56 = vcombine.low %v608_v36, %v609_v37  ;;  %v1922_v58 = vor.u32 %v1921_v49, %v1918_v44  ;;  %v9578_v62 = vcombine.low %v610_v42, %v610_v42  ;;  %11210 = vmatpush3.bf16.msra.mxu1 %v11897_v1  ;;  %v12786_v35 = vld [vmem:[#allocation2 + $0x6c] sm:$0xf]  ;;  %v500_v36 = vld [vmem:[%s12702_s28 + $0x44] sm:$0xf] }
  0x8c   : > { %v1893_v59 = vrot.slane %v1891_v50, 3  ;;  %v1896_v60 = vrot.slane %v1894_v51, 4  ;;  %v1901_v2 = vrot.slane %v1899_v54, 3  ;;  %v9653_v4 = vcombine.low %v609_v37, %v610_v42  ;;  %532 = vst.msk [vmem:[#allocation2 + $0xbc] sm:$0xf] %vm515_vm0, %v499_v30  ;;  %v11911_v42 = vld [vmem:[#allocation4 + $0x90] sm:$0xff]  }
  0x8d   : > { %v1904_v3 = vrot.slane %v1902_v55, 4  ;;  %v1959_v5 = vshrl.u32 %v9577_v56, 16  ;;  %v1923_v6 = vsel %vm1736_vm1, %v1914_v53, %v1922_v58  ;;  %v1962_v7 = vshll.u32 %v9577_v56, 16  ;;  %v12791_v41 = vld [vmem:[#allocation2 + $0x70] sm:$0xf]  ;;  %11170 = vmatpush3.bf16.msra.mxu0 %v11904_v25  ;;  %11211 = vmatprep.subr.bf16.mxu1 %v11911_v42 }
  0x8e   : > { %v1967_v8 = vshrl.u32 %v9578_v62, 16  ;;  %v1897_v9 = vor.u32 %v1896_v60, %v1893_v59  ;;  %v1970_v10 = vshll.u32 %v9578_v62, 16  ;;  %v9545_v12 = vcombine.low %v560_v57, %v12770_v63  ;;  %533 = vst.msk [vmem:[#allocation2 + $0xc0] sm:$0xf] %vm515_vm0, %v500_v36  ;;  %v614_v47 = vld [vmem:[#allocation2 + $0x90] sm:$0x8] }
  0x8f   : > { %2794 = vmatmul.mubr.bf16.gmra.mrb[8].mxu1 %v1855_v48  ;;  %v1961_v11 = vrot.slane %v1959_v5, 3  ;;  %v1905_v15 = vor.u32 %v1904_v3, %v1901_v2  ;;  %v1964_v16 = vrot.slane %v1962_v7, 4  ;;  %v9546_v18 = vcombine.low %v12773_v61, %v12773_v61  ;;  %v12796_v48 = vld [vmem:[#allocation2 + $0x94] sm:$0xf]  ;;  %v12799_v53 = vld [vmem:[#allocation2 + $0x98] sm:$0xf] }
  0x90   : > { %2801 = vmatprep.mubr.bf16.mxu1 %v1923_v6  ;;  %1471 = vmatmul.mubr.bf16.gmra.mrb[12].mxu0 %v9636_v46  ;;  %v1969_v17 = vrot.slane %v1967_v8, 3  ;;  %v1972_v20 = vrot.slane %v1970_v10, 4  ;;  %v9637_v21 = vcombine.low %v12770_v63, %v12773_v61  ;;  %v1942_v22 = vshrl.u32 %v9545_v12, 16  ;;  %v501_v58 = vld [vmem:[%s12702_s28 + $0x48] sm:$0xf]  ;;  %v11918_v2 = vld [vmem:[#allocation4 + $0x170] sm:$0xff]  }
  0x91   : > { %1478 = vmatprep.mubr.bf16.mxu0 %v9653_v4  ;;  %v1945_v23 = vshll.u32 %v9545_v12, 16  ;;  %v1965_v26 = vor.u32 %v1964_v16, %v1961_v11  ;;  %v1950_v27 = vshrl.u32 %v9546_v18, 16  ;;  %v1953_v28 = vshll.u32 %v9546_v18, 16  ;;  %v502_v0 = vld [vmem:[%s12702_s28 + $0x4c] sm:$0xf]  ;;  %11212 = vmatpush3.bf16.msra.mxu1 %v11911_v42 }
  0x92   : > { %v9579_v29 = vcombine.low %v611_v13, %v12778_v14  ;;  %v1973_v31 = vor.u32 %v1972_v20, %v1969_v17  ;;  %v1944_v32 = vrot.slane %v1942_v22, 3  ;;  %v9580_v34 = vcombine.low %v613_v19, %v613_v19  ;;  %534 = vst.msk [vmem:[#allocation2 + $0xd0] sm:$0xf] %vm515_vm0, %v501_v58  ;;  %v566_v1 = vld [vmem:[#allocation2 + $0x7c] sm:$0x8]  ;;  %11171 = vmatprep.subr.bf16.mxu0 %v11918_v2  ;;  %v11925_v17 = vld [vmem:[#allocation4 + $0x98] sm:$0xff]  }
  0x93   : > { %v1947_v33 = vrot.slane %v1945_v23, 4  ;;  %v1906_v37 = vsel %vm1736_vm1, %v1897_v9, %v1905_v15  ;;  %v1952_v38 = vrot.slane %v1950_v27, 3  ;;  %v1955_v39 = vrot.slane %v1953_v28, 4  ;;  %535 = vst.msk [vmem:[#allocation2 + $0xd4] sm:$0xf] %vm515_vm0, %v502_v0  ;;  %11172 = vmatpush3.bf16.msra.mxu0 %v11918_v2  ;;  %11213 = vmatprep.subr.bf16.mxu1 %v11925_v17 }
  0x94   : > { %v2010_v40 = vshrl.u32 %v9579_v29, 16  ;;  %v1974_v43 = vsel %vm1736_vm1, %v1965_v26, %v1973_v31  ;;  %v9654_v44 = vcombine.low %v12778_v14, %v613_v19  ;;  %v2013_v45 = vshll.u32 %v9579_v29, 16  ;;  %v12812_v10 = vld [vmem:[#allocation2 + $0x80] sm:$0xf]  ;;  %v12814_v11 = vld [vmem:[#allocation2 + $0x84] sm:$0xf] }
  0x95   : > { %v2018_v46 = vshrl.u32 %v9580_v34, 16  ;;  %v1948_v49 = vor.u32 %v1947_v33, %v1944_v32  ;;  %v2021_v50 = vshll.u32 %v9580_v34, 16  ;;  %v9547_v52 = vcombine.low %v563_v24, %v12786_v35  ;;  %v617_v16 = vld [vmem:[#allocation2 + $0xa4] sm:$0x8]  ;;  %v12820_v22 = vld [vmem:[#allocation2 + $0xa8] sm:$0xf]  ;;  %11214 = vmatpush3.bf16.msra.mxu1 %v11925_v17 }
  0x96   : > { %v2012_v51 = vrot.slane %v2010_v40, 3  ;;  %v1956_v54 = vor.u32 %v1955_v39, %v1952_v38  ;;  %v2015_v55 = vrot.slane %v2013_v45, 4  ;;  %v9548_v57 = vcombine.low %v12791_v41, %v12791_v41  ;;  %v503_v27 = vld [vmem:[%s12702_s28 + $0x50] sm:$0xf]  ;;  %v12826_v32 = vld [vmem:[#allocation2 + $0xac] sm:$0xf] }
  0x97   : > { %2802 = vmatmul.mubr.bf16.gmra.mrb[12].mxu1 %v1906_v37  ;;  %v2020_v56 = vrot.slane %v2018_v46, 3  ;;  %v2023_v59 = vrot.slane %v2021_v50, 4  ;;  %v9638_v60 = vcombine.low %v12786_v35, %v12791_v41  ;;  %v1993_v62 = vshrl.u32 %v9547_v52, 16  ;;  %v504_v33 = vld [vmem:[%s12702_s28 + $0x54] sm:$0xf]  ;;  %v11932_v38 = vld [vmem:[#allocation4 + $0x178] sm:$0xff]  }
  0x98   : > { %2809 = vmatprep.mubr.bf16.mxu1 %v1974_v43  ;;  %1479 = vmatmul.mubr.bf16.gmra.mrb[16].mxu0 %v9637_v21  ;;  %v1996_v63 = vshll.u32 %v9547_v52, 16  ;;  %v2016_v3 = vor.u32 %v2015_v55, %v2012_v51  ;;  %v2001_v4 = vshrl.u32 %v9548_v57, 16  ;;  %v2004_v5 = vshll.u32 %v9548_v57, 16  ;;  %536 = vst.msk [vmem:[#allocation2 + $0xe4] sm:$0xf] %vm515_vm0, %v503_v27  ;;  %v11933_v55 = vld [vmem:[#allocation4 + $0xa0] sm:$0xff]  }
  0x99   : > { %1486 = vmatprep.mubr.bf16.mxu0 %v9654_v44  ;;  %v9581_v61 = vcombine.low %v614_v47, %v12796_v48  ;;  %v2024_v6 = vor.u32 %v2023_v59, %v2020_v56  ;;  %v1995_v7 = vrot.slane %v1993_v62, 3  ;;  %v9582_v9 = vcombine.low %v12799_v53, %v12799_v53  ;;  %537 = vst.msk [vmem:[#allocation2 + $0xe8] sm:$0xf] %vm515_vm0, %v504_v33  ;;  %v569_v43 = vld [vmem:[#allocation2 + $0x90] sm:$0x8]  ;;  %v11941_v27 = vld [vmem:[#allocation4 + $0xb0] sm:$0xff]  }
  0x9a   : > { %v1998_v8 = vrot.slane %v1996_v63, 4  ;;  %v1957_v12 = vsel %vm1736_vm1, %v1948_v49, %v1956_v54  ;;  %v2003_v13 = vrot.slane %v2001_v4, 3  ;;  %v2006_v14 = vrot.slane %v2004_v5, 4  ;;  %v12838_v49 = vld [vmem:[#allocation2 + $0x98] sm:$0xf]  ;;  %11173 = vmatprep.subr.bf16.mxu0 %v11932_v38  ;;  %11215 = vmatprep.subr.bf16.mxu1 %v11933_v55 }
  0x9b   : > { %v2061_v15 = vshrl.u32 %v9581_v61, 16  ;;  %v2025_v18 = vsel %vm1736_vm1, %v2016_v3, %v2024_v6  ;;  %v9655_v19 = vcombine.low %v12796_v48, %v12799_v53  ;;  %v2064_v20 = vshll.u32 %v9581_v61, 16  ;;  %v12836_v48 = vld [vmem:[#allocation2 + $0x94] sm:$0xf]  ;;  %v620_v54 = vld [vmem:[#allocation2 + $0xb8] sm:$0x8]  ;;  %11174 = vmatpush3.bf16.msra.mxu0 %v11932_v38  ;;  %11216 = vmatpush3.bf16.msra.mxu1 %v11933_v55 }
  0x9c   : > { %v2069_v21 = vshrl.u32 %v9582_v9, 16  ;;  %v1999_v23 = vor.u32 %v1998_v8, %v1995_v7  ;;  %v2072_v24 = vshll.u32 %v9582_v9, 16  ;;  %v9549_v26 = vcombine.low %v566_v1, %v12812_v10  ;;  %v12846_v3 = vld [vmem:[#allocation2 + $0xbc] sm:$0xf]  ;;  %v12852_v7 = vld [vmem:[#allocation2 + $0xc0] sm:$0xf] }
  0x9d   : > { %v2063_v25 = vrot.slane %v2061_v15, 3  ;;  %v2007_v28 = vor.u32 %v2006_v14, %v2003_v13  ;;  %v2066_v29 = vrot.slane %v2064_v20, 4  ;;  %v9550_v31 = vcombine.low %v12814_v11, %v12814_v11  ;;  %v506_v4 = vld [vmem:[%s12702_s28 + $0x5c] sm:$0xf]  ;;  %v12858_v17 = vld [vmem:[#allocation2 + $0xa8] sm:$0xf] }
  0x9e   : > { %v2071_v30 = vrot.slane %v2069_v21, 3  ;;  %v2074_v34 = vrot.slane %v2072_v24, 4  ;;  %v9639_v35 = vcombine.low %v12812_v10, %v12814_v11  ;;  %v2044_v36 = vshrl.u32 %v9549_v26, 16  ;;  %539 = vst.msk [vmem:[#allocation2 + $0xfc] sm:$0xf] %vm515_vm0, %v506_v4  ;;  %v11934_v11 = vld [vmem:[#allocation4 + $0xa8] sm:$0xff]  }
  0x9f   : > { %2810 = vmatmul.mubr.bf16.gmra.mrb[16].mxu1 %v1957_v12  ;;  %v2047_v37 = vshll.u32 %v9549_v26, 16  ;;  %v2067_v39 = vor.u32 %v2066_v29, %v2063_v25  ;;  %v2052_v40 = vshrl.u32 %v9550_v31, 16  ;;  %v2055_v41 = vshll.u32 %v9550_v31, 16  ;;  %v12862_v21 = vld [vmem:[#allocation2 + $0xac] sm:$0xf]  ;;  %11217 = vmatprep.subr.bf16.mxu1 %v11934_v11 }
  0xa0   : > { %2817 = vmatprep.mubr.bf16.mxu1 %v2025_v18  ;;  %1487 = vmatmul.mubr.bf16.gmra.mrb[20].mxu0 %v9638_v60  ;;  %v9583_v42 = vcombine.low %v617_v16, %v12820_v22  ;;  %v2075_v44 = vor.u32 %v2074_v34, %v2071_v30  ;;  %v2046_v45 = vrot.slane %v2044_v36, 3  ;;  %v9584_v47 = vcombine.low %v12826_v32, %v12826_v32  ;;  %v505_v60 = vld [vmem:[%s12702_s28 + $0x58] sm:$0xf]  ;;  %v572_v16 = vld [vmem:[#allocation2 + $0xa4] sm:$0x8] }
  0xa1   : > { %1494 = vmatprep.mubr.bf16.mxu0 %v9655_v19  ;;  %v2049_v46 = vrot.slane %v2047_v37, 4  ;;  %v2008_v50 = vsel %vm1736_vm1, %v1999_v23, %v2007_v28  ;;  %v2054_v51 = vrot.slane %v2052_v40, 3  ;;  %v2057_v52 = vrot.slane %v2055_v41, 4  ;;  %538 = vst.msk [vmem:[#allocation2 + $0xf8] sm:$0xf] %vm515_vm0, %v505_v60  ;;  %11218 = vmatpush3.bf16.msra.mxu1 %v11934_v11 }
  0xa2   : > { %v2112_v53 = vshrl.u32 %v9583_v42, 16  ;;  %v2076_v56 = vsel %vm1736_vm1, %v2067_v39, %v2075_v44  ;;  %v9656_v57 = vcombine.low %v12820_v22, %v12826_v32  ;;  %v2115_v58 = vshll.u32 %v9583_v42, 16  ;;  %v507_v26 = vld [vmem:[%s12702_s28 + $0x60] sm:$0xf]  ;;  %v508_v32 = vld [vmem:[%s12702_s28 + $0x64] sm:$0xf]  ;;  %11219 = vmatprep.subr.bf16.mxu1 %v11941_v27 }
  0xa3   : > { %v2120_v59 = vshrl.u32 %v9584_v47, 16  ;;  %v2050_v62 = vor.u32 %v2049_v46, %v2046_v45  ;;  %v2123_v63 = vshll.u32 %v9584_v47, 16  ;;  %v9551_v2 = vcombine.low %v569_v43, %v12836_v48  ;;  %540 = vst.msk [vmem:[#allocation2 + $0x10c] sm:$0xf] %vm515_vm0, %v507_v26  ;;  %v623_v37 = vld [vmem:[#allocation2 + $0xcc] sm:$0x8] }
  0xa4   : > { %v2114_v0 = vrot.slane %v2112_v53, 3  ;;  %v2058_v5 = vor.u32 %v2057_v52, %v2054_v51  ;;  %v2117_v61 = vrot.slane %v2115_v58, 4  ;;  %v9552_v6 = vcombine.low %v12838_v49, %v12838_v49  ;;  %v12875_v38 = vld [vmem:[#allocation2 + $0xd0] sm:$0xf]  ;;  %541 = vst.msk [vmem:[#allocation2 + $0x110] sm:$0xf] %vm515_vm0, %v508_v32 }
  0xa5   : > { %v2122_v1 = vrot.slane %v2120_v59, 3  ;;  %v2125_v8 = vrot.slane %v2123_v63, 4  ;;  %v2095_v9 = vshrl.u32 %v9551_v2, 16  ;;  %v2098_v10 = vshll.u32 %v9551_v2, 16  ;;  %v12881_v43 = vld [vmem:[#allocation2 + $0xd4] sm:$0xf]  ;;  %11220 = vmatpush3.bf16.msra.mxu1 %v11941_v27 }
  0xa6   : > { %v9640_v12 = vcombine.low %v12836_v48, %v12838_v49  ;;  %v2103_v13 = vshrl.u32 %v9552_v6, 16  ;;  %v2106_v14 = vshll.u32 %v9552_v6, 16  ;;  %v9585_v15 = vcombine.low %v620_v54, %v12846_v3  ;;  %v575_v48 = vld [vmem:[#allocation2 + $0xb8] sm:$0x8]  ;;  %v11942_v49 = vld [vmem:[#allocation4 + $0xb8] sm:$0xff]  }
  0xa7   : > { %2818 = vmatmul.mubr.bf16.gmra.mrb[20].mxu1 %v2008_v50  ;;  %v2118_v18 = vor.u32 %v2117_v61, %v2114_v0  ;;  %v2126_v19 = vor.u32 %v2125_v8, %v2122_v1  ;;  %v9586_v20 = vcombine.low %v12852_v7, %v12852_v7  ;;  %v2059_v22 = vsel %vm1736_vm1, %v2050_v62, %v2058_v5  ;;  %v509_v58 = vld [vmem:[%s12702_s28 + $0x68] sm:$0xf]  ;;  %v510_v59 = vld [vmem:[%s12702_s28 + $0x6c] sm:$0xf]  ;;  %v12894_v63 = vld [vmem:[#allocation2 + $0xc0] sm:$0xf] }
  0xa8   : > { %2825 = vmatprep.mubr.bf16.mxu1 %v2076_v56  ;;  %1495 = vmatmul.mubr.bf16.gmra.mrb[24].mxu0 %v9639_v35  ;;  %v12865_v23 = vrot.slane %v2095_v9, 3  ;;  %v12867_v24 = vrot.slane %v2098_v10, 4  ;;  %v2163_v25 = vshrl.u32 %v9585_v15, 16  ;;  %v2105_v28 = vrot.slane %v2103_v13, 3  ;;  %542 = vst.msk [vmem:[#allocation2 + $0x120] sm:$0xf] %vm515_vm0, %v509_v58 }
  0xa9   : > { %1502 = vmatprep.mubr.bf16.mxu0 %v9656_v57  ;;  %v2108_v29 = vrot.slane %v2106_v14, 4  ;;  %v2166_v30 = vshll.u32 %v9585_v15, 16  ;;  %v2171_v31 = vshrl.u32 %v9586_v20, 16  ;;  %v9657_v33 = vcombine.low %v12846_v3, %v12852_v7  ;;  %v12888_v57 = vld [vmem:[#allocation2 + $0xbc] sm:$0xf]  ;;  %11221 = vmatprep.subr.bf16.mxu1 %v11942_v49  ;;  %v11949_v0 = vld [vmem:[#allocation4 + $0x1c0] sm:$0xff]  }
  0xaa   : > { %v2174_v34 = vshll.u32 %v9586_v20, 16  ;;  %v2165_v35 = vrot.slane %v2163_v25, 3  ;;  %v9553_v36 = vcombine.low %v572_v16, %v12858_v17  ;;  %v2127_v39 = vsel %vm1736_vm1, %v2118_v18, %v2126_v19  ;;  %543 = vst.msk [vmem:[#allocation2 + $0x124] sm:$0xf] %vm515_vm0, %v510_v59  ;;  %v626_v61 = vld [vmem:[#allocation2 + $0xe0] sm:$0x8]  ;;  %11222 = vmatpush3.bf16.msra.mxu1 %v11942_v49  ;;  %10615 = vmatprep.subr.bf16.mxu0 %v11949_v0 }
  0xab   : > { %v2168_v40 = vrot.slane %v2166_v30, 4  ;;  %v2173_v41 = vrot.slane %v2171_v31, 3  ;;  %v9554_v42 = vcombine.low %v12862_v21, %v12862_v21  ;;  %v2101_v44 = vor.u32 %v12867_v24, %v12865_v23  ;;  %v12899_v9 = vld [vmem:[#allocation2 + $0xe4] sm:$0xf]  ;;  %v12907_v14 = vld [vmem:[#allocation2 + $0xe8] sm:$0xf] }
  0xac   : > { %v2176_v45 = vrot.slane %v2174_v34, 4  ;;  %v2146_v46 = vshrl.u32 %v9553_v36, 16  ;;  %v2149_v47 = vshll.u32 %v9553_v36, 16  ;;  %v2109_v50 = vor.u32 %v2108_v29, %v2105_v28  ;;  %v511_v23 = vld [vmem:[%s12702_s28 + $0x70] sm:$0xf] }
  0xad   : > { %v2154_v51 = vshrl.u32 %v9554_v42, 16  ;;  %v2157_v52 = vshll.u32 %v9554_v42, 16  ;;  %v9587_v53 = vcombine.low %v623_v37, %v12875_v38  ;;  %v2169_v54 = vor.u32 %v2168_v40, %v2165_v35  ;;  %v512_v24 = vld [vmem:[%s12702_s28 + $0x74] sm:$0xf]  ;;  %v578_v29 = vld [vmem:[#allocation2 + $0xcc] sm:$0x8] }
  0xae   : > { %v2177_v55 = vor.u32 %v2176_v45, %v2173_v41  ;;  %v9588_v56 = vcombine.low %v12881_v43, %v12881_v43  ;;  %v9641_v60 = vcombine.low %v12858_v17, %v12862_v21  ;;  %v2148_v2 = vrot.slane %v2146_v46, 3  ;;  %v12914_v30 = vld [vmem:[#allocation2 + $0xd0] sm:$0xf]  ;;  %544 = vst.msk [vmem:[#allocation2 + $0x134] sm:$0xf] %vm515_vm0, %v511_v23 }
  0xaf   : > { %2826 = vmatmul.mubr.bf16.gmra.mrb[24].mxu1 %v2059_v22  ;;  %v2214_v62 = vshrl.u32 %v9587_v53, 16  ;;  %v2151_v3 = vrot.slane %v2149_v47, 4  ;;  %v2217_v4 = vshll.u32 %v9587_v53, 16  ;;  %v2156_v1 = vrot.slane %v2154_v51, 3  ;;  %545 = vst.msk [vmem:[#allocation2 + $0x138] sm:$0xf] %vm515_vm0, %v512_v24 }
  0xb0   : > { %2833 = vmatprep.mubr.bf16.mxu1 %v2127_v39  ;;  %1503 = vmatmul.mubr.bf16.gmra.mrb[28].mxu0 %v9640_v12  ;;  %v2222_v5 = vshrl.u32 %v9588_v56, 16  ;;  %v2159_v6 = vrot.slane %v2157_v52, 4  ;;  %v2225_v7 = vshll.u32 %v9588_v56, 16  ;;  %v9555_v8 = vcombine.low %v575_v48, %v12888_v57  ;;  %v629_v34 = vld [vmem:[#allocation2 + $0xf4] sm:$0x8] }
  0xb1   : > { %1510 = vmatprep.mubr.bf16.mxu0 %v9657_v33  ;;  %v2110_v10 = vsel %vm1736_vm1, %v2101_v44, %v2109_v50  ;;  %v2178_v11 = vsel %vm1736_vm1, %v2169_v54, %v2177_v55  ;;  %v9658_v12 = vcombine.low %v12875_v38, %v12881_v43  ;;  %v9556_v13 = vcombine.low %v12894_v63, %v12894_v63  ;;  %v12920_v33 = vld [vmem:[#allocation2 + $0xd4] sm:$0xf]  ;;  %v12922_v39 = vld [vmem:[#allocation2 + $0xf8] sm:$0xf]  ;;  %v12924_v40 = vld [vmem:[#allocation2 + $0xfc] sm:$0xf] }
  0xb2   : > { %v2216_v15 = vrot.slane %v2214_v62, 3  ;;  %v2219_v16 = vrot.slane %v2217_v4, 4  ;;  %v2224_v17 = vrot.slane %v2222_v5, 3  ;;  %v2227_v18 = vrot.slane %v2225_v7, 4  ;;  %v581_v53 = vld [vmem:[#allocation2 + $0xe0] sm:$0x8] }
  0xb3   : > { %v2152_v19 = vor.u32 %v2151_v3, %v2148_v2  ;;  %v2197_v20 = vshrl.u32 %v9555_v8, 16  ;;  %v2200_v21 = vshll.u32 %v9555_v8, 16  ;;  %v9589_v22 = vcombine.low %v626_v61, %v12899_v9  ;;  %v12938_v3 = vld [vmem:[#allocation2 + $0xe8] sm:$0xf]  ;;  %v513_v4 = vld [vmem:[%s12702_s28 + $0x78] sm:$0xf] }
  0xb4   : > { %v2160_v25 = vor.u32 %v2159_v6, %v2156_v1  ;;  %v2205_v26 = vshrl.u32 %v9556_v13, 16  ;;  %v2208_v27 = vshll.u32 %v9556_v13, 16  ;;  %v9590_v28 = vcombine.low %v12907_v14, %v12907_v14  ;;  %v632_v7 = vld [vmem:[#allocation2 + $0x108] sm:$0x8]  ;;  %v514_v8 = vld [vmem:[%s12702_s28 + $0x7c] sm:$0xf] }
  0xb5   : > { %v9642_v31 = vcombine.low %v12888_v57, %v12894_v63  ;;  %v2265_v32 = vshrl.u32 %v9589_v22, 16  ;;  %v2220_v35 = vor.u32 %v2219_v16, %v2216_v15  ;;  %v2228_v36 = vor.u32 %v2227_v18, %v2224_v17  ;;  %v12936_v63 = vld [vmem:[#allocation2 + $0xe4] sm:$0xf]  ;;  %546 = vst.msk [vmem:[#allocation2 + $0x148] sm:$0xf] %vm515_vm0, %v513_v4 }
  0xb6   : > { %v2268_v37 = vshll.u32 %v9589_v22, 16  ;;  %v2273_v38 = vshrl.u32 %v9590_v28, 16  ;;  %v2199_v41 = vrot.slane %v2197_v20, 3  ;;  %v2202_v42 = vrot.slane %v2200_v21, 4  ;;  %v12944_v13 = vld [vmem:[#allocation2 + $0x10c] sm:$0xf] }
  0xb7   : > { %2834 = vmatmul.mubr.bf16.gmra.mrb[28].mxu1 %v2110_v10  ;;  %v2276_v43 = vshll.u32 %v9590_v28, 16  ;;  %v9557_v44 = vcombine.low %v578_v29, %v12914_v30  ;;  %v2161_v45 = vsel %vm1736_vm1, %v2152_v19, %v2160_v25  ;;  %v2207_v46 = vrot.slane %v2205_v26, 3  ;;  %547 = vst.msk [vmem:[#allocation2 + $0x14c] sm:$0xf] %vm515_vm0, %v514_v8  ;;  %v638_v4 = vld [vmem:[#allocation2 + $0x130] sm:$0x8] }
  0xb8   : > { %2841 = vmatprep.mubr.bf16.mxu1 %v2178_v11  ;;  %1511 = vmatmul.mubr.bf16.gmra.mrb[32].mxu0 %v9641_v60  ;;  %v2210_v47 = vrot.slane %v2208_v27, 4  ;;  %v9558_v48 = vcombine.low %v12920_v33, %v12920_v33  ;;  %v9659_v49 = vcombine.low %v12899_v9, %v12907_v14  ;;  %v2267_v50 = vrot.slane %v2265_v32, 3  ;;  %v12946_v14 = vld [vmem:[#allocation2 + $0x110] sm:$0xf]  ;;  %v12986_v8 = vld [vmem:[#allocation2 + $0x138] sm:$0xf] }
  0xb9   : > { %1518 = vmatprep.mubr.bf16.mxu0 %v9658_v12  ;;  %v2270_v51 = vrot.slane %v2268_v37, 4  ;;  %v2275_v52 = vrot.slane %v2273_v38, 3  ;;  %v2229_v54 = vsel %vm1736_vm1, %v2220_v35, %v2228_v36  ;;  %v2278_v55 = vrot.slane %v2276_v43, 4  ;;  %v584_v35 = vld [vmem:[#allocation2 + $0xf4] sm:$0x8] }
  0xba   : > { %v2248_v56 = vshrl.u32 %v9557_v44, 16  ;;  %v9591_v57 = vcombine.low %v629_v34, %v12922_v39  ;;  %v2251_v58 = vshll.u32 %v9557_v44, 16  ;;  %v2256_v59 = vshrl.u32 %v9558_v48, 16  ;;  %v635_v38 = vld [vmem:[#allocation2 + $0x11c] sm:$0x8] }
  0xbb   : > { %v2259_v60 = vshll.u32 %v9558_v48, 16  ;;  %v9592_v62 = vcombine.low %v12924_v40, %v12924_v40  ;;  %v2203_v0 = vor.u32 %v2202_v42, %v2199_v41  ;;  %v2211_v5 = vor.u32 %v2210_v47, %v2207_v46  ;;  %v12966_v46 = vld [vmem:[#allocation2 + $0x124] sm:$0xf] }
  0xbc   : > { %v2316_v2 = vshrl.u32 %v9591_v57, 16  ;;  %v2271_v61 = vor.u32 %v2270_v51, %v2267_v50  ;;  %v2319_v1 = vshll.u32 %v9591_v57, 16  ;;  %v2279_v9 = vor.u32 %v2278_v55, %v2275_v52 }
  0xbd   : > { %v2324_v6 = vshrl.u32 %v9592_v62, 16  ;;  %v2250_v10 = vrot.slane %v2248_v56, 3  ;;  %v2327_v11 = vshll.u32 %v9592_v62, 16  ;;  %v9559_v12 = vcombine.low %v581_v53, %v12936_v63  ;;  %v12982_v62 = vld [vmem:[#allocation2 + $0x110] sm:$0xf] }
  0xbe   : > { %v2253_v15 = vrot.slane %v2251_v58, 4  ;;  %v2258_v16 = vrot.slane %v2256_v59, 3  ;;  %v2261_v17 = vrot.slane %v2259_v60, 4  ;;  %v9560_v18 = vcombine.low %v12938_v3, %v12938_v3  ;;  %v587_v59 = vld [vmem:[#allocation2 + $0x108] sm:$0x8] }
  0xbf   : > { %2842 = vmatmul.mubr.bf16.gmra.mrb[32].mxu1 %v2161_v45  ;;  %v2318_v19 = vrot.slane %v2316_v2, 3  ;;  %v2321_v20 = vrot.slane %v2319_v1, 4  ;;  %v2326_v21 = vrot.slane %v2324_v6, 3  ;;  %v2329_v22 = vrot.slane %v2327_v11, 4  ;;  %v12964_v45 = vld [vmem:[#allocation2 + $0x120] sm:$0xf] }
  0xc0   : > { %2849 = vmatprep.mubr.bf16.mxu1 %v2229_v54  ;;  %1519 = vmatmul.mubr.bf16.gmra.mrb[36].mxu0 %v9642_v31  ;;  %v9643_v23 = vcombine.low %v12914_v30, %v12920_v33  ;;  %v2299_v24 = vshrl.u32 %v9559_v12, 16  ;;  %v2302_v25 = vshll.u32 %v9559_v12, 16  ;;  %v2212_v26 = vsel %vm1736_vm1, %v2203_v0, %v2211_v5  ;;  %v12960_v30 = vld [vmem:[#allocation2 + $0xf8] sm:$0xf]  ;;  %v12962_v33 = vld [vmem:[#allocation2 + $0xfc] sm:$0xf] }
  0xc1   : > { %1526 = vmatprep.mubr.bf16.mxu0 %v9659_v49  ;;  %v2307_v27 = vshrl.u32 %v9560_v18, 16  ;;  %v2310_v28 = vshll.u32 %v9560_v18, 16  ;;  %v9593_v29 = vcombine.low %v632_v7, %v12944_v13  ;;  %v2280_v31 = vsel %vm1736_vm1, %v2271_v61, %v2279_v9  ;;  %v12980_v60 = vld [vmem:[#allocation2 + $0x10c] sm:$0xf]  ;;  %v12984_v5 = vld [vmem:[#allocation2 + $0x134] sm:$0xf] }
  0xc2   : > { %v9660_v32 = vcombine.low %v12922_v39, %v12924_v40  ;;  %v9594_v34 = vcombine.low %v12946_v14, %v12946_v14  ;;  %v2254_v36 = vor.u32 %v2253_v15, %v2250_v10  ;;  %v2262_v37 = vor.u32 %v2261_v17, %v2258_v16 }
  0xc3   : > { %v2322_v41 = vor.u32 %v2321_v20, %v2318_v19  ;;  %v2330_v42 = vor.u32 %v2329_v22, %v2326_v21  ;;  %v2301_v43 = vrot.slane %v2299_v24, 3  ;;  %v2304_v44 = vrot.slane %v2302_v25, 4  ;;  %v12994_v19 = vld [vmem:[#allocation4 + $0x200] sm:$0xff]  }
  0xc4   : > { %v2309_v39 = vrot.slane %v2307_v27, 3  ;;  %v2312_v40 = vrot.slane %v2310_v28, 4  ;;  %v2367_v47 = vshrl.u32 %v9593_v29, 16  ;;  %v2370_v48 = vshll.u32 %v9593_v29, 16  ;;  %v590_v28 = vld [vmem:[#allocation2 + $0x11c] sm:$0x8]  ;;  %11255 = vmatprep.subr.bf16.mxu1 %v12994_v19 }
  0xc5   : > { %v2375_v49 = vshrl.u32 %v9594_v34, 16  ;;  %v2378_v50 = vshll.u32 %v9594_v34, 16  ;;  %v9561_v51 = vcombine.low %v584_v35, %v12960_v30  ;;  %v9644_v52 = vcombine.low %v12936_v63, %v12938_v3  ;;  %v13000_v35 = vld [vmem:[#allocation2 + $0x120] sm:$0xf] }
  0xc6   : > { %v9562_v53 = vcombine.low %v12962_v33, %v12962_v33  ;;  %v9595_v54 = vcombine.low %v635_v38, %v12964_v45  ;;  %v2263_v55 = vsel %vm1736_vm1, %v2254_v36, %v2262_v37  ;;  %v2331_v56 = vsel %vm1736_vm1, %v2322_v41, %v2330_v42  ;;  %v13002_v38 = vld [vmem:[#allocation2 + $0x124] sm:$0xf] }
  0xc7   : > { %2850 = vmatmul.mubr.bf16.gmra.mrb[36].mxu1 %v2212_v26  ;;  %v9661_v57 = vcombine.low %v12944_v13, %v12946_v14  ;;  %v9596_v58 = vcombine.low %v12966_v46, %v12966_v46  ;;  %v2305_v63 = vor.u32 %v2304_v44, %v2301_v43  ;;  %v2313_v0 = vor.u32 %v2312_v40, %v2309_v39 }
  0xc8   : > { %2857 = vmatprep.mubr.bf16.mxu1 %v2280_v31  ;;  %1527 = vmatmul.mubr.bf16.gmra.mrb[40].mxu0 %v9643_v23  ;;  %v2369_v2 = vrot.slane %v2367_v47, 3  ;;  %v2372_v3 = vrot.slane %v2370_v48, 4  ;;  %v2377_v61 = vrot.slane %v2375_v49, 3  ;;  %v2380_v1 = vrot.slane %v2378_v50, 4  ;;  %v641_v48 = vld [vmem:[#allocation2 + $0x144] sm:$0x8] }
  0xc9   : > { %1534 = vmatprep.mubr.bf16.mxu0 %v9660_v32  ;;  %v2350_v6 = vshrl.u32 %v9561_v51, 16  ;;  %v2353_v7 = vshll.u32 %v9561_v51, 16  ;;  %v2358_v9 = vshrl.u32 %v9562_v53, 16  ;;  %v2361_v10 = vshll.u32 %v9562_v53, 16  ;;  %v593_v53 = vld [vmem:[#allocation2 + $0x130] sm:$0x8] }
  0xca   : > { %v2418_v11 = vshrl.u32 %v9595_v54, 16  ;;  %v2421_v12 = vshll.u32 %v9595_v54, 16  ;;  %v9645_v13 = vcombine.low %v12960_v30, %v12962_v33  ;;  %v2426_v14 = vshrl.u32 %v9596_v58, 16  ;;  %v13010_v54 = vld [vmem:[#allocation2 + $0x134] sm:$0xf] }
  0xcb   : > { %v2429_v15 = vshll.u32 %v9596_v58, 16  ;;  %v2314_v16 = vsel %vm1736_vm1, %v2305_v63, %v2313_v0  ;;  %v9563_v17 = vcombine.low %v587_v59, %v12980_v60  ;;  %v9564_v18 = vcombine.low %v12982_v62, %v12982_v62 }
  0xcc   : > { %v2373_v20 = vor.u32 %v2372_v3, %v2369_v2  ;;  %v2381_v21 = vor.u32 %v2380_v1, %v2377_v61  ;;  %v2352_v22 = vrot.slane %v2350_v6, 3  ;;  %v9597_v23 = vcombine.low %v638_v4, %v12984_v5  ;;  %v13016_v2 = vld [vmem:[#allocation2 + $0x138] sm:$0xf] }
  0xcd   : > { %v2355_v24 = vrot.slane %v2353_v7, 4  ;;  %v2360_v25 = vrot.slane %v2358_v9, 3  ;;  %v2363_v26 = vrot.slane %v2361_v10, 4  ;;  %v9598_v27 = vcombine.low %v12986_v8, %v12986_v8 }
  0xce   : > { %v2420_v29 = vrot.slane %v2418_v11, 3  ;;  %v2423_v31 = vrot.slane %v2421_v12, 4  ;;  %v2428_v32 = vrot.slane %v2426_v14, 3  ;;  %v2431_v34 = vrot.slane %v2429_v15, 4 }
  0xcf   : > { %2858 = vmatmul.mubr.bf16.gmra.mrb[40].mxu1 %v2263_v55  ;;  %v2401_v36 = vshrl.u32 %v9563_v17, 16  ;;  %v2404_v37 = vshll.u32 %v9563_v17, 16  ;;  %v2409_v30 = vshrl.u32 %v9564_v18, 16  ;;  %v2412_v33 = vshll.u32 %v9564_v18, 16 }
  0xd0   : > { %2865 = vmatprep.mubr.bf16.mxu1 %v2331_v56  ;;  %1535 = vmatmul.mubr.bf16.gmra.mrb[44].mxu0 %v9644_v52  ;;  %v2382_v41 = vsel %vm1736_vm1, %v2373_v20, %v2381_v21  ;;  %v9662_v42 = vcombine.low %v12964_v45, %v12966_v46  ;;  %v2469_v43 = vshrl.u32 %v9597_v23, 16  ;;  %v2472_v44 = vshll.u32 %v9597_v23, 16  ;;  %v13008_v52 = vld [vmem:[#allocation2 + $0x148] sm:$0xf]  ;;  %v645_v20 = vld [vmem:[#allocation2 + $0x2c] sm:$0x8] }
  0xd1   : > { %1542 = vmatprep.mubr.bf16.mxu0 %v9661_v57  ;;  %v2477_v39 = vshrl.u32 %v9598_v27, 16  ;;  %v2480_v40 = vshll.u32 %v9598_v27, 16  ;;  %v9565_v47 = vcombine.low %v590_v28, %v13000_v35  ;;  %v2356_v49 = vor.u32 %v2355_v24, %v2352_v22  ;;  %v13012_v57 = vld [vmem:[#allocation2 + $0x14c] sm:$0xf]  ;;  %v13034_v24 = vld [vmem:[#allocation2 + $0x34] sm:$0xf] }
  0xd2   : > { %v2364_v50 = vor.u32 %v2363_v26, %v2360_v25  ;;  %v2424_v51 = vor.u32 %v2423_v31, %v2420_v29  ;;  %v2432_v55 = vor.u32 %v2431_v34, %v2428_v32  ;;  %v2403_v45 = vrot.slane %v2401_v36, 3 }
  0xd3   : > { %v2406_v46 = vrot.slane %v2404_v37, 4  ;;  %v2411_v56 = vrot.slane %v2409_v30, 3  ;;  %v2414_v58 = vrot.slane %v2412_v33, 4  ;;  %v2471_v59 = vrot.slane %v2469_v43, 3  ;;  %v648_v37 = vld [vmem:[#allocation2 + $0x40] sm:$0x8] }
  0xd4   : > { %v2474_v63 = vrot.slane %v2472_v44, 4  ;;  %v9566_v0 = vcombine.low %v13002_v38, %v13002_v38  ;;  %v2479_v3 = vrot.slane %v2477_v39, 3  ;;  %v2482_v4 = vrot.slane %v2480_v40, 4  ;;  %v13039_v30 = vld [vmem:[#allocation2 + $0x44] sm:$0xf] }
  0xd5   : > { %v2452_v61 = vshrl.u32 %v9565_v47, 16  ;;  %v9599_v1 = vcombine.low %v641_v48, %v13008_v52  ;;  %v2365_v6 = vsel %vm1736_vm1, %v2356_v49, %v2364_v50  ;;  %v9646_v7 = vcombine.low %v12980_v60, %v12982_v62  ;;  %v13030_v60 = vld [vmem:[#allocation2 + $0x30] sm:$0xf]  ;;  %v13044_v44 = vld [vmem:[#allocation2 + $0x48] sm:$0xf] }
  0xd6   : > { %v2455_v9 = vshll.u32 %v9565_v47, 16  ;;  %v9600_v10 = vcombine.low %v13012_v57, %v13012_v57  ;;  %v2433_v11 = vsel %vm1736_vm1, %v2424_v51, %v2432_v55  ;;  %v2407_v12 = vor.u32 %v2406_v46, %v2403_v45 }
  0xd7   : > { %2866 = vmatmul.mubr.bf16.gmra.mrb[44].mxu1 %v2314_v16  ;;  %v9567_v14 = vcombine.low %v593_v53, %v13010_v54  ;;  %v2415_v15 = vor.u32 %v2414_v58, %v2411_v56  ;;  %v2475_v16 = vor.u32 %v2474_v63, %v2471_v59  ;;  %v2460_v17 = vshrl.u32 %v9566_v0, 16  ;;  %v651_v58 = vld [vmem:[#allocation2 + $0x54] sm:$0x8]  ;;  %v13050_v59 = vld [vmem:[#allocation2 + $0x58] sm:$0xf] }
  0xd8   : > { %2873 = vmatprep.mubr.bf16.mxu1 %v2382_v41  ;;  %1543 = vmatmul.mubr.bf16.gmra.mrb[48].mxu0 %v9645_v13  ;;  %v9663_v13 = vcombine.low %v12984_v5, %v12986_v8  ;;  %v9568_v18 = vcombine.low %v13016_v2, %v13016_v2  ;;  %v2483_v62 = vor.u32 %v2482_v4, %v2479_v3  ;;  %v2463_v21 = vshll.u32 %v9566_v0, 16 }
  0xd9   : > { %1550 = vmatprep.mubr.bf16.mxu0 %v9662_v42  ;;  %v13032_v22 = vrot.slane %v2452_v61, 3  ;;  %v2520_v23 = vshrl.u32 %v9599_v1, 16  ;;  %v2457_v5 = vrot.slane %v2455_v9, 4  ;;  %v2523_v8 = vshll.u32 %v9599_v1, 16  ;;  %v13055_v1 = vld [vmem:[#allocation2 + $0x5c] sm:$0xf] }
  0xda   : > { %v2528_v25 = vshrl.u32 %v9600_v10, 16  ;;  %v2531_v26 = vshll.u32 %v9600_v10, 16  ;;  %v2503_v27 = vshrl.u32 %v9567_v14, 16  ;;  %v2506_v28 = vshll.u32 %v9567_v14, 16 }
  0xdb   : > { %v9601_v29 = vcombine.low %v645_v20, %v13030_v60  ;;  %v2462_v31 = vrot.slane %v2460_v17, 3  ;;  %v2511_v32 = vshrl.u32 %v9568_v18, 16  ;;  %v2514_v34 = vshll.u32 %v9568_v18, 16 }
  0xdc   : > { %v9602_v36 = vcombine.low %v13034_v24, %v13034_v24  ;;  %v2416_v33 = vsel %vm1736_vm1, %v2407_v12, %v2415_v15  ;;  %v9647_v41 = vcombine.low %v13000_v35, %v13002_v38  ;;  %v2465_v42 = vrot.slane %v2463_v21, 4  ;;  %v13058_v12 = vld [vmem:[#allocation2 + $0x6c] sm:$0xf]  ;;  %v13060_v15 = vld [vmem:[#allocation2 + $0x70] sm:$0xf] }
  0xdd   : > { %v2522_v43 = vrot.slane %v2520_v23, 3  ;;  %v2484_v39 = vsel %vm1736_vm1, %v2475_v16, %v2483_v62  ;;  %v9664_v40 = vcombine.low %v13008_v52, %v13012_v57  ;;  %v2525_v47 = vrot.slane %v2523_v8, 4  ;;  %v657_v16 = vld [vmem:[#allocation2 + $0x7c] sm:$0x8]  ;;  %v13070_v8 = vld [vmem:[#allocation2 + $0x80] sm:$0xf] }
  0xde   : > { %v2530_v48 = vrot.slane %v2528_v25, 3  ;;  %v2533_v49 = vrot.slane %v2531_v26, 4  ;;  %v2505_v50 = vrot.slane %v2503_v27, 3  ;;  %v2508_v51 = vrot.slane %v2506_v28, 4 }
  0xdf   : > { %2874 = vmatmul.mubr.bf16.gmra.mrb[48].mxu1 %v2365_v6  ;;  %v1772_v53 = vshrl.u32 %v9601_v29, 16  ;;  %v2513_v55 = vrot.slane %v2511_v32, 3  ;;  %v2516_v45 = vrot.slane %v2514_v34, 4  ;;  %v1775_v46 = vshll.u32 %v9601_v29, 16  ;;  %v13080_v32 = vld [vmem:[#allocation2 + $0x94] sm:$0xf] }
  0xe0   : > { %2881 = vmatprep.mubr.bf16.mxu1 %v2433_v11  ;;  %1551 = vmatmul.mubr.bf16.gmra.mrb[52].mxu0 %v9646_v7  ;;  %v1780_v56 = vshrl.u32 %v9602_v36, 16  ;;  %v1783_v35 = vshll.u32 %v9602_v36, 16  ;;  %v9603_v38 = vcombine.low %v648_v37, %v13039_v30  ;;  %v2458_v63 = vor.u32 %v2457_v5, %v13032_v22  ;;  %v654_v11 = vld [vmem:[#allocation2 + $0x68] sm:$0x8] }
  0xe1   : > { %1558 = vmatprep.mubr.bf16.mxu0 %v9663_v13  ;;  %v2466_v52 = vor.u32 %v2465_v42, %v2462_v31  ;;  %v9604_v57 = vcombine.low %v13044_v44, %v13044_v44  ;;  %v2526_v0 = vor.u32 %v2525_v47, %v2522_v43  ;;  %v2534_v3 = vor.u32 %v2533_v49, %v2530_v48  ;;  %v663_v49 = vld [vmem:[#allocation2 + $0xa4] sm:$0x8] }
  0xe2   : > { %v2509_v4 = vor.u32 %v2508_v51, %v2505_v50  ;;  %v1774_v61 = vrot.slane %v1772_v53, 3  ;;  %v2517_v6 = vor.u32 %v2516_v45, %v2513_v55  ;;  %v1777_v7 = vrot.slane %v1775_v46, 4  ;;  %v13102_v50 = vld [vmem:[#allocation2 + $0xa8] sm:$0xf]  ;;  %v13107_v46 = vld [vmem:[#allocation2 + $0xac] sm:$0xf] }
  0xe3   : > { %v1782_v9 = vrot.slane %v1780_v56, 3  ;;  %v9605_v10 = vcombine.low %v651_v58, %v13050_v59  ;;  %v1785_v13 = vrot.slane %v1783_v35, 4  ;;  %v1823_v14 = vshrl.u32 %v9603_v38, 16 }
  0xe4   : > { %v2467_v17 = vsel %vm1736_vm1, %v2458_v63, %v2466_v52  ;;  %v9648_v18 = vcombine.low %v13010_v54, %v13016_v2  ;;  %v1826_v20 = vshll.u32 %v9603_v38, 16  ;;  %v1831_v62 = vshrl.u32 %v9604_v57, 16  ;;  %v13075_v2 = vld [vmem:[#allocation2 + $0x84] sm:$0xf] }
  0xe5   : > { %v2535_v21 = vsel %vm1736_vm1, %v2526_v0, %v2534_v3  ;;  %v9665_v22 = vcombine.low %v13030_v60, %v13034_v24  ;;  %v1834_v23 = vshll.u32 %v9604_v57, 16  ;;  %v9606_v5 = vcombine.low %v13055_v1, %v13055_v1  ;;  %v660_v24 = vld [vmem:[#allocation2 + $0x90] sm:$0x8] }
  0xe6   : > { %v2518_v25 = vsel %vm1736_vm1, %v2509_v4, %v2517_v6  ;;  %v9666_v26 = vcombine.low %v13039_v30, %v13044_v44  ;;  %v1874_v27 = vshrl.u32 %v9605_v10, 16  ;;  %v1877_v54 = vshll.u32 %v9605_v10, 16  ;;  %v11950_v0 = vld [vmem:[#allocation4 + $0x180] sm:$0xff]  }
  0xe7   : > { %2882 = vmatmul.mubr.bf16.gmra.mrb[52].mxu1 %v2416_v33  ;;  %v1778_v28 = vor.u32 %v1777_v7, %v1774_v61  ;;  %v1786_v29 = vor.u32 %v1785_v13, %v1782_v9  ;;  %v13077_v31 = vrot.slane %v1823_v14, 3  ;;  %v9607_v60 = vcombine.low %v654_v11, %v13058_v12  ;;  %v13089_v33 = vld [vmem:[#allocation2 + $0x98] sm:$0xf] }
  0xe8   : > { %2889 = vmatprep.mubr.bf16.mxu1 %v2484_v39  ;;  %1559 = vmatmul.mubr.bf16.gmra.mrb[56].mxu0 %v9647_v41  ;;  %v13082_v34 = vrot.slane %v1826_v20, 4  ;;  %v13084_v36 = vrot.slane %v1831_v62, 3  ;;  %v9608_v37 = vcombine.low %v13060_v15, %v13060_v15  ;;  %v9609_v30 = vcombine.low %v657_v16, %v13070_v8  ;;  %v11957_v7 = vld [vmem:[#allocation4 + $0x1c8] sm:$0xff]  }
  0xe9   : > { %1566 = vmatprep.mubr.bf16.mxu0 %v9664_v40  ;;  %v13091_v41 = vrot.slane %v1834_v23, 4  ;;  %v1882_v42 = vshrl.u32 %v9606_v5, 16  ;;  %v1885_v43 = vshll.u32 %v9606_v5, 16  ;;  %v9610_v44 = vcombine.low %v13075_v2, %v13075_v2  ;;  %v666_v20 = vld [vmem:[#allocation2 + $0xb8] sm:$0x8] }
  0xea   : > { %v9667_v39 = vcombine.low %v13050_v59, %v13055_v1  ;;  %v13097_v40 = vrot.slane %v1874_v27, 3  ;;  %v13099_v47 = vrot.slane %v1877_v54, 4  ;;  %v9611_v48 = vcombine.low %v660_v24, %v13080_v32  ;;  %v13118_v62 = vld [vmem:[#allocation2 + $0xbc] sm:$0xf]  ;;  %v11965_v27 = vld [vmem:[#allocation4 + $0x1d0] sm:$0xff]  }
  0xeb   : > { %v1787_v51 = vsel %vm1736_vm1, %v1778_v28, %v1786_v29  ;;  %v1925_v53 = vshrl.u32 %v9607_v60, 16  ;;  %v1928_v55 = vshll.u32 %v9607_v60, 16  ;;  %v9612_v45 = vcombine.low %v13089_v33, %v13089_v33  ;;  %v13120_v54 = vld [vmem:[#allocation2 + $0xc0] sm:$0xf] }
  0xec   : > { %v1933_v56 = vshrl.u32 %v9608_v37, 16  ;;  %v1936_v35 = vshll.u32 %v9608_v37, 16  ;;  %v1976_v38 = vshrl.u32 %v9609_v30, 16  ;;  %v1979_v58 = vshll.u32 %v9609_v30, 16  ;;  %v11966_v30 = vld [vmem:[#allocation4 + $0x190] sm:$0xff]  }
  0xed   : > { %v1829_v59 = vor.u32 %v13082_v34, %v13077_v31  ;;  %v1837_v63 = vor.u32 %v13091_v41, %v13084_v36  ;;  %v1984_v52 = vshrl.u32 %v9610_v44, 16  ;;  %v1987_v57 = vshll.u32 %v9610_v44, 16 }
  0xee   : > { %v1884_v3 = vrot.slane %v1882_v42, 3  ;;  %v1887_v4 = vrot.slane %v1885_v43, 4  ;;  %v2027_v61 = vshrl.u32 %v9611_v48, 16  ;;  %v2030_v1 = vshll.u32 %v9611_v48, 16  ;;  %v669_v48 = vld [vmem:[#allocation2 + $0xcc] sm:$0x8] }
  0xef   : > { %2890 = vmatmul.mubr.bf16.gmra.mrb[56].mxu1 %v2467_v17  ;;  %v13113_v6 = vrot.slane %v1925_v53, 3  ;;  %v2035_v9 = vshrl.u32 %v9612_v45, 16  ;;  %v2038_v10 = vshll.u32 %v9612_v45, 16  ;;  %v9613_v11 = vcombine.low %v663_v49, %v13102_v50  ;;  %v11958_v17 = vld [vmem:[#allocation4 + $0x188] sm:$0xff]   ;;  %v13133_v49 = vld [vmem:[#allocation2 + $0xd0] sm:$0xf] }
  0xf0   : > { %2897 = vmatprep.mubr.bf16.mxu1 %v2535_v21  ;;  %1567 = vmatmul.mubr.bf16.gmra.mrb[60].mxu0 %v9648_v18  ;;  %v1930_v13 = vrot.slane %v1928_v55, 4  ;;  %v1935_v14 = vrot.slane %v1933_v56, 3  ;;  %v1938_v16 = vrot.slane %v1936_v35, 4  ;;  %v9614_v18 = vcombine.low %v13107_v46, %v13107_v46  ;;  %v13138_v55 = vld [vmem:[#allocation2 + $0xd4] sm:$0xf]  ;;  %v11984_v56 = vld [vmem:[#allocation4 + $0x208] sm:$0xff]  }
  0xf1   : > { %11175 = vmatprep.mubr.bf16.mxu0 %v9665_v22  ;;  %v1978_v21 = vrot.slane %v1976_v38, 3  ;;  %v1981_v22 = vrot.slane %v1979_v58, 4  ;;  %v1986_v23 = vrot.slane %v1984_v52, 3  ;;  %v1989_v5 = vrot.slane %v1987_v57, 4  ;;  %v672_v45 = vld [vmem:[#allocation2 + $0xe0] sm:$0x8] }
  0xf2   : > { %v1888_v28 = vor.u32 %v1887_v4, %v1884_v3  ;;  %v13124_v29 = vrot.slane %v2027_v61, 3  ;;  %v2032_v31 = vrot.slane %v2030_v1, 4  ;;  %v2037_v60 = vrot.slane %v2035_v9, 3  ;;  %v13143_v38 = vld [vmem:[#allocation2 + $0xe4] sm:$0xf] }
  0xf3   : > { %v2040_v24 = vrot.slane %v2038_v10, 4  ;;  %v2081_v34 = vshll.u32 %v9613_v11, 16  ;;  %v1838_v36 = vsel %vm1736_vm1, %v1829_v59, %v1837_v63  ;;  %v9668_v37 = vcombine.low %v13058_v12, %v13060_v15  ;;  %v13145_v58 = vld [vmem:[#allocation2 + $0xe8] sm:$0xf] }
  0xf4   : > { %v2086_v41 = vshrl.u32 %v9614_v18, 16  ;;  %v2089_v42 = vshll.u32 %v9614_v18, 16  ;;  %v1931_v43 = vor.u32 %v1930_v13, %v13113_v6  ;;  %v1939_v44 = vor.u32 %v1938_v16, %v1935_v14  ;;  %v11981_v6 = vld [vmem:[#allocation4 + $0x1e0] sm:$0xff]   ;;  %v13154_v14 = vld [vmem:[#allocation2 + $0xf8] sm:$0xf]  ;;  %v11992_v16 = vld [vmem:[#allocation4 + $0x210] sm:$0xff]  }
  0xf5   : > { %v1982_v53 = vor.u32 %v1981_v22, %v1978_v21  ;;  %v1990_v12 = vor.u32 %v1989_v5, %v1986_v23  ;;  %v9616_v15 = vcombine.low %v13120_v54, %v13120_v54  ;;  %v2041_v35 = vor.u32 %v2040_v24, %v2037_v60  ;;  %v675_v13 = vld [vmem:[#allocation2 + $0xf4] sm:$0x8]  ;;  %v13162_v21 = vld [vmem:[#allocation2 + $0xfc] sm:$0xf] }
  0xf6   : > { %v2083_v63 = vrot.slane %v2081_v34, 4  ;;  %v2088_v52 = vrot.slane %v2086_v41, 3  ;;  %v2091_v57 = vrot.slane %v2089_v42, 4  ;;  %v1940_v3 = vsel %vm1736_vm1, %v1931_v43, %v1939_v44  ;;  %v11983_v5 = vld [vmem:[#allocation4 + $0x1a0] sm:$0xff]   ;;  %v11991_v24 = vld [vmem:[#allocation4 + $0x1e8] sm:$0xff]  }
  0xf7   : > { %2898 = vmatmul.mubr.bf16.gmra.mrb[60].mxu1 %v2518_v25  ;;  %v1880_v25 = vor.u32 %v13099_v47, %v13097_v40  ;;  %v9615_v40 = vcombine.low %v666_v20, %v13118_v62  ;;  %v11973_v47 = vld [vmem:[#allocation4 + $0x1d8] sm:$0xff]   ;;  %v9617_v1 = vcombine.low %v669_v48, %v13133_v49  ;;  %v9671_v9 = vcombine.low %v13102_v50, %v13107_v46 }
  0xf8   : > { %11223 = vmatprep.mubr.bf16.mxu1 %v1787_v51  ;;  %11176 = vmatmul.mubr.bf16.vlgmr.msra.gmra.mrb[64].mxu0 %v9666_v26  ;;  %v2078_v26 = vshrl.u32 %v9613_v11, 16  ;;  %v2137_v10 = vshrl.u32 %v9616_v15, 16  ;;  %v2140_v11 = vshll.u32 %v9616_v15, 16  ;;  %v9618_v18 = vcombine.low %v13138_v55, %v13138_v55 }
  0xf9   : > { %10616 = vmatpush3.bf16.msra.mxu0 %v11950_v0  ;;  %11179 = vmatprep.mubr.bf16.mxu0 %v9667_v39  ;;  %v9669_v39 = vcombine.low %v13070_v8, %v13075_v2  ;;  %v1889_v51 = vsel %vm1736_vm1, %v1880_v25, %v1888_v28  ;;  %v9670_v8 = vcombine.low %v13080_v32, %v13089_v33  ;;  %v11974_v0 = vld [vmem:[#allocation4 + $0x198] sm:$0xff]   ;;  %v2129_v4 = vshrl.u32 %v9615_v40, 16  ;;  %v13172_v28 = vld [vmem:[#allocation2 + $0x110] sm:$0xf]  ;;  %v13198_v32 = vld [vmem:[#allocation2 + $0x120] sm:$0xf] }
  0xfa   : > { %10617 = vmatprep.subr.bf16.mxu0 %v11957_v7  ;;  %v2033_v2 = vor.u32 %v2032_v31, %v13124_v29  ;;  %v13147_v59 = vrot.slane %v2078_v26, 3  ;;  %v2132_v61 = vshll.u32 %v9615_v40, 16  ;;  %v1991_v7 = vsel %vm1736_vm1, %v1982_v53, %v1990_v12  ;;  %v13170_v25 = vld [vmem:[#allocation2 + $0x10c] sm:$0xf]  ;;  %v13200_v33 = vld [vmem:[#allocation2 + $0x124] sm:$0xf] }
  0xfb   : > { %v9619_v20 = vcombine.low %v672_v45, %v13143_v38  ;;  %v2092_v22 = vor.u32 %v2091_v57, %v2088_v52  ;;  %v9620_v23 = vcombine.low %v13145_v58, %v13145_v58  ;;  %v13174_v29 = vrot.slane %v2129_v4, 3  ;;  %v11993_v45 = vld [vmem:[#allocation4 + $0x1a8] sm:$0xff]  }
  0xfc   : > { %v13165_v50 = vsel %vm1736_vm1, %v2033_v2, %v2041_v35  ;;  %v2084_v46 = vor.u32 %v2083_v63, %v13147_v59  ;;  %v2180_v31 = vshrl.u32 %v9617_v1, 16  ;;  %v2183_v60 = vshll.u32 %v9617_v1, 16  ;;  %v681_v52 = vld [vmem:[#allocation2 + $0x11c] sm:$0x8] }
  0xfd   : > { %10618 = vmatpush3.bf16.msra.mxu0 %v11958_v17  ;;  %v9672_v17 = vcombine.low %v13118_v62, %v13120_v54  ;;  %v13178_v26 = vrot.slane %v2137_v10, 3  ;;  %v13180_v34 = vrot.slane %v2140_v11, 4  ;;  %v2188_v41 = vshrl.u32 %v9618_v18, 16  ;;  %v12013_v62 = vld [vmem:[#allocation4 + $0x1b8] sm:$0xff]  }
  0xfe   : > { %10619 = vmatprep.subr.bf16.mxu0 %v11965_v27  ;;  %v678_v27 = vld [vmem:[#allocation2 + $0x108] sm:$0x8]  ;;  %v2191_v42 = vshll.u32 %v9618_v18, 16  ;;  %v2231_v43 = vshrl.u32 %v9619_v20, 16  ;;  %v2234_v44 = vshll.u32 %v9619_v20, 16  ;;  %v2239_v40 = vshrl.u32 %v9620_v23, 16 }
  0xff   : > { %11224 = vmatmul.mubr.bf16.vlgmr.msra.gmra.mrb[64].mxu1 %v1838_v36  ;;  %v9621_v36 = vcombine.low %v675_v13, %v13154_v14  ;;  %v9623_v48 = vcombine.low %v678_v27, %v13170_v25  ;;  %v13192_v53 = vrot.slane %v2180_v31, 3  ;;  %v13194_v12 = vrot.slane %v2183_v60, 4 }
 0x100   : > { %11227 = vmatprep.mubr.bf16.mxu1 %v1889_v51  ;;  %11180 = vmatmul.mubr.bf16.gmra.mrb[68].mxu0 %v9668_v37  ;;  %v9622_v37 = vcombine.low %v13162_v21, %v13162_v21  ;;  %v2093_v51 = vsel %vm1736_vm1, %v2084_v46, %v2092_v22  ;;  %v9624_v15 = vcombine.low %v13172_v28, %v13172_v28  ;;  %v2190_v57 = vrot.slane %v2188_v41, 3 }
 0x101   : > { %11183 = vmatprep.mubr.bf16.mxu0 %v9669_v39  ;;  %10620 = vmatpush3.bf16.msra.mxu0 %v11966_v30  ;;  %v11994_v30 = vld [vmem:[#allocation4 + $0x218] sm:$0xff]   ;;  %v9673_v39 = vcombine.low %v13133_v49, %v13138_v55  ;;  %v2282_v2 = vshrl.u32 %v9621_v36, 16  ;;  %v2285_v35 = vshll.u32 %v9621_v36, 16  ;;  %v13204_v4 = vrot.slane %v2234_v44, 4 }
 0x102   : > { %10621 = vmatprep.subr.bf16.mxu0 %v11973_v47  ;;  %11256 = vmatpush3.bf16.msra.mxu1 %v12994_v19  ;;  %v13176_v19 = vrot.slane %v2132_v61, 4  ;;  %v2242_v47 = vshll.u32 %v9620_v23, 16  ;;  %v2290_v59 = vshrl.u32 %v9622_v37, 16  ;;  %v2293_v63 = vshll.u32 %v9622_v37, 16 }
 0x103   : > { %11257 = vmatprep.subr.bf16.mxu1 %v11984_v56  ;;  %v2241_v61 = vrot.slane %v2239_v40, 3  ;;  %v2143_v11 = vor.u32 %v13180_v34, %v13178_v26  ;;  %v2341_v13 = vshrl.u32 %v9624_v15, 16  ;;  %v2344_v18 = vshll.u32 %v9624_v15, 16  ;;  %v13218_v26 = vld [vmem:[#allocation2 + $0x134] sm:$0xf]  ;;  %v12004_v34 = vld [vmem:[#allocation4 + $0x228] sm:$0xff]  }
 0x104   : > { %v2244_v1 = vrot.slane %v2242_v47, 4  ;;  %v2135_v10 = vor.u32 %v13176_v19, %v13174_v29  ;;  %v2284_v20 = vrot.slane %v2282_v2, 3  ;;  %v2287_v46 = vrot.slane %v2285_v35, 4  ;;  %v684_v29 = vld [vmem:[#allocation2 + $0x130] sm:$0x8]  ;;  %v12011_v19 = vld [vmem:[#allocation4 + $0x1f8] sm:$0xff]  }
 0x105   : > { %10622 = vmatpush3.bf16.msra.mxu0 %v11974_v0  ;;  %v2193_v0 = vrot.slane %v2191_v42, 4  ;;  %v2292_v22 = vrot.slane %v2290_v59, 3  ;;  %v2295_v23 = vrot.slane %v2293_v63, 4  ;;  %v9626_v27 = vcombine.low %v13200_v33, %v13200_v33  ;;  %v13223_v42 = vld [vmem:[#allocation2 + $0x138] sm:$0xf]  ;;  %v12012_v15 = vld [vmem:[#allocation4 + $0x230] sm:$0xff]  }
 0x106   : > { %10623 = vmatprep.subr.bf16.mxu0 %v11981_v6  ;;  %11258 = vmatpush3.bf16.msra.mxu1 %v11984_v56  ;;  %v12001_v56 = vld [vmem:[#allocation4 + $0x1f0] sm:$0xff]   ;;  %v2333_v6 = vshrl.u32 %v9623_v48, 16  ;;  %v2346_v41 = vrot.slane %v2344_v18, 4  ;;  %v9674_v44 = vcombine.low %v13143_v38, %v13145_v58  ;;  %v2288_v40 = vor.u32 %v2287_v46, %v2284_v20  ;;  %v690_v58 = vld [vmem:[#allocation2 + $0x158] sm:$0x8] }
 0x107   : > { %11228 = vmatmul.mubr.bf16.gmra.mrb[68].mxu1 %v1940_v3  ;;  %11259 = vmatprep.subr.bf16.mxu1 %v11992_v16  ;;  %v13202_v3 = vrot.slane %v2231_v43, 3  ;;  %v2194_v31 = vor.u32 %v2193_v0, %v2190_v57  ;;  %v13225_v43 = vld [vmem:[#allocation2 + $0x148] sm:$0xf]  ;;  %v2296_v47 = vor.u32 %v2295_v23, %v2292_v22  ;;  %v9675_v55 = vcombine.low %v13154_v14, %v13162_v21  ;;  %v13246_v59 = vld [vmem:[#allocation2 + $0x160] sm:$0xf] }
 0x108   : > { %11231 = vmatprep.mubr.bf16.mxu1 %v1991_v7  ;;  %11184 = vmatmul.mubr.bf16.gmra.mrb[72].mxu0 %v9670_v8  ;;  %v12002_v8 = vld [vmem:[#allocation4 + $0x220] sm:$0xff]   ;;  %v2336_v7 = vshll.u32 %v9623_v48, 16  ;;  %v2335_v36 = vrot.slane %v2333_v6, 3  ;;  %v2392_v48 = vshrl.u32 %v9626_v27, 16  ;;  %v9627_v38 = vcombine.low %v684_v29, %v13218_v26  ;;  %v307_v57 = vld [vmem:[#allocation2 + $0x24] sm:$0x1] }
 0x109   : > { %11187 = vmatprep.mubr.bf16.mxu0 %v9671_v9  ;;  %10624 = vmatpush3.bf16.msra.mxu0 %v11983_v5  ;;  %v12003_v9 = vld [vmem:[#allocation4 + $0x1b0] sm:$0xff]   ;;  %v9625_v5 = vcombine.low %v681_v52, %v13198_v32  ;;  %v2237_v60 = vor.u32 %v13204_v4, %v13202_v3  ;;  %v13249_v63 = vsel %vm1736_vm1, %v2288_v40, %v2296_v47 }
 0x10a   : > { %10625 = vmatprep.subr.bf16.mxu0 %v11991_v24  ;;  %11260 = vmatpush3.bf16.msra.mxu1 %v11992_v16  ;;  %v2186_v16 = vor.u32 %v13194_v12, %v13192_v53  ;;  %v2245_v24 = vor.u32 %v2244_v1, %v2241_v61  ;;  %v2338_v37 = vrot.slane %v2336_v7, 4  ;;  %v13232_v53 = vld [vmem:[#allocation2 + $0x14c] sm:$0xf]  ;;  %v2144_v12 = vsel %vm1736_vm1, %v2135_v10, %v2143_v11  ;;  %v263_v10 = vld [vmem:[#allocation2 + $0x10] sm:$0x1] }
 0x10b   : > { %11261 = vmatprep.subr.bf16.mxu1 %v11994_v30  ;;  %v2384_v54 = vshrl.u32 %v9625_v5, 16  ;;  %v9677_v14 = vcombine.low %v13198_v32, %v13200_v33  ;;  %v9628_v21 = vcombine.low %v13223_v42, %v13223_v42  ;;  %v13260_v4 = vrot.slane %v2392_v48, 3 }
 0x10c   : > { %v2195_v49 = vsel %vm1736_vm1, %v2186_v16, %v2194_v31  ;;  %v2339_v2 = vor.u32 %v2338_v37, %v2335_v36  ;;  %v9678_v1 = vcombine.low %v13218_v26, %v13223_v42  ;;  %v2435_v6 = vshrl.u32 %v9627_v38, 16  ;;  %v316_v36 = vld [vmem:[#allocation2 + $0x60] sm:$0x1] }
 0x10d   : > { %10626 = vmatpush3.bf16.msra.mxu0 %v11993_v45  ;;  %v13242_v45 = vsel %vm1736_vm1, %v2237_v60, %v2245_v24  ;;  %v13256_v0 = vrot.slane %v2384_v54, 3  ;;  %v9630_v7 = vcombine.low %v13232_v53, %v13232_v53  ;;  %v2443_v20 = vshrl.u32 %v9628_v21, 16  ;;  %v13286_v24 = vld [vmem:[#allocation2 + $0x30] sm:$0xff]  }
 0x10e   : > { %11262 = vmatpush3.bf16.msra.mxu1 %v11994_v30  ;;  %10627 = vmatprep.subr.bf16.mxu0 %v12001_v56  ;;  %v2343_v30 = vrot.slane %v2341_v13, 3  ;;  %v9676_v56 = vcombine.low %v13170_v25, %v13172_v28  ;;  %v2438_v13 = vshll.u32 %v9627_v38, 16  ;;  %v2446_v46 = vshll.u32 %v9628_v21, 16 }
 0x10f   : > { %11232 = vmatmul.mubr.bf16.gmra.mrb[72].mxu1 %v13165_v50  ;;  %11263 = vmatprep.subr.bf16.mxu1 %v12002_v8  ;;  %v687_v50 = vld [vmem:[#allocation2 + $0x144] sm:$0x8]  ;;  %v9632_v23 = vcombine.low %v13246_v59, %v13246_v59  ;;  %v15698_v16 = vmov 0  ;;  %v308_v60 = vsel %vm13274_vm4, 0, %v307_v57  ;;  %v13290_v37 = vrot.slane %v2435_v6, 3 }
 0x110   : > { %11235 = vmatprep.mubr.bf16.mxu1 %v2093_v51  ;;  %11188 = vmatmul.mubr.bf16.gmra.mrb[76].mxu0 %v9672_v17  ;;  %v2387_v17 = vshll.u32 %v9625_v5, 16  ;;  %v2395_v51 = vshll.u32 %v9626_v27, 16  ;;  %v2347_v35 = vor.u32 %v2346_v41, %v2343_v30  ;;  %v9629_v52 = vcombine.low %v687_v50, %v13225_v43  ;;  %v13278_v5 = vld [vmem:[#allocation2 + $0x1c] sm:$0xff]   ;;  %v313_v27 = vld [vmem:[#allocation2 + $0x4c] sm:$0x1] }
 0x111   : > { %11191 = vmatprep.mubr.bf16.mxu0 %v9673_v39  ;;  %10628 = vmatpush3.bf16.msra.mxu0 %v12003_v9  ;;  %v13239_v39 = vld [vmem:[#allocation2 + $0x15c] sm:$0xf]  ;;  %v310_v9 = vld [vmem:[#allocation2 + $0x38] sm:$0x1]  ;;  %v15699_v16 = vsel %vm13274_vm4, 4294967295, %v15698_v16  ;;  %v2494_v30 = vshrl.u32 %v9630_v7, 16  ;;  %v9679_v38 = vcombine.low %v13225_v43, %v13232_v53 }
 0x112   : > { %11264 = vmatpush3.bf16.msra.mxu1 %v12002_v8  ;;  %10629 = vmatprep.subr.bf16.mxu0 %v12011_v19  ;;  %v12014_v8 = vld [vmem:[#allocation4 + $0x238] sm:$0xff]   ;;  %v13258_v3 = vrot.slane %v2387_v17, 4  ;;  %v13262_v61 = vrot.slane %v2395_v51, 4  ;;  %v13269_v11 = vsel %vm1736_vm1, %v2339_v2, %v2347_v35  ;;  %v9631_v18 = vcombine.low %v690_v58, %v13239_v39  ;;  %15700 = vst [vmem:[#allocation10_spill] sm:$0xff] %v15699_v16  ;;  %v319_v17 = vld [vmem:[#allocation2 + $0x74] sm:$0x1] }
 0x113   : > { %11265 = vmatprep.subr.bf16.mxu1 %v12004_v34  ;;  %v2486_v22 = vshrl.u32 %v9629_v52, 16  ;;  %v2489_v31 = vshll.u32 %v9629_v52, 16  ;;  %v2497_v41 = vshll.u32 %v9630_v7, 16  ;;  %309 = vst [vmem:[#allocation2 + $0x24] sm:$0x1] %v308_v60  ;;  %v311_v50 = vsel %vm13274_vm4, 0, %v310_v9 }
 0x114   : > { %v2390_v29 = vor.u32 %v13258_v3, %v13256_v0  ;;  %v2398_v19 = vor.u32 %v13262_v61, %v13260_v4  ;;  %v13296_v40 = vrot.slane %v2438_v13, 4  ;;  %v2537_v47 = vshrl.u32 %v9631_v18, 16  ;;  %312 = vst [vmem:[#allocation2 + $0x38] sm:$0x1] %v311_v50  ;;  %v13312_v2 = vld [vmem:[#allocation2 + $0x30] sm:$0xff]   ;;  %v13330_v61 = vld [vmem:[#allocation2 + $0x1c] sm:$0xff]  }
 0x115   : > { %10630 = vmatpush3.bf16.msra.mxu0 %v12013_v62  ;;  %v2540_v62 = vshll.u32 %v9631_v18, 16  ;;  %v264_v54 = vsel %vm13274_vm4, 0, %v263_v10  ;;  %v13300_v48 = vrot.slane %v2443_v20, 3  ;;  %v2545_v51 = vshrl.u32 %v9632_v23, 16 }
 0x116   : > { %11266 = vmatpush3.bf16.msra.mxu1 %v12004_v34  ;;  %v13288_v34 = vld [vmem:[#allocation2 + $0x8] sm:$0xff]   ;;  %265 = vst [vmem:[#allocation2 + $0x10] sm:$0x1] %v264_v54  ;;  %v13308_v58 = vrot.slane %v2486_v22, 3  ;;  %v2496_v35 = vrot.slane %v2494_v30, 3  ;;  %v2499_v21 = vrot.slane %v2497_v41, 4  ;;  %v2399_v28 = vsel %vm1736_vm1, %v2390_v29, %v2398_v19 }
 0x117   : > { %11236 = vmatmul.mubr.bf16.gmra.mrb[76].mxu1 %v2144_v12  ;;  %11267 = vmatprep.subr.bf16.mxu1 %v12012_v15  ;;  %v2548_v12 = vshll.u32 %v9632_v23, 16  ;;  %v3660_v52 = vshll.u32 %v13278_v5, 16  ;;  %v317_v57 = vsel %vm13274_vm4, 0, %v316_v36  ;;  %v2539_v43 = vrot.slane %v2537_v47, 3  ;;  %v322_v47 = vld [vmem:[#allocation2 + $0x88] sm:$0x1] }
 0x118   : > { %11239 = vmatprep.mubr.bf16.mxu1 %v2195_v49  ;;  %11192 = vmatmul.mubr.bf16.gmra.mrb[80].mxu0 %v9674_v44  ;;  %v13294_v44 = vld [vmem:[#allocation2 + $0x44] sm:$0xff]   ;;  %v314_v49 = vsel %vm13274_vm4, 0, %v313_v27  ;;  %v2542_v53 = vrot.slane %v2540_v62, 4  ;;  %v3648_v0 = vshll.u32 %v13288_v34, 16  ;;  %318 = vst [vmem:[#allocation2 + $0x60] sm:$0x1] %v317_v57  ;;  %v2500_v19 = vor.u32 %v2499_v21, %v2496_v35 }
 0x119   : > { %11195 = vmatprep.mubr.bf16.mxu0 %v9675_v55  ;;  %v13304_v55 = vrot.slane %v2446_v46, 4  ;;  %315 = vst [vmem:[#allocation2 + $0x4c] sm:$0x1] %v314_v49  ;;  %v2550_v3 = vrot.slane %v2548_v12, 4  ;;  %v3708_v4 = vshll.u32 %v13294_v44, 16  ;;  %v320_v25 = vsel %vm13274_vm4, 0, %v319_v17 }
 0x11a   : > { %11268 = vmatpush3.bf16.msra.mxu1 %v12012_v15  ;;  %v13310_v15 = vrot.slane %v2489_v31, 4  ;;  %v12016_v33 = vld [vmem:[#allocation2 + $0x24] ss:$0 sps:$4 sm:$0x11]   ;;  %321 = vst [vmem:[#allocation2 + $0x74] sm:$0x1] %v320_v25  ;;  %v2543_v36 = vor.u32 %v2542_v53, %v2539_v43  ;;  %v9680_v62 = vcombine.low %v13239_v39, %v13246_v59 }
 0x11b   : > { %11269 = vmatprep.subr.bf16.mxu1 %v12014_v8  ;;  %v2449_v32 = vor.u32 %v13304_v55, %v13300_v48  ;;  %v3658_v6 = vshrl.u32 %v13278_v5, 16  ;;  %v3662_v7 = vrot.slane %v3660_v52, 1  ;;  %v3670_v9 = vshrl.u32 %v13286_v24, 16  ;;  %v12018_v60 = vld [vmem:[#allocation2 + $0x38] ss:$0 sps:$4 sm:$0x11]  }
 0x11c   : > { %v3646_v10 = vshrl.u32 %v13288_v34, 16  ;;  %v3650_v18 = vrot.slane %v3648_v0, 1  ;;  %v3706_v20 = vshrl.u32 %v13294_v44, 16  ;;  %v3694_v46 = vshrl.u32 %v13312_v2, 16  ;;  %v13350_v34 = vld [vmem:[#allocation2 + $0x6c] sm:$0xff]   ;;  %v13368_v59 = vld [vmem:[#allocation2 + $0x80] sm:$0xff]  }
 0x11d   : > { %v3710_v22 = vrot.slane %v3708_v4, 1  ;;  %v3682_v29 = vshrl.u32 %v13330_v61, 16  ;;  %v2492_v5 = vor.u32 %v13310_v15, %v13308_v58  ;;  %v3665_v31 = vshll.u32 %v12016_v33, 16  ;;  %v12020_v30 = vld [vmem:[#allocation2 + $0x10] ss:$0 sps:$4 sm:$0x11]  }
 0x11e   : > { %11270 = vmatpush3.bf16.msra.mxu1 %v12014_v8  ;;  %v3672_v8 = vshll.u32 %v13286_v24, 16  ;;  %v12024_v50 = vld [vmem:[#allocation2 + $0x38] ss:$0 sps:$4 sm:$0x11]   ;;  %v3684_v44 = vshll.u32 %v13330_v61, 16  ;;  %v3778_v55 = vshrl.u32 %v13350_v34, 16 }
 0x11f   : > { %11240 = vmatmul.mubr.bf16.gmra.mrb[80].mxu1 %v13242_v45  ;;  %v2547_v45 = vrot.slane %v2545_v51, 3  ;;  %v12028_v54 = vld [vmem:[#allocation2 + $0x24] ss:$0 sps:$4 sm:$0x11]   ;;  %v2501_v48 = vsel %vm1736_vm1, %v2492_v5, %v2500_v19  ;;  %v3663_v51 = vor.u32 %v3662_v7, %v3658_v6  ;;  %v3667_v12 = vrot.slane %v3665_v31, 1  ;;  %v13372_v43 = vld [vmem:[#allocation2 + $0x30] sm:$0xff]  }
 0x120   : > { %11243 = vmatprep.mubr.bf16.mxu1 %v13249_v63  ;;  %11196 = vmatmul.mubr.bf16.gmra.mrb[84].mxu0 %v9676_v56  ;;  %v13328_v63 = vld [vmem:[#allocation2 + $0x58] sm:$0xff]   ;;  %v2441_v56 = vor.u32 %v13296_v40, %v13290_v37  ;;  %v3674_v13 = vrot.slane %v3672_v8, 1  ;;  %v12022_v41 = vld [vmem:[#allocation2 + $0x4c] ss:$0 sps:$4 sm:$0x11]   ;;  %v13357_v40 = vld [vmem:[#allocation2 + $0x44] sm:$0xff]   ;;  %v13375_v8 = vor.u32 %v3710_v22, %v3706_v20 }
 0x121   : > { %11199 = vmatprep.mubr.bf16.mxu0 %v9677_v14  ;;  %v3696_v14 = vshll.u32 %v13312_v2, 16  ;;  %v3742_v23 = vshrl.u32 %v13328_v63, 16  ;;  %v3744_v27 = vshll.u32 %v13328_v63, 16  ;;  %v2551_v37 = vor.u32 %v2550_v3, %v2547_v45  ;;  %v12030_v26 = vld [vmem:[#allocation2 + $0x74] ss:$0 sps:$4 sm:$0x11]  }
 0x122   : > { %v2450_v17 = vsel %vm1736_vm1, %v2441_v56, %v2449_v32  ;;  %v3653_v58 = vshll.u32 %v12020_v30, 16  ;;  %v3713_v15 = vshll.u32 %v12022_v41, 16  ;;  %v3780_v39 = vshll.u32 %v13350_v34, 16  ;;  %v12032_v52 = vld [vmem:[#allocation2 + $0x4c] ss:$0 sps:$4 sm:$0x11]  }
 0x123   : > { %v3698_v24 = vrot.slane %v3696_v14, 1  ;;  %v13364_v42 = vsel %vm1736_vm1, %v2543_v36, %v2551_v37  ;;  %v3746_v49 = vrot.slane %v3744_v27, 1  ;;  %v3651_v2 = vor.u32 %v3650_v18, %v3646_v10  ;;  %v325_v3 = vld [vmem:[#allocation2 + $0x9c] sm:$0x1]  ;;  %v13380_v32 = vld [vmem:[#allocation2 + $0x94] sm:$0xff]   ;;  %v13390_v19 = vld [vmem:[#allocation2 + $0xa8] sm:$0xff]  }
 0x124   : > { %v3701_v35 = vshll.u32 %v12024_v50, 16  ;;  %v323_v57 = vsel %vm13274_vm4, 0, %v322_v47  ;;  %v3668_v53 = vsel %vm3644_vm5, %v3663_v51, %v3667_v12  ;;  %v3689_v0 = vshll.u32 %v12028_v54, 16  ;;  %v12036_v56 = vld [vmem:[#allocation2 + $0x38] ss:$0 sps:$4 sm:$0x11]  }
 0x125   : > { %v3732_v45 = vshll.u32 %v13357_v40, 16  ;;  %324 = vst [vmem:[#allocation2 + $0x88] sm:$0x1] %v323_v57  ;;  %v3699_v4 = vor.u32 %v3698_v24, %v3694_v46  ;;  %v13378_v63 = vor.u32 %v3746_v49, %v3742_v23  ;;  %v3686_v25 = vrot.slane %v3684_v44, 1  ;;  %v328_v46 = vld [vmem:[#allocation2 + $0xb0] sm:$0x1] }
 0x126   : > { %v3655_v14 = vrot.slane %v3653_v58, 1  ;;  %v3715_v6 = vrot.slane %v3713_v15, 1  ;;  %v3782_v7 = vrot.slane %v3780_v39, 1  ;;  %v3703_v10 = vrot.slane %v3701_v35, 1  ;;  %v13397_v30 = vld [vmem:[#allocation2 + $0x44] sm:$0xff]   ;;  %v13404_v61 = vld [vmem:[#allocation2 + $0xbc] sm:$0xff]  }
 0x127   : > { %11244 = vmatmul.mubr.bf16.gmra.mrb[84].mxu1 %v13269_v11  ;;  %v12026_v11 = vld [vmem:[#allocation2 + $0x60] ss:$0 sps:$4 sm:$0x11]   ;;  %v3737_v18 = vshll.u32 %v12032_v52, 16  ;;  %v326_v20 = vsel %vm13274_vm4, 0, %v325_v3  ;;  %v3691_v22 = vrot.slane %v3689_v0, 1  ;;  %v3687_v31 = vor.u32 %v3686_v25, %v3682_v29 }
 0x128   : > { %11247 = vmatprep.mubr.bf16.mxu1 %v2399_v28  ;;  %11200 = vmatmul.mubr.bf16.gmra.mrb[88].mxu0 %v9678_v1  ;;  %v3675_v1 = vor.u32 %v3674_v13, %v3670_v9  ;;  %v3749_v21 = vshll.u32 %v12026_v11, 16  ;;  %v3785_v28 = vshll.u32 %v12030_v26, 16  ;;  %v13382_v9 = vld [vmem:[#allocation2 + $0x58] sm:$0xff]   ;;  %v3730_v23 = vshrl.u32 %v13357_v40, 16  ;;  %327 = vst [vmem:[#allocation2 + $0x9c] sm:$0x1] %v326_v20 }
 0x129   : > { %11203 = vmatprep.mubr.bf16.mxu0 %v9679_v38  ;;  %v3677_v38 = vshll.u32 %v12018_v60, 16  ;;  %v3734_v27 = vrot.slane %v3732_v45, 1  ;;  %v3816_v5 = vshll.u32 %v13368_v59, 16  ;;  %v3720_v24 = vshll.u32 %v13372_v43, 16  ;;  %v331_v41 = vld [vmem:[#allocation2 + $0xc4] sm:$0x1] }
 0x12a   : > { %v13384_v13 = vrot.slane %v3749_v21, 1  ;;  %v13394_v60 = vrot.slane %v3785_v28, 1  ;;  %v3725_v36 = vshll.u32 %v12036_v56, 16  ;;  %v12040_v37 = vld [vmem:[#allocation2 + $0x60] ss:$0 sps:$4 sm:$0x11]   ;;  %v3704_v11 = vsel %vm3644_vm5, %v3699_v4, %v3703_v10 }
 0x12b   : > { %v3679_v33 = vrot.slane %v3677_v38, 1  ;;  %v3814_v50 = vshrl.u32 %v13368_v59, 16  ;;  %v3718_v44 = vshrl.u32 %v13372_v43, 16  ;;  %v3852_v40 = vshll.u32 %v13380_v32, 16  ;;  %v334_v57 = vld [vmem:[#allocation2 + $0xd8] sm:$0x1] }
 0x12c   : > { %v329_v47 = vsel %vm13274_vm4, 0, %v328_v46  ;;  %v3739_v54 = vrot.slane %v3737_v18, 1  ;;  %v3735_v51 = vor.u32 %v3734_v27, %v3730_v23  ;;  %v3818_v12 = vrot.slane %v3816_v5, 1  ;;  %v12044_v38 = vld [vmem:[#allocation2 + $0x4c] ss:$0 sps:$4 sm:$0x11]  }
 0x12d   : > { %v3680_v29 = vsel %vm3644_vm5, %v3675_v1, %v3679_v33  ;;  %330 = vst [vmem:[#allocation2 + $0xb0] sm:$0x1] %v329_v47  ;;  %v3850_v26 = vshrl.u32 %v13380_v32, 16  ;;  %v3768_v49 = vshll.u32 %v13382_v9, 16  ;;  %v3722_v58 = vrot.slane %v3720_v24, 1  ;;  %v13427_v4 = vld [vmem:[#allocation2 + $0xd0] sm:$0xff]  }
 0x12e   : > { %v13414_v1 = vrot.slane %v3725_v36, 1  ;;  %v3766_v15 = vshrl.u32 %v13382_v9, 16  ;;  %v3773_v39 = vshll.u32 %v12040_v37, 16  ;;  %v13417_v35 = vrot.slane %v3852_v40, 1 }
 0x12f   : > { %11248 = vmatmul.mubr.bf16.gmra.mrb[88].mxu1 %v2450_v17  ;;  %v12034_v17 = vld [vmem:[#allocation2 + $0x88] ss:$0 sps:$4 sm:$0x11]   ;;  %v3888_v21 = vshll.u32 %v13390_v19, 16  ;;  %v332_v52 = vsel %vm13274_vm4, 0, %v331_v41  ;;  %v3756_v45 = vshll.u32 %v13397_v30, 16  ;;  %v3740_v10 = vsel %vm3644_vm5, %v3735_v51, %v3739_v54 }
 0x130   : > { %11251 = vmatprep.mubr.bf16.mxu1 %v2501_v48  ;;  %11204 = vmatmul.mubr.bf16.gmra.mrb[92].mxu0 %v9680_v62  ;;  %v3656_v62 = vsel %vm3644_vm5, %v3651_v2, %v3655_v14  ;;  %v13409_v48 = vld [vmem:[#allocation2 + $0x6c] sm:$0xff]   ;;  %v3821_v2 = vshll.u32 %v12034_v17, 16  ;;  %v12038_v0 = vld [vmem:[#allocation2 + $0x9c] ss:$0 sps:$4 sm:$0x11]   ;;  %v3770_v25 = vrot.slane %v3768_v49, 1  ;;  %v3819_v17 = vor.u32 %v3818_v12, %v3814_v50 }
 0x131   : > { %4445 = vmatprep.mubr.bf16.mxu0 %v3668_v53  ;;  %v3783_v53 = vor.u32 %v3782_v7, %v3778_v55  ;;  %333 = vst [vmem:[#allocation2 + $0xc4] sm:$0x1] %v332_v52  ;;  %v12048_v3 = vld [vmem:[#allocation2 + $0x74] ss:$0 sps:$4 sm:$0x11]   ;;  %v3886_v28 = vshrl.u32 %v13390_v19, 16  ;;  %v3692_v7 = vsel %vm3644_vm5, %v3687_v31, %v3691_v22  ;;  %v3723_v51 = vor.u32 %v3722_v58, %v3718_v44 }
 0x132   : > { %v3761_v56 = vshll.u32 %v12044_v38, 16  ;;  %v3924_v33 = vshll.u32 %v13404_v61, 16  ;;  %v3857_v14 = vshll.u32 %v12038_v0, 16  ;;  %v3775_v9 = vrot.slane %v3773_v39, 1  ;;  %v13433_v55 = vld [vmem:[#allocation2 + $0x58] sm:$0xff]   ;;  %v13450_v22 = vld [vmem:[#allocation2 + $0xe4] sm:$0xff]  }
 0x133   : > { %v3804_v34 = vshll.u32 %v13409_v48, 16  ;;  %v3890_v20 = vrot.slane %v3888_v21, 1  ;;  %v3823_v46 = vrot.slane %v3821_v2, 1  ;;  %v3758_v23 = vrot.slane %v3756_v45, 1  ;;  %v13452_v31 = vld [vmem:[#allocation2 + $0x80] sm:$0xff]   ;;  %v13471_v44 = vld [vmem:[#allocation2 + $0x6c] sm:$0xff]  }
 0x134   : > { %v12042_v18 = vld [vmem:[#allocation2 + $0xb0] ss:$0 sps:$4 sm:$0x11]   ;;  %v3922_v27 = vshrl.u32 %v13404_v61, 16  ;;  %v335_v5 = vsel %vm13274_vm4, 0, %v334_v57  ;;  %v13443_v36 = vrot.slane %v3857_v14, 1  ;;  %v3788_v39 = vsel %vm3644_vm5, %v3783_v53, %v13394_v60 }
 0x135   : > { %v12052_v24 = vld [vmem:[#allocation2 + $0x60] ss:$0 sps:$4 sm:$0x11]   ;;  %v13445_v37 = vrot.slane %v3761_v56, 1  ;;  %v13447_v41 = vrot.slane %v3924_v33, 1  ;;  %v3893_v40 = vshll.u32 %v12042_v18, 16  ;;  %v3771_v2 = vor.u32 %v3770_v25, %v3766_v15 }
 0x136   : > { %336 = vst [vmem:[#allocation2 + $0xd8] sm:$0x1] %v335_v5  ;;  %v3806_v47 = vrot.slane %v3804_v34, 1  ;;  %v3958_v54 = vshrl.u32 %v13427_v4, 16  ;;  %v3792_v49 = vshll.u32 %v13433_v55, 16  ;;  %v3797_v43 = vshll.u32 %v12052_v24, 16 }
 0x137   : > { %11252 = vmatmul.mubr.bf16.gmra.mrb[92].mxu1 %v13364_v42  ;;  %v3716_v42 = vsel %vm3644_vm5, %v13375_v8, %v3715_v6  ;;  %v3754_v8 = vshrl.u32 %v13397_v30, 16  ;;  %v3752_v6 = vsel %vm3644_vm5, %v13378_v63, %v13384_v13  ;;  %v3802_v63 = vshrl.u32 %v13409_v48, 16  ;;  %v337_v13 = vld [vmem:[#allocation2 + $0xec] sm:$0x1]  ;;  %v340_v57 = vld [vmem:[#allocation2 + $0x100] sm:$0x1] }
 0x138   : > { %11271 = vmatprep.mubr.bf16.mxu1 %v3680_v29  ;;  %4446 = vmatmul.mubr.bf16.vlgmr.msra.gmra.mrb[96].mxu0 %v3656_v62  ;;  %v3809_v29 = vshll.u32 %v12048_v3, 16  ;;  %v3960_v62 = vshll.u32 %v13427_v4, 16  ;;  %v12056_v38 = vld [vmem:[#allocation2 + $0x88] ss:$0 sps:$4 sm:$0x11]   ;;  %v338_v52 = vsel %vm13274_vm4, 0, %v337_v13  ;;  %v3824_v53 = vsel %vm3644_vm5, %v3819_v17, %v3823_v46 }
 0x139   : > { %4453 = vmatprep.mubr.bf16.mxu0 %v3704_v11  ;;  %v12046_v11 = vld [vmem:[#allocation2 + $0xc4] ss:$0 sps:$4 sm:$0x11]   ;;  %v3895_v0 = vrot.slane %v3893_v40, 1  ;;  %339 = vst [vmem:[#allocation2 + $0xec] sm:$0x1] %v338_v52  ;;  %v3728_v45 = vsel %vm3644_vm5, %v3723_v51, %v13414_v1  ;;  %v3855_v3 = vor.u32 %v13417_v35, %v3850_v26  ;;  %v3776_v33 = vsel %vm3644_vm5, %v3771_v2, %v3775_v9 }
 0x13a   : > { %v3929_v21 = vshll.u32 %v12046_v11, 16  ;;  %v13467_v59 = vrot.slane %v3809_v29, 1  ;;  %v13469_v50 = vrot.slane %v3960_v62, 1  ;;  %v3790_v12 = vshrl.u32 %v13433_v55, 16  ;;  %v13496_v9 = vld [vmem:[#allocation2 + $0x10c] sm:$0xff]   ;;  %v13508_v24 = vld [vmem:[#allocation2 + $0x120] sm:$0xff]  }
 0x13b   : > { %v13474_v60 = vrot.slane %v3792_v49, 1  ;;  %v3996_v58 = vshll.u32 %v13450_v22, 16  ;;  %v3840_v15 = vshll.u32 %v13452_v31, 16  ;;  %v3994_v56 = vshrl.u32 %v13450_v22, 16 }
 0x13c   : > { %v13486_v14 = vrot.slane %v3929_v21, 1  ;;  %v3845_v34 = vshll.u32 %v12056_v38, 16  ;;  %v3891_v1 = vor.u32 %v3890_v20, %v3886_v28  ;;  %v3759_v32 = vor.u32 %v3758_v23, %v3754_v8  ;;  %v13502_v28 = vld [vmem:[#allocation2 + $0x94] sm:$0xff]   ;;  %v12064_v52 = vld [vmem:[#allocation2 + $0x9c] ss:$0 sps:$4 sm:$0x11]  }
 0x13d   : > { %v12050_v25 = vld [vmem:[#allocation2 + $0xd8] ss:$0 sps:$4 sm:$0x11]   ;;  %v13494_v35 = vrot.slane %v3797_v43, 1  ;;  %v13498_v18 = vrot.slane %v3996_v58, 1  ;;  %v3838_v46 = vshrl.u32 %v13452_v31, 16  ;;  %v3807_v13 = vor.u32 %v3806_v47, %v3802_v63 }
 0x13e   : > { %v3965_v26 = vshll.u32 %v12050_v25, 16  ;;  %v3842_v5 = vrot.slane %v3840_v15, 1  ;;  %v3828_v8 = vshll.u32 %v13471_v44, 16  ;;  %v3847_v40 = vrot.slane %v3845_v34, 1 }
 0x13f   : > { %11272 = vmatmul.mubr.bf16.vlgmr.msra.gmra.mrb[64].mxu1 %v3716_v42  ;;  %v13465_v42 = vld [vmem:[#allocation2 + $0xf8] sm:$0xff]   ;;  %v3764_v62 = vsel %vm3644_vm5, %v3759_v32, %v13445_v37  ;;  %v3826_v51 = vshrl.u32 %v13471_v44, 16  ;;  %v3860_v49 = vsel %vm3644_vm5, %v3855_v3, %v13443_v36  ;;  %v3896_v47 = vsel %vm3644_vm5, %v3891_v1, %v3895_v0  ;;  %v346_v1 = vld [vmem:[#allocation2 + $0x128] sm:$0x1] }
 0x140   : > { %11275 = vmatprep.mubr.bf16.mxu1 %v3752_v6  ;;  %4454 = vmatmul.mubr.bf16.gmra.mrb[100].mxu0 %v3692_v7  ;;  %v341_v6 = vsel %vm13274_vm4, 0, %v340_v57  ;;  %v12060_v7 = vld [vmem:[#allocation2 + $0x74] ss:$0 sps:$4 sm:$0x11]   ;;  %v4032_v19 = vshll.u32 %v13465_v42, 16  ;;  %v4030_v30 = vshrl.u32 %v13465_v42, 16  ;;  %v3812_v36 = vsel %vm3644_vm5, %v3807_v13, %v13467_v59 }
 0x141   : > { %4461 = vmatprep.mubr.bf16.mxu0 %v3740_v10  ;;  %342 = vst [vmem:[#allocation2 + $0x100] sm:$0x1] %v341_v6  ;;  %v343_v10 = vld [vmem:[#allocation2 + $0x114] sm:$0x1]  ;;  %v3833_v20 = vshll.u32 %v12060_v7, 16  ;;  %v3967_v11 = vrot.slane %v3965_v26, 1  ;;  %v3927_v0 = vor.u32 %v13447_v41, %v3922_v27  ;;  %v3795_v59 = vor.u32 %v13474_v60, %v3790_v12 }
 0x142   : > { %v344_v23 = vsel %vm13274_vm4, 0, %v343_v10  ;;  %v12054_v31 = vld [vmem:[#allocation2 + $0xec] ss:$0 sps:$4 sm:$0x11]   ;;  %v13514_v17 = vrot.slane %v4032_v19, 1  ;;  %v13519_v2 = vrot.slane %v3828_v8, 1  ;;  %v3843_v7 = vor.u32 %v3842_v5, %v3838_v46 }
 0x143   : > { %345 = vst [vmem:[#allocation2 + $0x114] sm:$0x1] %v344_v23  ;;  %v13521_v48 = vrot.slane %v3833_v20, 1  ;;  %v4066_v21 = vshrl.u32 %v13496_v9, 16  ;;  %v4068_v37 = vshll.u32 %v13496_v9, 16  ;;  %v13526_v57 = vld [vmem:[#allocation2 + $0x80] sm:$0xff]   ;;  %v3963_v61 = vor.u32 %v13469_v50, %v3958_v54 }
 0x144   : > { %v3874_v15 = vshrl.u32 %v13502_v28, 16  ;;  %v4104_v34 = vshll.u32 %v13508_v24, 16  ;;  %v13541_v6 = vld [vmem:[#allocation2 + $0x134] sm:$0xff]   ;;  %v347_v19 = vsel %vm13274_vm4, 0, %v346_v1  ;;  %v3862_v55 = vshrl.u32 %v13526_v57, 16  ;;  %v13557_v8 = vld [vmem:[#allocation2 + $0xa8] sm:$0xff]  }
 0x145   : > { %v13551_v26 = vrot.slane %v4068_v37, 1  ;;  %348 = vst [vmem:[#allocation2 + $0x128] sm:$0x1] %v347_v19  ;;  %v3864_v5 = vshll.u32 %v13526_v57, 16  ;;  %v3932_v4 = vsel %vm3644_vm5, %v3927_v0, %v13486_v14  ;;  %v3800_v50 = vsel %vm3644_vm5, %v3795_v59, %v13494_v35 }
 0x146   : > { %v3848_v20 = vsel %vm3644_vm5, %v3843_v7, %v3847_v40  ;;  %v12068_v23 = vld [vmem:[#allocation2 + $0x88] ss:$0 sps:$4 sm:$0x11]   ;;  %v12072_v22 = vld [vmem:[#allocation2 + $0xb0] ss:$0 sps:$4 sm:$0x11]  }
 0x147   : > { %11276 = vmatmul.mubr.bf16.gmra.mrb[68].mxu1 %v3788_v39  ;;  %v4001_v39 = vshll.u32 %v12054_v31, 16  ;;  %v3968_v31 = vsel %vm3644_vm5, %v3963_v61, %v3967_v11  ;;  %v3866_v40 = vrot.slane %v3864_v5, 1  ;;  %v3869_v37 = vshll.u32 %v12068_v23, 16  ;;  %v13573_v11 = vld [vmem:[#allocation2 + $0x148] sm:$0xff]  }
 0x148   : > { %11279 = vmatprep.mubr.bf16.mxu1 %v3824_v53  ;;  %4462 = vmatmul.mubr.bf16.gmra.mrb[104].mxu0 %v3728_v45  ;;  %v3876_v53 = vshll.u32 %v13502_v28, 16  ;;  %v4102_v45 = vshrl.u32 %v13508_v24, 16  ;;  %v12058_v25 = vld [vmem:[#allocation2 + $0x100] ss:$0 sps:$4 sm:$0x11]  }
 0x149   : > { %4469 = vmatprep.mubr.bf16.mxu0 %v3776_v33  ;;  %v13538_v3 = vrot.slane %v4001_v39, 1  ;;  %v3881_v33 = vshll.u32 %v12064_v52, 16  ;;  %v4037_v27 = vshll.u32 %v12058_v25, 16  ;;  %v3999_v52 = vor.u32 %v13498_v18, %v3994_v56  ;;  %v352_v18 = vld [vmem:[#allocation2 + $0x150] sm:$0x1] }
 0x14a   : > { %v12062_v41 = vld [vmem:[#allocation2 + $0x114] ss:$0 sps:$4 sm:$0x11]   ;;  %v3878_v10 = vrot.slane %v3876_v53, 1  ;;  %v4035_v25 = vor.u32 %v13514_v17, %v4030_v30  ;;  %v3912_v56 = vshll.u32 %v13557_v8, 16  ;;  %v353_v7 = vsel %vm13274_vm4, 0, %v352_v18 }
 0x14b   : > { %v10359_v29 = vpop.f32.mrb[0].mxu0  ;;  %v4073_v60 = vshll.u32 %v12062_v41, 16  ;;  %v3883_v46 = vrot.slane %v3881_v33, 1  ;;  %v13581_v53 = vld [vmem:[#allocation2 + $0x94] sm:$0xff]   ;;  %v3831_v33 = vor.u32 %v13519_v2, %v3826_v51  ;;  %v3871_v61 = vrot.slane %v3869_v37, 1  ;;  %v13603_v41 = vld [vmem:[#allocation2 + $0x15c] sm:$0xff]  }
 0x14c   : > { %v10360_v38 = vpop.f32.mrb[1].mxu0  ;;  %v12066_v59 = vld [vmem:[#allocation2 + $0x128] ss:$0 sps:$4 sm:$0x11]   ;;  %354 = vst [vmem:[#allocation2 + $0x150] sm:$0x1] %v353_v7  ;;  %v4004_v42 = vsel %vm3644_vm5, %v3999_v52, %v13538_v3  ;;  %v3867_v23 = vor.u32 %v3866_v40, %v3862_v55 }
 0x14d   : > { %v10362_v63 = vpop.f32.mrb[2].mxu0  ;;  %v13528_v43 = vadd.f32 %v10360_v38, %v10359_v29  ;;  %v4039_v29 = vrot.slane %v4037_v27, 1  ;;  %v4140_v38 = vshll.u32 %v13541_v6, 16  ;;  %v4109_v30 = vshll.u32 %v12066_v59, 16  ;;  %v13623_v55 = vld [vmem:[#allocation2 + $0xa8] sm:$0xff]  }
 0x14e   : > { %v10363_v58 = vpop.f32.mrb[3].mxu0  ;;  %v3917_v17 = vshll.u32 %v12072_v22, 16  ;;  %v4174_v51 = vshrl.u32 %v13573_v11, 16  ;;  %v3836_v28 = vsel %vm3644_vm5, %v3831_v33, %v13521_v48  ;;  %v3900_v5 = vshll.u32 %v13581_v53, 16  ;;  %v12083_v22 = vld [vmem:[#allocation2 + $0xd0] sm:$0xff]  }
 0x14f   : > { %11280 = vmatmul.mubr.bf16.gmra.mrb[72].mxu1 %v3860_v49  ;;  %v13546_v32 = vadd.f32 %v10363_v58, %v10362_v63  ;;  %v349_v49 = vld [vmem:[#allocation2 + $0x13c] sm:$0x1]  ;;  %v13566_v63 = vrot.slane %v4073_v60, 1  ;;  %v13578_v58 = vrot.slane %v4140_v38, 1  ;;  %v4040_v27 = vsel %vm3644_vm5, %v4035_v25, %v4039_v29 }
 0x150   : > { %11283 = vmatprep.mubr.bf16.mxu1 %v3896_v47  ;;  %4470 = vmatmul.mubr.bf16.gmra.mrb[108].mxu0 %v3764_v62  ;;  %v4106_v62 = vrot.slane %v4104_v34, 1  ;;  %v350_v14 = vsel %vm13274_vm4, 0, %v349_v49  ;;  %v4138_v47 = vshrl.u32 %v13541_v6, 16  ;;  %v3879_v34 = vor.u32 %v3878_v10, %v3874_v15 }
 0x151   : > { %4477 = vmatprep.mubr.bf16.mxu0 %v3812_v36  ;;  %351 = vst [vmem:[#allocation2 + $0x13c] sm:$0x1] %v350_v14  ;;  %v3910_v36 = vshrl.u32 %v13557_v8, 16  ;;  %v4176_v15 = vshll.u32 %v13573_v11, 16  ;;  %v3898_v60 = vshrl.u32 %v13581_v53, 16  ;;  %v4071_v8 = vor.u32 %v13551_v26, %v4066_v21 }
 0x152   : > { %v3884_v3 = vsel %vm3644_vm5, %v3879_v34, %v3883_v46  ;;  %v4107_v46 = vor.u32 %v4106_v62, %v4102_v45  ;;  %v3902_v29 = vrot.slane %v3900_v5, 1  ;;  %v4210_v26 = vshrl.u32 %v13603_v41, 16 }
 0x153   : > { %v10365_v12 = vpop.f32.mrb[4].mxu0  ;;  %v4178_v9 = vrot.slane %v4176_v15, 1  ;;  %v4212_v62 = vshll.u32 %v13603_v41, 16  ;;  %v4076_v14 = vsel %vm3644_vm5, %v4071_v8, %v13566_v63  ;;  %v3872_v25 = vsel %vm3644_vm5, %v3867_v23, %v3871_v61 }
 0x154   : > { %v10366_v54 = vpop.f32.mrb[5].mxu0  ;;  %v4143_v61 = vor.u32 %v13578_v58, %v4138_v47  ;;  %v3934_v6 = vshrl.u32 %v13623_v55, 16  ;;  %v12084_v58 = vld [vmem:[#allocation2 + $0xd8] ss:$0 sps:$4 sm:$0x11]   ;;  %v3982_v23 = vshrl.u32 %v12083_v22, 16 }
 0x155   : > { %v10368_v13 = vpop.f32.mrb[6].mxu0  ;;  %v13571_v35 = vadd.f32 %v10366_v54, %v10365_v12  ;;  %v3914_v12 = vrot.slane %v3912_v56, 1  ;;  %v12079_v54 = vld [vmem:[#allocation2 + $0xbc] sm:$0xff]   ;;  %v10495_v56 = vpop.f32.mrb[0].mxu1  ;;  %v4214_v63 = vrot.slane %v4212_v62, 1 }
 0x156   : > { %v10369_v39 = vpop.f32.mrb[7].mxu0  ;;  %v3946_v57 = vshrl.u32 %v12079_v54, 16  ;;  %v3948_v33 = vshll.u32 %v12079_v54, 16 }
 0x157   : > { %11284 = vmatmul.mubr.bf16.gmra.mrb[76].mxu1 %v3932_v4  ;;  %v13583_v0 = vadd.f32 %v10369_v39, %v10368_v13  ;;  %v12076_v4 = vld [vmem:[#allocation2 + $0x9c] ss:$0 sps:$4 sm:$0x11]   ;;  %v3919_v13 = vrot.slane %v3917_v17, 1  ;;  %v3915_v38 = vor.u32 %v3914_v12, %v3910_v36  ;;  %v3903_v17 = vor.u32 %v3902_v29, %v3898_v60 }
 0x158   : > { %11287 = vmatprep.mubr.bf16.mxu1 %v3968_v31  ;;  %4478 = vmatmul.mubr.bf16.gmra.mrb[112].mxu0 %v3800_v50  ;;  %v12070_v48 = vld [vmem:[#allocation2 + $0x13c] ss:$0 sps:$4 sm:$0x11]   ;;  %v271_v31 = vld [vmem:[#allocation2 + $0x164] sm:$0x1]  ;;  %v3905_v45 = vshll.u32 %v12076_v4, 16 }
 0x159   : > { %4485 = vmatprep.mubr.bf16.mxu0 %v3848_v20  ;;  %v4111_v20 = vrot.slane %v4109_v30, 1  ;;  %v272_v21 = vsel %vm13274_vm4, 0, %v271_v31  ;;  %v4145_v49 = vshll.u32 %v12070_v48, 16  ;;  %v12074_v39 = vld [vmem:[#allocation2 + $0x150] ss:$0 sps:$4 sm:$0x11]   ;;  %v3920_v59 = vsel %vm3644_vm5, %v3915_v38, %v3919_v13 }
 0x15a   : > { %273 = vst [vmem:[#allocation2 + $0x164] sm:$0x1] %v272_v21  ;;  %v4181_v37 = vshll.u32 %v12074_v39, 16  ;;  %v12080_v36 = vld [vmem:[#allocation2 + $0xc4] ss:$0 sps:$4 sm:$0x11]  }
 0x15b   : > { %v10371_v1 = vpop.f32.mrb[8].mxu0  ;;  %v4112_v53 = vsel %vm3644_vm5, %v4107_v46, %v4111_v20  ;;  %v4147_v34 = vrot.slane %v4145_v49, 1  ;;  %v3984_v60 = vshll.u32 %v12083_v22, 16  ;;  %v3989_v21 = vshll.u32 %v12084_v58, 16  ;;  %v10496_v39 = vpop.f32.mrb[1].mxu1 }
 0x15c   : > { %v10372_v44 = vpop.f32.mrb[9].mxu0  ;;  %v4183_v30 = vrot.slane %v4181_v37, 1  ;;  %v12086_v49 = vld [vmem:[#allocation2 + $0xc4] ss:$0 sps:$4 sm:$0x11]  }
 0x15d   : > { %v10374_v2 = vpop.f32.mrb[10].mxu0  ;;  %v13605_v10 = vadd.f32 %v10372_v44, %v10371_v1  ;;  %v3907_v1 = vrot.slane %v3905_v45, 1  ;;  %v3953_v44 = vshll.u32 %v12080_v36, 16  ;;  %v4148_v48 = vsel %vm3644_vm5, %v4143_v61, %v4147_v34 }
 0x15e   : > { %v10375_v19 = vpop.f32.mrb[11].mxu0  ;;  %v3986_v29 = vrot.slane %v3984_v60, 1  ;;  %v4215_v45 = vor.u32 %v4214_v63, %v4210_v26  ;;  %v3991_v36 = vrot.slane %v3989_v21, 1  ;;  %v3977_v26 = vshll.u32 %v12086_v49, 16 }
 0x15f   : > { %11288 = vmatmul.mubr.bf16.gmra.mrb[80].mxu1 %v4004_v42  ;;  %v13613_v50 = vadd.f32 %v10375_v19, %v10374_v2  ;;  %v3950_v42 = vrot.slane %v3948_v33, 1  ;;  %v12082_v2 = vld [vmem:[#allocation2 + $0xb0] ss:$0 sps:$4 sm:$0x11]   ;;  %v3936_v19 = vshll.u32 %v13623_v55, 16  ;;  %v3955_v5 = vrot.slane %v3953_v44, 1 }
 0x160   : > { %11291 = vmatprep.mubr.bf16.mxu1 %v4040_v27  ;;  %4486 = vmatmul.mubr.bf16.gmra.mrb[116].mxu0 %v3836_v28  ;;  %v4179_v28 = vor.u32 %v4178_v9, %v4174_v51  ;;  %v3941_v47 = vshll.u32 %v12082_v2, 16  ;;  %v3908_v54 = vsel %vm3644_vm5, %v3903_v17, %v3907_v1  ;;  %v13654_v55 = vadd.f32 %v10496_v39, %v10495_v56 }
 0x161   : > { %4493 = vmatprep.mubr.bf16.mxu0 %v3884_v3  ;;  %v12078_v15 = vld [vmem:[#allocation2 + $0x164] ss:$0 sps:$4 sm:$0x11]   ;;  %v13640_v3 = vld [vmem:[#allocation2 + $0xbc] sm:$0xff]   ;;  %v3951_v12 = vor.u32 %v3950_v42, %v3946_v57  ;;  %v3938_v20 = vrot.slane %v3936_v19, 1 }
 0x162   : > { %v4217_v11 = vshll.u32 %v12078_v15, 16  ;;  %v4184_v46 = vsel %vm3644_vm5, %v4179_v28, %v4183_v30  ;;  %v3972_v38 = vshll.u32 %v13640_v3, 16  ;;  %v3943_v57 = vrot.slane %v3941_v47, 1  ;;  %v12090_v42 = vld [vmem:[#allocation2 + $0xd8] ss:$0 sps:$4 sm:$0x11]  }
 0x163   : > { %v10377_v24 = vpop.f32.mrb[12].mxu0  ;;  %v3956_v9 = vsel %vm3644_vm5, %v3951_v12, %v3955_v5  ;;  %v3939_v37 = vor.u32 %v3938_v20, %v3934_v6  ;;  %v3970_v34 = vshrl.u32 %v13640_v3, 16  ;;  %v4013_v6 = vshll.u32 %v12090_v42, 16  ;;  %v12092_v47 = vld [vmem:[#allocation2 + $0x100] ss:$0 sps:$4 sm:$0x11]  }
 0x164   : > { %v10378_v40 = vpop.f32.mrb[13].mxu0  ;;  %v4219_v62 = vrot.slane %v4217_v11, 1  ;;  %v3974_v41 = vrot.slane %v3972_v38, 1  ;;  %v3979_v11 = vrot.slane %v3977_v26, 1 }
 0x165   : > { %v10380_v52 = vpop.f32.mrb[14].mxu0  ;;  %v13630_v7 = vadd.f32 %v10378_v40, %v10377_v24  ;;  %v10498_v40 = vpop.f32.mrb[2].mxu1  ;;  %v3944_v30 = vsel %vm3644_vm5, %v3939_v37, %v3943_v57  ;;  %v4015_v38 = vrot.slane %v4013_v6, 1 }
 0x166   : > { %v10381_v18 = vpop.f32.mrb[15].mxu0  ;;  %v10499_v22 = vpop.f32.mrb[3].mxu1  ;;  %v4220_v56 = vsel %vm3644_vm5, %v4215_v45, %v4219_v62  ;;  %v4061_v62 = vshll.u32 %v12092_v47, 16 }
 0x167   : > { %11292 = vmatmul.mubr.bf16.gmra.mrb[84].mxu1 %v4076_v14  ;;  %v13635_v27 = vadd.f32 %v10381_v18, %v10380_v52  ;;  %v12087_v14 = vld [vmem:[#allocation2 + $0xe4] sm:$0xff]   ;;  %v12088_v52 = vld [vmem:[#allocation2 + $0xec] ss:$0 sps:$4 sm:$0x11]   ;;  %v10501_v44 = vpop.f32.mrb[4].mxu1 }
 0x168   : > { %11295 = vmatprep.mubr.bf16.mxu1 %v4112_v53  ;;  %4494 = vmatmul.mubr.bf16.gmra.mrb[120].mxu0 %v3872_v25  ;;  %v13656_v53 = vld [vmem:[#allocation2 + $0xd0] sm:$0xff]   ;;  %v3987_v25 = vor.u32 %v3986_v29, %v3982_v23  ;;  %v4020_v33 = vshll.u32 %v12087_v14, 16  ;;  %v4018_v63 = vshrl.u32 %v12087_v14, 16  ;;  %v4025_v17 = vshll.u32 %v12088_v52, 16  ;;  %v10502_v28 = vpop.f32.mrb[5].mxu1 }
 0x169   : > { %4501 = vmatprep.mubr.bf16.mxu0 %v3920_v59  ;;  %v13659_v59 = vadd.f32 %v10499_v22, %v10498_v40  ;;  %v4008_v2 = vshll.u32 %v13656_v53, 16  ;;  %v13667_v5 = vadd.f32 %v10502_v28, %v10501_v44  ;;  %v10504_v58 = vpop.f32.mrb[6].mxu1  ;;  %v12095_v40 = vld [vmem:[#allocation2 + $0x10c] sm:$0xff]  }
 0x16a   : > { %v3992_v3 = vsel %vm3644_vm5, %v3987_v25, %v3991_v36  ;;  %v4022_v12 = vrot.slane %v4020_v33, 1  ;;  %v4027_v20 = vrot.slane %v4025_v17, 1  ;;  %v4092_v42 = vshll.u32 %v12095_v40, 16 }
 0x16b   : > { %v10383_v8 = vpop.f32.mrb[16].mxu0  ;;  %v4010_v49 = vrot.slane %v4008_v2, 1  ;;  %v12098_v2 = vld [vmem:[#allocation2 + $0x100] ss:$0 sps:$4 sm:$0x11]  }
 0x16c   : > { %v10384_v4 = vpop.f32.mrb[17].mxu0 }
 0x16d   : > { %v10386_v51 = vpop.f32.mrb[18].mxu0  ;;  %v13646_v13 = vadd.f32 %v10384_v4, %v10383_v8  ;;  %v12091_v8 = vld [vmem:[#allocation2 + $0xf8] sm:$0xff]   ;;  %v10505_v4 = vpop.f32.mrb[7].mxu1 }
 0x16e   : > { %v10387_v31 = vpop.f32.mrb[19].mxu0  ;;  %v4056_v23 = vshll.u32 %v12091_v8, 16  ;;  %v10507_v29 = vpop.f32.mrb[8].mxu1  ;;  %v4054_v22 = vshrl.u32 %v12091_v8, 16 }
 0x16f   : > { %11296 = vmatmul.mubr.bf16.gmra.mrb[88].mxu1 %v4148_v48  ;;  %v13650_v24 = vadd.f32 %v10387_v31, %v10386_v51  ;;  %v13671_v48 = vld [vmem:[#allocation2 + $0xe4] sm:$0xff]   ;;  %v4006_v51 = vshrl.u32 %v13656_v53, 16  ;;  %v12094_v31 = vld [vmem:[#allocation2 + $0xec] ss:$0 sps:$4 sm:$0x11]   ;;  %v10508_v39 = vpop.f32.mrb[9].mxu1 }
 0x170   : > { %11299 = vmatprep.mubr.bf16.mxu1 %v4184_v46  ;;  %4502 = vmatmul.mubr.bf16.gmra.mrb[124].mxu0 %v3908_v54  ;;  %v3975_v54 = vor.u32 %v3974_v41, %v3970_v34  ;;  %v4023_v46 = vor.u32 %v4022_v12, %v4018_v63  ;;  %v4044_v57 = vshll.u32 %v13671_v48, 16  ;;  %v13677_v14 = vadd.f32 %v10508_v39, %v10507_v29  ;;  %v12096_v53 = vld [vmem:[#allocation2 + $0x114] ss:$0 sps:$4 sm:$0x11]   ;;  %v10510_v34 = vpop.f32.mrb[10].mxu1 }
 0x171   : > { %4509 = vmatprep.mubr.bf16.mxu0 %v3956_v9  ;;  %v13674_v9 = vadd.f32 %v10505_v4, %v10504_v58  ;;  %v4042_v41 = vshrl.u32 %v13671_v48, 16  ;;  %v4049_v26 = vshll.u32 %v12094_v31, 16  ;;  %v4097_v44 = vshll.u32 %v12096_v53, 16  ;;  %v13692_v48 = vld [vmem:[#allocation2 + $0x120] sm:$0xff]  }
 0x172   : > { %v3980_v52 = vsel %vm3644_vm5, %v3975_v54, %v3979_v11  ;;  %v4028_v33 = vsel %vm3644_vm5, %v4023_v46, %v4027_v20  ;;  %v4046_v63 = vrot.slane %v4044_v57, 1  ;;  %v4011_v17 = vor.u32 %v4010_v49, %v4006_v51  ;;  %v12100_v4 = vld [vmem:[#allocation2 + $0x128] ss:$0 sps:$4 sm:$0x11]  }
 0x173   : > { %v10389_v18 = vpop.f32.mrb[20].mxu0  ;;  %v4090_v12 = vshrl.u32 %v12095_v40, 16  ;;  %v4051_v47 = vrot.slane %v4049_v26, 1  ;;  %v4094_v11 = vrot.slane %v4092_v42, 1  ;;  %v4099_v31 = vrot.slane %v4097_v44, 1  ;;  %v13708_v26 = vld [vmem:[#allocation2 + $0x134] sm:$0xff]  }
 0x174   : > { %v10390_v1 = vpop.f32.mrb[21].mxu0  ;;  %v4085_v39 = vshll.u32 %v12098_v2, 16  ;;  %v4128_v57 = vshll.u32 %v13692_v48, 16 }
 0x175   : > { %v10392_v61 = vpop.f32.mrb[22].mxu0  ;;  %v13664_v15 = vadd.f32 %v10390_v1, %v10389_v18  ;;  %v4058_v18 = vrot.slane %v4056_v23, 1  ;;  %v4063_v1 = vrot.slane %v4061_v62, 1  ;;  %v4016_v23 = vsel %vm3644_vm5, %v4011_v17, %v4015_v38  ;;  %v12102_v62 = vld [vmem:[#allocation2 + $0x114] ss:$0 sps:$4 sm:$0x11]  }
 0x176   : > { %v10393_v19 = vpop.f32.mrb[23].mxu0  ;;  %v4095_v42 = vor.u32 %v4094_v11, %v4090_v12  ;;  %v4087_v44 = vrot.slane %v4085_v39, 1  ;;  %v4130_v2 = vrot.slane %v4128_v57, 1 }
 0x177   : > { %11300 = vmatmul.mubr.bf16.gmra.mrb[92].mxu1 %v4220_v56  ;;  %v13669_v60 = vadd.f32 %v10393_v19, %v10392_v61  ;;  %v13686_v61 = vld [vmem:[#allocation2 + $0xf8] sm:$0xff]  }
 0x178   : > { %4510 = vmatmul.mubr.bf16.gmra.mrb[128].mxu0 %v3944_v30  ;;  %v10511_v30 = vpop.f32.mrb[11].mxu1  ;;  %v4080_v46 = vshll.u32 %v13686_v61, 16  ;;  %v4078_v53 = vshrl.u32 %v13686_v61, 16 }
 0x179   : > { %4517 = vmatprep.mubr.bf16.mxu0 %v3992_v3  ;;  %v13688_v28 = vadd.f32 %v10511_v30, %v10510_v34  ;;  %v10513_v19 = vpop.f32.mrb[12].mxu1  ;;  %v4059_v3 = vor.u32 %v4058_v18, %v4054_v22  ;;  %v4126_v30 = vshrl.u32 %v13692_v48, 16 }
 0x17a   : > { %v10514_v6 = vpop.f32.mrb[13].mxu1  ;;  %v4082_v38 = vrot.slane %v4080_v46, 1 }
 0x17b   : > { %v10395_v21 = vpop.f32.mrb[24].mxu0  ;;  %v13690_v58 = vadd.f32 %v10514_v6, %v10513_v19  ;;  %v10516_v20 = vpop.f32.mrb[14].mxu1  ;;  %v4064_v49 = vsel %vm3644_vm5, %v4059_v3, %v4063_v1  ;;  %v12104_v1 = vld [vmem:[#allocation2 + $0x13c] ss:$0 sps:$4 sm:$0x11]   ;;  %v4121_v19 = vshll.u32 %v12102_v62, 16 }
 0x17c   : > { %v10396_v45 = vpop.f32.mrb[25].mxu0  ;;  %v10517_v40 = vpop.f32.mrb[15].mxu1  ;;  %v4164_v3 = vshll.u32 %v13708_v26, 16 }
 0x17d   : > { %v10398_v37 = vpop.f32.mrb[26].mxu0  ;;  %v13680_v25 = vadd.f32 %v10396_v45, %v10395_v21  ;;  %v13699_v45 = vld [vmem:[#allocation2 + $0x10c] sm:$0xff]   ;;  %v13706_v18 = vadd.f32 %v10517_v40, %v10516_v20 }
 0x17e   : > { %v10399_v36 = vpop.f32.mrb[27].mxu0  ;;  %v4116_v22 = vshll.u32 %v13699_v45, 16  ;;  %v4114_v48 = vshrl.u32 %v13699_v45, 16  ;;  %v4162_v45 = vshrl.u32 %v13708_v26, 16 }
 0x17f   : > { %v13684_v56 = vadd.f32 %v10399_v36, %v10398_v37  ;;  %v4133_v36 = vshll.u32 %v12100_v4, 16  ;;  %v12106_v4 = vld [vmem:[#allocation2 + $0x128] ss:$0 sps:$4 sm:$0x11]  }
 0x180   : > { %4518 = vmatmul.mubr.bf16.gmra.mrb[132].mxu0 %v3980_v52  ;;  %v4047_v52 = vor.u32 %v4046_v63, %v4042_v41  ;;  %v13713_v63 = vld [vmem:[#allocation2 + $0x120] sm:$0xff]   ;;  %v4118_v46 = vrot.slane %v4116_v22, 1  ;;  %v4157_v40 = vshll.u32 %v12106_v4, 16 }
 0x181   : > { %4525 = vmatprep.mubr.bf16.mxu0 %v4028_v33  ;;  %v10519_v33 = vpop.f32.mrb[16].mxu1  ;;  %v4135_v11 = vrot.slane %v4133_v36, 1  ;;  %v4152_v39 = vshll.u32 %v13713_v63, 16  ;;  %v13728_v36 = vrot.slane %v4121_v19, 1 }
 0x182   : > { %v10520_v34 = vpop.f32.mrb[17].mxu1  ;;  %v13739_v26 = vrot.slane %v4157_v40, 1 }
 0x183   : > { %v10401_v8 = vpop.f32.mrb[28].mxu0  ;;  %v13711_v17 = vadd.f32 %v10520_v34, %v10519_v33  ;;  %v10522_v41 = vpop.f32.mrb[18].mxu1  ;;  %v4166_v33 = vrot.slane %v4164_v3, 1  ;;  %v12108_v34 = vld [vmem:[#allocation2 + $0x150] ss:$0 sps:$4 sm:$0x11]  }
 0x184   : > { %v10402_v54 = vpop.f32.mrb[29].mxu0  ;;  %v10523_v20 = vpop.f32.mrb[19].mxu1 }
 0x185   : > { %v10404_v51 = vpop.f32.mrb[30].mxu0  ;;  %v13696_v29 = vadd.f32 %v10402_v54, %v10401_v8  ;;  %v4052_v8 = vsel %vm3644_vm5, %v4047_v52, %v4051_v47  ;;  %v13724_v62 = vadd.f32 %v10523_v20, %v10522_v41  ;;  %v10525_v47 = vpop.f32.mrb[20].mxu1  ;;  %v4131_v41 = vor.u32 %v4130_v2, %v4126_v30 }
 0x186   : > { %v10405_v21 = vpop.f32.mrb[31].mxu0  ;;  %v10526_v52 = vpop.f32.mrb[21].mxu1 }
 0x187   : > { %v13702_v37 = vadd.f32 %v10405_v21, %v10404_v51  ;;  %v13720_v51 = vld [vmem:[#allocation2 + $0x148] sm:$0xff]   ;;  %v4100_v21 = vsel %vm3644_vm5, %v4095_v42, %v4099_v31  ;;  %v13731_v22 = vadd.f32 %v10526_v52, %v10525_v47  ;;  %v4083_v31 = vor.u32 %v4082_v38, %v4078_v53  ;;  %v13733_v42 = vld [vmem:[#allocation2 + $0x134] sm:$0xff]  }
 0x188   : > { %4526 = vmatmul.mubr.bf16.gmra.mrb[136].mxu0 %v4016_v23  ;;  %v4200_v3 = vshll.u32 %v13720_v51, 16  ;;  %v12111_v38 = vld [vmem:[#allocation6 + $0x100] sm:$0xff]  }
 0x189   : > { %4533 = vmatprep.mubr.bf16.mxu0 %v4064_v49  ;;  %v4169_v49 = vshll.u32 %v12104_v1, 16  ;;  %v10528_v1 = vpop.f32.mrb[22].mxu1  ;;  %v4088_v52 = vsel %vm3644_vm5, %v4083_v31, %v4087_v44  ;;  %10751 = vmatprep.subr.bf16.mxu0 %v12111_v38  ;;  %v13756_v44 = vld [vmem:[#allocation2 + $0x13c] ss:$0 sps:$4 sm:$0x11]  }
 0x18a   : > { %v4202_v30 = vrot.slane %v4200_v3, 1  ;;  %v4167_v3 = vor.u32 %v4166_v33, %v4162_v45 }
 0x18b   : > { %v10407_v61 = vpop.f32.mrb[32].mxu0 }
 0x18c   : > { %v10408_v6 = vpop.f32.mrb[33].mxu0 }
 0x18d   : > { %v13717_v54 = vadd.f32 %v10408_v6, %v10407_v61  ;;  %v10410_v12 = vpop.f32.mrb[34].mxu0  ;;  %v4171_v61 = vrot.slane %v4169_v49, 1  ;;  %v4136_v6 = vsel %vm3644_vm5, %v4131_v41, %v4135_v11 }
 0x18e   : > { %v10411_v23 = vpop.f32.mrb[35].mxu0 }
 0x18f   : > { %15701 = vst [vmem:[#allocation11_spill] sm:$0xff] %v13717_v54  ;;  %v13726_v57 = vadd.f32 %v10411_v23, %v10410_v12  ;;  %v13737_v12 = vrot.slane %v4152_v39, 1  ;;  %v4188_v39 = vshll.u32 %v13733_v42, 16 }
 0x190   : > { %4534 = vmatmul.mubr.bf16.gmra.mrb[140].mxu0 %v4052_v8  ;;  %v10529_v8 = vpop.f32.mrb[23].mxu1 }
 0x191   : > { %15702 = vst [vmem:[#allocation12_spill] sm:$0xff] %v13726_v57  ;;  %4541 = vmatprep.mubr.bf16.mxu0 %v4100_v21  ;;  %v13742_v20 = vadd.f32 %v10529_v8, %v10528_v1  ;;  %v10531_v53 = vpop.f32.mrb[24].mxu1  ;;  %v4205_v21 = vshll.u32 %v12108_v34, 16  ;;  %v12112_v1 = vld [vmem:[#allocation6 + $0xc0] sm:$0xff]  }
 0x192   : > { %v10532_v2 = vpop.f32.mrb[25].mxu1  ;;  %10752 = vmatpush3.bf16.msra.mxu0 %v12112_v1 }
 0x193   : > { %v10413_v19 = vpop.f32.mrb[36].mxu0  ;;  %v13749_v40 = vadd.f32 %v10532_v2, %v10531_v53  ;;  %v10534_v4 = vpop.f32.mrb[26].mxu1  ;;  %v12113_v53 = vld [vmem:[#allocation6 + $0x108] sm:$0xff]   ;;  %v13758_v38 = vrot.slane %v4205_v21, 1  ;;  %v13760_v2 = vrot.slane %v4188_v39, 1 }
 0x194   : > { %v10414_v23 = vpop.f32.mrb[37].mxu0  ;;  %v10535_v16 = vpop.f32.mrb[27].mxu1  ;;  %10753 = vmatprep.subr.bf16.mxu0 %v12113_v53  ;;  %v4172_v53 = vsel %vm3644_vm5, %v4167_v3, %v4171_v61 }
 0x195   : > { %v13745_v49 = vadd.f32 %v10414_v23, %v10413_v19  ;;  %v10416_v47 = vpop.f32.mrb[38].mxu0  ;;  %v13754_v57 = vadd.f32 %v10535_v16, %v10534_v4  ;;  %v10537_v19 = vpop.f32.mrb[28].mxu1  ;;  %v4119_v23 = vor.u32 %v4118_v46, %v4114_v48  ;;  %v12115_v4 = vld [vmem:[#allocation6 + $0x110] sm:$0xff]  }
 0x196   : > { %v10417_v8 = vpop.f32.mrb[39].mxu0  ;;  %v10538_v31 = vpop.f32.mrb[29].mxu1 }
 0x197   : > { %15703 = vst [vmem:[#allocation13_spill] sm:$0xff] %v13745_v49  ;;  %v13752_v34 = vadd.f32 %v10417_v8, %v10416_v47  ;;  %v13762_v11 = vadd.f32 %v10538_v31, %v10537_v19  ;;  %v10540_v41 = vpop.f32.mrb[30].mxu1  ;;  %v12114_v47 = vld [vmem:[#allocation6 + $0xc8] sm:$0xff]   ;;  %v4124_v19 = vsel %vm3644_vm5, %v4119_v23, %v13728_v36  ;;  %v12120_v36 = vld [vmem:[#allocation6 + $0x120] sm:$0xff]   ;;  %v15705_v23 = vshrl.u32 %v13713_v63, 16 }
 0x198   : > { %4542 = vmatmul.mubr.bf16.gmra.mrb[144].mxu0 %v4088_v52  ;;  %v10541_v16 = vpop.f32.mrb[31].mxu1 }
 0x199   : > { %15704 = vst [vmem:[#allocation14_spill] sm:$0xff] %v13752_v34  ;;  %4549 = vmatprep.mubr.bf16.mxu0 %v4136_v6  ;;  %v13764_v52 = vadd.f32 %v10541_v16, %v10540_v41  ;;  %v10543_v8 = vpop.f32.mrb[32].mxu1  ;;  %10754 = vmatpush3.bf16.msra.mxu0 %v12114_v47  ;;  %v12116_v34 = vld [vmem:[#allocation6 + $0xd0] sm:$0xff]   ;;  %v12117_v6 = vld [vmem:[#allocation6 + $0x118] sm:$0xff]   ;;  %v4193_v41 = vshll.u32 %v13756_v44, 16  ;;  %v12119_v16 = vld [vmem:[#allocation6 + $0x140] sm:$0xff]   ;;  %v4155_v61 = vor.u32 %v13737_v12, %v15705_v23 }
 0x19a   : > { %v10544_v46 = vpop.f32.mrb[33].mxu1  ;;  %10755 = vmatprep.subr.bf16.mxu0 %v12115_v4  ;;  %11303 = vmatprep.subr.bf16.mxu1 %v12119_v16  ;;  %v12123_v12 = vld [vmem:[#allocation6 + $0x128] sm:$0xff]  }
 0x19b   : > { %v10419_v1 = vpop.f32.mrb[40].mxu0  ;;  %v13770_v45 = vadd.f32 %v10544_v46, %v10543_v8  ;;  %v10546_v33 = vpop.f32.mrb[34].mxu1  ;;  %v12122_v8 = vld [vmem:[#allocation6 + $0x148] sm:$0xff]   ;;  %v15706_v46 = vshrl.u32 %v13720_v51, 16  ;;  %11304 = vmatpush3.bf16.msra.mxu1 %v12119_v16  ;;  %v4160_v51 = vsel %vm3644_vm5, %v4155_v61, %v13739_v26  ;;  %v15707_v26 = vshrl.u32 %v13733_v42, 16 }
 0x19c   : > { %v10420_v48 = vpop.f32.mrb[41].mxu0  ;;  %v10547_v47 = vpop.f32.mrb[35].mxu1  ;;  %11305 = vmatprep.subr.bf16.mxu1 %v12122_v8 }
 0x19d   : > { %v13766_v21 = vadd.f32 %v10420_v48, %v10419_v1  ;;  %v10422_v39 = vpop.f32.mrb[42].mxu0  ;;  %v13776_v49 = vadd.f32 %v10547_v47, %v10546_v33  ;;  %v10549_v4 = vpop.f32.mrb[36].mxu1  ;;  %10756 = vmatpush3.bf16.msra.mxu0 %v12116_v34  ;;  %v12118_v1 = vld [vmem:[#allocation6 + $0xd8] sm:$0xff]   ;;  %v12121_v34 = vld [vmem:[#allocation6 + $0xe0] sm:$0xff]   ;;  %v12125_v47 = vld [vmem:[#allocation6 + $0x150] sm:$0xff]   ;;  %v4191_v61 = vor.u32 %v13760_v2, %v15707_v26 }
 0x19e   : > { %v10423_v31 = vpop.f32.mrb[43].mxu0  ;;  %v10550_v48 = vpop.f32.mrb[37].mxu1  ;;  %10757 = vmatprep.subr.bf16.mxu0 %v12117_v6  ;;  %v12138_v26 = vld [vmem:[#allocation6 + $0x168] sm:$0xff]  }
 0x19f   : > { %v13774_v54 = vadd.f32 %v10423_v31, %v10422_v39  ;;  %v13781_v3 = vadd.f32 %v10550_v48, %v10549_v4  ;;  %v10552_v44 = vpop.f32.mrb[38].mxu1  ;;  %v4203_v39 = vor.u32 %v4202_v30, %v15706_v46  ;;  %11306 = vmatpush3.bf16.msra.mxu1 %v12122_v8 }
 0x1a0   : > { %4550 = vmatmul.mubr.bf16.gmra.mrb[148].mxu0 %v4124_v19  ;;  %v10553_v33 = vpop.f32.mrb[39].mxu1  ;;  %11307 = vmatprep.subr.bf16.mxu1 %v12125_v47 }
 0x1a1   : > { %4557 = vmatprep.mubr.bf16.mxu0 %v4172_v53  ;;  %v13785_v31 = vadd.f32 %v10553_v33, %v10552_v44  ;;  %10758 = vmatpush3.bf16.msra.mxu0 %v12118_v1  ;;  %v4208_v44 = vsel %vm3644_vm5, %v4203_v39, %v13758_v38  ;;  %v12124_v33 = vld [vmem:[#allocation6 + $0xe8] sm:$0xff]  }
 0x1a2   : > { %v10555_v6 = vpop.f32.mrb[40].mxu1  ;;  %10759 = vmatprep.subr.bf16.mxu0 %v12120_v36 }
 0x1a3   : > { %v10425_v19 = vpop.f32.mrb[44].mxu0  ;;  %v10556_v53 = vpop.f32.mrb[41].mxu1  ;;  %11308 = vmatpush3.bf16.msra.mxu1 %v12125_v47 }
 0x1a4   : > { %v10426_v63 = vpop.f32.mrb[45].mxu0  ;;  %v13791_v30 = vadd.f32 %v10556_v53, %v10555_v6  ;;  %v10558_v16 = vpop.f32.mrb[42].mxu1  ;;  %v4195_v6 = vrot.slane %v4193_v41, 1  ;;  %v12127_v53 = vld [vmem:[#allocation6 + $0xf0] sm:$0xff]  }
 0x1a5   : > { %v13787_v4 = vadd.f32 %v10426_v63, %v10425_v19  ;;  %v10428_v48 = vpop.f32.mrb[46].mxu0  ;;  %v10559_v1 = vpop.f32.mrb[43].mxu1  ;;  %10760 = vmatpush3.bf16.msra.mxu0 %v12121_v34  ;;  %v12126_v19 = vld [vmem:[#allocation6 + $0x130] sm:$0xff]   ;;  %v12128_v63 = vld [vmem:[#allocation6 + $0x158] sm:$0xff]  }
 0x1a6   : > { %v10429_v23 = vpop.f32.mrb[47].mxu0  ;;  %v13797_v36 = vadd.f32 %v10559_v1, %v10558_v16  ;;  %10761 = vmatprep.subr.bf16.mxu0 %v12123_v12  ;;  %11309 = vmatprep.subr.bf16.mxu1 %v12128_v63  ;;  %v12129_v34 = vld [vmem:[#allocation6 + $0x138] sm:$0xff]   ;;  %v4196_v2 = vsel %vm3644_vm5, %v4191_v61, %v4195_v6  ;;  %v12142_v61 = vld [vmem:[#allocation6 + $0x170] sm:$0xff]  }
 0x1a7   : > { %v13795_v46 = vadd.f32 %v10429_v23, %v10428_v48  ;;  %v12134_v48 = vld [vmem:[#allocation6 + $0x160] sm:$0xff]   ;;  %11310 = vmatpush3.bf16.msra.mxu1 %v12128_v63  ;;  %v12130_v1 = vld [vmem:[#allocation6 + $0xf8] sm:$0xff]  }
 0x1a8   : > { %4558 = vmatmul.mubr.bf16.gmra.mrb[152].mxu0 %v4160_v51  ;;  %11311 = vmatprep.subr.bf16.mxu1 %v12134_v48 }
 0x1a9   : > { %4565 = vmatprep.mubr.bf16.mxu0 %v4208_v44  ;;  %10762 = vmatpush3.bf16.msra.mxu0 %v12124_v33 }
 0x1aa   : > { %v10561_v38 = vpop.f32.mrb[44].mxu1  ;;  %10763 = vmatprep.subr.bf16.mxu0 %v12126_v19 }
 0x1ab   : > { %v10431_v8 = vpop.f32.mrb[48].mxu0  ;;  %v10562_v39 = vpop.f32.mrb[45].mxu1  ;;  %11312 = vmatpush3.bf16.msra.mxu1 %v12134_v48 }
 0x1ac   : > { %v10432_v16 = vpop.f32.mrb[49].mxu0  ;;  %v13802_v51 = vadd.f32 %v10562_v39, %v10561_v38  ;;  %v10564_v12 = vpop.f32.mrb[46].mxu1  ;;  %11313 = vmatprep.subr.bf16.mxu1 %v12138_v26 }
 0x1ad   : > { %v13804_v23 = vadd.f32 %v10432_v16, %v10431_v8  ;;  %v10434_v42 = vpop.f32.mrb[50].mxu0  ;;  %v10565_v41 = vpop.f32.mrb[47].mxu1  ;;  %10764 = vmatpush3.bf16.msra.mxu0 %v12127_v53 }
 0x1ae   : > { %v10435_v44 = vpop.f32.mrb[51].mxu0  ;;  %v13807_v47 = vadd.f32 %v10565_v41, %v10564_v12  ;;  %10765 = vmatprep.subr.bf16.mxu0 %v12129_v34 }
 0x1af   : > { %15708 = vst [vmem:[#allocation15_spill] sm:$0xff] %v13804_v23  ;;  %v13809_v33 = vadd.f32 %v10435_v44, %v10434_v42  ;;  %11314 = vmatpush3.bf16.msra.mxu1 %v12138_v26 }
 0x1b0   : > { %4566 = vmatmul.mubr.bf16.gmra.mrb[156].mxu0 %v4196_v2  ;;  %11315 = vmatprep.subr.bf16.mxu1 %v12142_v61  ;;  %v12149_v2 = vld [vmem:[#allocation6 + $0x178] sm:$0xff]  }
 0x1b1   : > { %15709 = vst [vmem:[#allocation16_spill] sm:$0xff] %v13809_v33  ;;  %10766 = vmatpush3.bf16.msra.mxu0 %v12130_v1 }
 0x1b2   : > { %v10567_v38 = vpop.f32.mrb[48].mxu1 }
 0x1b3   : > { %v10437_v19 = vpop.f32.mrb[52].mxu0  ;;  %v10568_v8 = vpop.f32.mrb[49].mxu1  ;;  %11316 = vmatpush3.bf16.msra.mxu1 %v12142_v61 }
 0x1b4   : > { %v10438_v6 = vpop.f32.mrb[53].mxu0  ;;  %v13811_v39 = vadd.f32 %v10568_v8, %v10567_v38  ;;  %v10570_v16 = vpop.f32.mrb[50].mxu1  ;;  %11317 = vmatprep.subr.bf16.mxu1 %v12149_v2 }
 0x1b5   : > { %v13813_v63 = vadd.f32 %v10438_v6, %v10437_v19  ;;  %v10440_v12 = vpop.f32.mrb[54].mxu0  ;;  %v10571_v42 = vpop.f32.mrb[51].mxu1 }
 0x1b6   : > { %15710 = vst [vmem:[#allocation17_spill] sm:$0xff] %v13811_v39  ;;  %v10441_v53 = vpop.f32.mrb[55].mxu0  ;;  %v13815_v41 = vadd.f32 %v10571_v42, %v10570_v16 }
 0x1b7   : > { %v13817_v34 = vadd.f32 %v10441_v53, %v10440_v12  ;;  %11318 = vmatpush3.bf16.msra.mxu1 %v12149_v2 }
 0x1b8   : > { %15711 = vst [vmem:[#allocation18_spill] sm:$0xff] %v13815_v41 }
 0x1b9   : > { %15712 = vst [vmem:[#allocation19_spill] sm:$0xff] %v13817_v34 }
 0x1ba   : > { %v10573_v48 = vpop.f32.mrb[52].mxu1 }
 0x1bb   : > { %v10443_v44 = vpop.f32.mrb[56].mxu0  ;;  %v10574_v1 = vpop.f32.mrb[53].mxu1 }
 0x1bc   : > { %v10444_v33 = vpop.f32.mrb[57].mxu0  ;;  %v13819_v38 = vadd.f32 %v10574_v1, %v10573_v48  ;;  %v10576_v8 = vpop.f32.mrb[54].mxu1 }
 0x1bd   : > { %v13821_v19 = vadd.f32 %v10444_v33, %v10443_v44  ;;  %v10446_v6 = vpop.f32.mrb[58].mxu0  ;;  %v10577_v39 = vpop.f32.mrb[55].mxu1 }
 0x1be   : > { %15713 = vst [vmem:[#allocation20_spill] sm:$0xff] %v13819_v38  ;;  %v10447_v16 = vpop.f32.mrb[59].mxu0  ;;  %v13823_v42 = vadd.f32 %v10577_v39, %v10576_v8 }
 0x1bf   : > { %15714 = vst [vmem:[#allocation21_spill] sm:$0xff] %v13821_v19  ;;  %v13825_v26 = vadd.f32 %v10447_v16, %v10446_v6 }
 0x1c1   : > { %15715 = vst [vmem:[#allocation22_spill] sm:$0xff] %v13825_v26 }
 0x1c2   : > { %v10579_v12 = vpop.f32.mrb[56].mxu1 }
 0x1c3   : > { %v10449_v61 = vpop.f32.mrb[60].mxu0  ;;  %v10580_v53 = vpop.f32.mrb[57].mxu1 }
 0x1c4   : > { %v10450_v41 = vpop.f32.mrb[61].mxu0  ;;  %v13827_v34 = vadd.f32 %v10580_v53, %v10579_v12  ;;  %v10582_v48 = vpop.f32.mrb[58].mxu1 }
 0x1c5   : > { %v13829_v1 = vadd.f32 %v10450_v41, %v10449_v61  ;;  %v10452_v38 = vpop.f32.mrb[62].mxu0  ;;  %v10583_v33 = vpop.f32.mrb[59].mxu1 }
 0x1c6   : > { %15716 = vst [vmem:[#allocation23_spill] sm:$0xff] %v13827_v34  ;;  %v10453_v44 = vpop.f32.mrb[63].mxu0  ;;  %v13831_v19 = vadd.f32 %v10583_v33, %v10582_v48 }
 0x1c7   : > { %v13833_v23 = vadd.f32 %v10453_v44, %v10452_v38 }
 0x1ca   : > { %v10585_v39 = vpop.f32.mrb[60].mxu1 }
 0x1cb   : > { %v11177_v2 = vpop.f32.mrb[64].mxu0  ;;  %v10586_v8 = vpop.f32.mrb[61].mxu1 }
 0x1cc   : > { %v1618_v6 = vadd.f32 %v11177_v2, %v13571_v35  ;;  %v1609_v16 = vpop.f32.mrb[65].mxu0  ;;  %v13836_v26 = vadd.f32 %v10586_v8, %v10585_v39  ;;  %v10588_v12 = vpop.f32.mrb[62].mxu1 }
 0x1cd   : > { %v1610_v53 = vadd.f32 %v13528_v43, %v1609_v16  ;;  %v11178_v41 = vpop.f32.mrb[66].mxu0  ;;  %v10589_v61 = vpop.f32.mrb[63].mxu1 }
 0x1ce   : > { %v13840_v34 = vadd.f32 %v13667_v5, %v1618_v6  ;;  %v1621_v48 = vadd.f32 %v11178_v41, %v13583_v0  ;;  %v1612_v38 = vpop.f32.mrb[67].mxu0  ;;  %v13843_v33 = vadd.f32 %v10589_v61, %v10588_v12 }
 0x1cf   : > { %v13846_v44 = vadd.f32 %v13654_v55, %v1610_v53  ;;  %v1613_v35 = vadd.f32 %v13546_v32, %v1612_v38 }
 0x1d0   : > { %v13850_v39 = vadd.f32 %v13674_v9, %v1621_v48 }
 0x1d1   : > { %v13853_v43 = vadd.f32 %v13659_v59, %v1613_v35 }
 0x1d3   : > { %v11181_v2 = vpop.f32.mrb[68].mxu0 }
 0x1d4   : > { %v1634_v5 = vadd.f32 %v11181_v2, %v13630_v7  ;;  %v1625_v8 = vpop.f32.mrb[69].mxu0 }
 0x1d5   : > { %v1626_v0 = vadd.f32 %v13605_v10, %v1625_v8  ;;  %v11182_v6 = vpop.f32.mrb[70].mxu0 }
 0x1d6   : > { %v13858_v16 = vadd.f32 %v13690_v58, %v1634_v5  ;;  %v1637_v55 = vadd.f32 %v11182_v6, %v13635_v27  ;;  %v1628_v12 = vpop.f32.mrb[71].mxu0 }
 0x1d7   : > { %v13862_v32 = vadd.f32 %v13677_v14, %v1626_v0  ;;  %v1629_v9 = vadd.f32 %v13613_v50, %v1628_v12 }
 0x1d8   : > { %v13866_v59 = vadd.f32 %v13706_v18, %v1637_v55 }
 0x1d9   : > { %v13869_v7 = vadd.f32 %v13688_v28, %v1629_v9 }
 0x1db   : > { %v11185_v53 = vpop.f32.mrb[72].mxu0 }
 0x1dc   : > { %v1650_v10 = vadd.f32 %v11185_v53, %v13664_v15  ;;  %v1641_v41 = vpop.f32.mrb[73].mxu0 }
 0x1dd   : > { %v1642_v58 = vadd.f32 %v13646_v13, %v1641_v41  ;;  %v11186_v61 = vpop.f32.mrb[74].mxu0 }
 0x1de   : > { %v13874_v27 = vadd.f32 %v13731_v22, %v1650_v10  ;;  %v1653_v14 = vadd.f32 %v11186_v61, %v13669_v60  ;;  %v1644_v48 = vpop.f32.mrb[75].mxu0 }
 0x1df   : > { %v13878_v50 = vadd.f32 %v13711_v17, %v1642_v58  ;;  %v1645_v18 = vadd.f32 %v13650_v24, %v1644_v48 }
 0x1e0   : > { %v13882_v28 = vadd.f32 %v13742_v20, %v1653_v14 }
 0x1e1   : > { %v13885_v15 = vadd.f32 %v13724_v62, %v1645_v18 }
 0x1e3   : > { %v11189_v38 = vpop.f32.mrb[76].mxu0 }
 0x1e4   : > { %v1666_v13 = vadd.f32 %v11189_v38, %v13696_v29  ;;  %v1657_v35 = vpop.f32.mrb[77].mxu0 }
 0x1e5   : > { %v1658_v22 = vadd.f32 %v13680_v25, %v1657_v35  ;;  %v11190_v2 = vpop.f32.mrb[78].mxu0  ;;  %v15717_v25 = vld [vmem:[#allocation13_spill] sm:$0xff] }
 0x1e6   : > { %v13890_v60 = vadd.f32 %v13762_v11, %v1666_v13  ;;  %v1669_v17 = vadd.f32 %v11190_v2, %v13702_v37  ;;  %v1660_v5 = vpop.f32.mrb[79].mxu0  ;;  %v15718_v11 = vld [vmem:[#allocation11_spill] sm:$0xff] }
 0x1e7   : > { %v13894_v24 = vadd.f32 %v13749_v40, %v1658_v22  ;;  %v1661_v20 = vadd.f32 %v13684_v56, %v1660_v5  ;;  %v15719_v40 = vld [vmem:[#allocation14_spill] sm:$0xff]  ;;  %v15721_v2 = vld [vmem:[#allocation15_spill] sm:$0xff]  ;;  %v15722_v5 = vld [vmem:[#allocation20_spill] sm:$0xff] }
 0x1e8   : > { %v13898_v62 = vadd.f32 %v13764_v52, %v1669_v17  ;;  %v15720_v52 = vld [vmem:[#allocation12_spill] sm:$0xff] }
 0x1e9   : > { %v13901_v29 = vadd.f32 %v13754_v57, %v1661_v20 }
 0x1eb   : > { %v11193_v8 = vpop.f32.mrb[80].mxu0 }
 0x1ec   : > { %v1682_v0 = vadd.f32 %v11193_v8, %v15717_v25  ;;  %v1673_v6 = vpop.f32.mrb[81].mxu0 }
 0x1ed   : > { %v1674_v55 = vadd.f32 %v15718_v11, %v1673_v6  ;;  %v11194_v12 = vpop.f32.mrb[82].mxu0  ;;  %v15726_v11 = vld [vmem:[#allocation18_spill] sm:$0xff] }
 0x1ee   : > { %v13906_v37 = vadd.f32 %v13781_v3, %v1682_v0  ;;  %v1685_v9 = vadd.f32 %v11194_v12, %v15719_v40  ;;  %v1676_v53 = vpop.f32.mrb[83].mxu0  ;;  %v13920_v3 = vld [vmem:[#allocation6 + $0x80] sm:$0xff]  }
 0x1ef   : > { %v13910_v56 = vadd.f32 %v13770_v45, %v1674_v55  ;;  %v1677_v10 = vadd.f32 %v15720_v52, %v1676_v53  ;;  %11351 = vmatprep.subr.bf16.mxu1 %v13920_v3 }
 0x1f0   : > { %v13914_v57 = vadd.f32 %v13785_v31, %v1685_v9  ;;  %v15727_v9 = vld [vmem:[#allocation21_spill] sm:$0xff] }
 0x1f1   : > { %v13917_v41 = vadd.f32 %v13776_v49, %v1677_v10 }
 0x1f3   : > { %v11197_v58 = vpop.f32.mrb[84].mxu0 }
 0x1f4   : > { %v1698_v61 = vadd.f32 %v11197_v58, %v13787_v4  ;;  %v1689_v14 = vpop.f32.mrb[85].mxu0 }
 0x1f5   : > { %v1690_v48 = vadd.f32 %v13766_v21, %v1689_v14  ;;  %v11198_v18 = vpop.f32.mrb[86].mxu0  ;;  %v15729_v14 = vld [vmem:[#allocation23_spill] sm:$0xff] }
 0x1f6   : > { %v13924_v45 = vadd.f32 %v13802_v51, %v1698_v61  ;;  %v1701_v38 = vadd.f32 %v11198_v18, %v13795_v46  ;;  %v1692_v13 = vpop.f32.mrb[87].mxu0 }
 0x1f7   : > { %v13929_v49 = vadd.f32 %v13791_v30, %v1690_v48  ;;  %v1693_v31 = vadd.f32 %v13774_v54, %v1692_v13  ;;  %v15723_v30 = vld [vmem:[#allocation19_spill] sm:$0xff]  ;;  %v15724_v54 = vld [vmem:[#allocation17_spill] sm:$0xff] }
 0x1f8   : > { %v13933_v4 = vadd.f32 %v13807_v47, %v1701_v38  ;;  %v15725_v47 = vld [vmem:[#allocation16_spill] sm:$0xff] }
 0x1f9   : > { %v13936_v35 = vadd.f32 %v13797_v36, %v1693_v31 }
 0x1fb   : > { %v11201_v21 = vpop.f32.mrb[88].mxu0 }
 0x1fc   : > { %v1714_v51 = vadd.f32 %v11201_v21, %v13813_v63  ;;  %v1705_v22 = vpop.f32.mrb[89].mxu0 }
 0x1fd   : > { %v1706_v46 = vadd.f32 %v15721_v2, %v1705_v22  ;;  %v11202_v17 = vpop.f32.mrb[90].mxu0 }
 0x1fe   : > { %v13941_v20 = vadd.f32 %v15722_v5, %v1714_v51  ;;  %v1717_v8 = vadd.f32 %v11202_v17, %v15723_v30  ;;  %v1708_v25 = vpop.f32.mrb[91].mxu0 }
 0x1ff   : > { %v13945_v0 = vadd.f32 %v15724_v54, %v1706_v46  ;;  %v1709_v6 = vadd.f32 %v15725_v47, %v1708_v25 }
 0x200   : > { %v13949_v36 = vadd.f32 %v13823_v42, %v1717_v8  ;;  %v15730_v42 = vld [vmem:[#allocation22_spill] sm:$0xff] }
 0x201   : > { %v13952_v63 = vadd.f32 %v15726_v11, %v1709_v6 }
 0x203   : > { %v11205_v55 = vpop.f32.mrb[92].mxu0 }
 0x204   : > { %v1730_v12 = vadd.f32 %v11205_v55, %v13829_v1  ;;  %v1721_v40 = vpop.f32.mrb[93].mxu0 }
 0x205   : > { %v1722_v53 = vadd.f32 %v15727_v9, %v1721_v40  ;;  %v11206_v52 = vpop.f32.mrb[94].mxu0 }
 0x206   : > { %v13957_v10 = vadd.f32 %v13836_v26, %v1730_v12  ;;  %v1733_v58 = vadd.f32 %v11206_v52, %v13833_v23  ;;  %v1724_v61 = vpop.f32.mrb[95].mxu0 }
 0x207   : > { %v13961_v48 = vadd.f32 %v15729_v14, %v1722_v53  ;;  %v1725_v18 = vadd.f32 %v15730_v42, %v1724_v61  ;;  %v12253_v14 = vld [vmem:[#allocation6 + $0x40] sm:$0xff]  }
 0x208   : > { %15728 = vst [vmem:[#allocation13_spill] sm:$0xff] %v13957_v10  ;;  %v13965_v38 = vadd.f32 %v13843_v33, %v1733_v58  ;;  %v13975_v33 = vld [vmem:[%s15573_s2] ss:$0 sm:$0xff]  ;;  %10887 = vmatprep.subr.bf16.mxu0 %v12253_v14 }
 0x209   : > { %v13968_v1 = vadd.f32 %v13831_v19, %v1725_v18 }
 0x20a   : > { %15731 = vst [vmem:[#allocation11_spill] sm:$0xff] %v13965_v38  ;;  %v12285_v38 = vld [vmem:[#allocation6 + $0x28] sm:$0xff]  }
 0x20b   : > { %v10631_v13 = vpop.f32.mrb[96].mxu0 }
 0x20c   : > { %v10632_v31 = vpop.f32.mrb[97].mxu0 }
 0x20d   : > { %v10633_v21 = vadd.f32 %v10632_v31, %v10631_v13  ;;  %v10634_v51 = vpop.f32.mrb[98].mxu0 }
 0x20e   : > { %v10635_v26 = vpop.f32.mrb[99].mxu0 }
 0x20f   : > { %v11453_v22 = vadd.f32 %v10633_v21, %v13846_v44  ;;  %v10636_v23 = vadd.f32 %v10635_v26, %v10634_v51 }
 0x211   : > { %v11461_v2 = vadd.f32 %v10636_v23, %v13853_v43 }
 0x212   : > { %v11273_v46 = vpop.f32.mrb[64].mxu1 }
 0x213   : > { %v4608_v17 = vpop.f32.mrb[65].mxu1  ;;  %v10637_v5 = vpop.f32.mrb[100].mxu0 }
 0x214   : > { %v11454_v19 = vadd.f32 %v11453_v22, %v4608_v17  ;;  %v11274_v30 = vpop.f32.mrb[66].mxu1  ;;  %v10638_v8 = vpop.f32.mrb[101].mxu0 }
 0x215   : > { %v4611_v25 = vpop.f32.mrb[67].mxu1  ;;  %v10639_v54 = vadd.f32 %v10638_v8, %v10637_v5  ;;  %v10640_v47 = vpop.f32.mrb[102].mxu0 }
 0x216   : > { %v4774_v6 = vadd.f32 %v11454_v19, %v13975_v33  ;;  %v11462_v44 = vadd.f32 %v11461_v2, %v4611_v25  ;;  %v10641_v11 = vpop.f32.mrb[103].mxu0 }
 0x217   : > { %v11449_v43 = vadd.f32 %v10639_v54, %v13840_v34  ;;  %v10642_v55 = vadd.f32 %v10641_v11, %v10640_v47  ;;  %v5046_v54 = vld [vmem:[#allocation3 + $0x18] sm:$0x8] }
 0x218   : > { %v4806_v12 = vmax.f32 %v4774_v6, 0.0  ;;  %v4775_v40 = vadd.f32 %v11462_v44, %v13975_v33  ;;  %v4999_v6 = vld [vmem:[#allocation3 + $0x8] sm:$0xf]  ;;  %v13989_v44 = vld [vmem:[#allocation3 + $0xc] sm:$0xf] }
 0x219   : > { %v11450_v9 = vadd.f32 %v11449_v43, %v11273_v46  ;;  %v11457_v53 = vadd.f32 %v10642_v55, %v13850_v39 }
 0x21a   : > { %v10231_v52 = vpack.c.bf16 %v4806_v12, %v4806_v12  ;;  %v4807_v58 = vmax.f32 %v4775_v40, 0.0  ;;  %v11277_v61 = vpop.f32.mrb[68].mxu1 }
 0x21b   : > { %v4776_v42 = vadd.f32 %v11450_v9, %v13975_v33  ;;  %v4624_v18 = vpop.f32.mrb[69].mxu1  ;;  %v11458_v13 = vadd.f32 %v11457_v53, %v11274_v30  ;;  %v10643_v31 = vpop.f32.mrb[104].mxu0 }
 0x21c   : > { %4966 = vst [vmem:[#allocation3 + $0x1c] sm:$0xf] %v10231_v52  ;;  %v10232_v21 = vpack.c.bf16 %v4807_v58, %v4807_v58  ;;  %v13982_v51 = vpop.f32.mrb[70].mxu1  ;;  %v10644_v34 = vpop.f32.mrb[105].mxu0 }
 0x21d   : > { %v4777_v26 = vadd.f32 %v11458_v13, %v13975_v33  ;;  %v4627_v22 = vpop.f32.mrb[71].mxu1  ;;  %v10645_v23 = vadd.f32 %v10644_v34, %v10643_v31  ;;  %v10646_v39 = vpop.f32.mrb[106].mxu0  ;;  %v4808_v46 = vmax.f32 %v4776_v42, 0.0  ;;  %v9978_v13 = vcombine.low %v4999_v6, %v13989_v44 }
 0x21e   : > { %4967 = vst [vmem:[#allocation3 + $0x20] sm:$0xf] %v10232_v21  ;;  %v10647_v2 = vpop.f32.mrb[107].mxu0 }
 0x21f   : > { %v4809_v17 = vmax.f32 %v4777_v26, 0.0  ;;  %v11469_v5 = vadd.f32 %v10645_v23, %v13862_v32  ;;  %v10648_v19 = vadd.f32 %v10647_v2, %v10646_v39  ;;  %v5001_v26 = vld [vmem:[#allocation3 + $0x18] sm:$0x8] }
 0x221   : > { %v10298_v30 = vpack.c.bf16 %v4809_v17, %v4808_v46  ;;  %v11470_v8 = vadd.f32 %v11469_v5, %v4624_v18  ;;  %v11477_v25 = vadd.f32 %v10648_v19, %v13869_v7  ;;  %v5049_v17 = vld [vmem:[#allocation3 + $0x2c] sm:$0x8]  ;;  %v12256_v19 = vld [vmem:[#allocation6 + $0x48] sm:$0xff]  }
 0x222   : > { %v13987_v47 = vpop.f32.mrb[72].mxu1 }
 0x223   : > { %10335 = vst [vmem:[#allocation3 + $0x30] sm:$0xff] %v10298_v30   ;;  %v4778_v11 = vadd.f32 %v11470_v8, %v13975_v33  ;;  %v13992_v43 = vpop.f32.mrb[73].mxu1  ;;  %v11478_v55 = vadd.f32 %v11477_v25, %v4627_v22  ;;  %v10649_v12 = vpop.f32.mrb[108].mxu0  ;;  %v5047_v40 = vld [vmem:[#allocation3 + $0x1c] sm:$0xf]  ;;  %v12255_v22 = vld [vmem:[#allocation6] sm:$0xff]  }
 0x224   : > { %v13994_v32 = vpop.f32.mrb[74].mxu1  ;;  %v10650_v9 = vpop.f32.mrb[109].mxu0  ;;  %v13996_v53 = vcombine.low %v5046_v54, %v5047_v40  ;;  %v14005_v5 = vld [vmem:[#allocation3 + $0x1c] sm:$0xf]  ;;  %v5095_v25 = vld [vmem:[#allocation3 + $0x2c] sm:$0x8] }
 0x225   : > { %v4810_v7 = vmax.f32 %v4778_v11, 0.0  ;;  %v4779_v52 = vadd.f32 %v11478_v55, %v13975_v33  ;;  %v13999_v58 = vpop.f32.mrb[75].mxu1  ;;  %v10651_v14 = vadd.f32 %v10650_v9, %v10649_v12  ;;  %v10652_v42 = vpop.f32.mrb[110].mxu0  ;;  %v5048_v18 = vld [vmem:[#allocation3 + $0x20] sm:$0xf]  ;;  %v12257_v12 = vld [vmem:[#allocation6 + $0x8] sm:$0xff]  }
 0x226   : > { %15732 = vst [vmem:[#allocation14_spill] sm:$0xff] %v13996_v53  ;;  %v14002_v31 = vcombine.low %v5048_v18, %v5048_v18  ;;  %v9994_v21 = vcombine.low %v5047_v40, %v5048_v18  ;;  %v10653_v34 = vpop.f32.mrb[111].mxu0  ;;  %v5003_v55 = vld [vmem:[#allocation3 + $0x20] sm:$0xf]  ;;  %v14077_v53 = vld [vmem:[#allocation6 + $0x90] sm:$0xff]  }
 0x227   : > { %v10235_v23 = vpack.c.bf16 %v4810_v7, %v4810_v7  ;;  %v4811_v39 = vmax.f32 %v4779_v52, 0.0  ;;  %v11465_v2 = vadd.f32 %v10651_v14, %v13858_v16  ;;  %v10654_v46 = vadd.f32 %v10653_v34, %v10652_v42 }
 0x228   : > { %15733 = vst [vmem:[#allocation12_spill] sm:$0xff] %v14002_v31  ;;  %5896 = vmatprep.mubr.bf16.mxu0 %v9994_v21  ;;  %v14014_v52 = vcombine.low %v5001_v26, %v14005_v5  ;;  %v14032_v40 = vcombine.low %v5003_v55, %v5003_v55  ;;  %v9979_v8 = vcombine.low %v14005_v5, %v5003_v55  ;;  %v5055_v31 = vld [vmem:[#allocation3 + $0x54] sm:$0x8] }
 0x229   : > { %4970 = vst [vmem:[#allocation3 + $0x44] sm:$0xf] %v10235_v23  ;;  %v10236_v54 = vpack.c.bf16 %v4811_v39, %v4811_v39  ;;  %v11466_v6 = vadd.f32 %v11465_v2, %v11277_v61  ;;  %v11473_v11 = vadd.f32 %v10654_v46, %v13866_v59  ;;  %5897 = vmatmul.mubr.bf16.vlgmr.msra.gmra.mrb[160].mxu0 %v9978_v13  ;;  %v12267_v46 = vld [vmem:[#allocation6 + $0x50] sm:$0xff]  }
 0x22a   : > { %v14010_v16 = vpop.f32.mrb[76].mxu1  ;;  %v5050_v9 = vld [vmem:[#allocation3 + $0x30] sm:$0xf]  ;;  %v5051_v7 = vld [vmem:[#allocation3 + $0x34] sm:$0xf]  ;;  %15734 = vst [vmem:[#allocation15_spill] sm:$0xff] %v14014_v52  ;;  %10888 = vmatpush3.bf16.msra.mxu0 %v12255_v22 }
 0x22b   : > { %4971 = vst [vmem:[#allocation3 + $0x48] sm:$0xf] %v10236_v54  ;;  %v4780_v14 = vadd.f32 %v11466_v6, %v13975_v33  ;;  %v14017_v42 = vpop.f32.mrb[77].mxu1  ;;  %v11474_v59 = vadd.f32 %v11473_v11, %v13982_v51  ;;  %v10655_v61 = vpop.f32.mrb[112].mxu0  ;;  %v14020_v18 = vcombine.low %v5049_v17, %v5050_v9  ;;  %v5096_v13 = vld [vmem:[#allocation3 + $0x30] sm:$0xf]  ;;  %10889 = vmatprep.subr.bf16.mxu0 %v12256_v19 }
 0x22c   : > { %v5097_v21 = vld [vmem:[#allocation3 + $0x34] sm:$0xf]  ;;  %v14022_v34 = vpop.f32.mrb[78].mxu1  ;;  %v10656_v26 = vpop.f32.mrb[113].mxu0  ;;  %v14025_v39 = vcombine.low %v5051_v7, %v5051_v7  ;;  %v9995_v22 = vcombine.low %v5050_v9, %v5051_v7  ;;  %v14030_v11 = vcombine.low %v5095_v25, %v5096_v13  ;;  %15738 = vst [vmem:[#allocation16_spill] sm:$0xff] %v14032_v40  ;;  %v12270_v7 = vld [vmem:[#allocation6 + $0x58] sm:$0xff]  }
 0x22d   : > { %15735 = vst [vmem:[#allocation20_spill] sm:$0xff] %v14020_v18  ;;  %v10010_v2 = vcombine.low %v5096_v13, %v5097_v21  ;;  %v4781_v54 = vadd.f32 %v11474_v59, %v13975_v33  ;;  %v14028_v6 = vpop.f32.mrb[79].mxu1  ;;  %v10657_v51 = vadd.f32 %v10656_v26, %v10655_v61  ;;  %v10658_v17 = vpop.f32.mrb[114].mxu0  ;;  %v14034_v19 = vcombine.low %v5097_v21, %v5097_v21  ;;  %v5052_v13 = vld [vmem:[#allocation3 + $0x40] sm:$0x8] }
 0x22e   : > { %15736 = vst [vmem:[#allocation19_spill] sm:$0xff] %v14025_v39  ;;  %15737 = vst [vmem:[#allocation17_spill] sm:$0xff] %v14030_v11  ;;  %5904 = vmatprep.mubr.bf16.mxu0 %v9995_v22  ;;  %v10659_v23 = vpop.f32.mrb[115].mxu0  ;;  %v4812_v59 = vmax.f32 %v4780_v14, 0.0  ;;  %v5004_v26 = vld [vmem:[#allocation3 + $0x2c] sm:$0x8]  ;;  %10890 = vmatpush3.bf16.msra.mxu0 %v12257_v12 }
 0x22f   : > { %15739 = vst [vmem:[#allocation18_spill] sm:$0xff] %v14034_v19  ;;  %11319 = vmatprep.mubr.bf16.mxu1 %v10010_v2  ;;  %v4813_v30 = vmax.f32 %v4781_v54, 0.0  ;;  %v11485_v61 = vadd.f32 %v10657_v51, %v13878_v50  ;;  %v12269_v22 = vld [vmem:[#allocation6 + $0x10] sm:$0xff]   ;;  %v10660_v55 = vadd.f32 %v10659_v23, %v10658_v17  ;;  %10891 = vmatprep.subr.bf16.mxu0 %v12267_v46  ;;  %v5005_v12 = vld [vmem:[#allocation3 + $0x30] sm:$0xf]  ;;  %v12271_v2 = vld [vmem:[#allocation6 + $0x18] sm:$0xff]  }
 0x230   : > { %v5053_v9 = vld [vmem:[#allocation3 + $0x44] sm:$0xf]  ;;  %v5006_v25 = vld [vmem:[#allocation3 + $0x34] sm:$0xf]  ;;  %v14066_v50 = vcombine.low %v5004_v26, %v5005_v12  ;;  %v12281_v39 = vld [vmem:[#allocation6 + $0x60] sm:$0xff]  }
 0x231   : > { %v10303_v14 = vpack.c.bf16 %v4813_v30, %v4812_v59  ;;  %v11486_v54 = vadd.f32 %v11485_v61, %v13992_v43  ;;  %5905 = vmatmul.mubr.bf16.gmra.mrb[164].mxu0 %v9979_v8  ;;  %v11493_v5 = vadd.f32 %v10660_v55, %v13885_v15  ;;  %v14051_v17 = vcombine.low %v5052_v13, %v5053_v9  ;;  %v14059_v51 = vld [vmem:[#allocation3 + $0x44] sm:$0xf]  ;;  %v12223_v59 = vld [vmem:[#allocation6 + $0x88] sm:$0xff]   ;;  %v5058_v40 = vld [vmem:[#allocation3 + $0x68] sm:$0x8] }
 0x232   : > { %v14047_v52 = vpop.f32.mrb[80].mxu1  ;;  %v5054_v23 = vld [vmem:[#allocation3 + $0x48] sm:$0xf]  ;;  %10892 = vmatpush3.bf16.msra.mxu0 %v12269_v22  ;;  %15742 = vst [vmem:[#allocation22_spill] sm:$0xff] %v14066_v50  ;;  %v9980_v11 = vcombine.low %v5005_v12, %v5006_v25  ;;  %v14082_v22 = vcombine.low %v5006_v25, %v5006_v25  ;;  %v12243_v50 = vld [vmem:[#allocation6 + $0x98] sm:$0xff]  }
 0x233   : > { %15740 = vst [vmem:[#allocation21_spill] sm:$0xff] %v14051_v17  ;;  %v5100_v46 = vld [vmem:[#allocation3 + $0x48] sm:$0xf]  ;;  %10336 = vst [vmem:[#allocation3 + $0x58] sm:$0xff] %v10303_v14   ;;  %v4782_v43 = vadd.f32 %v11486_v54, %v13975_v33  ;;  %v14054_v30 = vpop.f32.mrb[81].mxu1  ;;  %v10661_v8 = vpop.f32.mrb[116].mxu0  ;;  %v14057_v61 = vcombine.low %v5054_v23, %v5054_v23  ;;  %v9996_v21 = vcombine.low %v5053_v9, %v5054_v23  ;;  %10893 = vmatprep.subr.bf16.mxu0 %v12270_v7 }
 0x234   : > { %v14061_v15 = vpop.f32.mrb[82].mxu1  ;;  %v11494_v13 = vadd.f32 %v11493_v5, %v13999_v58  ;;  %v10662_v14 = vpop.f32.mrb[117].mxu0  ;;  %v10011_v54 = vcombine.low %v14059_v51, %v5100_v46  ;;  %v5007_v58 = vld [vmem:[#allocation3 + $0x40] sm:$0x8]  ;;  %v14071_v5 = vld [vmem:[#allocation3 + $0x44] sm:$0xf] }
 0x235   : > { %15741 = vst [vmem:[#allocation23_spill] sm:$0xff] %v14057_v61  ;;  %v4814_v18 = vmax.f32 %v4782_v43, 0.0  ;;  %v14068_v9 = vpop.f32.mrb[83].mxu1  ;;  %v10663_v23 = vadd.f32 %v10662_v14, %v10661_v8  ;;  %v10664_v19 = vpop.f32.mrb[118].mxu0  ;;  %5912 = vmatprep.mubr.bf16.mxu0 %v9996_v21  ;;  %15743 = vst [vmem:[#allocation24_spill] sm:$0xff] %v14082_v22  ;;  %v14091_v7 = vcombine.low %v5007_v58, %v14071_v5 }
 0x236   : > { %v4783_v55 = vadd.f32 %v11494_v13, %v13975_v33  ;;  %11320 = vmatmul.mubr.bf16.vlgmr.msra.gmra.mrb[96].mxu1 %v10011_v54  ;;  %v10665_v43 = vpop.f32.mrb[119].mxu0  ;;  %10894 = vmatpush3.bf16.msra.mxu0 %v12271_v2  ;;  %v12283_v13 = vld [vmem:[#allocation6 + $0x20] sm:$0xff]   ;;  %v5101_v54 = vld [vmem:[#allocation3 + $0x54] sm:$0x8] }
 0x237   : > { %v10239_v8 = vpack.c.bf16 %v4814_v18, %v4814_v18  ;;  %v11481_v21 = vadd.f32 %v10663_v23, %v13874_v27  ;;  %v10666_v14 = vadd.f32 %v10665_v43, %v10664_v19  ;;  %11352 = vmatpush3.bf16.msra.mxu1 %v13920_v3  ;;  %10895 = vmatprep.subr.bf16.mxu0 %v12281_v39  ;;  %v5009_v23 = vld [vmem:[#allocation3 + $0x48] sm:$0xf]  ;;  %v12284_v19 = vld [vmem:[#allocation6 + $0x68] sm:$0xff]  }
 0x238   : > { %v4815_v26 = vmax.f32 %v4783_v55, 0.0  ;;  %11353 = vmatprep.subr.bf16.mxu1 %v12223_v59  ;;  %15744 = vst [vmem:[#allocation25_spill] sm:$0xff] %v14091_v7  ;;  %v9981_v17 = vcombine.low %v14071_v5, %v5009_v23 }
 0x239   : > { %4974 = vst [vmem:[#allocation3 + $0x6c] sm:$0xf] %v10239_v8  ;;  %v11482_v18 = vadd.f32 %v11481_v21, %v13987_v47  ;;  %v11489_v27 = vadd.f32 %v10666_v14, %v13882_v28  ;;  %5913 = vmatmul.mubr.bf16.gmra.mrb[168].mxu0 %v9980_v11 }
 0x23a   : > { %v10240_v43 = vpack.c.bf16 %v4815_v26, %v4815_v26  ;;  %v14087_v3 = vpop.f32.mrb[84].mxu1  ;;  %v5056_v25 = vld [vmem:[#allocation3 + $0x58] sm:$0xf]  ;;  %v5057_v55 = vld [vmem:[#allocation3 + $0x5c] sm:$0xf]  ;;  %10896 = vmatpush3.bf16.msra.mxu0 %v12283_v13 }
 0x23b   : > { %v4784_v39 = vadd.f32 %v11482_v18, %v13975_v33  ;;  %v14094_v8 = vpop.f32.mrb[85].mxu1  ;;  %v11490_v47 = vadd.f32 %v11489_v27, %v13994_v32  ;;  %v10667_v28 = vpop.f32.mrb[120].mxu0  ;;  %v14097_v11 = vcombine.low %v5055_v31, %v5056_v25  ;;  %v5102_v21 = vld [vmem:[#allocation3 + $0x58] sm:$0xf]  ;;  %v5103_v26 = vld [vmem:[#allocation3 + $0x5c] sm:$0xf]  ;;  %11354 = vmatpush3.bf16.msra.mxu1 %v12223_v59  ;;  %v14102_v58 = vcombine.low %v5057_v55, %v5057_v55 }
 0x23c   : > { %4975 = vst [vmem:[#allocation3 + $0x70] sm:$0xf] %v10240_v43  ;;  %v14099_v14 = vpop.f32.mrb[86].mxu1  ;;  %v10668_v12 = vpop.f32.mrb[121].mxu0  ;;  %v9997_v46 = vcombine.low %v5056_v25, %v5057_v55  ;;  %v10012_v18 = vcombine.low %v5102_v21, %v5103_v26  ;;  %11355 = vmatprep.subr.bf16.mxu1 %v14077_v53  ;;  %v14109_v61 = vcombine.low %v5101_v54, %v5102_v21  ;;  %v5104_v13 = vld [vmem:[#allocation3 + $0x68] sm:$0x8] }
 0x23d   : > { %15745 = vst [vmem:[#allocation26_spill] sm:$0xff] %v14097_v11  ;;  %15746 = vst [vmem:[#allocation27_spill] sm:$0xff] %v14102_v58  ;;  %v4785_v32 = vadd.f32 %v11490_v47, %v13975_v33  ;;  %v14106_v31 = vpop.f32.mrb[87].mxu1  ;;  %v10669_v59 = vadd.f32 %v10668_v12, %v10667_v28  ;;  %v10670_v43 = vpop.f32.mrb[122].mxu0  ;;  %v14111_v2 = vcombine.low %v5103_v26, %v5103_v26  ;;  %v4816_v10 = vmax.f32 %v4784_v39, 0.0  ;;  %v12254_v39 = vld [vmem:[#allocation6 + $0xa0] sm:$0xff]  }
 0x23e   : > { %5920 = vmatprep.mubr.bf16.mxu0 %v9997_v46  ;;  %11323 = vmatprep.mubr.bf16.mxu1 %v10012_v18  ;;  %v10671_v25 = vpop.f32.mrb[123].mxu0  ;;  %v14113_v55 = vcombine.low %v5009_v23, %v5009_v23  ;;  %v12298_v46 = vld [vmem:[#allocation6 + $0x70] sm:$0xff]   ;;  %v12301_v47 = vld [vmem:[#allocation6 + $0x78] sm:$0xff]   ;;  %v12268_v11 = vld [vmem:[#allocation6 + $0xa8] sm:$0xff]  }
 0x23f   : > { %15747 = vst [vmem:[#allocation28_spill] sm:$0xff] %v14111_v2  ;;  %v4817_v27 = vmax.f32 %v4785_v32, 0.0  ;;  %v11501_v12 = vadd.f32 %v10669_v59, %v13894_v24  ;;  %11356 = vmatpush3.bf16.msra.mxu1 %v14077_v53  ;;  %10897 = vmatprep.subr.bf16.mxu0 %v12284_v19  ;;  %v10672_v23 = vadd.f32 %v10671_v25, %v10670_v43  ;;  %v12300_v19 = vld [vmem:[#allocation6 + $0x30] sm:$0xff]   ;;  %v5010_v59 = vld [vmem:[#allocation3 + $0x54] sm:$0x8] }
 0x240   : > { %15748 = vst [vmem:[#allocation29_spill] sm:$0xff] %v14113_v55  ;;  %v5059_v26 = vld [vmem:[#allocation3 + $0x6c] sm:$0xf]  ;;  %11357 = vmatprep.subr.bf16.mxu1 %v12243_v50  ;;  %v5011_v5 = vld [vmem:[#allocation3 + $0x58] sm:$0xf]  ;;  %10898 = vmatpush3.bf16.msra.mxu0 %v12285_v38 }
 0x241   : > { %v10308_v18 = vpack.c.bf16 %v4817_v27, %v4816_v10  ;;  %v11502_v24 = vadd.f32 %v11501_v12, %v14017_v42  ;;  %5921 = vmatmul.mubr.bf16.gmra.mrb[172].mxu0 %v9981_v17  ;;  %v5105_v53 = vld [vmem:[#allocation3 + $0x6c] sm:$0xf]  ;;  %v11509_v43 = vadd.f32 %v10672_v23, %v13901_v29  ;;  %v14130_v25 = vcombine.low %v5058_v40, %v5059_v26  ;;  %v5012_v32 = vld [vmem:[#allocation3 + $0x5c] sm:$0xf] }
 0x242   : > { %v14126_v28 = vpop.f32.mrb[88].mxu1  ;;  %10899 = vmatprep.subr.bf16.mxu0 %v12298_v46 }
 0x243   : > { %15749 = vst [vmem:[#allocation30_spill] sm:$0xff] %v14130_v25  ;;  %10337 = vst [vmem:[#allocation3 + $0x80] sm:$0xff] %v10308_v18   ;;  %v4786_v10 = vadd.f32 %v11502_v24, %v13975_v33  ;;  %v14133_v42 = vpop.f32.mrb[89].mxu1  ;;  %v10673_v12 = vpop.f32.mrb[124].mxu0  ;;  %v5060_v54 = vld [vmem:[#allocation3 + $0x70] sm:$0xf]  ;;  %11358 = vmatpush3.bf16.msra.mxu1 %v12243_v50  ;;  %v11510_v29 = vadd.f32 %v11509_v43, %v14028_v6  ;;  %v14142_v24 = vcombine.low %v5104_v13, %v5105_v53 }
 0x244   : > { %v14137_v21 = vpop.f32.mrb[90].mxu1  ;;  %v10674_v40 = vpop.f32.mrb[125].mxu0  ;;  %v14140_v23 = vcombine.low %v5060_v54, %v5060_v54  ;;  %v9998_v38 = vcombine.low %v5059_v26, %v5060_v54  ;;  %v5106_v18 = vld [vmem:[#allocation3 + $0x70] sm:$0xf]  ;;  %11359 = vmatprep.subr.bf16.mxu1 %v12254_v39  ;;  %10900 = vmatpush3.bf16.msra.mxu0 %v12300_v19  ;;  %v5014_v25 = vld [vmem:[#allocation3 + $0x6c] sm:$0xf] }
 0x245   : > { %v4818_v17 = vmax.f32 %v4786_v10, 0.0  ;;  %v14144_v27 = vpop.f32.mrb[91].mxu1  ;;  %v10675_v46 = vadd.f32 %v10674_v40, %v10673_v12  ;;  %v10676_v7 = vpop.f32.mrb[126].mxu0  ;;  %v10013_v58 = vcombine.low %v5105_v53, %v5106_v18  ;;  %v4787_v6 = vadd.f32 %v11510_v29, %v13975_v33  ;;  %v12302_v10 = vld [vmem:[#allocation6 + $0x38] sm:$0xff]   ;;  %v5061_v40 = vld [vmem:[#allocation3 + $0x7c] sm:$0x8]  ;;  %10901 = vmatprep.subr.bf16.mxu0 %v12301_v47 }
 0x246   : > { %15750 = vst [vmem:[#allocation31_spill] sm:$0xff] %v14140_v23  ;;  %5928 = vmatprep.mubr.bf16.mxu0 %v9998_v38  ;;  %v14150_v13 = vcombine.low %v5106_v18, %v5106_v18  ;;  %v10677_v26 = vpop.f32.mrb[127].mxu0  ;;  %v9982_v53 = vcombine.low %v5011_v5, %v5012_v32  ;;  %v12282_v18 = vld [vmem:[#allocation6 + $0xb0] sm:$0xff]   ;;  %v5015_v50 = vld [vmem:[#allocation3 + $0x70] sm:$0xf] }
 0x247   : > { %v10243_v22 = vpack.c.bf16 %v4818_v17, %v4818_v17  ;;  %v11497_v2 = vadd.f32 %v10675_v46, %v13890_v60  ;;  %11324 = vmatmul.mubr.bf16.gmra.mrb[100].mxu1 %v10013_v58  ;;  %v4819_v29 = vmax.f32 %v4787_v6, 0.0  ;;  %v10678_v54 = vadd.f32 %v10677_v26, %v10676_v7 }
 0x248   : > { %15751 = vst [vmem:[#allocation32_spill] sm:$0xff] %v14150_v13  ;;  %11360 = vmatpush3.bf16.msra.mxu1 %v12254_v39  ;;  %v14159_v46 = vcombine.low %v5010_v59, %v5011_v5  ;;  %v14165_v39 = vcombine.low %v5012_v32, %v5012_v32  ;;  %10902 = vmatpush3.bf16.msra.mxu0 %v12302_v10  ;;  %v12299_v10 = vld [vmem:[#allocation6 + $0xb8] sm:$0xff]  }
 0x249   : > { %4978 = vst [vmem:[#allocation3 + $0x94] sm:$0xf] %v10243_v22  ;;  %v11498_v19 = vadd.f32 %v11497_v2, %v14010_v16  ;;  %5929 = vmatmul.mubr.bf16.gmra.mrb[176].mxu0 %v9982_v53  ;;  %11361 = vmatprep.subr.bf16.mxu1 %v12268_v11  ;;  %v10244_v58 = vpack.c.bf16 %v4819_v29, %v4819_v29  ;;  %v5107_v16 = vld [vmem:[#allocation3 + $0x7c] sm:$0x8] }
 0x24a   : > { %15752 = vst [vmem:[#allocation33_spill] sm:$0xff] %v14159_v46  ;;  %v14161_v47 = vpop.f32.mrb[92].mxu1  ;;  %v11505_v7 = vadd.f32 %v10678_v54, %v13898_v62  ;;  %15753 = vst [vmem:[#allocation34_spill] sm:$0xff] %v14165_v39  ;;  %v5062_v22 = vld [vmem:[#allocation3 + $0x80] sm:$0xf] }
 0x24b   : > { %v5063_v26 = vld [vmem:[#allocation3 + $0x84] sm:$0xf]  ;;  %v14167_v2 = vpop.f32.mrb[93].mxu1  ;;  %v10679_v17 = vpop.f32.mrb[128].mxu0  ;;  %v5108_v59 = vld [vmem:[#allocation3 + $0x80] sm:$0xf]  ;;  %v4788_v29 = vadd.f32 %v11498_v19, %v13975_v33  ;;  %v14173_v32 = vcombine.low %v5061_v40, %v5062_v22 }
 0x24c   : > { %v9999_v5 = vcombine.low %v5062_v22, %v5063_v26  ;;  %v5109_v53 = vld [vmem:[#allocation3 + $0x84] sm:$0xf]  ;;  %4979 = vst [vmem:[#allocation3 + $0x98] sm:$0xf] %v10244_v58  ;;  %v14170_v43 = vpop.f32.mrb[94].mxu1  ;;  %v11506_v12 = vadd.f32 %v11505_v7, %v14022_v34  ;;  %v10680_v62 = vpop.f32.mrb[129].mxu0  ;;  %11362 = vmatpush3.bf16.msra.mxu1 %v12268_v11  ;;  %v14179_v19 = vcombine.low %v5063_v26, %v5063_v26 }
 0x24d   : > { %15754 = vst [vmem:[#allocation35_spill] sm:$0xff] %v14173_v32  ;;  %v10014_v54 = vcombine.low %v5108_v59, %v5109_v53  ;;  %v14176_v60 = vpop.f32.mrb[95].mxu1  ;;  %v10681_v58 = vadd.f32 %v10680_v62, %v10679_v17  ;;  %v10682_v23 = vpop.f32.mrb[130].mxu0  ;;  %11363 = vmatprep.subr.bf16.mxu1 %v12282_v18  ;;  %v14186_v38 = vcombine.low %v5107_v16, %v5108_v59  ;;  %v5013_v26 = vld [vmem:[#allocation3 + $0x68] sm:$0x8]  ;;  %v4820_v62 = vmax.f32 %v4788_v29, 0.0 }
 0x24e   : > { %15755 = vst [vmem:[#allocation36_spill] sm:$0xff] %v14179_v19  ;;  %5936 = vmatprep.mubr.bf16.mxu0 %v9999_v5  ;;  %v4789_v34 = vadd.f32 %v11506_v12, %v13975_v33  ;;  %v10683_v22 = vpop.f32.mrb[131].mxu0  ;;  %v14188_v17 = vcombine.low %v5109_v53, %v5109_v53  ;;  %v9983_v5 = vcombine.low %v5014_v25, %v5015_v50  ;;  %v5064_v40 = vld [vmem:[#allocation3 + $0x90] sm:$0x8]  ;;  %v12303_v59 = vld [vmem:[#allocation6 + $0x1c0] sm:$0xff]  }
 0x24f   : > { %11327 = vmatprep.mubr.bf16.mxu1 %v10014_v54  ;;  %v11517_v6 = vadd.f32 %v10681_v58, %v13910_v56  ;;  %v10684_v13 = vadd.f32 %v10683_v22, %v10682_v23  ;;  %v14196_v58 = vcombine.low %v5013_v26, %v5014_v25  ;;  %v14198_v23 = vcombine.low %v5015_v50, %v5015_v50  ;;  %v5017_v7 = vld [vmem:[#allocation3 + $0x80] sm:$0xf]  ;;  %v5018_v54 = vld [vmem:[#allocation3 + $0x84] sm:$0xf] }
 0x250   : > { %v4821_v55 = vmax.f32 %v4789_v34, 0.0  ;;  %11364 = vmatpush3.bf16.msra.mxu1 %v12282_v18  ;;  %v5065_v16 = vld [vmem:[#allocation3 + $0x94] sm:$0xf]  ;;  %v5110_v18 = vld [vmem:[#allocation3 + $0x90] sm:$0x8] }
 0x251   : > { %v11518_v11 = vadd.f32 %v11517_v6, %v14054_v30  ;;  %5937 = vmatmul.mubr.bf16.gmra.mrb[180].mxu0 %v9983_v5  ;;  %11365 = vmatprep.subr.bf16.mxu1 %v12299_v10  ;;  %v11525_v29 = vadd.f32 %v10684_v13, %v13917_v41  ;;  %15756 = vst [vmem:[#allocation37_spill] sm:$0xff] %v14196_v58  ;;  %15757 = vst [vmem:[#allocation38_spill] sm:$0xff] %v14198_v23  ;;  %v5111_v13 = vld [vmem:[#allocation3 + $0x94] sm:$0xf] }
 0x252   : > { %v10313_v53 = vpack.c.bf16 %v4821_v55, %v4820_v62  ;;  %v14206_v34 = vcombine.low %v5064_v40, %v5065_v16  ;;  %v5016_v40 = vld [vmem:[#allocation3 + $0x7c] sm:$0x8] }
 0x253   : > { %v4790_v30 = vadd.f32 %v11518_v11, %v13975_v33  ;;  %v10685_v5 = vpop.f32.mrb[132].mxu0  ;;  %v5066_v56 = vld [vmem:[#allocation3 + $0x98] sm:$0xf]  ;;  %v11526_v55 = vadd.f32 %v11525_v29, %v14068_v9 }
 0x254   : > { %10338 = vst [vmem:[#allocation3 + $0xa8] sm:$0xff] %v10313_v53   ;;  %v10686_v25 = vpop.f32.mrb[133].mxu0  ;;  %v10000_v50 = vcombine.low %v5065_v16, %v5066_v56  ;;  %v5112_v26 = vld [vmem:[#allocation3 + $0x98] sm:$0xf]  ;;  %11366 = vmatpush3.bf16.msra.mxu1 %v12299_v10  ;;  %15758 = vst [vmem:[#allocation39_spill] sm:$0xff] %v14206_v34 }
 0x255   : > { %v4822_v11 = vmax.f32 %v4790_v30, 0.0  ;;  %v10687_v62 = vadd.f32 %v10686_v25, %v10685_v5  ;;  %v10688_v12 = vpop.f32.mrb[134].mxu0  ;;  %v10015_v22 = vcombine.low %v5111_v13, %v5112_v26  ;;  %11023 = vmatprep.subr.bf16.mxu1 %v12303_v59  ;;  %v4791_v6 = vadd.f32 %v11526_v55, %v13975_v33  ;;  %v5140_v53 = vld [vmem:[#allocation3 + $0x158] sm:$0x8]  ;;  %v5020_v34 = vld [vmem:[#allocation3 + $0x94] sm:$0xf] }
 0x256   : > { %5944 = vmatprep.mubr.bf16.mxu0 %v10000_v50  ;;  %v10689_v29 = vpop.f32.mrb[135].mxu0  ;;  %v14214_v5 = vcombine.low %v5110_v18, %v5111_v13  ;;  %v14216_v59 = vcombine.low %v5066_v56, %v5066_v56  ;;  %v9984_v25 = vcombine.low %v5017_v7, %v5018_v54  ;;  %v14221_v10 = vcombine.low %v5112_v26, %v5112_v26  ;;  %v14223_v18 = vld [vmem:[#allocation3 + $0x15c] sm:$0xf] }
 0x257   : > { %v10247_v19 = vpack.c.bf16 %v4822_v11, %v4822_v11  ;;  %v11513_v30 = vadd.f32 %v10687_v62, %v13906_v37  ;;  %11328 = vmatmul.mubr.bf16.gmra.mrb[104].mxu1 %v10015_v22  ;;  %v4823_v16 = vmax.f32 %v4791_v6, 0.0  ;;  %v10690_v55 = vadd.f32 %v10689_v29, %v10688_v12  ;;  %v5067_v37 = vld [vmem:[#allocation3 + $0xa4] sm:$0x8]  ;;  %v14228_v12 = vld [vmem:[#allocation3 + $0x98] sm:$0xf] }
 0x258   : > { %15759 = vst [vmem:[#allocation40_spill] sm:$0xff] %v14216_v59  ;;  %v14226_v56 = vcombine.low %v5016_v40, %v5017_v7  ;;  %v14235_v13 = vcombine.low %v5018_v54, %v5018_v54  ;;  %v9985_v41 = vcombine.low %v5020_v34, %v14228_v12 }
 0x259   : > { %4982 = vst [vmem:[#allocation3 + $0xbc] sm:$0xf] %v10247_v19  ;;  %v11514_v9 = vadd.f32 %v11513_v30, %v14047_v52  ;;  %v10248_v22 = vpack.c.bf16 %v4823_v16, %v4823_v16  ;;  %v11521_v6 = vadd.f32 %v10690_v55, %v13914_v57  ;;  %5945 = vmatmul.mubr.bf16.gmra.mrb[184].mxu0 %v9984_v25  ;;  %v5113_v30 = vld [vmem:[#allocation3 + $0xa4] sm:$0x8] }
 0x25a   : > { %15760 = vst [vmem:[#allocation41_spill] sm:$0xff] %v14226_v56  ;;  %v14232_v52 = vcombine.low %v13989_v44, %v13989_v44  ;;  %15761 = vst [vmem:[#allocation42_spill] sm:$0xff] %v14235_v13  ;;  %v14238_v16 = vcombine.low %v5140_v53, %v14223_v18  ;;  %v4998_v13 = vld [vmem:[#allocation3 + $0x4] sm:$0x8] }
 0x25b   : > { %v10691_v26 = vpop.f32.mrb[136].mxu0  ;;  %v5068_v62 = vld [vmem:[#allocation3 + $0xa8] sm:$0xf]  ;;  %v5069_v29 = vld [vmem:[#allocation3 + $0xac] sm:$0xf]  ;;  %v4792_v57 = vadd.f32 %v11514_v9, %v13975_v33  ;;  %v11522_v40 = vadd.f32 %v11521_v6, %v14061_v15 }
 0x25c   : > { %4983 = vst [vmem:[#allocation3 + $0xc0] sm:$0xf] %v10248_v22  ;;  %v10692_v44 = vpop.f32.mrb[137].mxu0  ;;  %v10001_v55 = vcombine.low %v5068_v62, %v5069_v29  ;;  %v5114_v25 = vld [vmem:[#allocation3 + $0xa8] sm:$0xf]  ;;  %v14249_v15 = vcombine.low %v5067_v37, %v5068_v62  ;;  %v14254_v59 = vcombine.low %v5069_v29, %v5069_v29 }
 0x25d   : > { %v5115_v11 = vld [vmem:[#allocation3 + $0xac] sm:$0xf]  ;;  %v10693_v19 = vadd.f32 %v10692_v44, %v10691_v26  ;;  %v10694_v53 = vpop.f32.mrb[138].mxu0  ;;  %v4793_v9 = vadd.f32 %v11522_v40, %v13975_v33  ;;  %v4824_v26 = vmax.f32 %v4792_v57, 0.0  ;;  %v14256_v22 = vcombine.low %v5113_v30, %v5114_v25  ;;  %v5019_v33 = vld [vmem:[#allocation3 + $0x90] sm:$0x8] }
 0x25e   : > { %15762 = vst [vmem:[#allocation43_spill] sm:$0xff] %v14249_v15  ;;  %5952 = vmatprep.mubr.bf16.mxu0 %v10001_v55  ;;  %v10695_v6 = vpop.f32.mrb[139].mxu0  ;;  %v10016_v50 = vcombine.low %v5114_v25, %v5115_v11  ;;  %15763 = vst [vmem:[#allocation44_spill] sm:$0xff] %v14254_v59  ;;  %v5070_v57 = vld [vmem:[#allocation3 + $0xb8] sm:$0x8] }
 0x25f   : > { %v11533_v54 = vadd.f32 %v10693_v19, %v13929_v49  ;;  %v4825_v44 = vmax.f32 %v4793_v9, 0.0  ;;  %v10696_v55 = vadd.f32 %v10695_v6, %v10694_v53  ;;  %v14262_v19 = vcombine.low %v5115_v11, %v5115_v11  ;;  %v14268_v25 = vld [vmem:[%s15573_s2] ss:$0 sm:$0xff]  ;;  %v5023_v40 = vld [vmem:[#allocation3 + $0xa8] sm:$0xf] }
 0x260   : > { %11331 = vmatprep.mubr.bf16.mxu1 %v10016_v50  ;;  %v5071_v29 = vld [vmem:[#allocation3 + $0xbc] sm:$0xf] }
 0x261   : > { %v11534_v62 = vadd.f32 %v11533_v54, %v14094_v8  ;;  %v10318_v23 = vpack.c.bf16 %v4825_v44, %v4824_v26  ;;  %5953 = vmatmul.mubr.bf16.gmra.mrb[188].mxu0 %v9985_v41  ;;  %v11541_v50 = vadd.f32 %v10696_v55, %v13936_v35  ;;  %v14273_v54 = vcombine.low %v5019_v33, %v5020_v34  ;;  %v5116_v41 = vld [vmem:[#allocation3 + $0xb8] sm:$0x8]  ;;  %v5024_v8 = vld [vmem:[#allocation3 + $0xac] sm:$0xf] }
 0x262   : > { %v14281_v34 = vcombine.low %v14228_v12, %v14228_v12  ;;  %v5022_v12 = vld [vmem:[#allocation3 + $0xa4] sm:$0x8] }
 0x263   : > { %v4794_v9 = vadd.f32 %v14268_v25, %v11534_v62  ;;  %15764 = vst [vmem:[#allocation45_spill] sm:$0xff] %v14273_v54  ;;  %v10697_v11 = vpop.f32.mrb[140].mxu0  ;;  %v5072_v53 = vld [vmem:[#allocation3 + $0xc0] sm:$0xf]  ;;  %10339 = vst [vmem:[#allocation3 + $0xd0] sm:$0xff] %v10318_v23   ;;  %v11542_v35 = vadd.f32 %v11541_v50, %v14106_v31  ;;  %v14288_v50 = vcombine.low %v5070_v57, %v5071_v29 }
 0x264   : > { %v5118_v6 = vld [vmem:[#allocation3 + $0xc0] sm:$0xf]  ;;  %v10698_v49 = vpop.f32.mrb[141].mxu0  ;;  %v10002_v37 = vcombine.low %v5071_v29, %v5072_v53  ;;  %v5117_v62 = vld [vmem:[#allocation3 + $0xbc] sm:$0xf]  ;;  %15765 = vst [vmem:[#allocation46_spill] sm:$0xff] %v14281_v34  ;;  %v14295_v44 = vcombine.low %v5072_v53, %v5072_v53 }
 0x265   : > { %v4826_v7 = vmax.f32 %v4794_v9, 0.0  ;;  %v10699_v33 = vadd.f32 %v10698_v49, %v10697_v11  ;;  %v10700_v23 = vpop.f32.mrb[142].mxu0  ;;  %v10017_v30 = vcombine.low %v5117_v62, %v5118_v6  ;;  %v4795_v9 = vadd.f32 %v14268_v25, %v11542_v35  ;;  %15766 = vst [vmem:[#allocation47_spill] sm:$0xff] %v14288_v50  ;;  %v12424_v11 = vld [vmem:[#allocation3 + $0x8] sm:$0xf] }
 0x266   : > { %5960 = vmatprep.mubr.bf16.mxu0 %v10002_v37  ;;  %v10701_v59 = vpop.f32.mrb[143].mxu0  ;;  %v14292_v55 = vcombine.low %v5116_v41, %v5117_v62  ;;  %15767 = vst [vmem:[#allocation48_spill] sm:$0xff] %v14295_v44  ;;  %v9986_v35 = vcombine.low %v5023_v40, %v5024_v8  ;;  %v9898_v49 = vcombine.low %v5022_v12, %v5023_v40 }
 0x267   : > { %v10251_v15 = vpack.c.bf16 %v4826_v7, %v4826_v7  ;;  %v11529_v31 = vadd.f32 %v10699_v33, %v13924_v45  ;;  %11332 = vmatmul.mubr.bf16.gmra.mrb[108].mxu1 %v10017_v30  ;;  %v10702_v26 = vadd.f32 %v10701_v59, %v10700_v23  ;;  %v4827_v37 = vmax.f32 %v4795_v9, 0.0  ;;  %v5098_v45 = vld [vmem:[#allocation3 + $0x40] sm:$0x8] }
 0x268   : > { %v14300_v41 = vcombine.low %v4998_v13, %v12424_v11  ;;  %v6595_v9 = vshrl.u32 %v9898_v49, 16  ;;  %v6598_v29 = vshll.u32 %v9898_v49, 16 }
 0x269   : > { %4986 = vst [vmem:[#allocation3 + $0xe4] sm:$0xf] %v10251_v15  ;;  %v11530_v7 = vadd.f32 %v11529_v31, %v14087_v3  ;;  %v11537_v33 = vadd.f32 %v10702_v26, %v13933_v4  ;;  %v10252_v30 = vpack.c.bf16 %v4827_v37, %v4827_v37  ;;  %v14303_v15 = vcombine.low %v5118_v6, %v5118_v6  ;;  %v5073_v37 = vld [vmem:[#allocation3 + $0xcc] sm:$0x8] }
 0x26a   : > { %5961 = vmatmul.mubr.bf16.gmra.mrb[192].mxu0 %v9986_v35  ;;  %v5074_v53 = vld [vmem:[#allocation3 + $0xd0] sm:$0xf]  ;;  %v5075_v62 = vld [vmem:[#allocation3 + $0xd4] sm:$0xf]  ;;  %v9899_v4 = vcombine.low %v5024_v8, %v5024_v8  ;;  %v14312_v35 = vcombine.low %v5098_v45, %v14059_v51  ;;  %v14322_v26 = vrot.slane %v6595_v9, 3 }
 0x26b   : > { %v10703_v3 = vpop.f32.mrb[144].mxu0  ;;  %v4796_v23 = vadd.f32 %v14268_v25, %v11530_v7  ;;  %v11538_v31 = vadd.f32 %v11537_v33, %v14099_v14  ;;  %4987 = vst [vmem:[#allocation3 + $0xe8] sm:$0xf] %v10252_v30  ;;  %v10003_v59 = vcombine.low %v5074_v53, %v5075_v62  ;;  %v5120_v14 = vld [vmem:[#allocation3 + $0xd0] sm:$0xf]  ;;  %v14319_v50 = vcombine.low %v5073_v37, %v5074_v53 }
 0x26c   : > { %v10704_v40 = vpop.f32.mrb[145].mxu0  ;;  %v5121_v8 = vld [vmem:[#allocation3 + $0xd4] sm:$0xf]  ;;  %v5025_v30 = vld [vmem:[#allocation3 + $0xb8] sm:$0x8]  ;;  %v6603_v51 = vshrl.u32 %v9899_v4, 16  ;;  %v14324_v49 = vcombine.low %v5075_v62, %v5075_v62 }
 0x26d   : > { %v10705_v12 = vadd.f32 %v10704_v40, %v10703_v3  ;;  %v10706_v11 = vpop.f32.mrb[146].mxu0  ;;  %v4797_v7 = vadd.f32 %v14268_v25, %v11538_v31  ;;  %v5026_v40 = vld [vmem:[#allocation3 + $0xbc] sm:$0xf]  ;;  %v4828_v57 = vmax.f32 %v4796_v23, 0.0  ;;  %v6606_v45 = vshll.u32 %v9899_v4, 16  ;;  %5968 = vmatprep.mubr.bf16.mxu0 %v10003_v59  ;;  %15768 = vst [vmem:[#allocation49_spill] sm:$0xff] %v14319_v50 }
 0x26e   : > { %v10707_v33 = vpop.f32.mrb[147].mxu0  ;;  %v5027_v31 = vld [vmem:[#allocation3 + $0xc0] sm:$0xf]  ;;  %v10018_v34 = vcombine.low %v5120_v14, %v5121_v8  ;;  %15769 = vst [vmem:[#allocation50_spill] sm:$0xff] %v14324_v49  ;;  %v5119_v23 = vld [vmem:[#allocation3 + $0xcc] sm:$0x8]  ;;  %v9900_v4 = vcombine.low %v5025_v30, %v5026_v40 }
 0x26f   : > { %v11549_v3 = vadd.f32 %v10705_v12, %v13945_v0  ;;  %v4829_v6 = vmax.f32 %v4797_v7, 0.0  ;;  %v10708_v54 = vadd.f32 %v10707_v33, %v10706_v11  ;;  %v9987_v12 = vcombine.low %v5026_v40, %v5027_v31  ;;  %v5029_v7 = vld [vmem:[#allocation3 + $0xd0] sm:$0xf] }
 0x270   : > { %11335 = vmatprep.mubr.bf16.mxu1 %v10018_v34  ;;  %v14328_v53 = vrot.slane %v6598_v29, 4  ;;  %v14330_v11 = vrot.slane %v6603_v51, 3  ;;  %v14332_v37 = vrot.slane %v6606_v45, 4  ;;  %v14339_v33 = vcombine.low %v5119_v23, %v5120_v14  ;;  %v5076_v45 = vld [vmem:[#allocation3 + $0xe0] sm:$0x8] }
 0x271   : > { %v11550_v44 = vadd.f32 %v11549_v3, %v14133_v42  ;;  %v10323_v56 = vpack.c.bf16 %v4829_v6, %v4828_v57  ;;  %v11557_v59 = vadd.f32 %v10708_v54, %v13952_v63  ;;  %v9901_v57 = vcombine.low %v5027_v31, %v5027_v31  ;;  %v5077_v31 = vld [vmem:[#allocation3 + $0xe4] sm:$0xf]  ;;  %v5030_v29 = vld [vmem:[#allocation3 + $0xd4] sm:$0xf]  ;;  %v12425_v14 = vld [vmem:[#allocation3 + $0x48] sm:$0xf] }
 0x272   : > { %5969 = vmatmul.mubr.bf16.gmra.mrb[196].mxu0 %v9987_v12  ;;  %v5078_v54 = vld [vmem:[#allocation3 + $0xe8] sm:$0xf]  ;;  %15770 = vst [vmem:[#allocation51_spill] sm:$0xff] %v14339_v33  ;;  %v14341_v40 = vcombine.low %v5121_v8, %v5121_v8  ;;  %v6649_v12 = vshll.u32 %v9900_v4, 16  ;;  %v14345_v23 = vcombine.low %v12425_v14, %v12425_v14  ;;  %v5123_v6 = vld [vmem:[#allocation3 + $0xe4] sm:$0xf]  ;;  %v14350_v13 = vcombine.low %v5076_v45, %v5077_v31 }
 0x273   : > { %v4798_v0 = vadd.f32 %v14268_v25, %v11550_v44  ;;  %v10709_v42 = vpop.f32.mrb[148].mxu0  ;;  %10340 = vst [vmem:[#allocation3 + $0xf8] sm:$0xff] %v10323_v56   ;;  %v11558_v44 = vadd.f32 %v11557_v59, %v14144_v27  ;;  %v6646_v59 = vshrl.u32 %v9900_v4, 16  ;;  %v5122_v56 = vld [vmem:[#allocation3 + $0xe0] sm:$0x8]  ;;  %v14353_v58 = vcombine.low %v5078_v54, %v5078_v54 }
 0x274   : > { %v10710_v9 = vpop.f32.mrb[149].mxu0  ;;  %15771 = vst [vmem:[#allocation52_spill] sm:$0xff] %v14341_v40  ;;  %15772 = vst [vmem:[#allocation53_spill] sm:$0xff] %v14350_v13 }
 0x275   : > { %v4830_v62 = vmax.f32 %v4798_v0, 0.0  ;;  %v10711_v34 = vadd.f32 %v10710_v9, %v10709_v42  ;;  %v10712_v63 = vpop.f32.mrb[150].mxu0  ;;  %v4799_v51 = vadd.f32 %v14268_v25, %v11558_v44  ;;  %v5124_v0 = vld [vmem:[#allocation3 + $0xe8] sm:$0xf]  ;;  %v6654_v42 = vshrl.u32 %v9901_v57, 16  ;;  %15773 = vst [vmem:[#allocation54_spill] sm:$0xff] %v14353_v58 }
 0x276   : > { %v10713_v30 = vpop.f32.mrb[151].mxu0  ;;  %v10004_v9 = vcombine.low %v5077_v31, %v5078_v54  ;;  %v10019_v4 = vcombine.low %v5123_v6, %v5124_v0  ;;  %v5125_v58 = vld [vmem:[#allocation3 + $0xf4] sm:$0x8] }
 0x277   : > { %v10255_v3 = vpack.c.bf16 %v4830_v62, %v4830_v62  ;;  %v11545_v27 = vadd.f32 %v10711_v34, %v13941_v20  ;;  %v4831_v8 = vmax.f32 %v4799_v51, 0.0  ;;  %v6657_v62 = vshll.u32 %v9901_v57, 16 }
 0x278   : > { %5976 = vmatprep.mubr.bf16.mxu0 %v10004_v9  ;;  %v10714_v14 = vadd.f32 %v10713_v30, %v10712_v63  ;;  %v14360_v20 = vrot.slane %v6654_v42, 3  ;;  %11336 = vmatmul.mubr.bf16.gmra.mrb[112].mxu1 %v10019_v4  ;;  %v14364_v9 = vcombine.low %v5122_v56, %v5123_v6  ;;  %v9988_v63 = vcombine.low %v5029_v7, %v5030_v29 }
 0x279   : > { %4990 = vst [vmem:[#allocation3 + $0x10c] sm:$0xf] %v10255_v3  ;;  %v11546_v44 = vadd.f32 %v11545_v27, %v14126_v28  ;;  %v10256_v50 = vpack.c.bf16 %v4831_v8, %v4831_v8  ;;  %v5028_v3 = vld [vmem:[#allocation3 + $0xcc] sm:$0x8]  ;;  %v14356_v28 = vrot.slane %v6646_v59, 3  ;;  %v14358_v27 = vrot.slane %v6649_v12, 4 }
 0x27a   : > { %v14362_v31 = vrot.slane %v6657_v62, 4  ;;  %15774 = vst [vmem:[#allocation55_spill] sm:$0xff] %v14364_v9  ;;  %v11553_v54 = vadd.f32 %v10714_v14, %v13949_v36  ;;  %v5080_v8 = vld [vmem:[#allocation3 + $0xf8] sm:$0xf]  ;;  %v5081_v49 = vld [vmem:[#allocation3 + $0xfc] sm:$0xf]  ;;  %v9902_v57 = vcombine.low %v5028_v3, %v5029_v7  ;;  %v9903_v56 = vcombine.low %v5030_v29, %v5030_v29  ;;  %5977 = vmatmul.mubr.bf16.gmra.mrb[200].mxu0 %v9988_v63 }
 0x27b   : > { %v10715_v51 = vpop.f32.mrb[152].mxu0  ;;  %4991 = vst [vmem:[#allocation3 + $0x110] sm:$0xf] %v10256_v50  ;;  %v4800_v59 = vadd.f32 %v14268_v25, %v11546_v44  ;;  %v14372_v36 = vld [vmem:[#allocation3 + $0x160] sm:$0xf]  ;;  %v14375_v14 = vcombine.low %v5124_v0, %v5124_v0  ;;  %v10005_v7 = vcombine.low %v5080_v8, %v5081_v49  ;;  %v14397_v40 = vcombine.low %v5081_v49, %v5081_v49 }
 0x27c   : > { %v10716_v45 = vpop.f32.mrb[153].mxu0  ;;  %v11554_v6 = vadd.f32 %v11553_v54, %v14137_v21  ;;  %v5079_v12 = vld [vmem:[#allocation3 + $0xf4] sm:$0x8]  ;;  %v5126_v50 = vld [vmem:[#allocation3 + $0xf8] sm:$0xf]  ;;  %v14383_v29 = vcombine.low %v14372_v36, %v14372_v36  ;;  %v6697_v63 = vshrl.u32 %v9902_v57, 16 }
 0x27d   : > { %v10718_v30 = vpop.f32.mrb[154].mxu0  ;;  %v10717_v42 = vadd.f32 %v10716_v45, %v10715_v51  ;;  %15775 = vst [vmem:[#allocation56_spill] sm:$0xff] %v14375_v14  ;;  %v5127_v21 = vld [vmem:[#allocation3 + $0xfc] sm:$0xf]  ;;  %v4832_v54 = vmax.f32 %v4800_v59, 0.0  ;;  %5984 = vmatprep.mubr.bf16.mxu0 %v10005_v7  ;;  %v6705_v51 = vshrl.u32 %v9903_v56, 16  ;;  %v14393_v46 = vcombine.low %v5079_v12, %v5080_v8 }
 0x27e   : > { %v10719_v34 = vpop.f32.mrb[155].mxu0  ;;  %v4801_v45 = vadd.f32 %v14268_v25, %v11554_v6  ;;  %v6700_v6 = vshll.u32 %v9902_v57, 16  ;;  %v10020_v59 = vcombine.low %v5126_v50, %v5127_v21  ;;  %v5032_v9 = vld [vmem:[#allocation3 + $0xe4] sm:$0xf]  ;;  %15778 = vst [vmem:[#allocation59_spill] sm:$0xff] %v14397_v40 }
 0x27f   : > { %v11565_v44 = vadd.f32 %v10717_v42, %v13961_v48  ;;  %v5031_v48 = vld [vmem:[#allocation3 + $0xe0] sm:$0x8]  ;;  %v10720_v32 = vadd.f32 %v10719_v34, %v10718_v30  ;;  %v6708_v42 = vshll.u32 %v9903_v56, 16  ;;  %15776 = vst [vmem:[#allocation57_spill] sm:$0xff] %v14393_v46  ;;  %v14402_v33 = vrot.slane %v6705_v51, 3 }
 0x280   : > { %v4833_v4 = vmax.f32 %v4801_v45, 0.0  ;;  %v14395_v45 = vrot.slane %v6697_v63, 3  ;;  %11339 = vmatprep.mubr.bf16.mxu1 %v10020_v59  ;;  %v14400_v30 = vrot.slane %v6700_v6, 4  ;;  %v5083_v8 = vld [vmem:[#allocation3 + $0x10c] sm:$0xf] }
 0x281   : > { %v11566_v0 = vadd.f32 %v11565_v44, %v14167_v2  ;;  %v5033_v2 = vld [vmem:[#allocation3 + $0xe8] sm:$0xf]  ;;  %15780 = vst [vmem:[#allocation61_spill] sm:$0xff] %v14402_v33  ;;  %v14405_v7 = vrot.slane %v6708_v42, 4  ;;  %v14417_v42 = vcombine.low %v5127_v21, %v5127_v21  ;;  %v5036_v46 = vld [vmem:[#allocation3 + $0xfc] sm:$0xf] }
 0x282   : > { %v10328_v39 = vpack.c.bf16 %v4833_v4, %v4832_v54  ;;  %15777 = vst [vmem:[#allocation58_spill] sm:$0xff] %v14395_v45  ;;  %15779 = vst [vmem:[#allocation60_spill] sm:$0xff] %v14400_v30  ;;  %v9904_v4 = vcombine.low %v5031_v48, %v5032_v9  ;;  %v9989_v56 = vcombine.low %v5032_v9, %v5033_v2  ;;  %v5084_v12 = vld [vmem:[#allocation3 + $0x110] sm:$0xf]  ;;  %v15782_v48 = vld [vmem:[#allocation13_spill] sm:$0xff] }
 0x283   : > { %v10721_v3 = vpop.f32.mrb[156].mxu0  ;;  %v4802_v13 = vadd.f32 %v14268_v25, %v11566_v0  ;;  %v11573_v0 = vadd.f32 %v10720_v32, %v13968_v1  ;;  %15781 = vst [vmem:[#allocation62_spill] sm:$0xff] %v14405_v7  ;;  %v5082_v32 = vld [vmem:[#allocation3 + $0x108] sm:$0x8]  ;;  %v10006_v6 = vcombine.low %v5083_v8, %v5084_v12  ;;  %v5038_v59 = vld [vmem:[#allocation3 + $0x10c] sm:$0xf] }
 0x284   : > { %v10722_v44 = vpop.f32.mrb[157].mxu0  ;;  %10341 = vst [vmem:[#allocation3 + $0x120] sm:$0xff] %v10328_v39   ;;  %v14409_v39 = vcombine.low %v5125_v58, %v5126_v50  ;;  %5985 = vmatmul.mubr.bf16.gmra.mrb[204].mxu0 %v9989_v56  ;;  %v5129_v58 = vld [vmem:[#allocation3 + $0x10c] sm:$0xf]  ;;  %v5130_v50 = vld [vmem:[#allocation3 + $0x110] sm:$0xf] }
 0x285   : > { %v10724_v62 = vpop.f32.mrb[158].mxu0  ;;  %v4834_v57 = vmax.f32 %v4802_v13, 0.0  ;;  %v11574_v63 = vadd.f32 %v11573_v0, %v14176_v60  ;;  %v9905_v13 = vcombine.low %v5033_v2, %v5033_v2  ;;  %v10723_v49 = vadd.f32 %v10722_v44, %v10721_v3  ;;  %5992 = vmatprep.mubr.bf16.mxu0 %v10006_v6 }
 0x286   : > { %v10725_v34 = vpop.f32.mrb[159].mxu0  ;;  %v6748_v2 = vshrl.u32 %v9904_v4, 16  ;;  %v6751_v44 = vshll.u32 %v9904_v4, 16  ;;  %v14424_v4 = vcombine.low %v5082_v32, %v5083_v8  ;;  %v10021_v9 = vcombine.low %v5129_v58, %v5130_v50  ;;  %v5034_v32 = vld [vmem:[#allocation3 + $0xf4] sm:$0x8] }
 0x287   : > { %v10259_v54 = vpack.c.bf16 %v4834_v57, %v4834_v57  ;;  %v4803_v51 = vadd.f32 %v14268_v25, %v11574_v63  ;;  %v11561_v60 = vadd.f32 %v10723_v49, %v15782_v48  ;;  %v6756_v0 = vshrl.u32 %v9905_v13, 16  ;;  %v5035_v63 = vld [vmem:[#allocation3 + $0xf8] sm:$0xf] }
 0x288   : > { %v6759_v56 = vshll.u32 %v9905_v13, 16  ;;  %15783 = vst [vmem:[#allocation13_spill] sm:$0xff] %v14424_v4  ;;  %v14430_v6 = vrot.slane %v6748_v2, 3  ;;  %v14432_v48 = vrot.slane %v6751_v44, 4  ;;  %v14438_v8 = vcombine.low %v5084_v12, %v5084_v12  ;;  %11340 = vmatmul.mubr.bf16.gmra.mrb[116].mxu1 %v10021_v9  ;;  %v5085_v2 = vld [vmem:[#allocation3 + $0x11c] sm:$0x8] }
 0x289   : > { %4994 = vst [vmem:[#allocation3 + $0x134] sm:$0xf] %v10259_v54  ;;  %v4835_v57 = vmax.f32 %v4803_v51, 0.0  ;;  %v11562_v1 = vadd.f32 %v11561_v60, %v14161_v47  ;;  %v5128_v54 = vld [vmem:[#allocation3 + $0x108] sm:$0x8]  ;;  %v10726_v51 = vadd.f32 %v10725_v34, %v10724_v62  ;;  %v14434_v49 = vrot.slane %v6756_v0, 3 }
 0x28a   : > { %15784 = vst [vmem:[#allocation63_spill] sm:$0xff] %v14430_v6  ;;  %15785 = vst [vmem:[#allocation64_spill] sm:$0xff] %v14432_v48  ;;  %v15789_v62 = vld [vmem:[#allocation11_spill] sm:$0xff]  ;;  %v14441_v21 = vcombine.low %v5128_v54, %v5129_v58  ;;  %v14443_v47 = vcombine.low %v5130_v50, %v5130_v50  ;;  %v9990_v60 = vcombine.low %v5035_v63, %v5036_v46  ;;  %v5037_v9 = vld [vmem:[#allocation3 + $0x108] sm:$0x8] }
 0x28b   : > { %v10260_v3 = vpack.c.bf16 %v4835_v57, %v4835_v57  ;;  %v5086_v13 = vld [vmem:[#allocation3 + $0x120] sm:$0xf]  ;;  %v14426_v14 = vld [vmem:[#allocation3 + $0x124] sm:$0xf]  ;;  %15786 = vst [vmem:[#allocation65_spill] sm:$0xff] %v14434_v49  ;;  %v14436_v57 = vrot.slane %v6759_v56, 4  ;;  %v11569_v34 = vadd.f32 %v10726_v51, %v15789_v62  ;;  %v9906_v54 = vcombine.low %v5034_v32, %v5035_v63 }
 0x28c   : > { %15788 = vst [vmem:[#allocation67_spill] sm:$0xff] %v14438_v8  ;;  %v10007_v44 = vcombine.low %v5086_v13, %v14426_v14  ;;  %v9907_v51 = vcombine.low %v5036_v46, %v5036_v46  ;;  %5993 = vmatmul.mubr.bf16.gmra.mrb[208].mxu0 %v9990_v60  ;;  %v5131_v62 = vld [vmem:[#allocation3 + $0x11c] sm:$0x8]  ;;  %v5132_v40 = vld [vmem:[#allocation3 + $0x120] sm:$0xf]  ;;  %v9908_v0 = vcombine.low %v5037_v9, %v5038_v59 }
 0x28d   : > { %4995 = vst [vmem:[#allocation3 + $0x138] sm:$0xf] %v10260_v3  ;;  %15787 = vst [vmem:[#allocation66_spill] sm:$0xff] %v14436_v57  ;;  %v4804_v3 = vadd.f32 %v14268_v25, %v11562_v1  ;;  %v11570_v12 = vadd.f32 %v11569_v34, %v14170_v43  ;;  %v5133_v1 = vld [vmem:[#allocation3 + $0x124] sm:$0xf]  ;;  %v14457_v34 = vcombine.low %v5085_v2, %v5086_v13  ;;  %v6799_v30 = vshrl.u32 %v9906_v54, 16 }
 0x28e   : > { %6000 = vmatprep.mubr.bf16.mxu0 %v10007_v44  ;;  %v5039_v4 = vld [vmem:[#allocation3 + $0x110] sm:$0xf]  ;;  %v10022_v45 = vcombine.low %v5132_v40, %v5133_v1  ;;  %v6802_v56 = vshll.u32 %v9906_v54, 16  ;;  %v6807_v8 = vshrl.u32 %v9907_v51, 16  ;;  %v14474_v54 = vcombine.low %v5133_v1, %v5133_v1  ;;  %v5040_v63 = vld [vmem:[#allocation3 + $0x11c] sm:$0x8] }
 0x28f   : > { %v4805_v43 = vadd.f32 %v14268_v25, %v11570_v12  ;;  %15790 = vst [vmem:[#allocation11_spill] sm:$0xff] %v14457_v34  ;;  %v4836_v60 = vmax.f32 %v4804_v3, 0.0  ;;  %v6810_v25 = vshll.u32 %v9907_v51, 16  ;;  %v14466_v12 = vcombine.low %v5131_v62, %v5132_v40  ;;  %v5134_v3 = vld [vmem:[#allocation3 + $0x130] sm:$0x8] }
 0x290   : > { %11343 = vmatprep.mubr.bf16.mxu1 %v10022_v45  ;;  %v9909_v50 = vcombine.low %v5039_v4, %v5039_v4  ;;  %v14468_v46 = vld [vmem:[#allocation3 + $0x134] sm:$0xf]  ;;  %15792 = vst [vmem:[#allocation69_spill] sm:$0xff] %v14474_v54  ;;  %v9991_v51 = vcombine.low %v5038_v59, %v5039_v4  ;;  %v6850_v45 = vshrl.u32 %v9908_v0, 16  ;;  %v6853_v62 = vshll.u32 %v9908_v0, 16 }
 0x291   : > { %v4837_v32 = vmax.f32 %v4805_v43, 0.0  ;;  %v5135_v58 = vld [vmem:[#allocation3 + $0x134] sm:$0xf]  ;;  %v14480_v33 = vrot.slane %v6799_v30, 3  ;;  %v14483_v9 = vrot.slane %v6802_v56, 4  ;;  %v14485_v6 = vrot.slane %v6807_v8, 3 }
 0x292   : > { %v6858_v59 = vshrl.u32 %v9909_v50, 16  ;;  %v6861_v4 = vshll.u32 %v9909_v50, 16  ;;  %v14487_v40 = vrot.slane %v6810_v25, 4  ;;  %v14493_v1 = vrot.slane %v6850_v45, 3  ;;  %v5137_v8 = vld [vmem:[#allocation3 + $0x144] sm:$0x8] }
 0x293   : > { %v10333_v2 = vpack.c.bf16 %v4837_v32, %v4836_v60  ;;  %v5041_v60 = vld [vmem:[#allocation3 + $0x120] sm:$0xf]  ;;  %v5042_v32 = vld [vmem:[#allocation3 + $0x124] sm:$0xf]  ;;  %v14499_v25 = vcombine.low %v14426_v14, %v14426_v14  ;;  %v5043_v30 = vld [vmem:[#allocation3 + $0x130] sm:$0x8] }
 0x294   : > { %v14463_v13 = vld [vmem:[#allocation3 + $0x138] sm:$0xf]  ;;  %6001 = vmatmul.mubr.bf16.gmra.mrb[212].mxu0 %v9991_v51  ;;  %v14495_v51 = vrot.slane %v6853_v62, 4  ;;  %v9910_v56 = vcombine.low %v5040_v63, %v5041_v60  ;;  %v9911_v50 = vcombine.low %v5042_v32, %v5042_v32  ;;  %v14501_v0 = vrot.slane %v6858_v59, 3  ;;  %v5044_v45 = vld [vmem:[#allocation3 + $0x134] sm:$0xf] }
 0x295   : > { %15791 = vst [vmem:[#allocation68_spill] sm:$0xff] %v14463_v13  ;;  %v5136_v43 = vld [vmem:[#allocation3 + $0x138] sm:$0xf]  ;;  %10342 = vst [vmem:[#allocation3 + $0x148] sm:$0xff] %v10333_v2   ;;  %v10008_v44 = vcombine.low %v14468_v46, %v14463_v13  ;;  %v5088_v2 = vld [vmem:[#allocation3 + $0x130] sm:$0x8]  ;;  %v14505_v13 = vcombine.low %v5134_v3, %v5135_v58  ;;  %v9992_v54 = vcombine.low %v5041_v60, %v5042_v32 }
 0x296   : > { %v10023_v48 = vcombine.low %v5135_v58, %v5136_v43  ;;  %15793 = vst [vmem:[#allocation70_spill] sm:$0xff] %v14499_v25  ;;  %v6901_v34 = vshrl.u32 %v9910_v56, 16  ;;  %v6904_v62 = vshll.u32 %v9910_v56, 16  ;;  %v6909_v49 = vshrl.u32 %v9911_v50, 16  ;;  %v5045_v57 = vld [vmem:[#allocation3 + $0x138] sm:$0xf] }
 0x297   : > { %6008 = vmatprep.mubr.bf16.mxu0 %v10008_v44  ;;  %v14503_v44 = vrot.slane %v6861_v4, 4  ;;  %v6912_v63 = vshll.u32 %v9911_v50, 16  ;;  %v14507_v7 = vcombine.low %v5136_v43, %v5136_v43  ;;  %v15794_v4 = vor.u32 %v14332_v37, %v14330_v11 }
 0x298   : > { %11344 = vmatmul.mubr.bf16.gmra.mrb[120].mxu1 %v10023_v48  ;;  %v15795_v48 = vor.u32 %v14328_v53, %v14322_v26  ;;  %v15796_v3 = vor.u32 %v14362_v31, %v14360_v20  ;;  %v15797_v43 = vor.u32 %v14358_v27, %v14356_v28  ;;  %v14529_v32 = vrot.slane %v6901_v34, 3 }
 0x299   : > { %v14531_v56 = vrot.slane %v6904_v62, 4  ;;  %v14533_v11 = vrot.slane %v6909_v49, 3  ;;  %v14535_v37 = vrot.slane %v6912_v63, 4  ;;  %v14545_v31 = vcombine.low %v5088_v2, %v14468_v46  ;;  %v15808_v2 = vld [vmem:[#allocation18_spill] sm:$0xff] }
 0x29a   : > { %v14518_v58 = vsel %vm1736_vm1, %v15795_v48, %v15794_v4  ;;  %v14527_v60 = vsel %vm1736_vm1, %v15797_v43, %v15796_v3  ;;  %v14549_v50 = vcombine.low %v5043_v30, %v5044_v45  ;;  %v9993_v30 = vcombine.low %v5044_v45, %v5045_v57  ;;  %v15799_v45 = vld [vmem:[#allocation14_spill] sm:$0xff]  ;;  %v15805_v3 = vld [vmem:[#allocation17_spill] sm:$0xff] }
 0x29b   : > { %v15798_v43 = vcombine.low %v14223_v18, %v14372_v36  ;;  %v15801_v18 = vshll.u32 %v15799_v45, 16  ;;  %v15806_v48 = vshrl.u32 %v15805_v3, 16  ;;  %v15807_v63 = vshll.u32 %v15805_v3, 16 }
 0x29c   : > { %v14509_v14 = vld [vmem:[#allocation3 + $0x148] sm:$0xf]  ;;  %v5093_v59 = vld [vmem:[#allocation3 + $0x14c] sm:$0xf]  ;;  %6009 = vmatmul.mubr.bf16.gmra.mrb[216].mxu0 %v9992_v54  ;;  %v6198_v4 = vshll.u32 %v14232_v52, 16 }
 0x29d   : > { %v5138_v25 = vld [vmem:[#allocation3 + $0x148] sm:$0xf]  ;;  %v5139_v26 = vld [vmem:[#allocation3 + $0x14c] sm:$0xf]  ;;  %v10009_v28 = vcombine.low %v14509_v14, %v5093_v59  ;;  %v14556_v59 = vcombine.low %v5045_v57, %v5045_v57  ;;  %v6209_v36 = vrot.slane %v15801_v18, 4  ;;  %v6226_v53 = vrot.slane %v15807_v63, 4 }
 0x29e   : > { %v14542_v27 = vcombine.low %v5137_v8, %v5138_v25  ;;  %v14547_v34 = vcombine.low %v5139_v26, %v5139_v26  ;;  %v10024_v49 = vcombine.low %v5138_v25, %v5139_v26 }
 0x29f   : > { %6016 = vmatprep.mubr.bf16.mxu0 %v10009_v28 }
 0x2a0   : > { %11347 = vmatprep.mubr.bf16.mxu1 %v10024_v49  ;;  %v15800_v49 = vshrl.u32 %v15799_v45, 16  ;;  %v15809_v45 = vshrl.u32 %v15808_v2, 16 }
 0x2a1   : > { %11348 = vmatmul.mubr.bf16.gmra.mrb[124].mxu1 %v15798_v43  ;;  %v15802_v43 = vld [vmem:[#allocation12_spill] sm:$0xff] }
 0x2a2   : > { %v6206_v25 = vrot.slane %v15800_v49, 3  ;;  %v15803_v20 = vshrl.u32 %v15802_v43, 16  ;;  %v15804_v28 = vshll.u32 %v15802_v43, 16  ;;  %v6223_v49 = vrot.slane %v15806_v48, 3 }
 0x2a3   : > { %v6231_v18 = vrot.slane %v15809_v45, 3  ;;  %v6195_v48 = vshrl.u32 %v14232_v52, 16  ;;  %v6272_v45 = vshrl.u32 %v14312_v35, 16 }
 0x2a4   : > { %v6214_v26 = vrot.slane %v15803_v20, 3  ;;  %v6217_v57 = vrot.slane %v15804_v28, 4  ;;  %6017 = vmatmul.mubr.bf16.gmra.mrb[220].mxu0 %v9993_v30  ;;  %v6210_v46 = vor.u32 %v6209_v36, %v6206_v25  ;;  %v15810_v20 = vshll.u32 %v15808_v2, 16 }
 0x2a5   : > { %v6187_v28 = vshrl.u32 %v14300_v41, 16  ;;  %v6227_v54 = vor.u32 %v6226_v53, %v6223_v49  ;;  %v6190_v30 = vshll.u32 %v14300_v41, 16  ;;  %v6200_v2 = vrot.slane %v6198_v4, 4 }
 0x2a6   : > { %v6218_v8 = vor.u32 %v6217_v57, %v6214_v26  ;;  %v6234_v43 = vrot.slane %v15810_v20, 4  ;;  %v6197_v26 = vrot.slane %v6195_v48, 3  ;;  %v6275_v57 = vshll.u32 %v14312_v35, 16  ;;  %v15814_v35 = vld [vmem:[#allocation19_spill] sm:$0xff] }
 0x2a7   : > { %v6189_v62 = vrot.slane %v6187_v28, 3  ;;  %v6192_v25 = vrot.slane %v6190_v30, 4  ;;  %v6274_v36 = vrot.slane %v6272_v45, 3  ;;  %v6280_v41 = vshrl.u32 %v14345_v23, 16 }
 0x2a8   : > { %v6219_v3 = vsel %vm1736_vm1, %v6210_v46, %v6218_v8  ;;  %v6235_v63 = vor.u32 %v6234_v43, %v6231_v18  ;;  %v6283_v49 = vshll.u32 %v14345_v23, 16  ;;  %v6201_v8 = vor.u32 %v6200_v2, %v6197_v26  ;;  %v15811_v18 = vld [vmem:[#allocation20_spill] sm:$0xff] }
 0x2a9   : > { %7226 = vmatprep.mubr.bf16.mxu0 %v6219_v3  ;;  %v6193_v52 = vor.u32 %v6192_v25, %v6189_v62  ;;  %v6277_v46 = vrot.slane %v6275_v57, 4  ;;  %v15812_v20 = vshrl.u32 %v15811_v18, 16  ;;  %v6282_v28 = vrot.slane %v6280_v41, 3 }
 0x2aa   : > { %v6236_v53 = vsel %vm1736_vm1, %v6227_v54, %v6235_v63  ;;  %v6285_v30 = vrot.slane %v6283_v49, 4  ;;  %v15813_v4 = vshll.u32 %v15811_v18, 16  ;;  %v15815_v3 = vshrl.u32 %v15814_v35, 16  ;;  %v15819_v49 = vld [vmem:[#allocation28_spill] sm:$0xff] }
 0x2ab   : > { %11367 = vmatprep.mubr.bf16.mxu1 %v6236_v53  ;;  %v6257_v43 = vrot.slane %v15812_v20, 3  ;;  %v6202_v63 = vsel %vm1736_vm1, %v6193_v52, %v6201_v8  ;;  %v6278_v45 = vor.u32 %v6277_v46, %v6274_v36  ;;  %v15816_v23 = vshll.u32 %v15814_v35, 16  ;;  %v15822_v8 = vld [vmem:[#allocation15_spill] sm:$0xff] }
 0x2ac   : > { %v6260_v48 = vrot.slane %v15813_v4, 4  ;;  %v6265_v54 = vrot.slane %v15815_v3, 3  ;;  %v15817_v62 = vshrl.u32 %v14109_v61, 16  ;;  %7227 = vmatmul.mubr.bf16.vlgmr.msra.gmra.mrb[224].mxu0 %v6202_v63  ;;  %v6286_v26 = vor.u32 %v6285_v30, %v6282_v28  ;;  %v12304_v4 = vld [vmem:[#allocation6 + $0x180] sm:$0xff]   ;;  %v12305_v63 = vld [vmem:[#allocation6 + $0x1c8] sm:$0xff]  }
 0x2ad   : > { %v6268_v53 = vrot.slane %v15816_v23, 4  ;;  %v15818_v57 = vshll.u32 %v14109_v61, 16  ;;  %v15820_v18 = vshrl.u32 %v15819_v49, 16  ;;  %v15821_v52 = vshll.u32 %v15819_v49, 16  ;;  %v15825_v61 = vld [vmem:[#allocation16_spill] sm:$0xff] }
 0x2ae   : > { %v6325_v25 = vrot.slane %v15817_v62, 3  ;;  %v6261_v2 = vor.u32 %v6260_v48, %v6257_v43  ;;  %v15823_v46 = vshrl.u32 %v15822_v8, 16  ;;  %v15824_v23 = vshll.u32 %v15822_v8, 16 }
 0x2af   : > { %v6328_v41 = vrot.slane %v15818_v57, 4  ;;  %v6333_v20 = vrot.slane %v15820_v18, 3  ;;  %v6269_v3 = vor.u32 %v6268_v53, %v6265_v54  ;;  %v6336_v36 = vrot.slane %v15821_v52, 4 }
 0x2b0   : > { %v6240_v35 = vrot.slane %v15823_v46, 3  ;;  %v6243_v62 = vrot.slane %v15824_v23, 4  ;;  %v6287_v43 = vsel %vm1736_vm1, %v6278_v45, %v6286_v26  ;;  %v15826_v30 = vshrl.u32 %v15825_v61, 16  ;;  %v15830_v26 = vld [vmem:[#allocation32_spill] sm:$0xff] }
 0x2b1   : > { %v6329_v28 = vor.u32 %v6328_v41, %v6325_v25  ;;  %v15827_v57 = vshll.u32 %v15825_v61, 16  ;;  %11368 = vmatmul.mubr.bf16.vlgmr.msra.gmra.mrb[96].mxu1 %v6287_v43  ;;  %v6270_v54 = vsel %vm1736_vm1, %v6261_v2, %v6269_v3  ;;  %v6337_v53 = vor.u32 %v6336_v36, %v6333_v20  ;;  %v12306_v43 = vld [vmem:[#allocation6 + $0x188] sm:$0xff]   ;;  %v15833_v20 = vld [vmem:[#allocation21_spill] sm:$0xff] }
 0x2b2   : > { %v6248_v48 = vrot.slane %v15826_v30, 3  ;;  %v6244_v49 = vor.u32 %v6243_v62, %v6240_v35  ;;  %v15828_v52 = vshrl.u32 %v14142_v24, 16  ;;  %7234 = vmatprep.mubr.bf16.mxu0 %v6270_v54  ;;  %11024 = vmatpush3.bf16.msra.mxu1 %v12304_v4  ;;  %v15829_v45 = vshll.u32 %v14142_v24, 16  ;;  %v15836_v62 = vld [vmem:[#allocation23_spill] sm:$0xff] }
 0x2b3   : > { %v6251_v18 = vrot.slane %v15827_v57, 4  ;;  %v15831_v41 = vshrl.u32 %v15830_v26, 16  ;;  %v15832_v61 = vshll.u32 %v15830_v26, 16  ;;  %v6338_v2 = vsel %vm1736_vm1, %v6329_v28, %v6337_v53  ;;  %11025 = vmatprep.subr.bf16.mxu1 %v12305_v63  ;;  %v12307_v57 = vld [vmem:[#allocation6 + $0x1d0] sm:$0xff]  }
 0x2b4   : > { %v6376_v46 = vrot.slane %v15828_v52, 3  ;;  %v6379_v25 = vrot.slane %v15829_v45, 4  ;;  %v15834_v3 = vshrl.u32 %v15833_v20, 16  ;;  %v15835_v35 = vshll.u32 %v15833_v20, 16  ;;  %11371 = vmatprep.mubr.bf16.mxu1 %v6338_v2 }
 0x2b5   : > { %v6252_v8 = vor.u32 %v6251_v18, %v6248_v48  ;;  %v6384_v23 = vrot.slane %v15831_v41, 3  ;;  %v6387_v30 = vrot.slane %v15832_v61, 4  ;;  %v15837_v48 = vshrl.u32 %v15836_v62, 16 }
 0x2b6   : > { %v6308_v36 = vrot.slane %v15834_v3, 3  ;;  %v6311_v4 = vrot.slane %v15835_v35, 4  ;;  %v6380_v54 = vor.u32 %v6379_v25, %v6376_v46  ;;  %v15838_v45 = vshll.u32 %v15836_v62, 16  ;;  %11026 = vmatpush3.bf16.msra.mxu1 %v12306_v43  ;;  %v15846_v62 = vld [vmem:[#allocation24_spill] sm:$0xff] }
 0x2b7   : > { %v6316_v24 = vrot.slane %v15837_v48, 3  ;;  %v6253_v18 = vsel %vm1736_vm1, %v6244_v49, %v6252_v8  ;;  %v6388_v52 = vor.u32 %v6387_v30, %v6384_v23  ;;  %v15839_v63 = vshrl.u32 %v14186_v38, 16  ;;  %v15843_v8 = vld [vmem:[#allocation22_spill] sm:$0xff]  ;;  %v12308_v30 = vld [vmem:[#allocation6 + $0x190] sm:$0xff]   ;;  %11027 = vmatprep.subr.bf16.mxu1 %v12307_v57 }
 0x2b8   : > { %v6319_v26 = vrot.slane %v15838_v45, 4  ;;  %v6312_v28 = vor.u32 %v6311_v4, %v6308_v36  ;;  %v15840_v41 = vshll.u32 %v14186_v38, 16  ;;  %v15841_v20 = vshrl.u32 %v14188_v17, 16  ;;  %7235 = vmatmul.mubr.bf16.gmra.mrb[228].mxu0 %v6253_v18 }
 0x2b9   : > { %v6427_v53 = vrot.slane %v15839_v63, 3  ;;  %v6389_v2 = vsel %vm1736_vm1, %v6380_v54, %v6388_v52  ;;  %v15842_v49 = vshll.u32 %v14188_v17, 16  ;;  %v15844_v25 = vshrl.u32 %v15843_v8, 16 }
 0x2ba   : > { %v6430_v61 = vrot.slane %v15840_v41, 4  ;;  %v6435_v3 = vrot.slane %v15841_v20, 3  ;;  %v6320_v35 = vor.u32 %v6319_v26, %v6316_v24  ;;  %v15845_v4 = vshll.u32 %v15843_v8, 16  ;;  %v12309_v24 = vld [vmem:[#allocation6 + $0x1d8] sm:$0xff]   ;;  %11372 = vmatmul.mubr.bf16.gmra.mrb[100].mxu1 %v6389_v2 }
 0x2bb   : > { %v6438_v46 = vrot.slane %v15842_v49, 4  ;;  %v6291_v23 = vrot.slane %v15844_v25, 3  ;;  %v15847_v48 = vshrl.u32 %v15846_v62, 16  ;;  %v15848_v18 = vshll.u32 %v15846_v62, 16  ;;  %11028 = vmatpush3.bf16.msra.mxu1 %v12308_v30  ;;  %v12310_v2 = vld [vmem:[#allocation6 + $0x198] sm:$0xff]   ;;  %v15856_v62 = vld [vmem:[#allocation27_spill] sm:$0xff] }
 0x2bc   : > { %v6431_v36 = vor.u32 %v6430_v61, %v6427_v53  ;;  %v6294_v38 = vrot.slane %v15845_v4, 4  ;;  %v6321_v17 = vsel %vm1736_vm1, %v6312_v28, %v6320_v35  ;;  %v15849_v43 = vshrl.u32 %v14214_v5, 16  ;;  %11029 = vmatprep.subr.bf16.mxu1 %v12309_v24 }
 0x2bd   : > { %v6299_v45 = vrot.slane %v15847_v48, 3  ;;  %v6302_v63 = vrot.slane %v15848_v18, 4  ;;  %v6439_v54 = vor.u32 %v6438_v46, %v6435_v3  ;;  %v15850_v26 = vshll.u32 %v14214_v5, 16  ;;  %7242 = vmatprep.mubr.bf16.mxu0 %v6321_v17  ;;  %v15853_v3 = vld [vmem:[#allocation26_spill] sm:$0xff] }
 0x2be   : > { %v6478_v52 = vrot.slane %v15849_v43, 3  ;;  %v6295_v41 = vor.u32 %v6294_v38, %v6291_v23  ;;  %v15851_v20 = vshrl.u32 %v14221_v10, 16  ;;  %v15852_v8 = vshll.u32 %v14221_v10, 16 }
 0x2bf   : > { %v6481_v53 = vrot.slane %v15850_v26, 4  ;;  %v6303_v61 = vor.u32 %v6302_v63, %v6299_v45  ;;  %v6440_v25 = vsel %vm1736_vm1, %v6431_v36, %v6439_v54  ;;  %v15854_v35 = vshrl.u32 %v15853_v3, 16  ;;  %v12311_v36 = vld [vmem:[#allocation6 + $0x1e0] sm:$0xff]   ;;  %11030 = vmatpush3.bf16.msra.mxu1 %v12310_v2 }
 0x2c0   : > { %v6486_v49 = vrot.slane %v15851_v20, 3  ;;  %v6489_v57 = vrot.slane %v15852_v8, 4  ;;  %v15855_v4 = vshll.u32 %v15853_v3, 16  ;;  %11375 = vmatprep.mubr.bf16.mxu1 %v6440_v25  ;;  %v15857_v48 = vshrl.u32 %v15856_v62, 16  ;;  %11031 = vmatprep.subr.bf16.mxu1 %v12311_v36 }
 0x2c1   : > { %v6482_v28 = vor.u32 %v6481_v53, %v6478_v52  ;;  %v6359_v46 = vrot.slane %v15854_v35, 3  ;;  %v6304_v23 = vsel %vm1736_vm1, %v6295_v41, %v6303_v61  ;;  %v15858_v10 = vshll.u32 %v15856_v62, 16  ;;  %v15866_v35 = vld [vmem:[#allocation29_spill] sm:$0xff] }
 0x2c2   : > { %v6362_v5 = vrot.slane %v15855_v4, 4  ;;  %v6490_v38 = vor.u32 %v6489_v57, %v6486_v49  ;;  %v6367_v45 = vrot.slane %v15857_v48, 3  ;;  %v15859_v17 = vshrl.u32 %v14256_v22, 16  ;;  %v15863_v49 = vld [vmem:[#allocation25_spill] sm:$0xff]  ;;  %7243 = vmatmul.mubr.bf16.gmra.mrb[232].mxu0 %v6304_v23 }
 0x2c3   : > { %v6370_v18 = vrot.slane %v15858_v10, 4  ;;  %v15860_v43 = vshll.u32 %v14256_v22, 16  ;;  %v15861_v52 = vshrl.u32 %v14262_v19, 16  ;;  %v15862_v61 = vshll.u32 %v14262_v19, 16  ;;  %v12313_v10 = vld [vmem:[#allocation6 + $0x1e8] sm:$0xff]  }
 0x2c4   : > { %v6363_v63 = vor.u32 %v6362_v5, %v6359_v46  ;;  %v6529_v54 = vrot.slane %v15859_v17, 3  ;;  %v6491_v53 = vsel %vm1736_vm1, %v6482_v28, %v6490_v38  ;;  %v15864_v8 = vshrl.u32 %v15863_v49, 16  ;;  %v12312_v28 = vld [vmem:[#allocation6 + $0x1a0] sm:$0xff]  }
 0x2c5   : > { %v6532_v30 = vrot.slane %v15860_v43, 4  ;;  %v6537_v26 = vrot.slane %v15861_v52, 3  ;;  %v6371_v41 = vor.u32 %v6370_v18, %v6367_v45  ;;  %v6540_v20 = vrot.slane %v15862_v61, 4  ;;  %11376 = vmatmul.mubr.bf16.gmra.mrb[104].mxu1 %v6491_v53  ;;  %v12314_v53 = vld [vmem:[#allocation6 + $0x1a8] sm:$0xff]  }
 0x2c6   : > { %v6342_v24 = vrot.slane %v15864_v8, 3  ;;  %v15865_v25 = vshll.u32 %v15863_v49, 16  ;;  %v15867_v22 = vshrl.u32 %v15866_v35, 16  ;;  %v15868_v4 = vshll.u32 %v15866_v35, 16  ;;  %v15876_v8 = vld [vmem:[#allocation31_spill] sm:$0xff]  ;;  %11032 = vmatpush3.bf16.msra.mxu1 %v12312_v28  ;;  %v15885_v28 = vld [vmem:[#allocation33_spill] sm:$0xff] }
 0x2c7   : > { %v6533_v57 = vor.u32 %v6532_v30, %v6529_v54  ;;  %v6372_v38 = vsel %vm1736_vm1, %v6363_v63, %v6371_v41  ;;  %v6541_v19 = vor.u32 %v6540_v20, %v6537_v26  ;;  %v15869_v62 = vshrl.u32 %v14292_v55, 16  ;;  %v15873_v26 = vld [vmem:[#allocation30_spill] sm:$0xff]  ;;  %v15879_v35 = vld [vmem:[#allocation51_spill] sm:$0xff]  ;;  %11033 = vmatprep.subr.bf16.mxu1 %v12313_v10 }
 0x2c8   : > { %v6345_v3 = vrot.slane %v15865_v25, 4  ;;  %v6350_v46 = vrot.slane %v15867_v22, 3  ;;  %v6353_v5 = vrot.slane %v15868_v4, 4  ;;  %v15870_v23 = vshll.u32 %v14292_v55, 16  ;;  %7250 = vmatprep.mubr.bf16.mxu0 %v6372_v38  ;;  %v15882_v38 = vld [vmem:[#allocation52_spill] sm:$0xff] }
 0x2c9   : > { %v6580_v48 = vrot.slane %v15869_v62, 3  ;;  %v15871_v54 = vshrl.u32 %v14303_v15, 16  ;;  %v15872_v2 = vshll.u32 %v14303_v15, 16  ;;  %v6542_v63 = vsel %vm1736_vm1, %v6533_v57, %v6541_v19 }
 0x2ca   : > { %v6583_v45 = vrot.slane %v15870_v23, 4  ;;  %v6346_v18 = vor.u32 %v6345_v3, %v6342_v24  ;;  %v6354_v17 = vor.u32 %v6353_v5, %v6350_v46  ;;  %v15874_v41 = vshrl.u32 %v15873_v26, 16  ;;  %11379 = vmatprep.mubr.bf16.mxu1 %v6542_v63  ;;  %11034 = vmatpush3.bf16.msra.mxu1 %v12314_v53 }
 0x2cb   : > { %v6588_v43 = vrot.slane %v15871_v54, 3  ;;  %v6591_v30 = vrot.slane %v15872_v2, 4  ;;  %v15875_v55 = vshll.u32 %v15873_v26, 16  ;;  %v15877_v24 = vshrl.u32 %v15876_v8, 16  ;;  %v15888_v26 = vld [vmem:[#allocation34_spill] sm:$0xff] }
 0x2cc   : > { %v6584_v52 = vor.u32 %v6583_v45, %v6580_v48  ;;  %v6410_v61 = vrot.slane %v15874_v41, 3  ;;  %v6355_v20 = vsel %vm1736_vm1, %v6346_v18, %v6354_v17  ;;  %v15878_v15 = vshll.u32 %v15876_v8, 16  ;;  %v12315_v48 = vld [vmem:[#allocation6 + $0x1f0] sm:$0xff]  }
 0x2cd   : > { %v6413_v36 = vrot.slane %v15875_v55, 4  ;;  %v6592_v49 = vor.u32 %v6591_v30, %v6588_v43  ;;  %v6418_v25 = vrot.slane %v15877_v24, 3  ;;  %v15880_v22 = vshrl.u32 %v15879_v35, 16  ;;  %7251 = vmatmul.mubr.bf16.gmra.mrb[236].mxu0 %v6355_v20  ;;  %11035 = vmatprep.subr.bf16.mxu1 %v12315_v48 }
 0x2ce   : > { %v6421_v3 = vrot.slane %v15878_v15, 4  ;;  %v15881_v4 = vshll.u32 %v15879_v35, 16  ;;  %v15883_v19 = vshrl.u32 %v15882_v38, 16  ;;  %v15884_v18 = vshll.u32 %v15882_v38, 16 }
 0x2cf   : > { %v6414_v57 = vor.u32 %v6413_v36, %v6410_v61  ;;  %v6631_v46 = vrot.slane %v15880_v22, 3  ;;  %v6593_v23 = vsel %vm1736_vm1, %v6584_v52, %v6592_v49  ;;  %v15886_v54 = vshrl.u32 %v15885_v28, 16  ;;  %v15891_v49 = vld [vmem:[#allocation55_spill] sm:$0xff] }
 0x2d0   : > { %v6634_v5 = vrot.slane %v15881_v4, 4  ;;  %v6639_v62 = vrot.slane %v15883_v19, 3  ;;  %v6422_v45 = vor.u32 %v6421_v3, %v6418_v25  ;;  %v6642_v17 = vrot.slane %v15884_v18, 4  ;;  %v12316_v3 = vld [vmem:[#allocation6 + $0x1b0] sm:$0xff]   ;;  %11380 = vmatmul.mubr.bf16.gmra.mrb[108].mxu1 %v6593_v23 }
 0x2d1   : > { %v6393_v43 = vrot.slane %v15886_v54, 3  ;;  %v15887_v30 = vshll.u32 %v15885_v28, 16  ;;  %v15889_v41 = vshrl.u32 %v15888_v26, 16  ;;  %v15890_v55 = vshll.u32 %v15888_v26, 16  ;;  %11036 = vmatpush3.bf16.msra.mxu1 %v12316_v3 }
 0x2d2   : > { %v6635_v2 = vor.u32 %v6634_v5, %v6631_v46  ;;  %v6423_v52 = vsel %vm1736_vm1, %v6414_v57, %v6422_v45  ;;  %v6643_v36 = vor.u32 %v6642_v17, %v6639_v62  ;;  %v15892_v8 = vshrl.u32 %v15891_v49, 16  ;;  %v15894_v46 = vld [vmem:[#allocation56_spill] sm:$0xff]  ;;  %v12317_v57 = vld [vmem:[#allocation6 + $0x1f8] sm:$0xff]   ;;  %v15897_v45 = vld [vmem:[#allocation35_spill] sm:$0xff] }
 0x2d3   : > { %v6396_v63 = vrot.slane %v15887_v30, 4  ;;  %v6401_v61 = vrot.slane %v15889_v41, 3  ;;  %v6404_v10 = vrot.slane %v15890_v55, 4  ;;  %v15893_v25 = vshll.u32 %v15891_v49, 16  ;;  %7258 = vmatprep.mubr.bf16.mxu0 %v6423_v52  ;;  %v15900_v30 = vld [vmem:[#allocation36_spill] sm:$0xff]  ;;  %v12318_v49 = vld [vmem:[#allocation6 + $0x1b8] sm:$0xff]   ;;  %11037 = vmatprep.subr.bf16.mxu1 %v12317_v57 }
 0x2d4   : > { %v6682_v24 = vrot.slane %v15892_v8, 3  ;;  %v15895_v4 = vshrl.u32 %v15894_v46, 16  ;;  %v15896_v38 = vshll.u32 %v15894_v46, 16  ;;  %v6644_v19 = vsel %vm1736_vm1, %v6635_v2, %v6643_v36 }
 0x2d5   : > { %v6685_v15 = vrot.slane %v15893_v25, 4  ;;  %v6397_v35 = vor.u32 %v6396_v63, %v6393_v43  ;;  %v6405_v22 = vor.u32 %v6404_v10, %v6401_v61  ;;  %v15898_v18 = vshrl.u32 %v15897_v45, 16  ;;  %11383 = vmatprep.mubr.bf16.mxu1 %v6644_v19  ;;  %11038 = vmatpush3.bf16.msra.mxu1 %v12318_v49 }
 0x2d6   : > { %v6690_v5 = vrot.slane %v15895_v4, 3  ;;  %v6693_v20 = vrot.slane %v15896_v38, 4  ;;  %v15899_v53 = vshll.u32 %v15897_v45, 16  ;;  %v15901_v63 = vshrl.u32 %v15900_v30, 16  ;;  %v14769_v4 = vld [vmem:[#allocation6 + $0x200] sm:$0xff]  }
 0x2d7   : > { %v6686_v62 = vor.u32 %v6685_v15, %v6682_v24  ;;  %v6461_v17 = vrot.slane %v15898_v18, 3  ;;  %v6406_v54 = vsel %vm1736_vm1, %v6397_v35, %v6405_v22  ;;  %v15902_v41 = vshll.u32 %v15900_v30, 16  ;;  %v15907_v35 = vld [vmem:[#allocation37_spill] sm:$0xff]  ;;  %11399 = vmatprep.subr.bf16.mxu1 %v14769_v4 }
 0x2d8   : > { %v6464_v28 = vrot.slane %v15899_v53, 4  ;;  %v6694_v43 = vor.u32 %v6693_v20, %v6690_v5  ;;  %v6469_v26 = vrot.slane %v15901_v63, 3  ;;  %v15903_v2 = vshrl.u32 %v14409_v39, 16  ;;  %v15910_v20 = vld [vmem:[#allocation38_spill] sm:$0xff]  ;;  %7259 = vmatmul.mubr.bf16.gmra.mrb[240].mxu0 %v6406_v54 }
 0x2d9   : > { %v6472_v48 = vrot.slane %v15902_v41, 4  ;;  %v15904_v10 = vshll.u32 %v14409_v39, 16  ;;  %v15905_v36 = vshrl.u32 %v14417_v42, 16  ;;  %v15906_v25 = vshll.u32 %v14417_v42, 16 }
 0x2da   : > { %v6465_v61 = vor.u32 %v6464_v28, %v6461_v17  ;;  %v6733_v55 = vrot.slane %v15903_v2, 3  ;;  %v6695_v8 = vsel %vm1736_vm1, %v6686_v62, %v6694_v43  ;;  %v15908_v22 = vshrl.u32 %v15907_v35, 16 }
 0x2db   : > { %v6736_v52 = vrot.slane %v15904_v10, 4  ;;  %v6741_v23 = vrot.slane %v15905_v36, 3  ;;  %v6473_v24 = vor.u32 %v6472_v48, %v6469_v26  ;;  %v6744_v15 = vrot.slane %v15906_v25, 4  ;;  %11384 = vmatmul.mubr.bf16.gmra.mrb[112].mxu1 %v6695_v8 }
 0x2dc   : > { %v6444_v46 = vrot.slane %v15908_v22, 3  ;;  %v15909_v39 = vshll.u32 %v15907_v35, 16  ;;  %v15911_v19 = vshrl.u32 %v15910_v20, 16  ;;  %v15912_v45 = vshll.u32 %v15910_v20, 16 }
 0x2dd   : > { %v6737_v5 = vor.u32 %v6736_v52, %v6733_v55  ;;  %v6474_v18 = vsel %vm1736_vm1, %v6465_v61, %v6473_v24  ;;  %v6745_v42 = vor.u32 %v6744_v15, %v6741_v23  ;;  %v15913_v17 = vshrl.u32 %v14441_v21, 16  ;;  %v15917_v55 = vld [vmem:[#allocation39_spill] sm:$0xff]  ;;  %v15920_v24 = vld [vmem:[#allocation40_spill] sm:$0xff] }
 0x2de   : > { %v6447_v38 = vrot.slane %v15909_v39, 4  ;;  %v6452_v3 = vrot.slane %v15911_v19, 3  ;;  %v6455_v62 = vrot.slane %v15912_v45, 4  ;;  %v15914_v57 = vshll.u32 %v14441_v21, 16  ;;  %7266 = vmatprep.mubr.bf16.mxu0 %v6474_v18 }
 0x2df   : > { %v6784_v53 = vrot.slane %v15913_v17, 3  ;;  %v15915_v63 = vshrl.u32 %v14443_v47, 16  ;;  %v15916_v41 = vshll.u32 %v14443_v47, 16  ;;  %v6746_v61 = vsel %vm1736_vm1, %v6737_v5, %v6745_v42  ;;  %v15928_v42 = vld [vmem:[#allocation41_spill] sm:$0xff] }
 0x2e0   : > { %v6787_v28 = vrot.slane %v15914_v57, 4  ;;  %v6448_v43 = vor.u32 %v6447_v38, %v6444_v46  ;;  %v6456_v30 = vor.u32 %v6455_v62, %v6452_v3  ;;  %v15918_v10 = vshrl.u32 %v15917_v55, 16  ;;  %v15925_v38 = vld [vmem:[#allocation69_spill] sm:$0xff]  ;;  %11387 = vmatprep.mubr.bf16.mxu1 %v6746_v61 }
 0x2e1   : > { %v6792_v26 = vrot.slane %v15915_v63, 3  ;;  %v6795_v48 = vrot.slane %v15916_v41, 4  ;;  %v15919_v21 = vshll.u32 %v15917_v55, 16  ;;  %v15921_v25 = vshrl.u32 %v15920_v24, 16 }
 0x2e2   : > { %v6788_v2 = vor.u32 %v6787_v28, %v6784_v53  ;;  %v6512_v52 = vrot.slane %v15918_v10, 3  ;;  %v6457_v54 = vsel %vm1736_vm1, %v6448_v43, %v6456_v30  ;;  %v15922_v49 = vshll.u32 %v15920_v24, 16  ;;  %v15931_v43 = vld [vmem:[#allocation42_spill] sm:$0xff] }
 0x2e3   : > { %v6515_v36 = vrot.slane %v15919_v21, 4  ;;  %v6796_v23 = vor.u32 %v6795_v48, %v6792_v26  ;;  %v6520_v47 = vrot.slane %v15921_v25, 3  ;;  %v15923_v22 = vshrl.u32 %v14466_v12, 16  ;;  %7267 = vmatmul.mubr.bf16.gmra.mrb[244].mxu0 %v6457_v54 }
 0x2e4   : > { %v6523_v15 = vrot.slane %v15922_v49, 4  ;;  %v15924_v5 = vshll.u32 %v14466_v12, 16  ;;  %v15926_v20 = vshrl.u32 %v15925_v38, 16  ;;  %v15927_v62 = vshll.u32 %v15925_v38, 16  ;;  %v15941_v38 = vld [vmem:[#allocation44_spill] sm:$0xff] }
 0x2e5   : > { %v6516_v35 = vor.u32 %v6515_v36, %v6512_v52  ;;  %v6835_v46 = vrot.slane %v15923_v22, 3  ;;  %v6797_v3 = vsel %vm1736_vm1, %v6788_v2, %v6796_v23  ;;  %v15929_v17 = vshrl.u32 %v15928_v42, 16 }
 0x2e6   : > { %v6838_v39 = vrot.slane %v15924_v5, 4  ;;  %v6843_v19 = vrot.slane %v15926_v20, 3  ;;  %v6524_v45 = vor.u32 %v6523_v15, %v6520_v47  ;;  %v6846_v18 = vrot.slane %v15927_v62, 4  ;;  %v15938_v15 = vld [vmem:[#allocation43_spill] sm:$0xff]  ;;  %11388 = vmatmul.mubr.bf16.gmra.mrb[116].mxu1 %v6797_v3 }
 0x2e7   : > { %v6495_v8 = vrot.slane %v15929_v17, 3  ;;  %v15930_v57 = vshll.u32 %v15928_v42, 16  ;;  %v15932_v12 = vshrl.u32 %v15931_v43, 16  ;;  %v15933_v63 = vshll.u32 %v15931_v43, 16 }
 0x2e8   : > { %v6839_v53 = vor.u32 %v6838_v39, %v6835_v46  ;;  %v6525_v41 = vsel %vm1736_vm1, %v6516_v35, %v6524_v45  ;;  %v6847_v48 = vor.u32 %v6846_v18, %v6843_v19  ;;  %v15934_v61 = vshrl.u32 %v14505_v13, 16 }
 0x2e9   : > { %v6498_v28 = vrot.slane %v15930_v57, 4  ;;  %v6503_v30 = vrot.slane %v15932_v12, 3  ;;  %v6506_v26 = vrot.slane %v15933_v63, 4  ;;  %v15935_v55 = vshll.u32 %v14505_v13, 16  ;;  %7274 = vmatprep.mubr.bf16.mxu0 %v6525_v41 }
 0x2ea   : > { %v6886_v2 = vrot.slane %v15934_v61, 3  ;;  %v15936_v36 = vshrl.u32 %v14507_v7, 16  ;;  %v15937_v24 = vshll.u32 %v14507_v7, 16  ;;  %v6848_v47 = vsel %vm1736_vm1, %v6839_v53, %v6847_v48 }
 0x2eb   : > { %v6889_v10 = vrot.slane %v15935_v55, 4  ;;  %v6499_v52 = vor.u32 %v6498_v28, %v6495_v8  ;;  %v6507_v21 = vor.u32 %v6506_v26, %v6503_v30  ;;  %v15939_v35 = vshrl.u32 %v15938_v15, 16  ;;  %v15948_v30 = vld [vmem:[#allocation45_spill] sm:$0xff]  ;;  %11391 = vmatprep.mubr.bf16.mxu1 %v6848_v47 }
 0x2ec   : > { %v6894_v23 = vrot.slane %v15936_v36, 3  ;;  %v6897_v25 = vrot.slane %v15937_v24, 4  ;;  %v15940_v46 = vshll.u32 %v15938_v15, 16  ;;  %v15942_v20 = vshrl.u32 %v15941_v38, 16 }
 0x2ed   : > { %v6890_v49 = vor.u32 %v6889_v10, %v6886_v2  ;;  %v6563_v22 = vrot.slane %v15939_v35, 3  ;;  %v6508_v13 = vsel %vm1736_vm1, %v6499_v52, %v6507_v21  ;;  %v15943_v7 = vshll.u32 %v15941_v38, 16  ;;  %v15952_v2 = vld [vmem:[#allocation46_spill] sm:$0xff] }
 0x2ee   : > { %v6566_v5 = vrot.slane %v15940_v46, 4  ;;  %v6898_v39 = vor.u32 %v6897_v25, %v6894_v23  ;;  %v6571_v19 = vrot.slane %v15942_v20, 3  ;;  %v15944_v62 = vshrl.u32 %v14542_v27, 16  ;;  %7275 = vmatmul.mubr.bf16.gmra.mrb[248].mxu0 %v6508_v13 }
 0x2ef   : > { %v6574_v45 = vrot.slane %v15943_v7, 4  ;;  %v15945_v42 = vshll.u32 %v14542_v27, 16  ;;  %v15946_v8 = vshrl.u32 %v14547_v34, 16  ;;  %v15947_v43 = vshll.u32 %v14547_v34, 16 }
 0x2f0   : > { %v6567_v54 = vor.u32 %v6566_v5, %v6563_v22  ;;  %v6937_v18 = vrot.slane %v15944_v62, 3  ;;  %v6899_v57 = vsel %vm1736_vm1, %v6890_v49, %v6898_v39  ;;  %v15949_v63 = vshrl.u32 %v15948_v30, 16  ;;  %v403_v5 = vld [vmem:[#allocation3 + $0x24] sm:$0x1]  ;;  %v14863_v39 = vld [vmem:[#allocation3 + $0x1c] sm:$0xff]  }
 0x2f1   : > { %v6940_v17 = vrot.slane %v15945_v42, 4  ;;  %v6945_v53 = vrot.slane %v15946_v8, 3  ;;  %v6575_v28 = vor.u32 %v6574_v45, %v6571_v19  ;;  %v6948_v12 = vrot.slane %v15947_v43, 4  ;;  %v15959_v19 = vld [vmem:[#allocation47_spill] sm:$0xff]  ;;  %11392 = vmatmul.mubr.bf16.gmra.mrb[120].mxu1 %v6899_v57 }
 0x2f2   : > { %v6546_v26 = vrot.slane %v15949_v63, 3  ;;  %v15950_v41 = vshrl.u32 %v14549_v50, 16  ;;  %v15951_v27 = vshll.u32 %v15948_v30, 16  ;;  %v15953_v55 = vshrl.u32 %v15952_v2, 16  ;;  %v359_v62 = vld [vmem:[#allocation3 + $0x10] sm:$0x1] }
 0x2f3   : > { %v15954_v10 = vshll.u32 %v15952_v2, 16  ;;  %v6576_v34 = vsel %vm1736_vm1, %v6567_v54, %v6575_v28  ;;  %v6941_v21 = vor.u32 %v6940_v17, %v6937_v18  ;;  %v15955_v36 = vshrl.u32 %v14238_v16, 16  ;;  %v14869_v18 = vld [vmem:[#allocation3 + $0x8] sm:$0xff]  }
 0x2f4   : > { %v14846_v48 = vrot.slane %v15950_v41, 3  ;;  %v6549_v61 = vrot.slane %v15951_v27, 4  ;;  %v6554_v3 = vrot.slane %v15953_v55, 3  ;;  %v15956_v24 = vshll.u32 %v14238_v16, 16  ;;  %7282 = vmatprep.mubr.bf16.mxu0 %v6576_v34 }
 0x2f5   : > { %v6557_v52 = vrot.slane %v15954_v10, 4  ;;  %v6988_v23 = vrot.slane %v15955_v36, 3  ;;  %v15957_v15 = vshrl.u32 %v14383_v29, 16  ;;  %v15958_v22 = vshll.u32 %v14383_v29, 16  ;;  %v15962_v29 = vld [vmem:[#allocation48_spill] sm:$0xff]  ;;  %v15968_v36 = vld [vmem:[#allocation49_spill] sm:$0xff] }
 0x2f6   : > { %v6991_v25 = vrot.slane %v15956_v24, 4  ;;  %v6550_v49 = vor.u32 %v6549_v61, %v6546_v26  ;;  %v6949_v38 = vor.u32 %v6948_v12, %v6945_v53  ;;  %v15960_v7 = vshrl.u32 %v15959_v19, 16  ;;  %v406_v61 = vld [vmem:[#allocation3 + $0x38] sm:$0x1] }
 0x2f7   : > { %v6558_v47 = vor.u32 %v6557_v52, %v6554_v3  ;;  %v6996_v35 = vrot.slane %v15957_v15, 3  ;;  %v6999_v46 = vrot.slane %v15958_v22, 4  ;;  %v15961_v54 = vshll.u32 %v15959_v19, 16  ;;  %v12324_v52 = vld [vmem:[#allocation3 + $0x30] sm:$0xff]   ;;  %v15971_v15 = vld [vmem:[#allocation50_spill] sm:$0xff] }
 0x2f8   : > { %v6992_v20 = vor.u32 %v6991_v25, %v6988_v23  ;;  %v6614_v45 = vrot.slane %v15960_v7, 3  ;;  %v15963_v8 = vshrl.u32 %v15962_v29, 16  ;;  %v15964_v43 = vshll.u32 %v15962_v29, 16  ;;  %v409_v29 = vld [vmem:[#allocation3 + $0x4c] sm:$0x1] }
 0x2f9   : > { %v6617_v16 = vrot.slane %v15961_v54, 4  ;;  %v6559_v42 = vsel %vm1736_vm1, %v6550_v49, %v6558_v47  ;;  %v7000_v17 = vor.u32 %v6999_v46, %v6996_v35  ;;  %v15965_v12 = vshrl.u32 %v14556_v59, 16 }
 0x2fa   : > { %v6622_v28 = vrot.slane %v15963_v8, 3  ;;  %v6625_v53 = vrot.slane %v15964_v43, 4  ;;  %v15966_v63 = vshll.u32 %v14556_v59, 16  ;;  %v404_v27 = vsel %vm13274_vm4, 0, %v403_v5  ;;  %v14903_v5 = vld [vmem:[#allocation3 + $0x1c] sm:$0xff]   ;;  %7283 = vmatmul.mubr.bf16.gmra.mrb[252].mxu0 %v6559_v42 }
 0x2fb   : > { %v14878_v30 = vrot.slane %v15965_v12, 3  ;;  %v6618_v41 = vor.u32 %v6617_v16, %v6614_v45  ;;  %v7001_v2 = vsel %vm1736_vm1, %v6992_v20, %v7000_v17  ;;  %405 = vst [vmem:[#allocation3 + $0x24] sm:$0x1] %v404_v27  ;;  %v8108_v3 = vshll.u32 %v14863_v39, 16 }
 0x2fc   : > { %v14882_v26 = vrot.slane %v15966_v63, 4  ;;  %v6626_v55 = vor.u32 %v6625_v53, %v6622_v28  ;;  %v360_v10 = vsel %vm13274_vm4, 0, %v359_v62  ;;  %v6950_v59 = vsel %vm1736_vm1, %v6941_v21, %v6949_v38  ;;  %v15975_v28 = vld [vmem:[#allocation53_spill] sm:$0xff]  ;;  %v15978_v63 = vld [vmem:[#allocation54_spill] sm:$0xff] }
 0x2fd   : > { %361 = vst [vmem:[#allocation3 + $0x10] sm:$0x1] %v360_v10  ;;  %v8096_v34 = vshll.u32 %v14869_v18, 16  ;;  %v15969_v23 = vshrl.u32 %v15968_v36, 16  ;;  %v15970_v25 = vshll.u32 %v15968_v36, 16  ;;  %11395 = vmatprep.mubr.bf16.mxu1 %v6950_v59  ;;  %v15972_v35 = vshrl.u32 %v15971_v15, 16 }
 0x2fe   : > { %v6627_v47 = vsel %vm1736_vm1, %v6618_v41, %v6626_v55  ;;  %v15973_v46 = vshll.u32 %v15971_v15, 16  ;;  %v407_v21 = vsel %vm13274_vm4, 0, %v406_v61  ;;  %v15974_v38 = vshll.u32 %v14549_v50, 16  ;;  %v14921_v55 = vld [vmem:[#allocation3 + $0x44] sm:$0xff]   ;;  %11396 = vmatmul.mubr.bf16.gmra.mrb[124].mxu1 %v7001_v2 }
 0x2ff   : > { %v6665_v24 = vrot.slane %v15969_v23, 3  ;;  %v6668_v49 = vrot.slane %v15970_v25, 4  ;;  %v6673_v22 = vrot.slane %v15972_v35, 3  ;;  %v6966_v19 = vor.u32 %v14882_v26, %v14878_v30  ;;  %408 = vst [vmem:[#allocation3 + $0x38] sm:$0x1] %v407_v21  ;;  %7290 = vmatprep.mubr.bf16.mxu0 %v6627_v47  ;;  %v15982_v36 = vld [vmem:[#allocation61_spill] sm:$0xff] }
 0x300   : > { %v6676_v57 = vrot.slane %v15973_v46, 4  ;;  %v6957_v20 = vrot.slane %v15974_v38, 4  ;;  %v8106_v7 = vshrl.u32 %v14863_v39, 16  ;;  %v8110_v54 = vrot.slane %v8108_v3, 1  ;;  %v15984_v23 = vld [vmem:[#allocation60_spill] sm:$0xff]  ;;  %v15988_v15 = vld [vmem:[#allocation65_spill] sm:$0xff] }
 0x301   : > { %v6669_v45 = vor.u32 %v6668_v49, %v6665_v24  ;;  %v8094_v16 = vshrl.u32 %v14869_v18, 16  ;;  %v8144_v17 = vshll.u32 %v12324_v52, 16  ;;  %v8098_v8 = vrot.slane %v8096_v34, 1  ;;  %v15981_v34 = vld [vmem:[#allocation62_spill] sm:$0xff]  ;;  %v15991_v46 = vld [vmem:[#allocation63_spill] sm:$0xff] }
 0x302   : > { %v6677_v62 = vor.u32 %v6676_v57, %v6673_v22  ;;  %v15976_v43 = vshrl.u32 %v15975_v28, 16  ;;  %v15977_v50 = vshll.u32 %v15975_v28, 16  ;;  %v15979_v41 = vshrl.u32 %v15978_v63, 16  ;;  %v12320_v10 = vld [vmem:[#allocation3 + $0x24] ss:$0 sps:$4 sm:$0x11]   ;;  %7291 = vmatmul.mubr.bf16.gmra.mrb[0].mxu0 %v14518_v58 }
 0x303   : > { %v8142_v26 = vshrl.u32 %v12324_v52, 16  ;;  %v8132_v27 = vshll.u32 %v14903_v5, 16  ;;  %v15980_v18 = vshll.u32 %v15978_v63, 16  ;;  %v6958_v3 = vor.u32 %v6957_v20, %v14846_v48  ;;  %v15985_v24 = vld [vmem:[#allocation58_spill] sm:$0xff]  ;;  %v15990_v22 = vld [vmem:[#allocation64_spill] sm:$0xff] }
 0x304   : > { %v6716_v53 = vrot.slane %v15976_v43, 3  ;;  %v6719_v12 = vrot.slane %v15977_v50, 4  ;;  %v6724_v30 = vrot.slane %v15979_v41, 3  ;;  %v6678_v39 = vsel %vm1736_vm1, %v6669_v45, %v6677_v62  ;;  %v15987_v49 = vld [vmem:[#allocation66_spill] sm:$0xff] }
 0x305   : > { %v6727_v61 = vrot.slane %v15980_v18, 4  ;;  %v410_v59 = vsel %vm13274_vm4, 0, %v409_v29  ;;  %v15983_v42 = vor.u32 %v15981_v34, %v15982_v36  ;;  %v15986_v52 = vor.u32 %v15984_v23, %v15985_v24  ;;  %v12322_v21 = vld [vmem:[#allocation3 + $0x10] ss:$0 sps:$4 sm:$0x11]   ;;  %7298 = vmatprep.mubr.bf16.mxu0 %v6678_v39  ;;  %v15002_v39 = vld [vmem:[#allocation3 + $0x58] sm:$0xff]  }
 0x306   : > { %v15989_v35 = vor.u32 %v15987_v49, %v15988_v15  ;;  %v15992_v48 = vor.u32 %v15990_v22, %v15991_v46  ;;  %v8111_v57 = vor.u32 %v8110_v54, %v8106_v7  ;;  %v8146_v38 = vrot.slane %v8144_v17, 1  ;;  %411 = vst [vmem:[#allocation3 + $0x4c] sm:$0x1] %v410_v59  ;;  %v12327_v29 = vld [vmem:[#allocation3 + $0x24] ss:$0 sps:$4 sm:$0x11]  }
 0x307   : > { %v14933_v25 = vsel %vm1736_vm1, %v15986_v52, %v15983_v42  ;;  %v6720_v20 = vor.u32 %v6719_v12, %v6716_v53  ;;  %v6728_v45 = vor.u32 %v6727_v61, %v6724_v30  ;;  %v8113_v62 = vshll.u32 %v12320_v10, 16  ;;  %v12325_v53 = vld [vmem:[#allocation3 + $0x38] ss:$0 sps:$4 sm:$0x11]   ;;  %v14987_v18 = vld [vmem:[#allocation3 + $0x30] sm:$0xff]   ;;  %v16001_v61 = vld [vmem:[#allocation57_spill] sm:$0xff] }
 0x308   : > { %v14942_v47 = vsel %vm1736_vm1, %v15992_v48, %v15989_v35  ;;  %v15993_v28 = vor.u32 %v14487_v40, %v14485_v6  ;;  %v15994_v43 = vor.u32 %v14483_v9, %v14480_v33  ;;  %v15995_v7 = vor.u32 %v14503_v44, %v14501_v0  ;;  %v12332_v42 = vld [vmem:[#allocation6 + $0x208] sm:$0xff]   ;;  %v412_v23 = vld [vmem:[#allocation3 + $0x60] sm:$0x1] }
 0x309   : > { %v15996_v54 = vor.u32 %v14495_v51, %v14493_v1  ;;  %v15997_v2 = vor.u32 %v14535_v37, %v14533_v11  ;;  %v15998_v6 = vor.u32 %v14531_v56, %v14529_v32  ;;  %v8099_v9 = vor.u32 %v8098_v8, %v8094_v16  ;;  %v15999_v51 = vld [vmem:[#allocation70_spill] sm:$0xff]  ;;  %v16000_v11 = vld [vmem:[#allocation68_spill] sm:$0xff]  ;;  %v16004_v35 = vld [vmem:[#allocation59_spill] sm:$0xff] }
 0x30a   : > { %v14951_v50 = vsel %vm1736_vm1, %v15994_v43, %v15993_v28  ;;  %v8101_v40 = vshll.u32 %v12322_v21, 16  ;;  %v14972_v0 = vsel %vm1736_vm1, %v6720_v20, %v6728_v45  ;;  %v14975_v1 = vsel %vm1736_vm1, %v6958_v3, %v6966_v19  ;;  %v12331_v45 = vld [vmem:[#allocation3 + $0x38] ss:$0 sps:$4 sm:$0x11]   ;;  %7299 = vmatmul.mubr.bf16.gmra.mrb[4].mxu0 %v14527_v60  ;;  %v12350_v60 = vld [vmem:[#allocation6 + $0x218] sm:$0xff]  }
 0x30b   : > { %v14960_v17 = vsel %vm1736_vm1, %v15996_v54, %v15995_v7  ;;  %v14969_v33 = vsel %vm1736_vm1, %v15998_v6, %v15997_v2  ;;  %v6875_v44 = vshrl.u32 %v15999_v51, 16  ;;  %v6878_v12 = vshll.u32 %v15999_v51, 16  ;;  %v415_v54 = vld [vmem:[#allocation3 + $0x74] sm:$0x1]  ;;  %v12341_v2 = vld [vmem:[#allocation6 + $0x210] sm:$0xff]   ;;  %7306 = vmatprep.mubr.bf16.mxu0 %v14972_v0 }
 0x30c   : > { %v14981_v37 = vcombine.low %v16000_v11, %v16000_v11  ;;  %v8115_v32 = vrot.slane %v8113_v62, 1  ;;  %v8103_v56 = vrot.slane %v8101_v40, 1  ;;  %v8147_v63 = vor.u32 %v8146_v38, %v8142_v26  ;;  %v16007_v40 = vld [vmem:[#allocation13_spill] sm:$0xff] }
 0x30d   : > { %v8149_v16 = vshll.u32 %v12325_v53, 16  ;;  %v8180_v8 = vshll.u32 %v14921_v55, 16  ;;  %v6918_v41 = vshrl.u32 %v14545_v31, 16  ;;  %v8130_v19 = vshrl.u32 %v14903_v5, 16 }
 0x30e   : > { %v8116_v30 = vsel %vm3644_vm5, %v8111_v57, %v8115_v32  ;;  %v16002_v3 = vshrl.u32 %v16001_v61, 16  ;;  %v8104_v59 = vsel %vm3644_vm5, %v8099_v9, %v8103_v56  ;;  %v8134_v34 = vrot.slane %v8132_v27, 1  ;;  %v12329_v24 = vld [vmem:[#allocation3 + $0x4c] ss:$0 sps:$4 sm:$0x11]   ;;  %v15010_v9 = vld [vmem:[#allocation3 + $0x44] sm:$0xff]  }
 0x30f   : > { %8893 = vmatprep.mubr.bf16.mxu1 %v8116_v30  ;;  %v8151_v26 = vrot.slane %v8149_v16, 1  ;;  %v8137_v36 = vshll.u32 %v12327_v29, 16  ;;  %v16003_v52 = vshll.u32 %v16001_v61, 16  ;;  %v8182_v15 = vrot.slane %v8180_v8, 1  ;;  %v16010_v56 = vld [vmem:[#allocation67_spill] sm:$0xff] }
 0x310   : > { %v6767_v10 = vrot.slane %v16002_v3, 3  ;;  %v16005_v22 = vshrl.u32 %v16004_v35, 16  ;;  %8894 = vmatmul.mubr.bf16.vlgmr.msra.gmra.mrb[128].mxu1 %v8104_v59  ;;  %v8185_v58 = vshll.u32 %v12329_v24, 16  ;;  %v16006_v57 = vshll.u32 %v16004_v35, 16  ;;  %v5091_v8 = vld [vmem:[#allocation3 + $0x144] sm:$0x8] }
 0x311   : > { %v6770_v5 = vrot.slane %v16003_v52, 4  ;;  %v8152_v49 = vsel %vm3644_vm5, %v8147_v63, %v8151_v26  ;;  %v413_v21 = vsel %vm13274_vm4, 0, %v412_v23  ;;  %v6921_v38 = vshll.u32 %v14545_v31, 16  ;;  %11400 = vmatpush3.bf16.msra.mxu1 %v14769_v4  ;;  %v10767_v59 = vpop.f32.mrb[160].mxu0  ;;  %v12377_v31 = vld [vmem:[#allocation6 + $0x230] sm:$0xff]  }
 0x312   : > { %v6775_v46 = vrot.slane %v16005_v22, 3  ;;  %v6778_v27 = vrot.slane %v16006_v57, 4  ;;  %v6926_v20 = vshrl.u32 %v14981_v37, 16  ;;  %8901 = vmatprep.mubr.bf16.mxu1 %v8152_v49  ;;  %v8168_v62 = vshll.u32 %v14987_v18, 16  ;;  %414 = vst [vmem:[#allocation3 + $0x60] sm:$0x1] %v413_v21  ;;  %11401 = vmatprep.subr.bf16.mxu1 %v12332_v42 }
 0x313   : > { %v6771_v48 = vor.u32 %v6770_v5, %v6767_v10  ;;  %v8135_v29 = vor.u32 %v8134_v34, %v8130_v19  ;;  %v8139_v28 = vrot.slane %v8137_v36, 1  ;;  %v8178_v43 = vshrl.u32 %v14921_v55, 16  ;;  %v10768_v52 = vpop.f32.mrb[161].mxu0  ;;  %v15030_v5 = vld [vmem:[#allocation3 + $0x4c] ss:$0 sps:$4 sm:$0x11]   ;;  %7307 = vmatmul.mubr.bf16.gmra.mrb[8].mxu0 %v14933_v25 }
 0x314   : > { %v6779_v7 = vor.u32 %v6778_v27, %v6775_v46  ;;  %v6929_v6 = vshll.u32 %v14981_v37, 16  ;;  %v16008_v53 = vshrl.u32 %v16007_v40, 16  ;;  %v16009_v4 = vshll.u32 %v16007_v40, 16  ;;  %v15035_v46 = vld [vmem:[#allocation3 + $0x6c] sm:$0xff]  }
 0x315   : > { %v16011_v63 = vshrl.u32 %v16010_v56, 16  ;;  %v8183_v30 = vor.u32 %v8182_v15, %v8178_v43  ;;  %v8187_v55 = vrot.slane %v8185_v58, 1  ;;  %v8216_v61 = vshll.u32 %v15002_v39, 16  ;;  %11402 = vmatpush3.bf16.msra.mxu1 %v12332_v42  ;;  %v10770_v15 = vpop.f32.mrb[162].mxu0  ;;  %v418_v58 = vld [vmem:[#allocation3 + $0x88] sm:$0x1] }
 0x316   : > { %v6818_v11 = vrot.slane %v16008_v53, 3  ;;  %v6821_v32 = vrot.slane %v16009_v4, 4  ;;  %v15019_v19 = vsel %vm1736_vm1, %v6771_v48, %v6779_v7  ;;  %v8170_v3 = vrot.slane %v8168_v62, 1  ;;  %11403 = vmatprep.subr.bf16.mxu1 %v12341_v2  ;;  %v10771_v62 = vpop.f32.mrb[163].mxu0  ;;  %v12359_v53 = vld [vmem:[#allocation6 + $0x220] sm:$0xff]  }
 0x317   : > { %v6826_v16 = vrot.slane %v16011_v63, 3  ;;  %v8173_v10 = vshll.u32 %v12331_v45, 16  ;;  %v16012_v26 = vshll.u32 %v16010_v56, 16  ;;  %v416_v36 = vsel %vm13274_vm4, 0, %v415_v54  ;;  %7314 = vmatprep.mubr.bf16.mxu0 %v15019_v19 }
 0x318   : > { %v8140_v23 = vsel %vm3644_vm5, %v8135_v29, %v8139_v28  ;;  %v8166_v24 = vshrl.u32 %v14987_v18, 16  ;;  %417 = vst [vmem:[#allocation3 + $0x74] sm:$0x1] %v416_v36  ;;  %v15032_v42 = vadd.f32 %v10768_v52, %v10767_v59  ;;  %v8204_v49 = vshll.u32 %v15010_v9, 16  ;;  %v16013_v29 = vld [vmem:[#allocation11_spill] sm:$0xff] }
 0x319   : > { %v6829_v34 = vrot.slane %v16012_v26, 4  ;;  %v6822_v35 = vor.u32 %v6821_v32, %v6818_v11  ;;  %v15038_v0 = vcombine.low %v5091_v8, %v14509_v14  ;;  %8902 = vmatmul.mubr.bf16.gmra.mrb[132].mxu1 %v8140_v23  ;;  %v8188_v18 = vsel %vm3644_vm5, %v8183_v30, %v8187_v55  ;;  %v12334_v48 = vld [vmem:[#allocation3 + $0x60] ss:$0 sps:$4 sm:$0x11]   ;;  %v15057_v8 = vld [vmem:[#allocation3 + $0x58] sm:$0xff]   ;;  %v12368_v36 = vld [vmem:[#allocation6 + $0x228] sm:$0xff]  }
 0x31a   : > { %v8218_v57 = vrot.slane %v8216_v61, 1  ;;  %8909 = vmatprep.mubr.bf16.mxu1 %v8188_v18  ;;  %v8171_v27 = vor.u32 %v8170_v3, %v8166_v24  ;;  %v8175_v21 = vrot.slane %v8173_v10, 1  ;;  %v16014_v28 = vshrl.u32 %v16013_v29, 16  ;;  %11404 = vmatpush3.bf16.msra.mxu1 %v12341_v2  ;;  %v12426_v55 = vld [vmem:[#allocation3 + $0x14c] sm:$0xf]  ;;  %v10773_v10 = vpop.f32.mrb[164].mxu0 }
 0x31b   : > { %v6830_v22 = vor.u32 %v6829_v34, %v6826_v16  ;;  %v8214_v7 = vshrl.u32 %v15002_v39, 16  ;;  %v8221_v14 = vshll.u32 %v12334_v48, 16  ;;  %v8209_v54 = vshll.u32 %v15030_v5, 16  ;;  %11405 = vmatprep.subr.bf16.mxu1 %v12350_v60  ;;  %v10774_v34 = vpop.f32.mrb[165].mxu0  ;;  %7315 = vmatmul.mubr.bf16.gmra.mrb[12].mxu0 %v14942_v47 }
 0x31c   : > { %v6869_v43 = vrot.slane %v16014_v28, 3  ;;  %v15048_v40 = vadd.f32 %v10771_v62, %v10770_v15  ;;  %v8252_v11 = vshll.u32 %v15035_v46, 16  ;;  %v16015_v4 = vshll.u32 %v16013_v29, 16  ;;  %v10776_v52 = vpop.f32.mrb[166].mxu0 }
 0x31d   : > { %v15042_v45 = vsel %vm1736_vm1, %v6822_v35, %v6830_v22  ;;  %v6877_v56 = vrot.slane %v6875_v44, 3  ;;  %v6880_v2 = vrot.slane %v6878_v12, 4  ;;  %v8219_v63 = vor.u32 %v8218_v57, %v8214_v7  ;;  %v10777_v19 = vpop.f32.mrb[167].mxu0  ;;  %v12340_v62 = vld [vmem:[#allocation3 + $0x60] ss:$0 sps:$4 sm:$0x11]  }
 0x31e   : > { %v6872_v32 = vrot.slane %v16015_v4, 4  ;;  %v8223_v39 = vrot.slane %v8221_v14, 1  ;;  %v8206_v16 = vrot.slane %v8204_v49, 1  ;;  %v419_v30 = vsel %vm13274_vm4, 0, %v418_v58  ;;  %11406 = vmatpush3.bf16.msra.mxu1 %v12350_v60  ;;  %v15074_v60 = vld [vmem:[#allocation3 + $0x80] sm:$0xff]   ;;  %v10779_v37 = vpop.f32.mrb[168].mxu0  ;;  %7322 = vmatprep.mubr.bf16.mxu0 %v15042_v45 }
 0x31f   : > { %v15061_v61 = vcombine.low %v12426_v55, %v12426_v55  ;;  %v12338_v3 = vld [vmem:[#allocation3 + $0x74] ss:$0 sps:$4 sm:$0x11]   ;;  %v6881_v44 = vor.u32 %v6880_v2, %v6877_v56  ;;  %420 = vst [vmem:[#allocation3 + $0x88] sm:$0x1] %v419_v30  ;;  %v6969_v51 = vshrl.u32 %v15038_v0, 16  ;;  %v8176_v26 = vsel %vm3644_vm5, %v8171_v27, %v8175_v21  ;;  %11407 = vmatprep.subr.bf16.mxu1 %v12359_v53 }
 0x320   : > { %v6873_v59 = vor.u32 %v6872_v32, %v6869_v43  ;;  %v6972_v12 = vshll.u32 %v15038_v0, 16  ;;  %v8202_v23 = vshrl.u32 %v15010_v9, 16  ;;  %v8254_v25 = vrot.slane %v8252_v11, 1  ;;  %v421_v49 = vld [vmem:[#allocation3 + $0x9c] sm:$0x1]  ;;  %v10780_v4 = vpop.f32.mrb[169].mxu0 }
 0x321   : > { %v15069_v24 = vadd.f32 %v10774_v34, %v10773_v10  ;;  %8910 = vmatmul.mubr.bf16.gmra.mrb[136].mxu1 %v8176_v26  ;;  %v8224_v15 = vsel %vm3644_vm5, %v8219_v63, %v8223_v39  ;;  %v8257_v35 = vshll.u32 %v12338_v3, 16  ;;  %v6920_v22 = vrot.slane %v6918_v41, 3  ;;  %v424_v2 = vld [vmem:[#allocation3 + $0xb0] sm:$0x1]  ;;  %v12386_v63 = vld [vmem:[#allocation6 + $0x238] sm:$0xff]   ;;  %v10782_v30 = vpop.f32.mrb[170].mxu0 }
 0x322   : > { %v15072_v5 = vsel %vm1736_vm1, %v6873_v59, %v6881_v44  ;;  %v6923_v9 = vrot.slane %v6921_v38, 4  ;;  %v6977_v58 = vshrl.u32 %v15061_v61, 16  ;;  %8917 = vmatprep.mubr.bf16.mxu1 %v8224_v15  ;;  %v8207_v0 = vor.u32 %v8206_v16, %v8202_v23  ;;  %11408 = vmatpush3.bf16.msra.mxu1 %v12359_v53  ;;  %v10783_v45 = vpop.f32.mrb[171].mxu0  ;;  %v427_v34 = vld [vmem:[#allocation3 + $0xc4] sm:$0x1] }
 0x323   : > { %v8211_v18 = vrot.slane %v8209_v54, 1  ;;  %v15082_v48 = vadd.f32 %v10777_v19, %v10776_v52  ;;  %v8250_v57 = vshrl.u32 %v15035_v46, 16  ;;  %v8240_v27 = vshll.u32 %v15057_v8, 16  ;;  %11409 = vmatprep.subr.bf16.mxu1 %v12368_v36  ;;  %v12345_v23 = vld [vmem:[#allocation3 + $0x74] ss:$0 sps:$4 sm:$0x11]   ;;  %7323 = vmatmul.mubr.bf16.gmra.mrb[16].mxu0 %v14951_v50 }
 0x324   : > { %v6928_v21 = vrot.slane %v6926_v20, 3  ;;  %v6931_v41 = vrot.slane %v6929_v6, 4  ;;  %v6980_v38 = vshll.u32 %v15061_v61, 16  ;;  %v8288_v29 = vshll.u32 %v15074_v60, 16  ;;  %v15095_v20 = vld [vmem:[#allocation3 + $0x6c] sm:$0xff]   ;;  %v15097_v6 = vld [vmem:[#allocation3 + $0x94] sm:$0xff]   ;;  %7330 = vmatprep.mubr.bf16.mxu0 %v15072_v5 }
 0x325   : > { %v422_v28 = vsel %vm13274_vm4, 0, %v421_v49  ;;  %v8255_v43 = vor.u32 %v8254_v25, %v8250_v57  ;;  %v8259_v46 = vrot.slane %v8257_v35, 1  ;;  %v6924_v14 = vor.u32 %v6923_v9, %v6920_v22  ;;  %v12348_v57 = vld [vmem:[#allocation3 + $0x80] sm:$0xff]  }
 0x326   : > { %v12343_v7 = vld [vmem:[#allocation3 + $0x88] ss:$0 sps:$4 sm:$0x11]   ;;  %v6932_v54 = vor.u32 %v6931_v41, %v6928_v21  ;;  %423 = vst [vmem:[#allocation3 + $0x9c] sm:$0x1] %v422_v28  ;;  %11410 = vmatpush3.bf16.msra.mxu1 %v12368_v36  ;;  %v8212_v53 = vsel %vm3644_vm5, %v8207_v0, %v8211_v18  ;;  %v8242_v11 = vrot.slane %v8240_v27, 1  ;;  %v15104_v16 = vadd.f32 %v10780_v4, %v10779_v37 }
 0x327   : > { %v6971_v56 = vrot.slane %v6969_v51, 3  ;;  %11411 = vmatprep.subr.bf16.mxu1 %v12377_v31  ;;  %v8245_v47 = vshll.u32 %v12340_v62, 16  ;;  %v8290_v39 = vrot.slane %v8288_v29, 1  ;;  %v6974_v55 = vrot.slane %v6972_v12, 4  ;;  %v430_v27 = vld [vmem:[#allocation3 + $0xd8] sm:$0x1] }
 0x328   : > { %v15102_v32 = vsel %vm1736_vm1, %v6924_v14, %v6932_v54  ;;  %v8260_v61 = vsel %vm3644_vm5, %v8255_v43, %v8259_v46  ;;  %v8293_v3 = vshll.u32 %v12343_v7, 16  ;;  %v6979_v10 = vrot.slane %v6977_v58, 3  ;;  %v12351_v62 = vld [vmem:[#allocation3 + $0xa8] sm:$0xff]  }
 0x329   : > { %8918 = vmatmul.mubr.bf16.gmra.mrb[140].mxu1 %v8212_v53  ;;  %v6982_v59 = vrot.slane %v6980_v38, 4  ;;  %v8238_v44 = vshrl.u32 %v15057_v8, 16  ;;  %v15108_v51 = vadd.f32 %v10783_v45, %v10782_v30  ;;  %v6975_v26 = vor.u32 %v6974_v55, %v6971_v56  ;;  %v12353_v45 = vld [vmem:[#allocation3 + $0x94] sm:$0xff]  }
 0x32a   : > { %8925 = vmatprep.mubr.bf16.mxu1 %v8260_v61  ;;  %v8286_v36 = vshrl.u32 %v15074_v60, 16  ;;  %v425_v12 = vsel %vm13274_vm4, 0, %v424_v2  ;;  %11412 = vmatpush3.bf16.msra.mxu1 %v12377_v31  ;;  %v8247_v49 = vrot.slane %v8245_v47, 1  ;;  %v8276_v15 = vshll.u32 %v15095_v20, 16  ;;  %v10785_v60 = vpop.f32.mrb[172].mxu0 }
 0x32b   : > { %v6983_v25 = vor.u32 %v6982_v59, %v6979_v10  ;;  %v8243_v52 = vor.u32 %v8242_v11, %v8238_v44  ;;  %v8324_v35 = vshll.u32 %v15097_v6, 16  ;;  %426 = vst [vmem:[#allocation3 + $0xb0] sm:$0x1] %v425_v12  ;;  %11413 = vmatprep.subr.bf16.mxu1 %v12386_v63  ;;  %v8295_v19 = vrot.slane %v8293_v3, 1  ;;  %v10786_v18 = vpop.f32.mrb[173].mxu0  ;;  %7331 = vmatmul.mubr.bf16.gmra.mrb[20].mxu0 %v14960_v17  ;;  %v12355_v17 = vld [vmem:[#allocation3 + $0xbc] sm:$0xff]  }
 0x32c   : > { %v8291_v8 = vor.u32 %v8290_v39, %v8286_v36  ;;  %v428_v58 = vsel %vm13274_vm4, 0, %v427_v34  ;;  %v8281_v0 = vshll.u32 %v12345_v23, 16  ;;  %v8278_v41 = vrot.slane %v8276_v15, 1  ;;  %v10788_v38 = vpop.f32.mrb[174].mxu0  ;;  %7338 = vmatprep.mubr.bf16.mxu0 %v15102_v32  ;;  %v436_v23 = vld [vmem:[#allocation3 + $0x100] sm:$0x1] }
 0x32d   : > { %v12347_v22 = vld [vmem:[#allocation3 + $0x9c] ss:$0 sps:$4 sm:$0x11]   ;;  %v15116_v9 = vsel %vm1736_vm1, %v6975_v26, %v6983_v25  ;;  %429 = vst [vmem:[#allocation3 + $0xc4] sm:$0x1] %v428_v58  ;;  %v8248_v21 = vsel %vm3644_vm5, %v8243_v52, %v8247_v49  ;;  %v15123_v31 = vadd.f32 %v10786_v18, %v10785_v60  ;;  %v8326_v29 = vrot.slane %v8324_v35, 1 }
 0x32e   : > { %11414 = vmatpush3.bf16.msra.mxu1 %v12386_v63  ;;  %v8296_v50 = vsel %vm3644_vm5, %v8291_v8, %v8295_v19  ;;  %v8329_v28 = vshll.u32 %v12347_v22, 16  ;;  %v10789_v43 = vpop.f32.mrb[175].mxu0  ;;  %v8274_v5 = vshrl.u32 %v15095_v20, 16  ;;  %v431_v7 = vsel %vm13274_vm4, 0, %v430_v27  ;;  %v433_v20 = vld [vmem:[#allocation3 + $0xec] sm:$0x1] }
 0x32f   : > { %v15127_v46 = vadd.f32 %v10789_v43, %v10788_v38  ;;  %v8283_v14 = vrot.slane %v8281_v0, 1  ;;  %v8322_v54 = vshrl.u32 %v15097_v6, 16  ;;  %v8312_v37 = vshll.u32 %v12348_v57, 16  ;;  %432 = vst [vmem:[#allocation3 + $0xd8] sm:$0x1] %v431_v7  ;;  %v10791_v47 = vpop.f32.mrb[176].mxu0 }
 0x330   : > { %v8279_v53 = vor.u32 %v8278_v41, %v8274_v5  ;;  %v12349_v11 = vld [vmem:[#allocation3 + $0x88] ss:$0 sps:$4 sm:$0x11]   ;;  %v8360_v4 = vshll.u32 %v12351_v62, 16  ;;  %v8331_v2 = vrot.slane %v8329_v28, 1  ;;  %v10792_v39 = vpop.f32.mrb[177].mxu0 }
 0x331   : > { %8926 = vmatmul.mubr.bf16.gmra.mrb[144].mxu1 %v8248_v21  ;;  %v8327_v56 = vor.u32 %v8326_v29, %v8322_v54  ;;  %v8314_v55 = vrot.slane %v8312_v37, 1  ;;  %v8317_v61 = vshll.u32 %v12349_v11, 16  ;;  %v15135_v6 = vadd.f32 %v10792_v39, %v10791_v47  ;;  %v10794_v3 = vpop.f32.mrb[178].mxu0  ;;  %v12354_v12 = vld [vmem:[#allocation3 + $0x9c] ss:$0 sps:$4 sm:$0x11]  }
 0x332   : > { %8933 = vmatprep.mubr.bf16.mxu1 %v8296_v50  ;;  %v12352_v63 = vld [vmem:[#allocation3 + $0xb0] ss:$0 sps:$4 sm:$0x11]   ;;  %v8284_v30 = vsel %vm3644_vm5, %v8279_v53, %v8283_v14  ;;  %v8362_v59 = vrot.slane %v8360_v4, 1  ;;  %v10795_v26 = vpop.f32.mrb[179].mxu0  ;;  %v434_v34 = vsel %vm13274_vm4, 0, %v433_v20 }
 0x333   : > { %v8332_v10 = vsel %vm3644_vm5, %v8327_v56, %v8331_v2  ;;  %v8365_v44 = vshll.u32 %v12352_v63, 16  ;;  %v8310_v32 = vshrl.u32 %v12348_v57, 16  ;;  %v15140_v36 = vadd.f32 %v10795_v26, %v10794_v3  ;;  %435 = vst [vmem:[#allocation3 + $0xec] sm:$0x1] %v434_v34  ;;  %7339 = vmatmul.mubr.bf16.gmra.mrb[24].mxu0 %v14969_v33  ;;  %v10797_v58 = vpop.f32.mrb[180].mxu0  ;;  %v12357_v57 = vld [vmem:[#allocation3 + $0xa8] sm:$0xff]  }
 0x334   : > { %v8358_v25 = vshrl.u32 %v12351_v62, 16  ;;  %v8319_v49 = vrot.slane %v8317_v61, 1  ;;  %v8348_v15 = vshll.u32 %v12353_v45, 16  ;;  %v12356_v35 = vld [vmem:[#allocation3 + $0xc4] ss:$0 sps:$4 sm:$0x11]   ;;  %7346 = vmatprep.mubr.bf16.mxu0 %v15116_v9 }
 0x335   : > { %v8315_v52 = vor.u32 %v8314_v55, %v8310_v32  ;;  %v8367_v19 = vrot.slane %v8365_v44, 1  ;;  %v8396_v22 = vshll.u32 %v12355_v17, 16  ;;  %v437_v60 = vsel %vm13274_vm4, 0, %v436_v23  ;;  %v10798_v18 = vpop.f32.mrb[181].mxu0  ;;  %v12360_v62 = vld [vmem:[#allocation3 + $0xd0] sm:$0xff]   ;;  %v12362_v3 = vld [vmem:[#allocation3 + $0xbc] sm:$0xff]  }
 0x336   : > { %v8363_v8 = vor.u32 %v8362_v59, %v8358_v25  ;;  %438 = vst [vmem:[#allocation3 + $0x100] sm:$0x1] %v437_v60  ;;  %v8353_v0 = vshll.u32 %v12354_v12, 16  ;;  %v8350_v21 = vrot.slane %v8348_v15, 1  ;;  %v15147_v41 = vadd.f32 %v10798_v18, %v10797_v58  ;;  %v10800_v38 = vpop.f32.mrb[182].mxu0  ;;  %v12364_v34 = vld [vmem:[#allocation3 + $0xe4] sm:$0xff]  }
 0x337   : > { %v8320_v27 = vsel %vm3644_vm5, %v8315_v52, %v8319_v49  ;;  %v439_v50 = vld [vmem:[#allocation3 + $0x114] sm:$0x1]  ;;  %v8398_v28 = vrot.slane %v8396_v22, 1  ;;  %v8401_v33 = vshll.u32 %v12356_v35, 16  ;;  %v10801_v43 = vpop.f32.mrb[183].mxu0  ;;  %v8346_v5 = vshrl.u32 %v12353_v45, 16 }
 0x338   : > { %v8368_v29 = vsel %vm3644_vm5, %v8363_v8, %v8367_v19  ;;  %v15150_v9 = vadd.f32 %v10801_v43, %v10800_v38  ;;  %v8355_v7 = vrot.slane %v8353_v0, 1  ;;  %v8394_v14 = vshrl.u32 %v12355_v17, 16  ;;  %v442_v53 = vld [vmem:[#allocation3 + $0x128] sm:$0x1]  ;;  %v10803_v20 = vpop.f32.mrb[184].mxu0  ;;  %v12366_v18 = vld [vmem:[#allocation3 + $0xd0] sm:$0xff]  }
 0x339   : > { %8934 = vmatmul.mubr.bf16.gmra.mrb[148].mxu1 %v8284_v30  ;;  %v8384_v54 = vshll.u32 %v12357_v57, 16  ;;  %v440_v37 = vsel %vm13274_vm4, 0, %v439_v50  ;;  %v8351_v11 = vor.u32 %v8350_v21, %v8346_v5  ;;  %v12358_v4 = vld [vmem:[#allocation3 + $0xb0] ss:$0 sps:$4 sm:$0x11]   ;;  %v8432_v56 = vshll.u32 %v12360_v62, 16 }
 0x33a   : > { %8941 = vmatprep.mubr.bf16.mxu1 %v8332_v10  ;;  %441 = vst [vmem:[#allocation3 + $0x114] sm:$0x1] %v440_v37  ;;  %v8399_v2 = vor.u32 %v8398_v28, %v8394_v14  ;;  %v8403_v63 = vrot.slane %v8401_v33, 1  ;;  %v12361_v47 = vld [vmem:[#allocation3 + $0xd8] ss:$0 sps:$4 sm:$0x11]  }
 0x33b   : > { %7347 = vmatmul.mubr.bf16.gmra.mrb[28].mxu0 %v14975_v1  ;;  %v8356_v39 = vsel %vm3644_vm5, %v8351_v11, %v8355_v7  ;;  %v8386_v30 = vrot.slane %v8384_v54, 1  ;;  %v8389_v55 = vshll.u32 %v12358_v4, 16  ;;  %v10804_v61 = vpop.f32.mrb[185].mxu0  ;;  %v443_v45 = vsel %vm13274_vm4, 0, %v442_v53  ;;  %v445_v23 = vld [vmem:[#allocation3 + $0x13c] sm:$0x1] }
 0x33c   : > { %v8404_v10 = vsel %vm3644_vm5, %v8399_v2, %v8403_v63  ;;  %v8434_v59 = vrot.slane %v8432_v56, 1  ;;  %v8437_v44 = vshll.u32 %v12361_v47, 16  ;;  %v15159_v26 = vadd.f32 %v10804_v61, %v10803_v20  ;;  %v10806_v17 = vpop.f32.mrb[186].mxu0  ;;  %444 = vst [vmem:[#allocation3 + $0x128] sm:$0x1] %v443_v45  ;;  %v12369_v50 = vld [vmem:[#allocation3 + $0xf8] sm:$0xff]  }
 0x33d   : > { %v8382_v1 = vshrl.u32 %v12357_v57, 16  ;;  %v10807_v32 = vpop.f32.mrb[187].mxu0  ;;  %v8430_v25 = vshrl.u32 %v12360_v62, 16  ;;  %v12363_v52 = vld [vmem:[#allocation3 + $0xc4] ss:$0 sps:$4 sm:$0x11]  }
 0x33e   : > { %v15161_v12 = vadd.f32 %v10807_v32, %v10806_v17  ;;  %v8391_v15 = vrot.slane %v8389_v55, 1  ;;  %v8420_v35 = vshll.u32 %v12362_v3, 16  ;;  %v8439_v19 = vrot.slane %v8437_v44, 1  ;;  %v12365_v22 = vld [vmem:[#allocation3 + $0xec] ss:$0 sps:$4 sm:$0x11]  }
 0x33f   : > { %v8387_v49 = vor.u32 %v8386_v30, %v8382_v1  ;;  %v8435_v8 = vor.u32 %v8434_v59, %v8430_v25  ;;  %v8468_v60 = vshll.u32 %v12364_v34, 16  ;;  %v446_v58 = vsel %vm13274_vm4, 0, %v445_v23  ;;  %v10809_v0 = vpop.f32.mrb[188].mxu0  ;;  %v448_v57 = vld [vmem:[#allocation3 + $0x150] sm:$0x1]  ;;  %v12371_v45 = vld [vmem:[#allocation3 + $0xe4] sm:$0xff]  }
 0x340   : > { %447 = vst [vmem:[#allocation3 + $0x13c] sm:$0x1] %v446_v58  ;;  %v8422_v21 = vrot.slane %v8420_v35, 1  ;;  %v8425_v38 = vshll.u32 %v12363_v52, 16  ;;  %v10810_v62 = vpop.f32.mrb[189].mxu0  ;;  %v8473_v33 = vshll.u32 %v12365_v22, 16 }
 0x341   : > { %8942 = vmatmul.mubr.bf16.gmra.mrb[152].mxu1 %v8320_v27  ;;  %v8392_v27 = vsel %vm3644_vm5, %v8387_v49, %v8391_v15  ;;  %v8470_v28 = vrot.slane %v8468_v60, 1  ;;  %v15167_v43 = vadd.f32 %v10810_v62, %v10809_v0  ;;  %v10812_v5 = vpop.f32.mrb[190].mxu0  ;;  %v8418_v7 = vshrl.u32 %v12362_v3, 16  ;;  %v12367_v53 = vld [vmem:[#allocation3 + $0xd8] ss:$0 sps:$4 sm:$0x11]  }
 0x342   : > { %8949 = vmatprep.mubr.bf16.mxu1 %v8368_v29  ;;  %v8440_v29 = vsel %vm3644_vm5, %v8435_v8, %v8439_v19  ;;  %v8466_v14 = vshrl.u32 %v12364_v34, 16  ;;  %v10813_v54 = vpop.f32.mrb[191].mxu0  ;;  %v449_v11 = vsel %vm13274_vm4, 0, %v448_v57  ;;  %v8427_v56 = vrot.slane %v8425_v38, 1 }
 0x343   : > { %v15169_v37 = vadd.f32 %v10813_v54, %v10812_v5  ;;  %v8423_v4 = vor.u32 %v8422_v21, %v8418_v7  ;;  %v8456_v2 = vshll.u32 %v12366_v18, 16  ;;  %v8504_v63 = vshll.u32 %v12369_v50, 16  ;;  %450 = vst [vmem:[#allocation3 + $0x150] sm:$0x1] %v449_v11  ;;  %v10815_v3 = vpop.f32.mrb[192].mxu0 }
 0x344   : > { %v8471_v47 = vor.u32 %v8470_v28, %v8466_v14  ;;  %v8475_v20 = vrot.slane %v8473_v33, 1  ;;  %v8461_v30 = vshll.u32 %v12367_v53, 16  ;;  %v10816_v34 = vpop.f32.mrb[193].mxu0  ;;  %v8454_v1 = vshrl.u32 %v12366_v18, 16  ;;  %v12375_v18 = vld [vmem:[#allocation3 + $0xf8] sm:$0xff]  }
 0x345   : > { %v8428_v55 = vsel %vm3644_vm5, %v8423_v4, %v8427_v56  ;;  %v8458_v61 = vrot.slane %v8456_v2, 1  ;;  %v8506_v44 = vrot.slane %v8504_v63, 1  ;;  %v15175_v32 = vadd.f32 %v10816_v34, %v10815_v3  ;;  %v10818_v23 = vpop.f32.mrb[194].mxu0  ;;  %v12372_v8 = vld [vmem:[#allocation3 + $0xec] ss:$0 sps:$4 sm:$0x11]  }
 0x346   : > { %v8476_v59 = vsel %vm3644_vm5, %v8471_v47, %v8475_v20  ;;  %v8463_v25 = vrot.slane %v8461_v30, 1  ;;  %v8502_v52 = vshrl.u32 %v12369_v50, 16  ;;  %v10819_v49 = vpop.f32.mrb[195].mxu0  ;;  %v8492_v19 = vshll.u32 %v12371_v45, 16 }
 0x347   : > { %v8459_v15 = vor.u32 %v8458_v61, %v8454_v1  ;;  %v15177_v35 = vadd.f32 %v10819_v49, %v10818_v23  ;;  %v12374_v0 = vld [vmem:[#allocation3 + $0x114] ss:$0 sps:$4 sm:$0x11]   ;;  %v8497_v21 = vshll.u32 %v12372_v8, 16  ;;  %v8490_v28 = vshrl.u32 %v12371_v45, 16  ;;  %v10821_v33 = vpop.f32.mrb[196].mxu0 }
 0x348   : > { %v8507_v60 = vor.u32 %v8506_v44, %v8502_v52  ;;  %v8545_v50 = vshll.u32 %v12374_v0, 16  ;;  %v10822_v7 = vpop.f32.mrb[197].mxu0  ;;  %v12376_v4 = vld [vmem:[#allocation3 + $0x100] ss:$0 sps:$4 sm:$0x11]   ;;  %v8528_v56 = vshll.u32 %v12375_v18, 16 }
 0x349   : > { %8950 = vmatmul.mubr.bf16.gmra.mrb[156].mxu1 %v8356_v39  ;;  %v12370_v39 = vld [vmem:[#allocation3 + $0x100] ss:$0 sps:$4 sm:$0x11]   ;;  %v8464_v57 = vsel %vm3644_vm5, %v8459_v15, %v8463_v25  ;;  %v8499_v54 = vrot.slane %v8497_v21, 1  ;;  %v15181_v53 = vadd.f32 %v10822_v7, %v10821_v33  ;;  %v10824_v11 = vpop.f32.mrb[198].mxu0  ;;  %v8533_v3 = vshll.u32 %v12376_v4, 16 }
 0x34a   : > { %8957 = vmatprep.mubr.bf16.mxu1 %v8404_v10  ;;  %v12373_v10 = vld [vmem:[#allocation3 + $0x10c] sm:$0xff]   ;;  %v8509_v17 = vshll.u32 %v12370_v39, 16  ;;  %v8547_v63 = vrot.slane %v8545_v50, 1  ;;  %v10825_v47 = vpop.f32.mrb[199].mxu0  ;;  %v8530_v61 = vrot.slane %v8528_v56, 1  ;;  %v8526_v34 = vshrl.u32 %v12375_v18, 16 }
 0x34b   : > { %v8540_v22 = vshll.u32 %v12373_v10, 16  ;;  %v8538_v5 = vshrl.u32 %v12373_v10, 16  ;;  %v12379_v20 = vld [vmem:[#allocation3 + $0x128] ss:$0 sps:$4 sm:$0x11]   ;;  %v15183_v30 = vadd.f32 %v10825_v47, %v10824_v11  ;;  %v12380_v45 = vld [vmem:[#allocation3 + $0x10c] sm:$0xff]  }
 0x34c   : > { %v8511_v58 = vrot.slane %v8509_v17, 1  ;;  %v8581_v44 = vshll.u32 %v12379_v20, 16  ;;  %v12382_v17 = vld [vmem:[#allocation3 + $0x134] sm:$0xff]   ;;  %v8531_v23 = vor.u32 %v8530_v61, %v8526_v34  ;;  %v8535_v25 = vrot.slane %v8533_v3, 1  ;;  %v12384_v50 = vld [vmem:[#allocation3 + $0x120] sm:$0xff]  }
 0x34d   : > { %v8542_v62 = vrot.slane %v8540_v22, 1  ;;  %v10827_v52 = vpop.f32.mrb[200].mxu0  ;;  %v12381_v49 = vld [vmem:[#allocation3 + $0x114] ss:$0 sps:$4 sm:$0x11]   ;;  %v8564_v15 = vshll.u32 %v12380_v45, 16 }
 0x34e   : > { %v8512_v38 = vsel %vm3644_vm5, %v8507_v60, %v8511_v58  ;;  %v10828_v22 = vpop.f32.mrb[201].mxu0  ;;  %v12383_v60 = vld [vmem:[#allocation3 + $0x13c] ss:$0 sps:$4 sm:$0x11]   ;;  %v8612_v58 = vshll.u32 %v12382_v17, 16  ;;  %v8536_v21 = vsel %vm3644_vm5, %v8531_v23, %v8535_v25  ;;  %v8562_v7 = vshrl.u32 %v12380_v45, 16 }
 0x34f   : > { %v8543_v2 = vor.u32 %v8542_v62, %v8538_v5  ;;  %v15187_v0 = vadd.f32 %v10828_v22, %v10827_v52  ;;  %v8566_v18 = vrot.slane %v8564_v15, 1  ;;  %v8569_v62 = vshll.u32 %v12381_v49, 16  ;;  %v12387_v5 = vld [vmem:[#allocation3 + $0x148] sm:$0xff]   ;;  %v12388_v20 = vld [vmem:[#allocation3 + $0x150] ss:$0 sps:$4 sm:$0x11]  }
 0x350   : > { %v8617_v33 = vshll.u32 %v12383_v60, 16  ;;  %v12385_v56 = vld [vmem:[#allocation3 + $0x128] ss:$0 sps:$4 sm:$0x11]   ;;  %v12389_v34 = vld [vmem:[#allocation3 + $0x134] sm:$0xff]   ;;  %v8653_v52 = vshll.u32 %v12388_v20, 16 }
 0x351   : > { %8958 = vmatmul.mubr.bf16.gmra.mrb[160].mxu1 %v8392_v27  ;;  %v8494_v27 = vrot.slane %v8492_v19, 1  ;;  %v8548_v10 = vsel %vm3644_vm5, %v8543_v2, %v8547_v63  ;;  %v8583_v19 = vrot.slane %v8581_v44, 1  ;;  %v8567_v11 = vor.u32 %v8566_v18, %v8562_v7  ;;  %v12391_v49 = vld [vmem:[#allocation3 + $0x30] sm:$0xff]   ;;  %v12393_v7 = vld [vmem:[#allocation3 + $0x44] sm:$0xff]  }
 0x352   : > { %8965 = vmatprep.mubr.bf16.mxu1 %v8440_v29  ;;  %v12378_v29 = vld [vmem:[#allocation3 + $0x120] sm:$0xff]   ;;  %v8571_v4 = vrot.slane %v8569_v62, 1  ;;  %v8600_v2 = vshll.u32 %v12384_v50, 16  ;;  %v8619_v47 = vrot.slane %v8617_v33, 1  ;;  %v8598_v15 = vshrl.u32 %v12384_v50, 16 }
 0x353   : > { %v8495_v14 = vor.u32 %v8494_v27, %v8490_v28  ;;  %v8576_v39 = vshll.u32 %v12378_v29, 16  ;;  %v8574_v1 = vshrl.u32 %v12378_v29, 16  ;;  %v8614_v28 = vrot.slane %v8612_v58, 1  ;;  %v12390_v58 = vld [vmem:[#allocation3 + $0x13c] ss:$0 sps:$4 sm:$0x11]  }
 0x354   : > { %v8602_v44 = vrot.slane %v8600_v2, 1  ;;  %v8120_v18 = vshll.u32 %v12391_v49, 16  ;;  %v8641_v33 = vshll.u32 %v12390_v58, 16  ;;  %v8634_v2 = vshrl.u32 %v12389_v34, 16 }
 0x356   : > { %v8603_v22 = vor.u32 %v8602_v44, %v8598_v15  ;;  %v8122_v50 = vrot.slane %v8120_v18, 1  ;;  %v12396_v44 = vld [vmem:[#allocation3 + $0x60] ss:$0 sps:$4 sm:$0x11]   ;;  %v12397_v15 = vld [vmem:[#allocation3 + $0x6c] sm:$0xff]  }
 0x359   : > { %8966 = vmatmul.mubr.bf16.gmra.mrb[164].mxu1 %v8428_v55  ;;  %v8500_v55 = vsel %vm3644_vm5, %v8495_v14, %v8499_v54  ;;  %v367_v14 = vld [vmem:[#allocation3 + $0x164] sm:$0x1]  ;;  %v8610_v54 = vshrl.u32 %v12382_v17, 16  ;;  %v8605_v17 = vshll.u32 %v12385_v56, 16 }
 0x35a   : > { %8973 = vmatprep.mubr.bf16.mxu1 %v8476_v59  ;;  %v8578_v59 = vrot.slane %v8576_v39, 1  ;;  %v8648_v39 = vshll.u32 %v12387_v5, 16 }
 0x35b   : > { %v8615_v63 = vor.u32 %v8614_v28, %v8610_v54  ;;  %v8607_v60 = vrot.slane %v8605_v17, 1 }
 0x35c   : > { %v8579_v8 = vor.u32 %v8578_v59, %v8574_v1  ;;  %v8650_v25 = vrot.slane %v8648_v39, 1 }
 0x35d   : > { %v8620_v1 = vsel %vm3644_vm5, %v8615_v63, %v8619_v47  ;;  %v8608_v62 = vsel %vm3644_vm5, %v8603_v22, %v8607_v60  ;;  %v8118_v47 = vshrl.u32 %v12391_v49, 16  ;;  %v12399_v22 = vld [vmem:[#allocation3 + $0x80] sm:$0xff]  }
 0x35e   : > { %v8584_v29 = vsel %vm3644_vm5, %v8579_v8, %v8583_v19  ;;  %v8646_v8 = vshrl.u32 %v12387_v5, 16  ;;  %v12392_v19 = vld [vmem:[#allocation3 + $0x38] ss:$0 sps:$4 sm:$0x11]  }
 0x35f   : > { %v8125_v5 = vshll.u32 %v12392_v19, 16  ;;  %v8197_v19 = vshll.u32 %v12396_v44, 16  ;;  %v8226_v44 = vshrl.u32 %v12397_v15, 16 }
 0x361   : > { %8974 = vmatmul.mubr.bf16.gmra.mrb[168].mxu1 %v8464_v57  ;;  %v10830_v57 = vpop.f32.mrb[202].mxu0 }
 0x362   : > { %8981 = vmatprep.mubr.bf16.mxu1 %v8512_v38  ;;  %v10831_v27 = vpop.f32.mrb[203].mxu0 }
 0x363   : > { %v15190_v38 = vadd.f32 %v10831_v27, %v10830_v57  ;;  %v10833_v61 = vpop.f32.mrb[204].mxu0  ;;  %v8636_v57 = vshll.u32 %v12389_v34, 16  ;;  %v8651_v27 = vor.u32 %v8650_v25, %v8646_v8 }
 0x364   : > { %v10834_v3 = vpop.f32.mrb[205].mxu0 }
 0x365   : > { %v15196_v59 = vadd.f32 %v10834_v3, %v10833_v61  ;;  %v10836_v45 = vpop.f32.mrb[206].mxu0  ;;  %v8638_v28 = vrot.slane %v8636_v57, 1  ;;  %v12394_v61 = vld [vmem:[#allocation3 + $0x4c] ss:$0 sps:$4 sm:$0x11]   ;;  %v8156_v3 = vshll.u32 %v12393_v7, 16 }
 0x366   : > { %v10837_v23 = vpop.f32.mrb[207].mxu0  ;;  %v8154_v57 = vshrl.u32 %v12393_v7, 16 }
 0x367   : > { %v15199_v13 = vadd.f32 %v10837_v23, %v10836_v45  ;;  %v8639_v39 = vor.u32 %v8638_v28, %v8634_v2  ;;  %v8127_v45 = vrot.slane %v8125_v5, 1  ;;  %v8158_v25 = vrot.slane %v8156_v3, 1  ;;  %v12398_v28 = vld [vmem:[#allocation3 + $0x74] ss:$0 sps:$4 sm:$0x11]   ;;  %v12403_v3 = vld [vmem:[#allocation3 + $0xa8] sm:$0xff]  }
 0x368   : > { %v8264_v5 = vshll.u32 %v12399_v22, 16 }
 0x369   : > { %8982 = vmatmul.mubr.bf16.gmra.mrb[172].mxu1 %v8500_v55  ;;  %v368_v55 = vsel %vm13274_vm4, 0, %v367_v14 }
 0x36a   : > { %8989 = vmatprep.mubr.bf16.mxu1 %v8548_v10  ;;  %369 = vst [vmem:[#allocation3 + $0x164] sm:$0x1] %v368_v55  ;;  %v8572_v10 = vsel %vm3644_vm5, %v8567_v11, %v8571_v4  ;;  %v12395_v11 = vld [vmem:[#allocation3 + $0x58] sm:$0xff]   ;;  %v8643_v55 = vrot.slane %v8641_v33, 1  ;;  %v8228_v33 = vshll.u32 %v12397_v15, 16 }
 0x36b   : > { %v8192_v17 = vshll.u32 %v12395_v11, 16 }
 0x36d   : > { %v8194_v8 = vrot.slane %v8192_v17, 1 }
 0x371   : > { %8990 = vmatmul.mubr.bf16.gmra.mrb[176].mxu1 %v8536_v21  ;;  %v8655_v21 = vrot.slane %v8653_v52, 1  ;;  %v8161_v52 = vshll.u32 %v12394_v61, 16 }
 0x372   : > { %8997 = vmatprep.mubr.bf16.mxu1 %v8584_v29  ;;  %v10839_v29 = vpop.f32.mrb[208].mxu0 }
 0x373   : > { %v8656_v14 = vsel %vm3644_vm5, %v8651_v27, %v8655_v21  ;;  %v10840_v54 = vpop.f32.mrb[209].mxu0  ;;  %v8190_v21 = vshrl.u32 %v12395_v11, 16 }
 0x374   : > { %v15203_v4 = vadd.f32 %v10840_v54, %v10839_v29  ;;  %v10842_v56 = vpop.f32.mrb[210].mxu0  ;;  %v8163_v29 = vrot.slane %v8161_v52, 1  ;;  %v8199_v54 = vrot.slane %v8197_v19, 1 }
 0x375   : > { %v10843_v63 = vpop.f32.mrb[211].mxu0 }
 0x376   : > { %v15205_v20 = vadd.f32 %v10843_v63, %v10842_v56  ;;  %v10845_v23 = vpop.f32.mrb[212].mxu0  ;;  %v8230_v63 = vrot.slane %v8228_v33, 1 }
 0x377   : > { %v10846_v49 = vpop.f32.mrb[213].mxu0 }
 0x378   : > { %v15209_v60 = vadd.f32 %v10846_v49, %v10845_v23  ;;  %v10848_v58 = vpop.f32.mrb[214].mxu0 }
 0x379   : > { %8998 = vmatmul.mubr.bf16.gmra.mrb[180].mxu1 %v8572_v10  ;;  %v8123_v10 = vor.u32 %v8122_v50, %v8118_v47  ;;  %v10849_v27 = vpop.f32.mrb[215].mxu0  ;;  %v12400_v50 = vld [vmem:[#allocation3 + $0x88] ss:$0 sps:$4 sm:$0x11]   ;;  %v8233_v47 = vshll.u32 %v12398_v28, 16  ;;  %v12405_v28 = vld [vmem:[#allocation3 + $0xbc] sm:$0xff]  }
 0x37a   : > { %9005 = vmatprep.mubr.bf16.mxu1 %v8620_v1  ;;  %v8644_v1 = vsel %vm3644_vm5, %v8639_v39, %v8643_v55  ;;  %v15211_v18 = vadd.f32 %v10849_v27, %v10848_v58  ;;  %v10851_v2 = vpop.f32.mrb[216].mxu0  ;;  %v12401_v39 = vld [vmem:[#allocation3 + $0x94] sm:$0xff]   ;;  %v8266_v55 = vrot.slane %v8264_v5, 1  ;;  %v8269_v61 = vshll.u32 %v12400_v50, 16 }
 0x37b   : > { %v8128_v34 = vsel %vm3644_vm5, %v8123_v10, %v8127_v45  ;;  %v10852_v11 = vpop.f32.mrb[217].mxu0  ;;  %v8235_v52 = vrot.slane %v8233_v47, 1  ;;  %v8300_v49 = vshll.u32 %v12401_v39, 16  ;;  %v12404_v58 = vld [vmem:[#allocation3 + $0xb0] ss:$0 sps:$4 sm:$0x11]  }
 0x37c   : > { %v15215_v10 = vadd.f32 %v10852_v11, %v10851_v2  ;;  %v10854_v45 = vpop.f32.mrb[218].mxu0  ;;  %v8271_v19 = vrot.slane %v8269_v61, 1  ;;  %v12406_v47 = vld [vmem:[#allocation3 + $0xc4] ss:$0 sps:$4 sm:$0x11]   ;;  %v8372_v61 = vshll.u32 %v12405_v28, 16 }
 0x37d   : > { %v10855_v17 = vpop.f32.mrb[219].mxu0 }
 0x37e   : > { %v15217_v23 = vadd.f32 %v10855_v17, %v10854_v45  ;;  %v12408_v45 = vld [vmem:[#allocation3 + $0xd8] ss:$0 sps:$4 sm:$0x11]  }
 0x381   : > { %9006 = vmatmul.mubr.bf16.gmra.mrb[184].mxu1 %v8608_v62  ;;  %v8159_v62 = vor.u32 %v8158_v25, %v8154_v57  ;;  %v8231_v25 = vor.u32 %v8230_v63, %v8226_v44  ;;  %v8336_v57 = vshll.u32 %v12403_v3, 16  ;;  %v8334_v63 = vshrl.u32 %v12403_v3, 16 }
 0x382   : > { %9013 = vmatprep.mubr.bf16.mxu1 %v8656_v14  ;;  %v8195_v14 = vor.u32 %v8194_v8, %v8190_v21  ;;  %v10857_v21 = vpop.f32.mrb[220].mxu0 }
 0x383   : > { %v8164_v56 = vsel %vm3644_vm5, %v8159_v62, %v8163_v29  ;;  %v8236_v27 = vsel %vm3644_vm5, %v8231_v25, %v8235_v52  ;;  %v8302_v62 = vrot.slane %v8300_v49, 1  ;;  %v8338_v33 = vrot.slane %v8336_v57, 1 }
 0x384   : > { %v8200_v7 = vsel %vm3644_vm5, %v8195_v14, %v8199_v54  ;;  %v8341_v14 = vshll.u32 %v12404_v58, 16  ;;  %v12407_v54 = vld [vmem:[#allocation3 + $0xd0] sm:$0xff]   ;;  %v8374_v52 = vrot.slane %v8372_v61, 1  ;;  %v8413_v49 = vshll.u32 %v12408_v45, 16  ;;  %v12411_v58 = vld [vmem:[#allocation3 + $0xf8] sm:$0xff]  }
 0x385   : > { %v8339_v44 = vor.u32 %v8338_v33, %v8334_v63 }
 0x386   : > { %v8343_v17 = vrot.slane %v8341_v14, 1 }
 0x389   : > { %9014 = vmatmul.mubr.bf16.gmra.mrb[188].mxu1 %v8644_v1  ;;  %v8262_v1 = vshrl.u32 %v12399_v22, 16  ;;  %v10858_v22 = vpop.f32.mrb[221].mxu0 }
 0x38a   : > { %11415 = vmatprep.mubr.bf16.mxu1 %v8128_v34  ;;  %v12402_v34 = vld [vmem:[#allocation3 + $0x9c] ss:$0 sps:$4 sm:$0x11]   ;;  %v15221_v50 = vadd.f32 %v10858_v22, %v10857_v21  ;;  %v10860_v5 = vpop.f32.mrb[222].mxu0 }
 0x38b   : > { %v8267_v8 = vor.u32 %v8266_v55, %v8262_v1  ;;  %v8305_v29 = vshll.u32 %v12402_v34, 16  ;;  %v10861_v2 = vpop.f32.mrb[223].mxu0  ;;  %v8408_v1 = vshll.u32 %v12407_v54, 16  ;;  %v8377_v34 = vshll.u32 %v12406_v47, 16 }
 0x38c   : > { %v10903_v3 = vpop.f32.mrb[224].mxu0  ;;  %v12410_v21 = vld [vmem:[#allocation3 + $0xec] ss:$0 sps:$4 sm:$0x11]  }
 0x38d   : > { %v8272_v15 = vsel %vm3644_vm5, %v8267_v8, %v8271_v19  ;;  %v8307_v55 = vrot.slane %v8305_v29, 1  ;;  %v12409_v8 = vld [vmem:[#allocation3 + $0xe4] sm:$0xff]   ;;  %v8410_v19 = vrot.slane %v8408_v1, 1  ;;  %v10904_v57 = vpop.f32.mrb[225].mxu0 }
 0x38e   : > { %v10906_v29 = vpop.f32.mrb[226].mxu0  ;;  %v12412_v22 = vld [vmem:[#allocation3 + $0x100] ss:$0 sps:$4 sm:$0x11]  }
 0x38f   : > { %v10907_v33 = vpop.f32.mrb[227].mxu0 }
 0x390   : > { %v10908_v47 = vadd.f32 %v10907_v33, %v10906_v29 }
 0x391   : > { %11416 = vmatmul.mubr.bf16.vlgmr.msra.gmra.mrb[96].mxu1 %v8164_v56  ;;  %v8298_v56 = vshrl.u32 %v12401_v39, 16  ;;  %v8344_v39 = vsel %vm3644_vm5, %v8339_v44, %v8343_v17  ;;  %v8449_v44 = vshll.u32 %v12410_v21, 16  ;;  %v12413_v17 = vld [vmem:[#allocation3 + $0x10c] sm:$0xff]  }
 0x392   : > { %11419 = vmatprep.mubr.bf16.mxu1 %v8200_v7  ;;  %v15223_v7 = vadd.f32 %v10861_v2, %v10860_v5  ;;  %v8379_v5 = vrot.slane %v8377_v34, 1  ;;  %v8444_v2 = vshll.u32 %v12409_v8, 16  ;;  %v15231_v61 = vadd.f32 %v10908_v47, %v15048_v40  ;;  %v12415_v34 = vld [vmem:[#allocation3 + $0x120] sm:$0xff]  }
 0x393   : > { %v8303_v11 = vor.u32 %v8302_v62, %v8298_v56  ;;  %v10905_v62 = vadd.f32 %v10904_v57, %v10903_v3  ;;  %v8415_v56 = vrot.slane %v8413_v49, 1  ;;  %v8442_v49 = vshrl.u32 %v12409_v8, 16  ;;  %v12416_v57 = vld [vmem:[#allocation3 + $0x128] ss:$0 sps:$4 sm:$0x11]  }
 0x394   : > { %v8446_v45 = vrot.slane %v8444_v2, 1  ;;  %v8478_v40 = vshrl.u32 %v12411_v58, 16  ;;  %v8451_v29 = vrot.slane %v8449_v44, 1  ;;  %v12419_v44 = vld [vmem:[#allocation3 + $0x148] sm:$0xff]  }
 0x395   : > { %v8308_v25 = vsel %vm3644_vm5, %v8303_v11, %v8307_v55  ;;  %v15228_v63 = vadd.f32 %v10905_v62, %v15032_v42  ;;  %v8480_v55 = vshll.u32 %v12411_v58, 16  ;;  %v8557_v58 = vshll.u32 %v12416_v57, 16 }
 0x396   : > { %v8447_v62 = vor.u32 %v8446_v45, %v8442_v49 }
 0x398   : > { %v8452_v8 = vsel %vm3644_vm5, %v8447_v62, %v8451_v29  ;;  %v12420_v62 = vld [vmem:[#allocation3 + $0x150] ss:$0 sps:$4 sm:$0x11]   ;;  %v8624_v29 = vshll.u32 %v12419_v44, 16 }
 0x399   : > { %11420 = vmatmul.mubr.bf16.gmra.mrb[100].mxu1 %v8236_v27  ;;  %v8370_v27 = vshrl.u32 %v12405_v28, 16 }
 0x39a   : > { %11423 = vmatprep.mubr.bf16.mxu1 %v8272_v15  ;;  %v8406_v15 = vshrl.u32 %v12407_v54, 16  ;;  %v8485_v54 = vshll.u32 %v12412_v22, 16 }
 0x39b   : > { %v8375_v14 = vor.u32 %v8374_v52, %v8370_v27  ;;  %v8482_v52 = vrot.slane %v8480_v55, 1 }
 0x39c   : > { %v8411_v11 = vor.u32 %v8410_v19, %v8406_v15  ;;  %v8487_v21 = vrot.slane %v8485_v54, 1  ;;  %v8516_v15 = vshll.u32 %v12413_v17, 16  ;;  %v8514_v54 = vshrl.u32 %v12413_v17, 16 }
 0x39d   : > { %v8380_v28 = vsel %vm3644_vm5, %v8375_v14, %v8379_v5  ;;  %v8483_v14 = vor.u32 %v8482_v52, %v8478_v40  ;;  %v8552_v5 = vshll.u32 %v12415_v34, 16  ;;  %v8550_v52 = vshrl.u32 %v12415_v34, 16 }
 0x39e   : > { %v8416_v1 = vsel %vm3644_vm5, %v8411_v11, %v8415_v56  ;;  %v8518_v2 = vrot.slane %v8516_v15, 1  ;;  %v12417_v11 = vld [vmem:[#allocation3 + $0x134] sm:$0xff]  }
 0x39f   : > { %v8488_v55 = vsel %vm3644_vm5, %v8483_v14, %v8487_v21  ;;  %v8554_v45 = vrot.slane %v8552_v5, 1  ;;  %v12421_v21 = vld [vmem:[#allocation3 + $0x15c] sm:$0xff]  }
 0x3a0   : > { %v8519_v49 = vor.u32 %v8518_v2, %v8514_v54  ;;  %v8629_v2 = vshll.u32 %v12420_v62, 16 }
 0x3a1   : > { %11424 = vmatmul.mubr.bf16.gmra.mrb[104].mxu1 %v8308_v25  ;;  %v10909_v25 = vpop.f32.mrb[228].mxu0 }
 0x3a2   : > { %11427 = vmatprep.mubr.bf16.mxu1 %v8344_v39  ;;  %v10910_v42 = vpop.f32.mrb[229].mxu0  ;;  %v12414_v39 = vld [vmem:[#allocation3 + $0x114] ss:$0 sps:$4 sm:$0x11]  }
 0x3a3   : > { %v10911_v3 = vadd.f32 %v10910_v42, %v10909_v25  ;;  %v10912_v19 = vpop.f32.mrb[230].mxu0  ;;  %v8521_v47 = vshll.u32 %v12414_v39, 16  ;;  %v8588_v39 = vshll.u32 %v12417_v11, 16 }
 0x3a4   : > { %v10913_v27 = vpop.f32.mrb[231].mxu0 }
 0x3a5   : > { %v15236_v22 = vadd.f32 %v10911_v3, %v15069_v24  ;;  %v10914_v33 = vadd.f32 %v10913_v27, %v10912_v19  ;;  %v8523_v3 = vrot.slane %v8521_v47, 1  ;;  %v8559_v19 = vrot.slane %v8557_v58, 1  ;;  %v12422_v58 = vld [vmem:[#allocation3 + $0x164] ss:$0 sps:$4 sm:$0x11]  }
 0x3a6   : > { %v8555_v27 = vor.u32 %v8554_v45, %v8550_v52  ;;  %v8590_v34 = vrot.slane %v8588_v39, 1  ;;  %v8586_v47 = vshrl.u32 %v12417_v11, 16 }
 0x3a7   : > { %v15239_v56 = vadd.f32 %v10914_v33, %v15082_v48  ;;  %v12418_v48 = vld [vmem:[#allocation3 + $0x13c] ss:$0 sps:$4 sm:$0x11]   ;;  %v8524_v17 = vsel %vm3644_vm5, %v8519_v49, %v8523_v3  ;;  %v8658_v49 = vshrl.u32 %v12421_v21, 16 }
 0x3a8   : > { %v8593_v33 = vshll.u32 %v12418_v48, 16  ;;  %v8560_v14 = vsel %vm3644_vm5, %v8555_v27, %v8559_v19  ;;  %v8591_v54 = vor.u32 %v8590_v34, %v8586_v47  ;;  %v8665_v19 = vshll.u32 %v12422_v58, 16 }
 0x3a9   : > { %11428 = vmatmul.mubr.bf16.gmra.mrb[108].mxu1 %v8380_v28  ;;  %v10915_v28 = vpop.f32.mrb[232].mxu0 }
 0x3aa   : > { %11431 = vmatprep.mubr.bf16.mxu1 %v8416_v1  ;;  %v10916_v24 = vpop.f32.mrb[233].mxu0 }
 0x3ab   : > { %v10917_v1 = vadd.f32 %v10916_v24, %v10915_v28  ;;  %v10918_v25 = vpop.f32.mrb[234].mxu0  ;;  %v8622_v24 = vshrl.u32 %v12419_v44, 16 }
 0x3ac   : > { %v10919_v42 = vpop.f32.mrb[235].mxu0 }
 0x3ad   : > { %v15244_v40 = vadd.f32 %v10917_v1, %v15104_v16  ;;  %v10920_v57 = vadd.f32 %v10919_v42, %v10918_v25  ;;  %v10921_v5 = vpop.f32.mrb[236].mxu0  ;;  %v8595_v1 = vrot.slane %v8593_v33, 1  ;;  %v8631_v42 = vrot.slane %v8629_v2, 1 }
 0x3ae   : > { %v10922_v16 = vpop.f32.mrb[237].mxu0 }
 0x3af   : > { %v15247_v15 = vadd.f32 %v10920_v57, %v15108_v51  ;;  %v10923_v28 = vadd.f32 %v10922_v16, %v10921_v5  ;;  %v10924_v45 = vpop.f32.mrb[238].mxu0  ;;  %v8596_v11 = vsel %vm3644_vm5, %v8591_v54, %v8595_v1 }
 0x3b0   : > { %v10925_v51 = vpop.f32.mrb[239].mxu0 }
 0x3b1   : > { %11432 = vmatmul.mubr.bf16.gmra.mrb[112].mxu1 %v8452_v8  ;;  %v8626_v8 = vrot.slane %v8624_v29, 1  ;;  %v15252_v25 = vadd.f32 %v10923_v28, %v15123_v31  ;;  %v10926_v52 = vadd.f32 %v10925_v51, %v10924_v45  ;;  %v10927_v57 = vpop.f32.mrb[240].mxu0  ;;  %v8667_v31 = vrot.slane %v8665_v19, 1 }
 0x3b2   : > { %11435 = vmatprep.mubr.bf16.mxu1 %v8488_v55  ;;  %v8660_v55 = vshll.u32 %v12421_v21, 16  ;;  %v10928_v27 = vpop.f32.mrb[241].mxu0 }
 0x3b3   : > { %v8627_v48 = vor.u32 %v8626_v8, %v8622_v24  ;;  %v15255_v39 = vadd.f32 %v10926_v52, %v15127_v46  ;;  %v10929_v29 = vadd.f32 %v10928_v27, %v10927_v57 }
 0x3b4   : > { %v8662_v3 = vrot.slane %v8660_v55, 1 }
 0x3b5   : > { %v8632_v44 = vsel %vm3644_vm5, %v8627_v48, %v8631_v42  ;;  %v15260_v21 = vadd.f32 %v10929_v29, %v15135_v6 }
 0x3b6   : > { %v8663_v62 = vor.u32 %v8662_v3, %v8658_v49 }
 0x3b8   : > { %v8668_v46 = vsel %vm3644_vm5, %v8663_v62, %v8667_v31 }
 0x3b9   : > { %11436 = vmatmul.mubr.bf16.gmra.mrb[116].mxu1 %v8524_v17  ;;  %v10930_v17 = vpop.f32.mrb[242].mxu0 }
 0x3ba   : > { %11439 = vmatprep.mubr.bf16.mxu1 %v8560_v14  ;;  %v10931_v34 = vpop.f32.mrb[243].mxu0 }
 0x3bb   : > { %v10932_v33 = vadd.f32 %v10931_v34, %v10930_v17  ;;  %v10933_v5 = vpop.f32.mrb[244].mxu0 }
 0x3bc   : > { %v10934_v8 = vpop.f32.mrb[245].mxu0 }
 0x3bd   : > { %v15264_v14 = vadd.f32 %v10932_v33, %v15140_v36  ;;  %v10935_v2 = vadd.f32 %v10934_v8, %v10933_v5  ;;  %v10936_v16 = vpop.f32.mrb[246].mxu0 }
 0x3be   : > { %v10937_v47 = vpop.f32.mrb[247].mxu0 }
 0x3bf   : > { %v15267_v58 = vadd.f32 %v10935_v2, %v15147_v41  ;;  %v10938_v55 = vadd.f32 %v10937_v47, %v10936_v16 }
 0x3c1   : > { %11440 = vmatmul.mubr.bf16.gmra.mrb[120].mxu1 %v8596_v11  ;;  %v15270_v28 = vadd.f32 %v10938_v55, %v15150_v9  ;;  %v10939_v6 = vpop.f32.mrb[248].mxu0 }
 0x3c2   : > { %11443 = vmatprep.mubr.bf16.mxu1 %v8632_v44  ;;  %v10940_v45 = vpop.f32.mrb[249].mxu0 }
 0x3c3   : > { %v10941_v24 = vadd.f32 %v10940_v45, %v10939_v6  ;;  %v10942_v51 = vpop.f32.mrb[250].mxu0 }
 0x3c4   : > { %v10943_v54 = vpop.f32.mrb[251].mxu0 }
 0x3c5   : > { %v15273_v36 = vadd.f32 %v10941_v24, %v15159_v26  ;;  %v10944_v1 = vadd.f32 %v10943_v54, %v10942_v51 }
 0x3c7   : > { %v15276_v52 = vadd.f32 %v10944_v1, %v15161_v12 }
 0x3c9   : > { %11444 = vmatmul.mubr.bf16.gmra.mrb[124].mxu1 %v8668_v46 }
 0x3cd   : > { %v10945_v48 = vpop.f32.mrb[252].mxu0 }
 0x3ce   : > { %v10946_v42 = vpop.f32.mrb[253].mxu0 }
 0x3cf   : > { %v10947_v41 = vadd.f32 %v10946_v42, %v10945_v48  ;;  %v10948_v49 = vpop.f32.mrb[254].mxu0 }
 0x3d0   : > { %v10949_v3 = vpop.f32.mrb[255].mxu0 }
 0x3d1   : > { %v15279_v9 = vadd.f32 %v10947_v41, %v15167_v43  ;;  %v10950_v19 = vadd.f32 %v10949_v3, %v10948_v49 }
 0x3d3   : > { %v15282_v11 = vadd.f32 %v10950_v19, %v15169_v37 }
 0x3d5   : > { %v10951_v44 = vpop.f32.mrb[0].mxu0 }
 0x3d6   : > { %v10952_v57 = vpop.f32.mrb[1].mxu0 }
 0x3d7   : > { %v10953_v26 = vadd.f32 %v10952_v57, %v10951_v44  ;;  %v10954_v27 = vpop.f32.mrb[2].mxu0 }
 0x3d8   : > { %v10955_v31 = vpop.f32.mrb[3].mxu0 }
 0x3d9   : > { %v15285_v12 = vadd.f32 %v10953_v26, %v15175_v32  ;;  %v10956_v17 = vadd.f32 %v10955_v31, %v10954_v27 }
 0x3db   : > { %v15288_v43 = vadd.f32 %v10956_v17, %v15177_v35 }
 0x3dd   : > { %v10957_v37 = vpop.f32.mrb[4].mxu0 }
 0x3de   : > { %v10958_v8 = vpop.f32.mrb[5].mxu0 }
 0x3df   : > { %v10959_v2 = vadd.f32 %v10958_v8, %v10957_v37  ;;  %v10960_v16 = vpop.f32.mrb[6].mxu0 }
 0x3e0   : > { %v10961_v55 = vpop.f32.mrb[7].mxu0 }
 0x3e1   : > { %v15291_v6 = vadd.f32 %v10959_v2, %v15181_v53  ;;  %v10962_v45 = vadd.f32 %v10961_v55, %v10960_v16 }
 0x3e3   : > { %v11039_v62 = vpop.f32.mrb[128].mxu1  ;;  %v15297_v35 = vadd.f32 %v10962_v45, %v15183_v30 }
 0x3e4   : > { %v11040_v29 = vpop.f32.mrb[129].mxu1 }
 0x3e5   : > { %v11041_v34 = vadd.f32 %v11040_v29, %v11039_v62  ;;  %v11042_v33 = vpop.f32.mrb[130].mxu1 }
 0x3e6   : > { %v11043_v46 = vpop.f32.mrb[131].mxu1  ;;  %v10963_v53 = vpop.f32.mrb[8].mxu0 }
 0x3e7   : > { %v11044_v5 = vadd.f32 %v11043_v46, %v11042_v33  ;;  %v15294_v24 = vadd.f32 %v15228_v63, %v11041_v34  ;;  %v10964_v49 = vpop.f32.mrb[9].mxu0 }
 0x3e8   : > { %v10965_v63 = vadd.f32 %v10964_v49, %v10963_v53  ;;  %v10966_v19 = vpop.f32.mrb[10].mxu0 }
 0x3e9   : > { %v15300_v48 = vadd.f32 %v15231_v61, %v11044_v5  ;;  %v10967_v57 = vpop.f32.mrb[11].mxu0 }
 0x3ea   : > { %v15309_v30 = vadd.f32 %v10965_v63, %v15187_v0  ;;  %v10968_v27 = vadd.f32 %v10967_v57, %v10966_v19 }
 0x3ec   : > { %v11045_v47 = vpop.f32.mrb[132].mxu1  ;;  %v15312_v31 = vadd.f32 %v10968_v27, %v15190_v38 }
 0x3ed   : > { %v11046_v32 = vpop.f32.mrb[133].mxu1 }
 0x3ee   : > { %v11047_v51 = vadd.f32 %v11046_v32, %v11045_v47  ;;  %v11048_v54 = vpop.f32.mrb[134].mxu1 }
 0x3ef   : > { %v11049_v1 = vpop.f32.mrb[135].mxu1 }
 0x3f0   : > { %v11050_v42 = vadd.f32 %v11049_v1, %v11048_v54  ;;  %v15303_v41 = vadd.f32 %v15236_v22, %v11047_v51 }
 0x3f2   : > { %v15306_v3 = vadd.f32 %v15239_v56, %v11050_v42  ;;  %v10969_v56 = vpop.f32.mrb[12].mxu0 }
 0x3f3   : > { %v10970_v34 = vpop.f32.mrb[13].mxu0 }
 0x3f4   : > { %v11051_v44 = vpop.f32.mrb[136].mxu1  ;;  %v10971_v46 = vadd.f32 %v10970_v34, %v10969_v56  ;;  %v10972_v0 = vpop.f32.mrb[14].mxu0 }
 0x3f5   : > { %v11052_v26 = vpop.f32.mrb[137].mxu1  ;;  %v10973_v37 = vpop.f32.mrb[15].mxu0 }
 0x3f6   : > { %v11053_v61 = vadd.f32 %v11052_v26, %v11051_v44  ;;  %v11054_v62 = vpop.f32.mrb[138].mxu1  ;;  %v15321_v8 = vadd.f32 %v10971_v46, %v15196_v59  ;;  %v10974_v38 = vadd.f32 %v10973_v37, %v10972_v0 }
 0x3f7   : > { %v11055_v22 = vpop.f32.mrb[139].mxu1 }
 0x3f8   : > { %v11056_v29 = vadd.f32 %v11055_v22, %v11054_v62  ;;  %v15315_v17 = vadd.f32 %v15244_v40, %v11053_v61  ;;  %v15324_v55 = vadd.f32 %v10974_v38, %v15199_v13 }
 0x3fa   : > { %v15318_v33 = vadd.f32 %v15247_v15, %v11056_v29  ;;  %v10975_v15 = vpop.f32.mrb[16].mxu0 }
 0x3fb   : > { %v10976_v51 = vpop.f32.mrb[17].mxu0 }
 0x3fc   : > { %v11057_v5 = vpop.f32.mrb[140].mxu1  ;;  %v10977_v1 = vadd.f32 %v10976_v51, %v10975_v15  ;;  %v10978_v59 = vpop.f32.mrb[18].mxu0 }
 0x3fd   : > { %v11058_v2 = vpop.f32.mrb[141].mxu1  ;;  %v10979_v53 = vpop.f32.mrb[19].mxu0 }
 0x3fe   : > { %v11059_v16 = vadd.f32 %v11058_v2, %v11057_v5  ;;  %v11060_v47 = vpop.f32.mrb[142].mxu1  ;;  %v15333_v49 = vadd.f32 %v10977_v1, %v15203_v4  ;;  %v10980_v13 = vadd.f32 %v10979_v53, %v10978_v59 }
 0x3ff   : > { %v11061_v40 = vpop.f32.mrb[143].mxu1 }
 0x400   : > { %v11062_v32 = vadd.f32 %v11061_v40, %v11060_v47  ;;  %v15327_v45 = vadd.f32 %v15252_v25, %v11059_v16  ;;  %v15336_v57 = vadd.f32 %v10980_v13, %v15205_v20 }
 0x402   : > { %v15330_v54 = vadd.f32 %v15255_v39, %v11062_v32  ;;  %v10981_v39 = vpop.f32.mrb[20].mxu0 }
 0x403   : > { %v10982_v61 = vpop.f32.mrb[21].mxu0 }
 0x404   : > { %v11063_v42 = vpop.f32.mrb[144].mxu1  ;;  %v10983_v22 = vadd.f32 %v10982_v61, %v10981_v39  ;;  %v10984_v4 = vpop.f32.mrb[22].mxu0 }
 0x405   : > { %v11064_v63 = vpop.f32.mrb[145].mxu1  ;;  %v10985_v56 = vpop.f32.mrb[23].mxu0 }
 0x406   : > { %v11065_v19 = vadd.f32 %v11064_v63, %v11063_v42  ;;  %v11066_v44 = vpop.f32.mrb[146].mxu1  ;;  %v15345_v34 = vadd.f32 %v10983_v22, %v15209_v60  ;;  %v10986_v20 = vadd.f32 %v10985_v56, %v10984_v4 }
 0x407   : > { %v11067_v25 = vpop.f32.mrb[147].mxu1 }
 0x408   : > { %v11068_v26 = vadd.f32 %v11067_v25, %v11066_v44  ;;  %v15339_v27 = vadd.f32 %v15260_v21, %v11065_v19  ;;  %v15348_v37 = vadd.f32 %v10986_v20, %v15211_v18 }
 0x40a   : > { %v15342_v62 = vadd.f32 %v15264_v14, %v11068_v26  ;;  %v10987_v14 = vpop.f32.mrb[24].mxu0 }
 0x40b   : > { %v10988_v16 = vpop.f32.mrb[25].mxu0 }
 0x40c   : > { %v11069_v29 = vpop.f32.mrb[148].mxu1  ;;  %v10989_v40 = vadd.f32 %v10988_v16, %v10987_v14  ;;  %v10990_v60 = vpop.f32.mrb[26].mxu0 }
 0x40d   : > { %v11070_v46 = vpop.f32.mrb[149].mxu1  ;;  %v10991_v15 = vpop.f32.mrb[27].mxu0 }
 0x40e   : > { %v11071_v0 = vadd.f32 %v11070_v46, %v11069_v29  ;;  %v11072_v5 = vpop.f32.mrb[150].mxu1  ;;  %v15357_v51 = vadd.f32 %v10989_v40, %v15215_v10  ;;  %v10992_v18 = vadd.f32 %v10991_v15, %v10990_v60 }
 0x40f   : > { %v11073_v21 = vpop.f32.mrb[151].mxu1 }
 0x410   : > { %v11074_v2 = vadd.f32 %v11073_v21, %v11072_v5  ;;  %v15351_v38 = vadd.f32 %v15267_v58, %v11071_v0  ;;  %v15360_v53 = vadd.f32 %v10992_v18, %v15217_v23 }
 0x412   : > { %v15354_v47 = vadd.f32 %v15270_v28, %v11074_v2  ;;  %v10993_v28 = vpop.f32.mrb[28].mxu0 }
 0x413   : > { %v10994_v19 = vpop.f32.mrb[29].mxu0 }
 0x414   : > { %v11075_v32 = vpop.f32.mrb[152].mxu1  ;;  %v10995_v25 = vadd.f32 %v10994_v19, %v10993_v28  ;;  %v10996_v10 = vpop.f32.mrb[30].mxu0 }
 0x415   : > { %v11076_v1 = vpop.f32.mrb[153].mxu1  ;;  %v10997_v39 = vpop.f32.mrb[31].mxu0 }
 0x416   : > { %v11077_v59 = vadd.f32 %v11076_v1, %v11075_v32  ;;  %v11078_v42 = vpop.f32.mrb[154].mxu1  ;;  %v15369_v61 = vadd.f32 %v10995_v25, %v15221_v50  ;;  %v10998_v23 = vadd.f32 %v10997_v39, %v10996_v10 }
 0x417   : > { %v11079_v58 = vpop.f32.mrb[155].mxu1 }
 0x418   : > { %v11080_v63 = vadd.f32 %v11079_v58, %v11078_v42  ;;  %v15363_v13 = vadd.f32 %v15273_v36, %v11077_v59  ;;  %v15372_v56 = vadd.f32 %v10998_v23, %v15223_v7 }
 0x41a   : > { %v15366_v44 = vadd.f32 %v15276_v52, %v11080_v63 }
 0x41c   : > { %v11081_v26 = vpop.f32.mrb[156].mxu1 }
 0x41d   : > { %v11082_v22 = vpop.f32.mrb[157].mxu1 }
 0x41e   : > { %v11083_v4 = vadd.f32 %v11082_v22, %v11081_v26  ;;  %v11084_v29 = vpop.f32.mrb[158].mxu1 }
 0x41f   : > { %v11085_v36 = vpop.f32.mrb[159].mxu1 }
 0x420   : > { %v11086_v46 = vadd.f32 %v11085_v36, %v11084_v29  ;;  %v15375_v20 = vadd.f32 %v15279_v9, %v11083_v4 }
 0x422   : > { %v15378_v52 = vadd.f32 %v15282_v11, %v11086_v46 }
 0x424   : > { %v11087_v0 = vpop.f32.mrb[160].mxu1 }
 0x425   : > { %v11088_v5 = vpop.f32.mrb[161].mxu1 }
 0x426   : > { %v11089_v21 = vadd.f32 %v11088_v5, %v11087_v0  ;;  %v11090_v50 = vpop.f32.mrb[162].mxu1 }
 0x427   : > { %v11091_v2 = vpop.f32.mrb[163].mxu1 }
 0x428   : > { %v11092_v14 = vadd.f32 %v11091_v2, %v11090_v50  ;;  %v15381_v16 = vadd.f32 %v15285_v12, %v11089_v21 }
 0x42a   : > { %v15384_v7 = vadd.f32 %v15288_v43, %v11092_v14 }
 0x42c   : > { %v11093_v40 = vpop.f32.mrb[164].mxu1 }
 0x42d   : > { %v11094_v60 = vpop.f32.mrb[165].mxu1 }
 0x42e   : > { %v11095_v32 = vadd.f32 %v11094_v60, %v11093_v40  ;;  %v11096_v9 = vpop.f32.mrb[166].mxu1 }
 0x42f   : > { %v11097_v15 = vpop.f32.mrb[167].mxu1 }
 0x430   : > { %v11098_v1 = vadd.f32 %v11097_v15, %v11096_v9  ;;  %v15387_v11 = vadd.f32 %v15291_v6, %v11095_v32 }
 0x432   : > { %v15390_v18 = vadd.f32 %v15297_v35, %v11098_v1 }
 0x434   : > { %v11099_v59 = vpop.f32.mrb[168].mxu1 }
 0x435   : > { %v11100_v42 = vpop.f32.mrb[169].mxu1 }
 0x436   : > { %v11101_v58 = vadd.f32 %v11100_v42, %v11099_v59  ;;  %v11102_v12 = vpop.f32.mrb[170].mxu1 }
 0x437   : > { %v11103_v63 = vpop.f32.mrb[171].mxu1 }
 0x438   : > { %v11104_v28 = vadd.f32 %v11103_v63, %v11102_v12  ;;  %v15393_v43 = vadd.f32 %v15309_v30, %v11101_v58 }
 0x43a   : > { %v15396_v19 = vadd.f32 %v15312_v31, %v11104_v28 }
 0x43c   : > { %v11105_v25 = vpop.f32.mrb[172].mxu1 }
 0x43d   : > { %v11106_v10 = vpop.f32.mrb[173].mxu1 }
 0x43e   : > { %v11107_v26 = vadd.f32 %v11106_v10, %v11105_v25  ;;  %v11108_v6 = vpop.f32.mrb[174].mxu1 }
 0x43f   : > { %v11109_v39 = vpop.f32.mrb[175].mxu1 }
 0x440   : > { %v11110_v22 = vadd.f32 %v11109_v39, %v11108_v6  ;;  %v15399_v35 = vadd.f32 %v15321_v8, %v11107_v26 }
 0x442   : > { %v15402_v23 = vadd.f32 %v15324_v55, %v11110_v22 }
 0x444   : > { %v11111_v4 = vpop.f32.mrb[176].mxu1 }
 0x445   : > { %v11112_v29 = vpop.f32.mrb[177].mxu1 }
 0x446   : > { %v11113_v36 = vadd.f32 %v11112_v29, %v11111_v4  ;;  %v11114_v30 = vpop.f32.mrb[178].mxu1 }
 0x447   : > { %v11115_v46 = vpop.f32.mrb[179].mxu1 }
 0x448   : > { %v11116_v0 = vadd.f32 %v11115_v46, %v11114_v30  ;;  %v15405_v31 = vadd.f32 %v15333_v49, %v11113_v36 }
 0x44a   : > { %v15408_v5 = vadd.f32 %v15336_v57, %v11116_v0 }
 0x44c   : > { %v11117_v21 = vpop.f32.mrb[180].mxu1 }
 0x44d   : > { %v11118_v50 = vpop.f32.mrb[181].mxu1 }
 0x44e   : > { %v11119_v2 = vadd.f32 %v11118_v50, %v11117_v21  ;;  %v11120_v8 = vpop.f32.mrb[182].mxu1 }
 0x44f   : > { %v11121_v14 = vpop.f32.mrb[183].mxu1 }
 0x450   : > { %v11122_v40 = vadd.f32 %v11121_v14, %v11120_v8  ;;  %v15411_v55 = vadd.f32 %v15345_v34, %v11119_v2 }
 0x452   : > { %v15414_v60 = vadd.f32 %v15348_v37, %v11122_v40 }
 0x454   : > { %v11123_v32 = vpop.f32.mrb[184].mxu1 }
 0x455   : > { %v11124_v9 = vpop.f32.mrb[185].mxu1 }
 0x456   : > { %v11125_v15 = vadd.f32 %v11124_v9, %v11123_v32  ;;  %v11126_v49 = vpop.f32.mrb[186].mxu1 }
 0x457   : > { %v11127_v1 = vpop.f32.mrb[187].mxu1 }
 0x458   : > { %v11128_v59 = vadd.f32 %v11127_v1, %v11126_v49  ;;  %v15417_v57 = vadd.f32 %v15357_v51, %v11125_v15  ;;  %v15431_v51 = vld [vmem:[%s15575_s4] ss:$0 sm:$0xff] }
 0x45a   : > { %v15420_v42 = vadd.f32 %v15360_v53, %v11128_v59 }
 0x45c   : > { %v11129_v58 = vpop.f32.mrb[188].mxu1 }
 0x45d   : > { %v11130_v12 = vpop.f32.mrb[189].mxu1 }
 0x45e   : > { %v11131_v63 = vadd.f32 %v11130_v12, %v11129_v58  ;;  %v11132_v34 = vpop.f32.mrb[190].mxu1 }
 0x45f   : > { %v11133_v28 = vpop.f32.mrb[191].mxu1 }
 0x460   : > { %v11134_v25 = vadd.f32 %v11133_v28, %v11132_v34  ;;  %v15423_v37 = vadd.f32 %v15369_v61, %v11131_v63 }
 0x462   : > { %v15426_v10 = vadd.f32 %v15372_v56, %v11134_v25 }
 0x464   : > { %v11417_v26 = vpop.f32.mrb[96].mxu1 }
 0x465   : > { %v11577_v53 = vadd.f32 %v15303_v41, %v11417_v26  ;;  %v9056_v6 = vpop.f32.mrb[97].mxu1 }
 0x466   : > { %v11580_v39 = vadd.f32 %v15294_v24, %v9056_v6  ;;  %v11418_v22 = vpop.f32.mrb[98].mxu1 }
 0x467   : > { %v9224_v4 = vadd.f32 %v11577_v53, %v15431_v51  ;;  %v11583_v61 = vadd.f32 %v15306_v3, %v11418_v22  ;;  %v9059_v29 = vpop.f32.mrb[99].mxu1 }
 0x468   : > { %v9222_v56 = vadd.f32 %v11580_v39, %v15431_v51  ;;  %v11586_v36 = vadd.f32 %v15300_v48, %v9059_v29 }
 0x469   : > { %v9256_v30 = vmax.f32 %v9224_v4, 0.0  ;;  %v9225_v46 = vadd.f32 %v11583_v61, %v15431_v51 }
 0x46a   : > { %v9254_v24 = vmax.f32 %v9222_v56, 0.0  ;;  %v9223_v41 = vadd.f32 %v11586_v36, %v15431_v51 }
 0x46b   : > { %v10265_v3 = vpack.c.bf16 %v9256_v30, %v9256_v30  ;;  %v9257_v0 = vmax.f32 %v9225_v46, 0.0 }
 0x46c   : > { %v10263_v48 = vpack.c.bf16 %v9254_v24, %v9254_v24  ;;  %v9255_v21 = vmax.f32 %v9223_v41, 0.0  ;;  %v11421_v50 = vpop.f32.mrb[100].mxu1 }
 0x46d   : > { %9417 = vst.msk [vmem:[%s15445_s12 + $0x8] sm:$0xf] %vm9414_vm6, %v10265_v3  ;;  %v10266_v2 = vpack.c.bf16 %v9257_v0, %v9257_v0  ;;  %v11589_v8 = vadd.f32 %v15327_v45, %v11421_v50  ;;  %v9072_v14 = vpop.f32.mrb[101].mxu1 }
 0x46e   : > { %9415 = vst.msk [vmem:[%s15445_s12] sm:$0xf] %vm9414_vm6, %v10263_v48  ;;  %v10264_v40 = vpack.c.bf16 %v9255_v21, %v9255_v21  ;;  %v11592_v32 = vadd.f32 %v15315_v17, %v9072_v14  ;;  %v11422_v9 = vpop.f32.mrb[102].mxu1 }
 0x46f   : > { %9418 = vst.msk [vmem:[%s15445_s12 + $0xc] sm:$0xf] %vm9414_vm6, %v10266_v2  ;;  %v9228_v15 = vadd.f32 %v11589_v8, %v15431_v51  ;;  %v11595_v49 = vadd.f32 %v15330_v54, %v11422_v9  ;;  %v9075_v1 = vpop.f32.mrb[103].mxu1 }
 0x470   : > { %9416 = vst.msk [vmem:[%s15445_s12 + $0x4] sm:$0xf] %vm9414_vm6, %v10264_v40  ;;  %v9226_v45 = vadd.f32 %v11592_v32, %v15431_v51  ;;  %v11598_v59 = vadd.f32 %v15318_v33, %v9075_v1 }
 0x471   : > { %v9260_v58 = vmax.f32 %v9228_v15, 0.0  ;;  %v9229_v12 = vadd.f32 %v11595_v49, %v15431_v51 }
 0x472   : > { %v9258_v17 = vmax.f32 %v9226_v45, 0.0  ;;  %v9227_v63 = vadd.f32 %v11598_v59, %v15431_v51 }
 0x473   : > { %v10269_v34 = vpack.c.bf16 %v9260_v58, %v9260_v58  ;;  %v9261_v28 = vmax.f32 %v9229_v12, 0.0 }
 0x474   : > { %v10267_v25 = vpack.c.bf16 %v9258_v17, %v9258_v17  ;;  %v9259_v54 = vmax.f32 %v9227_v63, 0.0  ;;  %v11425_v26 = vpop.f32.mrb[104].mxu1 }
 0x475   : > { %9421 = vst.msk [vmem:[%s15445_s12 + $0x18] sm:$0xf] %vm9414_vm6, %v10269_v34  ;;  %v10270_v53 = vpack.c.bf16 %v9261_v28, %v9261_v28  ;;  %v11601_v6 = vadd.f32 %v15351_v38, %v11425_v26  ;;  %v9088_v39 = vpop.f32.mrb[105].mxu1 }
 0x476   : > { %9419 = vst.msk [vmem:[%s15445_s12 + $0x10] sm:$0xf] %vm9414_vm6, %v10267_v25  ;;  %v10268_v33 = vpack.c.bf16 %v9259_v54, %v9259_v54  ;;  %v11604_v22 = vadd.f32 %v15339_v27, %v9088_v39  ;;  %v11426_v4 = vpop.f32.mrb[106].mxu1 }
 0x477   : > { %9422 = vst.msk [vmem:[%s15445_s12 + $0x1c] sm:$0xf] %vm9414_vm6, %v10270_v53  ;;  %v9232_v61 = vadd.f32 %v11601_v6, %v15431_v51  ;;  %v11607_v29 = vadd.f32 %v15354_v47, %v11426_v4  ;;  %v9091_v56 = vpop.f32.mrb[107].mxu1 }
 0x478   : > { %9420 = vst.msk [vmem:[%s15445_s12 + $0x14] sm:$0xf] %vm9414_vm6, %v10268_v33  ;;  %v9230_v38 = vadd.f32 %v11604_v22, %v15431_v51  ;;  %v11610_v36 = vadd.f32 %v15342_v62, %v9091_v56 }
 0x479   : > { %v9264_v30 = vmax.f32 %v9232_v61, 0.0  ;;  %v9233_v46 = vadd.f32 %v11607_v29, %v15431_v51 }
 0x47a   : > { %v9262_v27 = vmax.f32 %v9230_v38, 0.0  ;;  %v9231_v24 = vadd.f32 %v11610_v36, %v15431_v51 }
 0x47b   : > { %v10273_v41 = vpack.c.bf16 %v9264_v30, %v9264_v30  ;;  %v9265_v3 = vmax.f32 %v9233_v46, 0.0 }
 0x47c   : > { %v10271_v0 = vpack.c.bf16 %v9262_v27, %v9262_v27  ;;  %v9263_v47 = vmax.f32 %v9231_v24, 0.0  ;;  %v11429_v48 = vpop.f32.mrb[108].mxu1 }
 0x47d   : > { %9425 = vst.msk [vmem:[%s15445_s12 + $0x28] sm:$0xf] %vm9414_vm6, %v10273_v41  ;;  %v10274_v21 = vpack.c.bf16 %v9265_v3, %v9265_v3  ;;  %v11613_v50 = vadd.f32 %v15375_v20, %v11429_v48  ;;  %v9104_v2 = vpop.f32.mrb[109].mxu1 }
 0x47e   : > { %9423 = vst.msk [vmem:[%s15445_s12 + $0x20] sm:$0xf] %vm9414_vm6, %v10271_v0  ;;  %v10272_v62 = vpack.c.bf16 %v9263_v47, %v9263_v47  ;;  %v11616_v8 = vadd.f32 %v15363_v13, %v9104_v2  ;;  %v11430_v14 = vpop.f32.mrb[110].mxu1 }
 0x47f   : > { %9426 = vst.msk [vmem:[%s15445_s12 + $0x2c] sm:$0xf] %vm9414_vm6, %v10274_v21  ;;  %v9236_v40 = vadd.f32 %v11613_v50, %v15431_v51  ;;  %v11619_v32 = vadd.f32 %v15378_v52, %v11430_v14  ;;  %v9107_v9 = vpop.f32.mrb[111].mxu1 }
 0x480   : > { %9424 = vst.msk [vmem:[%s15445_s12 + $0x24] sm:$0xf] %vm9414_vm6, %v10272_v62  ;;  %v9234_v20 = vadd.f32 %v11616_v8, %v15431_v51  ;;  %v11622_v15 = vadd.f32 %v15366_v44, %v9107_v9 }
 0x481   : > { %v9268_v49 = vmax.f32 %v9236_v40, 0.0  ;;  %v9237_v1 = vadd.f32 %v11619_v32, %v15431_v51 }
 0x482   : > { %v9266_v13 = vmax.f32 %v9234_v20, 0.0  ;;  %v9235_v45 = vadd.f32 %v11622_v15, %v15431_v51 }
 0x483   : > { %v10277_v59 = vpack.c.bf16 %v9268_v49, %v9268_v49  ;;  %v9269_v58 = vmax.f32 %v9237_v1, 0.0 }
 0x484   : > { %v10275_v12 = vpack.c.bf16 %v9266_v13, %v9266_v13  ;;  %v9267_v52 = vmax.f32 %v9235_v45, 0.0  ;;  %v11433_v17 = vpop.f32.mrb[112].mxu1 }
 0x485   : > { %9429 = vst.msk [vmem:[%s15445_s12 + $0x38] sm:$0xf] %vm9414_vm6, %v10277_v59  ;;  %v10278_v63 = vpack.c.bf16 %v9269_v58, %v9269_v58  ;;  %v11625_v34 = vadd.f32 %v15387_v11, %v11433_v17  ;;  %v9120_v28 = vpop.f32.mrb[113].mxu1 }
 0x486   : > { %9427 = vst.msk [vmem:[%s15445_s12 + $0x30] sm:$0xf] %vm9414_vm6, %v10275_v12  ;;  %v10276_v44 = vpack.c.bf16 %v9267_v52, %v9267_v52  ;;  %v11628_v25 = vadd.f32 %v15381_v16, %v9120_v28  ;;  %v11434_v54 = vpop.f32.mrb[114].mxu1 }
 0x487   : > { %9430 = vst.msk [vmem:[%s15445_s12 + $0x3c] sm:$0xf] %vm9414_vm6, %v10278_v63  ;;  %v9240_v26 = vadd.f32 %v11625_v34, %v15431_v51  ;;  %v11631_v53 = vadd.f32 %v15390_v18, %v11434_v54  ;;  %v9123_v6 = vpop.f32.mrb[115].mxu1 }
 0x488   : > { %9428 = vst.msk [vmem:[%s15445_s12 + $0x34] sm:$0xf] %vm9414_vm6, %v10276_v44  ;;  %v9238_v11 = vadd.f32 %v11628_v25, %v15431_v51  ;;  %v11634_v39 = vadd.f32 %v15384_v7, %v9123_v6 }
 0x489   : > { %v9272_v33 = vmax.f32 %v9240_v26, 0.0  ;;  %v9241_v22 = vadd.f32 %v11631_v53, %v15431_v51 }
 0x48a   : > { %v9270_v16 = vmax.f32 %v9238_v11, 0.0  ;;  %v9239_v4 = vadd.f32 %v11634_v39, %v15431_v51 }
 0x48b   : > { %v10281_v61 = vpack.c.bf16 %v9272_v33, %v9272_v33  ;;  %v9273_v29 = vmax.f32 %v9241_v22, 0.0 }
 0x48c   : > { %v10279_v56 = vpack.c.bf16 %v9270_v16, %v9270_v16  ;;  %v9271_v18 = vmax.f32 %v9239_v4, 0.0  ;;  %v11437_v38 = vpop.f32.mrb[116].mxu1 }
 0x48d   : > { %9433 = vst.msk [vmem:[%s15445_s12 + $0x48] sm:$0xf] %vm9414_vm6, %v10281_v61  ;;  %v10282_v36 = vpack.c.bf16 %v9273_v29, %v9273_v29  ;;  %v11637_v30 = vadd.f32 %v15399_v35, %v11437_v38  ;;  %v9136_v46 = vpop.f32.mrb[117].mxu1 }
 0x48e   : > { %9431 = vst.msk [vmem:[%s15445_s12 + $0x40] sm:$0xf] %vm9414_vm6, %v10279_v56  ;;  %v10280_v7 = vpack.c.bf16 %v9271_v18, %v9271_v18  ;;  %v11640_v27 = vadd.f32 %v15393_v43, %v9136_v46  ;;  %v11438_v24 = vpop.f32.mrb[118].mxu1 }
 0x48f   : > { %9434 = vst.msk [vmem:[%s15445_s12 + $0x4c] sm:$0xf] %vm9414_vm6, %v10282_v36  ;;  %v9244_v41 = vadd.f32 %v11637_v30, %v15431_v51  ;;  %v11643_v3 = vadd.f32 %v15402_v23, %v11438_v24  ;;  %v9139_v0 = vpop.f32.mrb[119].mxu1 }
 0x490   : > { %9432 = vst.msk [vmem:[%s15445_s12 + $0x44] sm:$0xf] %vm9414_vm6, %v10280_v7  ;;  %v9242_v35 = vadd.f32 %v11640_v27, %v15431_v51  ;;  %v11646_v47 = vadd.f32 %v15396_v19, %v9139_v0 }
 0x491   : > { %v9276_v48 = vmax.f32 %v9244_v41, 0.0  ;;  %v9245_v21 = vadd.f32 %v11643_v3, %v15431_v51 }
 0x492   : > { %v9274_v43 = vmax.f32 %v9242_v35, 0.0  ;;  %v9243_v50 = vadd.f32 %v11646_v47, %v15431_v51 }
 0x493   : > { %v10285_v2 = vpack.c.bf16 %v9276_v48, %v9276_v48  ;;  %v9277_v62 = vmax.f32 %v9245_v21, 0.0 }
 0x494   : > { %v10283_v8 = vpack.c.bf16 %v9274_v43, %v9274_v43  ;;  %v9275_v23 = vmax.f32 %v9243_v50, 0.0  ;;  %v11441_v14 = vpop.f32.mrb[120].mxu1 }
 0x495   : > { %9437 = vst.msk [vmem:[%s15445_s12 + $0x58] sm:$0xf] %vm9414_vm6, %v10285_v2  ;;  %v10286_v40 = vpack.c.bf16 %v9277_v62, %v9277_v62  ;;  %v11649_v32 = vadd.f32 %v15411_v55, %v11441_v14  ;;  %v9152_v9 = vpop.f32.mrb[121].mxu1 }
 0x496   : > { %9435 = vst.msk [vmem:[%s15445_s12 + $0x50] sm:$0xf] %vm9414_vm6, %v10283_v8  ;;  %v10284_v19 = vpack.c.bf16 %v9275_v23, %v9275_v23  ;;  %v11652_v20 = vadd.f32 %v15405_v31, %v9152_v9  ;;  %v11442_v15 = vpop.f32.mrb[122].mxu1 }
 0x497   : > { %9438 = vst.msk [vmem:[%s15445_s12 + $0x5c] sm:$0xf] %vm9414_vm6, %v10286_v40  ;;  %v9248_v49 = vadd.f32 %v11649_v32, %v15431_v51  ;;  %v11655_v1 = vadd.f32 %v15414_v60, %v11442_v15  ;;  %v9155_v13 = vpop.f32.mrb[123].mxu1 }
 0x498   : > { %9436 = vst.msk [vmem:[%s15445_s12 + $0x54] sm:$0xf] %vm9414_vm6, %v10284_v19  ;;  %v9246_v55 = vadd.f32 %v11652_v20, %v15431_v51  ;;  %v11658_v45 = vadd.f32 %v15408_v5, %v9155_v13 }
 0x499   : > { %v9280_v59 = vmax.f32 %v9248_v49, 0.0  ;;  %v9249_v58 = vadd.f32 %v11655_v1, %v15431_v51 }
 0x49a   : > { %v9278_v31 = vmax.f32 %v9246_v55, 0.0  ;;  %v9247_v12 = vadd.f32 %v11658_v45, %v15431_v51 }
 0x49b   : > { %v10289_v52 = vpack.c.bf16 %v9280_v59, %v9280_v59  ;;  %v9281_v17 = vmax.f32 %v9249_v58, 0.0 }
 0x49c   : > { %v10287_v63 = vpack.c.bf16 %v9278_v31, %v9278_v31  ;;  %v9279_v60 = vmax.f32 %v9247_v12, 0.0  ;;  %v11445_v34 = vpop.f32.mrb[124].mxu1 }
 0x49d   : > { %9441 = vst.msk [vmem:[%s15445_s12 + $0x68] sm:$0xf] %vm9414_vm6, %v10289_v52  ;;  %v10290_v28 = vpack.c.bf16 %v9281_v17, %v9281_v17  ;;  %v11661_v44 = vadd.f32 %v15423_v37, %v11445_v34  ;;  %v9168_v25 = vpop.f32.mrb[125].mxu1 }
 0x49e   : > { %9439 = vst.msk [vmem:[%s15445_s12 + $0x60] sm:$0xf] %vm9414_vm6, %v10287_v63  ;;  %v10288_v5 = vpack.c.bf16 %v9279_v60, %v9279_v60  ;;  %v11664_v54 = vadd.f32 %v15417_v57, %v9168_v25  ;;  %v11446_v26 = vpop.f32.mrb[126].mxu1 }
 0x49f   : > { %9442 = vst.msk [vmem:[%s15445_s12 + $0x6c] sm:$0xf] %vm9414_vm6, %v10290_v28  ;;  %v9252_v53 = vadd.f32 %v11661_v44, %v15431_v51  ;;  %v11667_v6 = vadd.f32 %v15426_v10, %v11446_v26  ;;  %v9171_v11 = vpop.f32.mrb[127].mxu1 }
 0x4a0   : > { %9440 = vst.msk [vmem:[%s15445_s12 + $0x64] sm:$0xf] %vm9414_vm6, %v10288_v5  ;;  %v9250_v37 = vadd.f32 %v11664_v54, %v15431_v51  ;;  %v11670_v39 = vadd.f32 %v15420_v42, %v9171_v11 }
 0x4a1   : > { %v9284_v33 = vmax.f32 %v9252_v53, 0.0  ;;  %v9253_v57 = vadd.f32 %v11667_v6, %v15431_v51 }
 0x4a2   : > { %v9282_v22 = vmax.f32 %v9250_v37, 0.0  ;;  %v9251_v16 = vadd.f32 %v11670_v39, %v15431_v51 }
 0x4a3   : > { %v10293_v4 = vpack.c.bf16 %v9284_v33, %v9284_v33  ;;  %v9285_v61 = vmax.f32 %v9253_v57, 0.0 }
 0x4a4   : > { %v10291_v29 = vpack.c.bf16 %v9282_v22, %v9282_v22  ;;  %v9283_v56 = vmax.f32 %v9251_v16, 0.0 }
 0x4a5   : > { %9445 = vst.msk [vmem:[%s15445_s12 + $0x78] sm:$0xf] %vm9414_vm6, %v10293_v4  ;;  %v10294_v10 = vpack.c.bf16 %v9285_v61, %v9285_v61 }
 0x4a6   : > { %9443 = vst.msk [vmem:[%s15445_s12 + $0x70] sm:$0xf] %vm9414_vm6, %v10291_v29  ;;  %v10292_v18 = vpack.c.bf16 %v9283_v56, %v9283_v56 }
 0x4a7   : > { %9446 = vst.msk [vmem:[%s15445_s12 + $0x7c] sm:$0xf] %vm9414_vm6, %v10294_v10 }
 0x4a8   : > { %9444 = vst.msk [vmem:[%s15445_s12 + $0x74] sm:$0xf] %vm9414_vm6, %v10292_v18 }
 0x4a9 PF: > { %s17_s18 = sadd.s32 1, %s12497_s18  }
 0x4aa   : > { %p14_p9 = scmp.ge.s32.totalorder %s17_s18, 4  }
 0x4ac   :  { %16 = sbr.rel (!%p14_p9) target bundleno = 2 (0x2), region = 89 }
 0x4b3   :  { %9468 = vsyncpa [#allocation5], 1 }
 0x4b4   :  { %9470 = vsyncpa [#allocation5 + $0x1], 1 }
 0x4b5   :  { %9471 = vsyncpa [#allocation7], 1 }

</bundles_post_ra>
